<compile_context>
chip_gen: v5e
topology: v5e:2x2
jax: 0.10.0
libtpu: 0.0.40
codegen_flags: <defaults>
</compile_context>

<pallas_src>
import functools

import jax
import jax.numpy as jnp
from jax.experimental import pallas as pl
from jax.experimental.pallas import tpu as pltpu

IN_CHANNELS = 3584
MID_CHANNELS = IN_CHANNELS // 8      # 448
MID_PADDED = 512                     # lane-pad 448 -> 512 (4 x 128)
OUT_CHANNELS = 256
BN_EPS = 1e-5


def _ft_kernel(x_ref, w1_ref, shift_ref, w2_ref, b2_ref, o_ref):
    """relu(x @ (W1^T * bn_scale) + bn_shift) @ W2^T + b2 for one (tm, 256) tile."""
    # conv1 (1x1) + folded BN scale: bf16 MXU operands, f32 accumulation.
    h = jnp.dot(x_ref[...], w1_ref[...], preferred_element_type=jnp.float32)
    # Folded BN shift + ReLU in f32.
    h = jnp.maximum(h + shift_ref[...], 0.0)
    # conv2 (1x1) + bias.
    y = jnp.dot(h.astype(w2_ref.dtype), w2_ref[...], preferred_element_type=jnp.float32)
    o_ref[...] = (y + b2_ref[...]).astype(o_ref.dtype)


@functools.partial(jax.jit, static_argnames=("tm",))
def feature_transform(x, w1, gamma, beta, run_mean, run_var, w2, b2, *, tm=1024):
    """x: (N, 3584, H, W) float32 NCHW. Returns (N, 256*(H+2)*(W+2)) float32."""
    N, C, H, W = x.shape
    assert C == IN_CHANNELS
    Hp, Wp = H + 2, W + 2
    pad_mid = MID_PADDED - MID_CHANNELS

    # Fold BatchNorm (eval mode) into per-channel scale/shift (f32).
    inv_std = jax.lax.rsqrt(run_var.astype(jnp.float32) + BN_EPS)
    scale_c = gamma * inv_std                          # (448,)
    shift_c = beta - run_mean * gamma * inv_std        # (448,)

    # Kernel parameters: BN scale folded into W1's columns, transposed 1x1-conv
    # weights in bf16 for the MXU, mid channels zero-padded 448 -> 512 (the pad
    # columns have zero weight / zero shift / zero W2 rows -> contribute nothing).
    w1t = jnp.pad(jnp.transpose(w1) * scale_c[None, :],
                  ((0, 0), (0, pad_mid))).astype(jnp.bfloat16)                  # (3584, 512)
    w2t = jnp.pad(jnp.transpose(w2), ((0, pad_mid), (0, 0))).astype(jnp.bfloat16)  # (512, 256)
    shift = jnp.pad(shift_c, (0, pad_mid)).reshape(1, MID_PADDED).astype(jnp.float32)
    b2r = b2.reshape(1, OUT_CHANNELS).astype(jnp.float32)

    # Interior rows only: border output pixels (from conv1's padding=1) see a zero
    # input vector; their constant output is computed in the wrapper below.
    xr = jnp.transpose(x, (0, 2, 3, 1)).reshape(N * H * W, C).astype(jnp.bfloat16)
    M = N * H * W
    tm_eff = min(tm, ((M + 15) // 16) * 16)            # multiple of 16 (bf16 sublane pairs)
    TM = ((M + tm_eff - 1) // tm_eff) * tm_eff
    if TM != M:
        xr = jnp.pad(xr, ((0, TM - M), (0, 0)))

    grid = (TM // tm_eff,)                             # single parallel M axis

    out = pl.pallas_call(
        _ft_kernel,
        out_shape=jax.ShapeDtypeStruct((TM, OUT_CHANNELS), jnp.float32),
        grid_spec=pltpu.PrefetchScalarGridSpec(
            num_scalar_prefetch=0,
            grid=grid,
            in_specs=[
                pl.BlockSpec((tm_eff, C), lambda m: (m, 0)),                   # x rows
                pl.BlockSpec((C, MID_PADDED), lambda m: (0, 0)),               # W1^T (resident)
                pl.BlockSpec((1, MID_PADDED), lambda m: (0, 0)),               # bn shift
                pl.BlockSpec((MID_PADDED, OUT_CHANNELS), lambda m: (0, 0)),    # W2^T
                pl.BlockSpec((1, OUT_CHANNELS), lambda m: (0, 0)),             # b2
            ],
            out_specs=pl.BlockSpec((tm_eff, OUT_CHANNELS), lambda m: (m, 0)),
        ),
        compiler_params=pltpu.CompilerParams(
            dimension_semantics=("parallel",),
            vmem_limit_bytes=48 * 1024 * 1024,
        ),
    )(xr, w1t, shift, w2t, b2r)

    # Assemble the (H+2, W+2) output: constant border + kernel interior (NHWC),
    # then back to NCHW so the flatten matches torch.nn.Flatten exactly.
    border_vec = jnp.dot(jnp.maximum(shift_c, 0.0), jnp.transpose(w2)) + b2   # (256,) f32
    canvas = jnp.broadcast_to(
        border_vec.reshape(1, 1, 1, OUT_CHANNELS), (N, Hp, Wp, OUT_CHANNELS)
    )
    interior = out[:M].reshape(N, H, W, OUT_CHANNELS)
    canvas = canvas.at[:, 1:1 + H, 1:1 + W, :].set(interior)
    out_nchw = jnp.transpose(canvas, (0, 3, 1, 2))
    return out_nchw.reshape(N, -1)                     # nn.Flatten()


def _reference(x, w1, gamma, beta, run_mean, run_var, w2, b2):
    """Plain-JAX full-f32 reference of the module's forward pass."""
    xp = jnp.pad(x, ((0, 0), (0, 0), (1, 1), (1, 1)))
    h = jnp.einsum("nchw,oc->nohw", xp, w1)
    inv_std = jax.lax.rsqrt(run_var + BN_EPS)
    h = (h - run_mean[None, :, None, None]) * inv_std[None, :, None, None]
    h = h * gamma[None, :, None, None] + beta[None, :, None, None]
    h = jnp.maximum(h, 0.0)
    y = jnp.einsum("nchw,oc->nohw", h, w2) + b2[None, :, None, None]
    return y.reshape(y.shape[0], -1)


def _reference_matched(x, w1, gamma, beta, run_mean, run_var, w2, b2):
    """Precision-matched reference (BN scale folded into bf16 W1, f32 accumulation)."""
    N, C, H, W = x.shape
    inv_std = jax.lax.rsqrt(run_var + BN_EPS)
    scale = gamma * inv_std
    shift = beta - run_mean * gamma * inv_std
    xr = jnp.transpose(x, (0, 2, 3, 1)).reshape(N * H * W, C).astype(jnp.bfloat16)
    w1s = (jnp.transpose(w1) * scale[None, :]).astype(jnp.bfloat16)
    h = jnp.dot(xr, w1s, preferred_element_type=jnp.float32)
    h = jnp.maximum(h + shift, 0.0)
    y = jnp.dot(h.astype(jnp.bfloat16), jnp.transpose(w2).astype(jnp.bfloat16),
                preferred_element_type=jnp.float32) + b2
    border = jnp.dot(jnp.maximum(shift, 0.0), jnp.transpose(w2)) + b2
    canvas = jnp.broadcast_to(border.reshape(1, 1, 1, OUT_CHANNELS),
                              (N, H + 2, W + 2, OUT_CHANNELS))
    canvas = canvas.at[:, 1:1 + H, 1:1 + W, :].set(y.reshape(N, H, W, OUT_CHANNELS))
    return jnp.transpose(canvas, (0, 3, 1, 2)).reshape(N, -1)


if __name__ == "__main__":
    key = jax.random.PRNGKey(0)
    kx, k1, kg, kb, km, kv, k2, kb2 = jax.random.split(key, 8)

    # Small spatial / batch; channel dims are fixed by the module (3584 -> 448 -> 256).
    N, H, W = 2, 4, 4
    x = jax.random.normal(kx, (N, IN_CHANNELS, H, W), dtype=jnp.float32)

    # Deterministic synthetic parameters (no checkpoint loading).
    w1 = 0.02 * jax.random.normal(k1, (MID_CHANNELS, IN_CHANNELS), dtype=jnp.float32)
    gamma = 1.0 + 0.1 * jax.random.normal(kg, (MID_CHANNELS,), dtype=jnp.float32)
    beta = 0.05 * jax.random.normal(kb, (MID_CHANNELS,), dtype=jnp.float32)
    run_mean = 0.1 * jax.random.normal(km, (MID_CHANNELS,), dtype=jnp.float32)
    run_var = 1.0 + 0.1 * jax.nn.softplus(
        jax.random.normal(kv, (MID_CHANNELS,), dtype=jnp.float32))
    w2 = 0.05 * jax.random.normal(k2, (OUT_CHANNELS, MID_CHANNELS), dtype=jnp.float32)
    b2 = 0.01 * jax.random.normal(kb2, (OUT_CHANNELS,), dtype=jnp.float32)

    out = feature_transform(x, w1, gamma, beta, run_mean, run_var, w2, b2)
    out = jax.block_until_ready(out)

    expected_shape = (N, OUT_CHANNELS * (H + 2) * (W + 2))
    assert out.shape == expected_shape, (out.shape, expected_shape)

    # Tight check vs. a precision-matched (bf16-operand, f32-accumulate) reference.
    ref_m = _reference_matched(x, w1, gamma, beta, run_mean, run_var, w2, b2)
    err_m = float(jnp.max(jnp.abs(out - ref_m)))
    assert err_m < 5e-3, err_m

    # Loose check vs. the full-f32 reference (bf16 MXU operands add ~1e-2 abs error).
    ref = _reference(x, w1, gamma, beta, run_mean, run_var, w2, b2)
    assert jnp.allclose(out, ref, atol=5e-2, rtol=5e-2), float(jnp.max(jnp.abs(out - ref)))

    print("KERNEL_OK")
</pallas_src>

<mosaic_0001>
module attributes {stable_mosaic.version = 11 : i64} {
  func.func @_ft_kernel(%arg0: i32, %arg1: memref<32x3584xbf16, #tpu.memory_space<vmem>>, %arg2: memref<3584x512xbf16, #tpu.memory_space<vmem>>, %arg3: memref<1x512xf32, #tpu.memory_space<vmem>>, %arg4: memref<512x256xbf16, #tpu.memory_space<vmem>>, %arg5: memref<1x256xf32, #tpu.memory_space<vmem>>, %arg6: memref<32x256xf32, #tpu.memory_space<vmem>>) attributes {dimension_semantics = [#tpu.dimension_semantics<parallel>], iteration_bounds = array<i64: 1>, scalar_prefetch = 0 : i64, scratch_operands = 0 : i64, tpu.core_type = #tpu.core_type<tc>, window_params = [{transform_indices = @transform_0, window_bounds = array<i64: 32, 3584>}, {pipeline_mode = #tpu.pipeline_mode<synchronous>, transform_indices = @transform_1, window_bounds = array<i64: 3584, 512>}, {pipeline_mode = #tpu.pipeline_mode<synchronous>, transform_indices = @transform_2, window_bounds = array<i64: 1, 512>}, {pipeline_mode = #tpu.pipeline_mode<synchronous>, transform_indices = @transform_3, window_bounds = array<i64: 512, 256>}, {pipeline_mode = #tpu.pipeline_mode<synchronous>, transform_indices = @transform_4, window_bounds = array<i64: 1, 256>}, {transform_indices = @transform_5, window_bounds = array<i64: 32, 256>}]} {
    %c0 = arith.constant 0 : index
    %c0_0 = arith.constant 0 : index
    %0 = vector.load %arg1[%c0, %c0_0] : memref<32x3584xbf16, #tpu.memory_space<vmem>>, vector<32x3584xbf16>
    %c0_1 = arith.constant 0 : index
    %c0_2 = arith.constant 0 : index
    %1 = vector.load %arg2[%c0_1, %c0_2] : memref<3584x512xbf16, #tpu.memory_space<vmem>>, vector<3584x512xbf16>
    %cst = arith.constant dense<0.000000e+00> : vector<32x512xf32>
    %2 = tpu.matmul %0, %1, %cst {dimension_numbers = #tpu.dot_dimension_numbers<[1], [0], [0], [1], [0, 0, 1, 1], [], []>} : vector<32x3584xbf16>, vector<3584x512xbf16>, vector<32x512xf32> -> vector<32x512xf32>
    %c0_3 = arith.constant 0 : index
    %c0_4 = arith.constant 0 : index
    %3 = vector.load %arg3[%c0_3, %c0_4] : memref<1x512xf32, #tpu.memory_space<vmem>>, vector<1x512xf32>
    %4 = vector.broadcast %3 : vector<1x512xf32> to vector<32x512xf32>
    %5 = arith.addf %2, %4 : vector<32x512xf32>
    %cst_5 = arith.constant 0.000000e+00 : f32
    %6 = vector.broadcast %cst_5 : f32 to vector<32x512xf32>
    %7 = arith.maximumf %5, %6 : vector<32x512xf32>
    %8 = arith.truncf %7 : vector<32x512xf32> to vector<32x512xbf16>
    %c0_6 = arith.constant 0 : index
    %c0_7 = arith.constant 0 : index
    %9 = vector.load %arg4[%c0_6, %c0_7] : memref<512x256xbf16, #tpu.memory_space<vmem>>, vector<512x256xbf16>
    %cst_8 = arith.constant dense<0.000000e+00> : vector<32x256xf32>
    %10 = tpu.matmul %8, %9, %cst_8 {dimension_numbers = #tpu.dot_dimension_numbers<[1], [0], [0], [1], [0, 0, 1, 1], [], []>} : vector<32x512xbf16>, vector<512x256xbf16>, vector<32x256xf32> -> vector<32x256xf32>
    %c0_9 = arith.constant 0 : index
    %c0_10 = arith.constant 0 : index
    %11 = vector.load %arg5[%c0_9, %c0_10] : memref<1x256xf32, #tpu.memory_space<vmem>>, vector<1x256xf32>
    %12 = vector.broadcast %11 : vector<1x256xf32> to vector<32x256xf32>
    %13 = arith.addf %10, %12 : vector<32x256xf32>
    %c0_11 = arith.constant 0 : index
    %c0_12 = arith.constant 0 : index
    %14 = vector.load %arg6[%c0_11, %c0_12] : memref<32x256xf32, #tpu.memory_space<vmem>>, vector<32x256xf32>
    tpu.vector_store %arg6[%c0_11, %c0_12], %13 {strides = array<i32>} : memref<32x256xf32, #tpu.memory_space<vmem>>, vector<32x256xf32>,
    return
  }
  func.func @transform_0(%arg0: i32) -> (i32, i32) {
    %c0_i32 = arith.constant 0 : i32
    %c0_i32_0 = arith.constant 0 : i32
    return %arg0, %c0_i32 : i32, i32
  }
  func.func @transform_1(%arg0: i32) -> (i32, i32) {
    %c0_i32 = arith.constant 0 : i32
    %c0_i32_0 = arith.constant 0 : i32
    %c0_i32_1 = arith.constant 0 : i32
    return %c0_i32, %c0_i32_0 : i32, i32
  }
  func.func @transform_2(%arg0: i32) -> (i32, i32) {
    %c0_i32 = arith.constant 0 : i32
    %c0_i32_0 = arith.constant 0 : i32
    %c0_i32_1 = arith.constant 0 : i32
    return %c0_i32, %c0_i32_0 : i32, i32
  }
  func.func @transform_3(%arg0: i32) -> (i32, i32) {
    %c0_i32 = arith.constant 0 : i32
    %c0_i32_0 = arith.constant 0 : i32
    %c0_i32_1 = arith.constant 0 : i32
    return %c0_i32, %c0_i32_0 : i32, i32
  }
  func.func @transform_4(%arg0: i32) -> (i32, i32) {
    %c0_i32 = arith.constant 0 : i32
    %c0_i32_0 = arith.constant 0 : i32
    %c0_i32_1 = arith.constant 0 : i32
    return %c0_i32, %c0_i32_0 : i32, i32
  }
  func.func @transform_5(%arg0: i32) -> (i32, i32) {
    %c0_i32 = arith.constant 0 : i32
    %c0_i32_0 = arith.constant 0 : i32
    return %arg0, %c0_i32 : i32, i32
  }
}

</mosaic_0001>

<bundles_post_ra>
// kernel: feature_transform.1
= control target key start
LH: loop header
LB: loop body
LE: loop exit
PB: predicated region body
PF: predicated region fallthrough
CT: control target
= control target key end

     0   :  { %s20422_s1 = inlined_call_operand.vmem [shape: bf16[3584,512], index: 1, kind: input, shape index: {}]   ;;  %s20423_s0 = inlined_call_operand.vmem [shape: bf16[32,3584], index: 0, kind: input, shape index: {}]   ;;  %s20424_s2 = inlined_call_operand.vmem [shape: f32[1,512], index: 2, kind: input, shape index: {}]   ;;  %s20425_s3 = inlined_call_operand.vmem [shape: bf16[512,256], index: 3, kind: input, shape index: {}]   ;;  %s20426_s4 = inlined_call_operand.vmem [shape: f32[1,256], index: 4, kind: input, shape index: {}]   ;;  %s20427_s5 = inlined_call_operand.vmem [shape: f32[32,256], index: 5, kind: output, shape index: {}]  }
   0x1   :  { %v8786_v0 = vld [vmem:[%s20422_s1 + $0xe0] sm:$0xf]  ;;  %v12598_v1 = vld [vmem:[%s20422_s1 + $0xec] sm:$0xf0] }
   0x2   :  { %v8914_v2 = vld [vmem:[%s20422_s1 + $0x1e0] sm:$0xf]  ;;  %v8787_v3 = vor.u32 %v12598_v1, %v8786_v0  ;;  %v12630_v4 = vld [vmem:[%s20422_s1 + $0x1ec] sm:$0xf0] }
   0x3   :  { %v9042_v5 = vld [vmem:[%s20422_s1 + $0x2e0] sm:$0xf]  ;;  %v12662_v6 = vld [vmem:[%s20422_s1 + $0x2ec] sm:$0xf0]  ;;  %v8915_v7 = vor.u32 %v12630_v4, %v8914_v2 }
   0x4   :  { %v9043_v8 = vor.u32 %v12662_v6, %v9042_v5  ;;  %v9170_v9 = vld [vmem:[%s20422_s1 + $0x3e0] sm:$0xf]  ;;  %v12694_v10 = vld [vmem:[%s20422_s1 + $0x3ec] sm:$0xf0]  ;;  %5742 = vmatpush.bf16.msra.mxu0 %v8787_v3 }
   0x5   :  { %v8770_v11 = vld [vmem:[%s20422_s1 + $0xc0] sm:$0xf]  ;;  %v9171_v12 = vor.u32 %v12694_v10, %v9170_v9  ;;  %v12594_v13 = vld [vmem:[%s20422_s1 + $0xcc] sm:$0xf0]  ;;  %5761 = vmatpush.bf16.msra.mxu1 %v8915_v7 }
   0x6   :  { %v8898_v14 = vld [vmem:[%s20422_s1 + $0x1c0] sm:$0xf]  ;;  %v12626_v15 = vld [vmem:[%s20422_s1 + $0x1cc] sm:$0xf0]  ;;  %5780 = vmatpush.bf16.msra.mxu2 %v9043_v8  ;;  %v8771_v16 = vor.u32 %v12594_v13, %v8770_v11 }
   0x7   :  { %v8899_v17 = vor.u32 %v12626_v15, %v8898_v14  ;;  %v9026_v18 = vld [vmem:[%s20422_s1 + $0x2c0] sm:$0xf]  ;;  %v12658_v19 = vld [vmem:[%s20422_s1 + $0x2cc] sm:$0xf0]  ;;  %5799 = vmatpush.bf16.msra.mxu3 %v9171_v12 }
   0x8   :  { %v9154_v20 = vld [vmem:[%s20422_s1 + $0x3c0] sm:$0xf]  ;;  %v9027_v21 = vor.u32 %v12658_v19, %v9026_v18  ;;  %v12690_v22 = vld [vmem:[%s20422_s1 + $0x3cc] sm:$0xf0]  ;;  %5743 = vmatpush.bf16.msra.mxu0 %v8771_v16 }
   0x9   :  { %v8754_v23 = vld [vmem:[%s20422_s1 + $0xa0] sm:$0xf]  ;;  %v12590_v24 = vld [vmem:[%s20422_s1 + $0xac] sm:$0xf0]  ;;  %v9155_v25 = vor.u32 %v12690_v22, %v9154_v20  ;;  %5762 = vmatpush.bf16.msra.mxu1 %v8899_v17 }
   0xa   :  { %v8882_v26 = vld [vmem:[%s20422_s1 + $0x1a0] sm:$0xf]  ;;  %v12622_v27 = vld [vmem:[%s20422_s1 + $0x1ac] sm:$0xf0]  ;;  %v8755_v29 = vor.u32 %v12590_v24, %v8754_v23  ;;  %5781 = vmatpush.bf16.msra.mxu2 %v9027_v21 }
   0xb   :  { %v9010_v28 = vld [vmem:[%s20422_s1 + $0x2a0] sm:$0xf]  ;;  %v12654_v30 = vld [vmem:[%s20422_s1 + $0x2ac] sm:$0xf0]  ;;  %v8883_v33 = vor.u32 %v12622_v27, %v8882_v26  ;;  %5800 = vmatpush.bf16.msra.mxu3 %v9155_v25 }
   0xc   :  { %v9138_v31 = vld [vmem:[%s20422_s1 + $0x3a0] sm:$0xf]  ;;  %v12686_v32 = vld [vmem:[%s20422_s1 + $0x3ac] sm:$0xf0]  ;;  %v9011_v34 = vor.u32 %v12654_v30, %v9010_v28  ;;  %5744 = vmatpush.bf16.msra.mxu0 %v8755_v29  ;;  %v12512_v30 = vld [vmem:[%s20423_s0 + $0x4] sm:$0xf] }
   0xd   :  { %v8738_v35 = vld [vmem:[%s20422_s1 + $0x80] sm:$0xf]  ;;  %v12586_v36 = vld [vmem:[%s20422_s1 + $0x8c] sm:$0xf0]  ;;  %v9139_v38 = vor.u32 %v12686_v32, %v9138_v31  ;;  %5763 = vmatpush.bf16.msra.mxu1 %v8883_v33  ;;  %v8452_v31 = vld [vmem:[%s20423_s0 + $0x70] sm:$0xf0] }
   0xe   :  { %v8866_v37 = vld [vmem:[%s20422_s1 + $0x180] sm:$0xf]  ;;  %v12618_v39 = vld [vmem:[%s20422_s1 + $0x18c] sm:$0xf0]  ;;  %v8739_v44 = vor.u32 %v12586_v36, %v8738_v35  ;;  %5782 = vmatpush.bf16.msra.mxu2 %v9011_v34  ;;  %v8458_v35 = vld [vmem:[%s20423_s0 + $0x8] sm:$0xf] }
   0xf   :  { %v8994_v40 = vld [vmem:[%s20422_s1 + $0x280] sm:$0xf]  ;;  %v12650_v41 = vld [vmem:[%s20422_s1 + $0x28c] sm:$0xf0]  ;;  %v8867_v45 = vor.u32 %v12618_v39, %v8866_v37  ;;  %5801 = vmatpush.bf16.msra.mxu3 %v9139_v38 }
  0x10   :  { %v9122_v42 = vld [vmem:[%s20422_s1 + $0x380] sm:$0xf]  ;;  %v12682_v43 = vld [vmem:[%s20422_s1 + $0x38c] sm:$0xf0]  ;;  %v8995_v46 = vor.u32 %v12650_v41, %v8994_v40  ;;  %5745 = vmatpush.bf16.msra.mxu0 %v8739_v44  ;;  %v12527_v40 = vld [vmem:[%s20423_s0 + $0x74] sm:$0xf0] }
  0x11   :  { %v8722_v47 = vld [vmem:[%s20422_s1 + $0x60] sm:$0xf]  ;;  %v12582_v48 = vld [vmem:[%s20422_s1 + $0x6c] sm:$0xf0]  ;;  %v9123_v50 = vor.u32 %v12682_v43, %v9122_v42  ;;  %5764 = vmatpush.bf16.msra.mxu1 %v8867_v45  ;;  %v12513_v41 = vld [vmem:[%s20423_s0 + $0xc] sm:$0xf] }
  0x12   :  { %v8850_v49 = vld [vmem:[%s20422_s1 + $0x160] sm:$0xf]  ;;  %v12614_v51 = vld [vmem:[%s20422_s1 + $0x16c] sm:$0xf0]  ;;  %v8723_v56 = vor.u32 %v12582_v48, %v8722_v47  ;;  %5783 = vmatpush.bf16.msra.mxu2 %v8995_v46  ;;  %v8460_v42 = vld [vmem:[%s20423_s0 + $0x78] sm:$0xf0] }
  0x13   :  { %v8978_v52 = vld [vmem:[%s20422_s1 + $0x260] sm:$0xf]  ;;  %v12646_v53 = vld [vmem:[%s20422_s1 + $0x26c] sm:$0xf0]  ;;  %v8851_v57 = vor.u32 %v12614_v51, %v8850_v49  ;;  %5802 = vmatpush.bf16.msra.mxu3 %v9123_v50 }
  0x14   :  { %v9106_v54 = vld [vmem:[%s20422_s1 + $0x360] sm:$0xf]  ;;  %v12678_v55 = vld [vmem:[%s20422_s1 + $0x36c] sm:$0xf0]  ;;  %v8979_v58 = vor.u32 %v12646_v53, %v8978_v52  ;;  %5746 = vmatpush.bf16.msra.mxu0 %v8723_v56  ;;  %v13809_v53 = vor.u32 %v12512_v30, %v8452_v31 }
  0x15   :  { %v8706_v59 = vld [vmem:[%s20422_s1 + $0x40] sm:$0xf]  ;;  %v12578_v60 = vld [vmem:[%s20422_s1 + $0x4c] sm:$0xf0]  ;;  %v9107_v62 = vor.u32 %v12678_v55, %v9106_v54  ;;  %5765 = vmatpush.bf16.msra.mxu1 %v8851_v57  ;;  %v13811_v54 = vor.u32 %v12527_v40, %v8458_v35  ;;  %v13819_v57 = vor.u32 %v12513_v41, %v8460_v42 }
  0x16   :  { %v8834_v61 = vld [vmem:[%s20422_s1 + $0x140] sm:$0xf]  ;;  %v12610_v63 = vld [vmem:[%s20422_s1 + $0x14c] sm:$0xf0]  ;;  %v8707_v4 = vor.u32 %v12578_v60, %v8706_v59  ;;  %5784 = vmatpush.bf16.msra.mxu2 %v8979_v58 }
  0x17   :  { %v8962_v0 = vld [vmem:[%s20422_s1 + $0x240] sm:$0xf]  ;;  %v12642_v1 = vld [vmem:[%s20422_s1 + $0x24c] sm:$0xf0]  ;;  %v8835_v5 = vor.u32 %v12610_v63, %v8834_v61  ;;  %5803 = vmatpush.bf16.msra.mxu3 %v9107_v62 }
  0x18   :  { %v9090_v2 = vld [vmem:[%s20422_s1 + $0x340] sm:$0xf]  ;;  %v12674_v3 = vld [vmem:[%s20422_s1 + $0x34c] sm:$0xf0]  ;;  %v8963_v6 = vor.u32 %v12642_v1, %v8962_v0  ;;  %5747 = vmatpush.bf16.msra.mxu0 %v8707_v4 }
  0x19   :  { %v8690_v7 = vld [vmem:[%s20422_s1 + $0x20] sm:$0xf]  ;;  %v12574_v8 = vld [vmem:[%s20422_s1 + $0x2c] sm:$0xf0]  ;;  %v9091_v10 = vor.u32 %v12674_v3, %v9090_v2  ;;  %5766 = vmatpush.bf16.msra.mxu1 %v8835_v5 }
  0x1a   :  { %v8818_v9 = vld [vmem:[%s20422_s1 + $0x120] sm:$0xf]  ;;  %v12606_v11 = vld [vmem:[%s20422_s1 + $0x12c] sm:$0xf0]  ;;  %v8691_v17 = vor.u32 %v12574_v8, %v8690_v7  ;;  %5785 = vmatpush.bf16.msra.mxu2 %v8963_v6 }
  0x1b   :  { %v8946_v12 = vld [vmem:[%s20422_s1 + $0x220] sm:$0xf]  ;;  %v12638_v13 = vld [vmem:[%s20422_s1 + $0x22c] sm:$0xf0]  ;;  %v8819_v21 = vor.u32 %v12606_v11, %v8818_v9  ;;  %5804 = vmatpush.bf16.msra.mxu3 %v9091_v10 }
  0x1c   :  { %v9074_v14 = vld [vmem:[%s20422_s1 + $0x320] sm:$0xf]  ;;  %v12670_v15 = vld [vmem:[%s20422_s1 + $0x32c] sm:$0xf0]  ;;  %v8947_v22 = vor.u32 %v12638_v13, %v8946_v12  ;;  %5748 = vmatpush.bf16.msra.mxu0 %v8691_v17 }
  0x1d   :  { %v8674_v16 = vld [vmem:[%s20422_s1] sm:$0xf]  ;;  %v12570_v18 = vld [vmem:[%s20422_s1 + $0xc] sm:$0xf0]  ;;  %v9075_v26 = vor.u32 %v12670_v15, %v9074_v14  ;;  %5767 = vmatpush.bf16.msra.mxu1 %v8819_v21 }
  0x1e   :  { %v8802_v19 = vld [vmem:[%s20422_s1 + $0x100] sm:$0xf]  ;;  %v12602_v20 = vld [vmem:[%s20422_s1 + $0x10c] sm:$0xf0]  ;;  %v8675_v34 = vor.u32 %v12570_v18, %v8674_v16  ;;  %5786 = vmatpush.bf16.msra.mxu2 %v8947_v22 }
  0x1f   :  { %v8930_v23 = vld [vmem:[%s20422_s1 + $0x200] sm:$0xf]  ;;  %v12634_v24 = vld [vmem:[%s20422_s1 + $0x20c] sm:$0xf0]  ;;  %v8803_v38 = vor.u32 %v12602_v20, %v8802_v19  ;;  %5805 = vmatpush.bf16.msra.mxu3 %v9075_v26 }
  0x20   :  { %v9058_v25 = vld [vmem:[%s20422_s1 + $0x300] sm:$0xf]  ;;  %v12666_v27 = vld [vmem:[%s20422_s1 + $0x30c] sm:$0xf0]  ;;  %v8931_v39 = vor.u32 %v12634_v24, %v8930_v23  ;;  %5749 = vmatpush.bf16.msra.mxu0 %v8675_v34 }
  0x21   :  { %v8450_v28 = vld [vmem:[%s20423_s0] sm:$0xf]  ;;  %v12526_v29 = vld [vmem:[%s20423_s0 + $0x6c] sm:$0xf0]  ;;  %v9059_v43 = vor.u32 %v12666_v27, %v9058_v25  ;;  %5768 = vmatpush.bf16.msra.mxu1 %v8803_v38  ;;  %v8572_v38 = vld [vmem:[%s20423_s0 + $0x158] sm:$0xf0] }
  0x22   :  { %v9554_v32 = vld [vmem:[%s20422_s1 + $0x6e0] sm:$0xf]  ;;  %v12790_v33 = vld [vmem:[%s20422_s1 + $0x6ec] sm:$0xf0]  ;;  %v13798_v48 = vor.u32 %v12526_v29, %v8450_v28  ;;  %5787 = vmatpush.bf16.msra.mxu2 %v8931_v39  ;;  %v12540_v28 = vld [vmem:[%s20423_s0 + $0xe4] sm:$0xf] }
  0x23   :  { %v9426_v36 = vld [vmem:[%s20422_s1 + $0x5e0] sm:$0xf]  ;;  %v12758_v37 = vld [vmem:[%s20422_s1 + $0x5ec] sm:$0xf0]  ;;  %v9555_v44 = vor.u32 %v12790_v33, %v9554_v32  ;;  %5806 = vmatpush.bf16.msra.mxu3 %v9059_v43  ;;  %v8564_v29 = vld [vmem:[%s20423_s0 + $0x150] sm:$0xf0] }
  0x24   :  { %v9298_v45 = vld [vmem:[%s20422_s1 + $0x4e0] sm:$0xf]  ;;  %v12726_v46 = vld [vmem:[%s20422_s1 + $0x4ec] sm:$0xf0]  ;;  %v9427_v49 = vor.u32 %v12758_v37, %v9426_v36  ;;  %5750 = vmatmul.bf16.vlgmr.msra.gmra.mxu0 %v13798_v48  ;;  %5769 = vmatmul.bf16.vlgmr.msra.gmra.mxu1 %v13809_v53  ;;  %v8570_v32 = vld [vmem:[%s20423_s0 + $0xe8] sm:$0xf] }
  0x25   :  { %v9682_v47 = vld [vmem:[%s20422_s1 + $0x7e0] sm:$0xf]  ;;  %v12822_v50 = vld [vmem:[%s20422_s1 + $0x7ec] sm:$0xf0]  ;;  %v9299_v58 = vor.u32 %v12726_v46, %v9298_v45  ;;  %5788 = vmatmul.bf16.vlgmr.msra.gmra.mxu2 %v13811_v54  ;;  %v12555_v36 = vld [vmem:[%s20423_s0 + $0x154] sm:$0xf0] }
  0x26   :  { %v9538_v51 = vld [vmem:[%s20422_s1 + $0x6c0] sm:$0xf]  ;;  %v12786_v52 = vld [vmem:[%s20422_s1 + $0x6cc] sm:$0xf0]  ;;  %5856 = vmatpush.bf16.msrb.mxu2 %v9555_v44  ;;  %v9683_v59 = vor.u32 %v12822_v50, %v9682_v47  ;;  %5837 = vmatpush.bf16.msrb.mxu1 %v9427_v49  ;;  %v12541_v37 = vld [vmem:[%s20423_s0 + $0xec] sm:$0xf]  ;;  %v13941_v50 = vor.u32 %v12540_v28, %v8564_v29 }
  0x27   :  { %v9410_v55 = vld [vmem:[%s20422_s1 + $0x5c0] sm:$0xf]  ;;  %v12754_v56 = vld [vmem:[%s20422_s1 + $0x5cc] sm:$0xf0]  ;;  %v9539_v60 = vor.u32 %v12786_v52, %v9538_v51  ;;  %5807 = vmatmul.bf16.vlgmr.msra.gmra.mxu3 %v13819_v57  ;;  %5818 = vmatpush.bf16.msrb.mxu0 %v9299_v58  ;;  %v13943_v51 = vor.u32 %v12555_v36, %v8570_v32  ;;  %v12514_v32 = vld [vmem:[%s20423_s0 + $0x14] sm:$0xf] }
  0x28   :  { %v9282_v61 = vld [vmem:[%s20422_s1 + $0x4c0] sm:$0xf]  ;;  %v12722_v62 = vld [vmem:[%s20422_s1 + $0x4cc] sm:$0xf0]  ;;  %v9411_v0 = vor.u32 %v12754_v56, %v9410_v55  ;;  %5875 = vmatpush.bf16.msrb.mxu3 %v9683_v59  ;;  %v13951_v56 = vor.u32 %v12541_v37, %v8572_v38 }
  0x29   :  { %v9666_v63 = vld [vmem:[%s20422_s1 + $0x7c0] sm:$0xf]  ;;  %v12818_v1 = vld [vmem:[%s20422_s1 + $0x7cc] sm:$0xf0]  ;;  %v9283_v6 = vor.u32 %v12722_v62, %v9282_v61 }
  0x2a   :  { %v9522_v2 = vld [vmem:[%s20422_s1 + $0x6a0] sm:$0xf]  ;;  %v12782_v3 = vld [vmem:[%s20422_s1 + $0x6ac] sm:$0xf0]  ;;  %5857 = vmatpush.bf16.msrb.mxu2 %v9539_v60  ;;  %v9667_v7 = vor.u32 %v12818_v1, %v9666_v63  ;;  %5838 = vmatpush.bf16.msrb.mxu1 %v9411_v0 }
  0x2b   :  { %v9394_v4 = vld [vmem:[%s20422_s1 + $0x5a0] sm:$0xf]  ;;  %v12750_v5 = vld [vmem:[%s20422_s1 + $0x5ac] sm:$0xf0]  ;;  %v9523_v8 = vor.u32 %v12782_v3, %v9522_v2  ;;  %5819 = vmatpush.bf16.msrb.mxu0 %v9283_v6 }
  0x2c   :  { %v9266_v9 = vld [vmem:[%s20422_s1 + $0x4a0] sm:$0xf]  ;;  %v12718_v10 = vld [vmem:[%s20422_s1 + $0x4ac] sm:$0xf0]  ;;  %v9395_v12 = vor.u32 %v12750_v5, %v9394_v4  ;;  %5876 = vmatpush.bf16.msrb.mxu3 %v9667_v7 }
  0x2d   :  { %v9650_v11 = vld [vmem:[%s20422_s1 + $0x7a0] sm:$0xf]  ;;  %v12814_v13 = vld [vmem:[%s20422_s1 + $0x7ac] sm:$0xf0]  ;;  %v9267_v18 = vor.u32 %v12718_v10, %v9266_v9 }
  0x2e   :  { %v9506_v14 = vld [vmem:[%s20422_s1 + $0x680] sm:$0xf]  ;;  %v12778_v15 = vld [vmem:[%s20422_s1 + $0x68c] sm:$0xf0]  ;;  %5858 = vmatpush.bf16.msrb.mxu2 %v9523_v8  ;;  %v9651_v22 = vor.u32 %v12814_v13, %v9650_v11  ;;  %5839 = vmatpush.bf16.msrb.mxu1 %v9395_v12 }
  0x2f   :  { %v9378_v16 = vld [vmem:[%s20422_s1 + $0x580] sm:$0xf]  ;;  %v12746_v17 = vld [vmem:[%s20422_s1 + $0x58c] sm:$0xf0]  ;;  %v9507_v23 = vor.u32 %v12778_v15, %v9506_v14  ;;  %5820 = vmatpush.bf16.msrb.mxu0 %v9267_v18 }
  0x30   :  { %v9250_v19 = vld [vmem:[%s20422_s1 + $0x480] sm:$0xf]  ;;  %v12714_v20 = vld [vmem:[%s20422_s1 + $0x48c] sm:$0xf0]  ;;  %v9379_v27 = vor.u32 %v12746_v17, %v9378_v16  ;;  %5877 = vmatpush.bf16.msrb.mxu3 %v9651_v22 }
  0x31   :  { %v9634_v21 = vld [vmem:[%s20422_s1 + $0x780] sm:$0xf]  ;;  %v12810_v24 = vld [vmem:[%s20422_s1 + $0x78c] sm:$0xf0]  ;;  %v9251_v35 = vor.u32 %v12714_v20, %v9250_v19 }
  0x32   :  { %v8562_v25 = vld [vmem:[%s20423_s0 + $0xe0] sm:$0xf]  ;;  %v12554_v26 = vld [vmem:[%s20423_s0 + $0x14c] sm:$0xf0]  ;;  %5859 = vmatpush.bf16.msrb.mxu2 %v9507_v23  ;;  %v9635_v39 = vor.u32 %v12810_v24, %v9634_v21  ;;  %5840 = vmatpush.bf16.msrb.mxu1 %v9379_v27 }
  0x33   :  { %v9490_v30 = vld [vmem:[%s20422_s1 + $0x660] sm:$0xf]  ;;  %v12774_v31 = vld [vmem:[%s20422_s1 + $0x66c] sm:$0xf0]  ;;  %v13930_v44 = vor.u32 %v12554_v26, %v8562_v25  ;;  %5821 = vmatpush.bf16.msrb.mxu0 %v9251_v35 }
  0x34   :  { %v9362_v33 = vld [vmem:[%s20422_s1 + $0x560] sm:$0xf]  ;;  %v12742_v34 = vld [vmem:[%s20422_s1 + $0x56c] sm:$0xf0]  ;;  %v9491_v40 = vor.u32 %v12774_v31, %v9490_v30  ;;  %5878 = vmatpush.bf16.msrb.mxu3 %v9635_v39  ;;  %5774 = vmatmul.bf16.gmra.mxu1 %v13941_v50 }
  0x35   :  { %v9234_v41 = vld [vmem:[%s20422_s1 + $0x460] sm:$0xf]  ;;  %v12710_v42 = vld [vmem:[%s20422_s1 + $0x46c] sm:$0xf0]  ;;  %v9363_v45 = vor.u32 %v12742_v34, %v9362_v33  ;;  %5755 = vmatmul.bf16.gmra.mxu0 %v13930_v44  ;;  %5793 = vmatmul.bf16.gmra.mxu2 %v13943_v51  ;;  %v8468_v33 = vld [vmem:[%s20423_s0 + $0x80] sm:$0xf0] }
  0x36   :  { %v9618_v43 = vld [vmem:[%s20422_s1 + $0x760] sm:$0xf]  ;;  %v12806_v46 = vld [vmem:[%s20422_s1 + $0x76c] sm:$0xf0]  ;;  %v9235_v58 = vor.u32 %v12710_v42, %v9234_v41  ;;  %5860 = vmatpush.bf16.msrb.mxu2 %v9491_v40 }
  0x37   :  { %v9474_v47 = vld [vmem:[%s20422_s1 + $0x640] sm:$0xf]  ;;  %v12770_v49 = vld [vmem:[%s20422_s1 + $0x64c] sm:$0xf0]  ;;  %v9619_v59 = vor.u32 %v12806_v46, %v9618_v43  ;;  %5841 = vmatpush.bf16.msrb.mxu1 %v9363_v45  ;;  %5812 = vmatmul.bf16.gmra.mxu3 %v13951_v56  ;;  %v8474_v43 = vld [vmem:[%s20423_s0 + $0x18] sm:$0xf] }
  0x38   :  { %v9346_v52 = vld [vmem:[%s20422_s1 + $0x540] sm:$0xf]  ;;  %v12738_v55 = vld [vmem:[%s20422_s1 + $0x54c] sm:$0xf0]  ;;  %v9475_v60 = vor.u32 %v12770_v49, %v9474_v47  ;;  %5822 = vmatpush.bf16.msrb.mxu0 %v9235_v58  ;;  %v12529_v45 = vld [vmem:[%s20423_s0 + $0x84] sm:$0xf0] }
  0x39   :  { %v9218_v61 = vld [vmem:[%s20422_s1 + $0x440] sm:$0xf]  ;;  %v12706_v62 = vld [vmem:[%s20422_s1 + $0x44c] sm:$0xf0]  ;;  %v9347_v0 = vor.u32 %v12738_v55, %v9346_v52  ;;  %5879 = vmatpush.bf16.msrb.mxu3 %v9619_v59  ;;  %v12515_v46 = vld [vmem:[%s20423_s0 + $0x1c] sm:$0xf] }
  0x3a   :  { %v9602_v63 = vld [vmem:[%s20422_s1 + $0x740] sm:$0xf]  ;;  %v12802_v1 = vld [vmem:[%s20422_s1 + $0x74c] sm:$0xf0]  ;;  %v9219_v6 = vor.u32 %v12706_v62, %v9218_v61  ;;  %5861 = vmatpush.bf16.msrb.mxu2 %v9475_v60  ;;  %v8476_v49 = vld [vmem:[%s20423_s0 + $0x88] sm:$0xf0] }
  0x3b   :  { %v9458_v2 = vld [vmem:[%s20422_s1 + $0x620] sm:$0xf]  ;;  %v12766_v3 = vld [vmem:[%s20422_s1 + $0x62c] sm:$0xf0]  ;;  %v9603_v8 = vor.u32 %v12802_v1, %v9602_v63  ;;  %5842 = vmatpush.bf16.msrb.mxu1 %v9347_v0  ;;  %v14088_v1 = vor.u32 %v12514_v32, %v8468_v33 }
  0x3c   :  { %v9330_v4 = vld [vmem:[%s20422_s1 + $0x520] sm:$0xf]  ;;  %v12734_v5 = vld [vmem:[%s20422_s1 + $0x52c] sm:$0xf0]  ;;  %v9459_v9 = vor.u32 %v12766_v3, %v9458_v2  ;;  %5823 = vmatpush.bf16.msrb.mxu0 %v9219_v6  ;;  %v14101_v6 = vor.u32 %v12515_v46, %v8476_v49  ;;  %v8586_v49 = vld [vmem:[%s20423_s0 + $0xf8] sm:$0xf] }
  0x3d   :  { %v9202_v7 = vld [vmem:[%s20422_s1 + $0x420] sm:$0xf]  ;;  %v12702_v10 = vld [vmem:[%s20422_s1 + $0x42c] sm:$0xf0]  ;;  %v9331_v13 = vor.u32 %v12734_v5, %v9330_v4  ;;  %5880 = vmatpush.bf16.msrb.mxu3 %v9603_v8  ;;  %v14099_v5 = vor.u32 %v12529_v45, %v8474_v43 }
  0x3e   :  { %v9586_v11 = vld [vmem:[%s20422_s1 + $0x720] sm:$0xf]  ;;  %v12798_v12 = vld [vmem:[%s20422_s1 + $0x72c] sm:$0xf0]  ;;  %v9203_v20 = vor.u32 %v12702_v10, %v9202_v7  ;;  %5862 = vmatpush.bf16.msrb.mxu2 %v9459_v9 }
  0x3f   :  { %v9442_v14 = vld [vmem:[%s20422_s1 + $0x600] sm:$0xf]  ;;  %v12762_v15 = vld [vmem:[%s20422_s1 + $0x60c] sm:$0xf0]  ;;  %v9587_v24 = vor.u32 %v12798_v12, %v9586_v11  ;;  %5843 = vmatpush.bf16.msrb.mxu1 %v9331_v13 }
  0x40   :  { %v9314_v16 = vld [vmem:[%s20422_s1 + $0x500] sm:$0xf]  ;;  %v12730_v17 = vld [vmem:[%s20422_s1 + $0x50c] sm:$0xf0]  ;;  %v9443_v25 = vor.u32 %v12762_v15, %v9442_v14  ;;  %5824 = vmatpush.bf16.msrb.mxu0 %v9203_v20 }
  0x41   :  { %v10066_v18 = vld [vmem:[%s20422_s1 + $0xae0] sm:$0xf]  ;;  %v12918_v19 = vld [vmem:[%s20422_s1 + $0xaec] sm:$0xf0]  ;;  %v9315_v29 = vor.u32 %v12730_v17, %v9314_v16  ;;  %5881 = vmatpush.bf16.msrb.mxu3 %v9587_v24 }
  0x42   :  { %v9186_v21 = vld [vmem:[%s20422_s1 + $0x400] sm:$0xf]  ;;  %v12886_v23 = vld [vmem:[%s20422_s1 + $0x9ec] sm:$0xf0]  ;;  %v10067_v34 = vor.u32 %v12918_v19, %v10066_v18  ;;  %5863 = vmatpush.bf16.msrb.mxu2 %v9443_v25 }
  0x43   :  { %v9938_v22 = vld [vmem:[%s20422_s1 + $0x9e0] sm:$0xf]  ;;  %v12698_v26 = vld [vmem:[%s20422_s1 + $0x40c] sm:$0xf0]  ;;  %5844 = vmatpush.bf16.msrb.mxu1 %v9315_v29 }
  0x44   :  { %v9570_v27 = vld [vmem:[%s20422_s1 + $0x700] sm:$0xf]  ;;  %v12794_v28 = vld [vmem:[%s20422_s1 + $0x70c] sm:$0xf0]  ;;  %v9939_v38 = vor.u32 %v12886_v23, %v9938_v22  ;;  %v9187_v42 = vor.u32 %v12698_v26, %v9186_v21 }
  0x45   :  { %v8466_v30 = vld [vmem:[%s20423_s0 + $0x10] sm:$0xf]  ;;  %v12528_v31 = vld [vmem:[%s20423_s0 + $0x7c] sm:$0xf0]  ;;  %v9571_v47 = vor.u32 %v12794_v28, %v9570_v27  ;;  %5864 = vmatmul.bf16.vlgmr.msrb.gmra.mxu2 %v14099_v5 }
  0x46   :  { %v9810_v35 = vld [vmem:[%s20422_s1 + $0x8e0] sm:$0xf]  ;;  %v12854_v36 = vld [vmem:[%s20422_s1 + $0x8ec] sm:$0xf0]  ;;  %5932 = vmatpush.bf16.msra.mxu2 %v10067_v34  ;;  %v14086_v0 = vor.u32 %v12528_v31, %v8466_v30  ;;  %5825 = vmatpush.bf16.msrb.mxu0 %v9187_v42 }
  0x47   :  { %v10194_v37 = vld [vmem:[%s20422_s1 + $0xbe0] sm:$0xf]  ;;  %v12950_v39 = vld [vmem:[%s20422_s1 + $0xbec] sm:$0xf0]  ;;  %v9811_v52 = vor.u32 %v12854_v36, %v9810_v35  ;;  %5913 = vmatpush.bf16.msra.mxu1 %v9939_v38  ;;  %5882 = vmatpush.bf16.msrb.mxu3 %v9571_v47  ;;  %v12542_v38 = vld [vmem:[%s20423_s0 + $0xf4] sm:$0xf] }
  0x48   :  { %v10050_v40 = vld [vmem:[%s20422_s1 + $0xac0] sm:$0xf]  ;;  %v12914_v41 = vld [vmem:[%s20422_s1 + $0xacc] sm:$0xf0]  ;;  %v10195_v59 = vor.u32 %v12950_v39, %v10194_v37  ;;  %5845 = vmatmul.bf16.vlgmr.msrb.gmra.mxu1 %v14088_v1  ;;  %v8580_v39 = vld [vmem:[%s20423_s0 + $0x160] sm:$0xf0] }
  0x49   :  { %v9794_v55 = vld [vmem:[%s20422_s1 + $0x8c0] sm:$0xf]  ;;  %v12850_v58 = vld [vmem:[%s20422_s1 + $0x8cc] sm:$0xf0]  ;;  %v10051_v60 = vor.u32 %v12914_v41, %v10050_v40  ;;  %5826 = vmatmul.bf16.vlgmr.msrb.gmra.mxu0 %v14086_v0 }
  0x4a   :  { %v9922_v61 = vld [vmem:[%s20422_s1 + $0x9c0] sm:$0xf]  ;;  %v12882_v62 = vld [vmem:[%s20422_s1 + $0x9cc] sm:$0xf0]  ;;  %5894 = vmatpush.bf16.msra.mxu0 %v9811_v52  ;;  %v9795_v7 = vor.u32 %v12850_v58, %v9794_v55  ;;  %5883 = vmatmul.bf16.vlgmr.msrb.gmra.mxu3 %v14101_v6  ;;  %v12557_v52 = vld [vmem:[%s20423_s0 + $0x164] sm:$0xf0] }
  0x4b   :  { %v10178_v63 = vld [vmem:[%s20422_s1 + $0xbc0] sm:$0xf]  ;;  %v12946_v2 = vld [vmem:[%s20422_s1 + $0xbcc] sm:$0xf0]  ;;  %v9923_v8 = vor.u32 %v12882_v62, %v9922_v61  ;;  %5951 = vmatpush.bf16.msra.mxu3 %v10195_v59  ;;  %5933 = vmatpush.bf16.msra.mxu2 %v10051_v60  ;;  %v12543_v55 = vld [vmem:[%s20423_s0 + $0xfc] sm:$0xf] }
  0x4c   :  { %v10034_v3 = vld [vmem:[%s20422_s1 + $0xaa0] sm:$0xf]  ;;  %v12910_v4 = vld [vmem:[%s20422_s1 + $0xaac] sm:$0xf0]  ;;  %v10179_v11 = vor.u32 %v12946_v2, %v10178_v63  ;;  %v8588_v58 = vld [vmem:[%s20423_s0 + $0x168] sm:$0xf0] }
  0x4d   :  { %v9778_v9 = vld [vmem:[%s20422_s1 + $0x8a0] sm:$0xf]  ;;  %v12846_v10 = vld [vmem:[%s20422_s1 + $0x8ac] sm:$0xf0]  ;;  %v10035_v12 = vor.u32 %v12910_v4, %v10034_v3  ;;  %5914 = vmatpush.bf16.msra.mxu1 %v9923_v8 }
  0x4e   :  { %v9906_v13 = vld [vmem:[%s20422_s1 + $0x9a0] sm:$0xf]  ;;  %v12878_v14 = vld [vmem:[%s20422_s1 + $0x9ac] sm:$0xf0]  ;;  %5895 = vmatpush.bf16.msra.mxu0 %v9795_v7  ;;  %v9779_v19 = vor.u32 %v12846_v10, %v9778_v9  ;;  %v14220_v9 = vor.u32 %v12542_v38, %v8580_v39 }
  0x4f   :  { %v10162_v15 = vld [vmem:[%s20422_s1 + $0xba0] sm:$0xf]  ;;  %v12942_v16 = vld [vmem:[%s20422_s1 + $0xbac] sm:$0xf0]  ;;  %v9907_v20 = vor.u32 %v12878_v14, %v9906_v13  ;;  %5952 = vmatpush.bf16.msra.mxu3 %v10179_v11  ;;  %5934 = vmatpush.bf16.msra.mxu2 %v10035_v12  ;;  %v14231_v13 = vor.u32 %v12557_v52, %v8586_v49  ;;  %v14233_v14 = vor.u32 %v12543_v55, %v8588_v58 }
  0x50   :  { %v10018_v17 = vld [vmem:[%s20422_s1 + $0xa80] sm:$0xf]  ;;  %v12906_v18 = vld [vmem:[%s20422_s1 + $0xa8c] sm:$0xf0]  ;;  %v10163_v23 = vor.u32 %v12942_v16, %v10162_v15 }
  0x51   :  { %v9762_v21 = vld [vmem:[%s20422_s1 + $0x880] sm:$0xf]  ;;  %v12842_v22 = vld [vmem:[%s20422_s1 + $0x88c] sm:$0xf0]  ;;  %v10019_v24 = vor.u32 %v12906_v18, %v10018_v17  ;;  %5915 = vmatpush.bf16.msra.mxu1 %v9907_v20 }
  0x52   :  { %v9890_v25 = vld [vmem:[%s20422_s1 + $0x980] sm:$0xf]  ;;  %v12874_v26 = vld [vmem:[%s20422_s1 + $0x98c] sm:$0xf0]  ;;  %5896 = vmatpush.bf16.msra.mxu0 %v9779_v19  ;;  %v9763_v31 = vor.u32 %v12842_v22, %v9762_v21 }
  0x53   :  { %v10146_v27 = vld [vmem:[%s20422_s1 + $0xb80] sm:$0xf]  ;;  %v12938_v28 = vld [vmem:[%s20422_s1 + $0xb8c] sm:$0xf0]  ;;  %v9891_v32 = vor.u32 %v12874_v26, %v9890_v25  ;;  %5953 = vmatpush.bf16.msra.mxu3 %v10163_v23  ;;  %5935 = vmatpush.bf16.msra.mxu2 %v10019_v24 }
  0x54   :  { %v10002_v29 = vld [vmem:[%s20422_s1 + $0xa60] sm:$0xf]  ;;  %v12902_v30 = vld [vmem:[%s20422_s1 + $0xa6c] sm:$0xf0]  ;;  %v10147_v35 = vor.u32 %v12938_v28, %v10146_v27 }
  0x55   :  { %v9746_v33 = vld [vmem:[%s20422_s1 + $0x860] sm:$0xf]  ;;  %v12838_v34 = vld [vmem:[%s20422_s1 + $0x86c] sm:$0xf0]  ;;  %v10003_v40 = vor.u32 %v12902_v30, %v10002_v29  ;;  %5916 = vmatpush.bf16.msra.mxu1 %v9891_v32  ;;  %5869 = vmatmul.bf16.gmra.mxu2 %v14231_v13 }
  0x56   :  { %v8578_v36 = vld [vmem:[%s20423_s0 + $0xf0] sm:$0xf]  ;;  %v12556_v37 = vld [vmem:[%s20423_s0 + $0x15c] sm:$0xf0]  ;;  %5897 = vmatpush.bf16.msra.mxu0 %v9763_v31  ;;  %v9747_v59 = vor.u32 %v12838_v34, %v9746_v33 }
  0x57   :  { %v9874_v41 = vld [vmem:[%s20422_s1 + $0x960] sm:$0xf]  ;;  %v12870_v42 = vld [vmem:[%s20422_s1 + $0x96c] sm:$0xf0]  ;;  %5954 = vmatpush.bf16.msra.mxu3 %v10147_v35  ;;  %5936 = vmatpush.bf16.msra.mxu2 %v10003_v40  ;;  %v14218_v8 = vor.u32 %v12556_v37, %v8578_v36 }
  0x58   :  { %v10130_v43 = vld [vmem:[%s20422_s1 + $0xb60] sm:$0xf]  ;;  %v12934_v45 = vld [vmem:[%s20422_s1 + $0xb6c] sm:$0xf0]  ;;  %v9875_v60 = vor.u32 %v12870_v42, %v9874_v41  ;;  %5850 = vmatmul.bf16.gmra.mxu1 %v14220_v9 }
  0x59   :  { %v9986_v46 = vld [vmem:[%s20422_s1 + $0xa40] sm:$0xf]  ;;  %v12898_v47 = vld [vmem:[%s20422_s1 + $0xa4c] sm:$0xf0]  ;;  %v10131_v63 = vor.u32 %v12934_v45, %v10130_v43  ;;  %5831 = vmatmul.bf16.gmra.mxu0 %v14218_v8 }
  0x5a   :  { %v9730_v61 = vld [vmem:[%s20422_s1 + $0x840] sm:$0xf]  ;;  %v12834_v62 = vld [vmem:[%s20422_s1 + $0x84c] sm:$0xf0]  ;;  %v9987_v2 = vor.u32 %v12898_v47, %v9986_v46  ;;  %5898 = vmatpush.bf16.msra.mxu0 %v9747_v59  ;;  %5917 = vmatpush.bf16.msra.mxu1 %v9875_v60 }
  0x5b   :  { %v9858_v3 = vld [vmem:[%s20422_s1 + $0x940] sm:$0xf]  ;;  %v12866_v4 = vld [vmem:[%s20422_s1 + $0x94c] sm:$0xf0]  ;;  %v9731_v15 = vor.u32 %v12834_v62, %v9730_v61  ;;  %5955 = vmatpush.bf16.msra.mxu3 %v10131_v63  ;;  %v12516_v61 = vld [vmem:[%s20423_s0 + $0x24] sm:$0xf] }
  0x5c   :  { %v10114_v7 = vld [vmem:[%s20422_s1 + $0xb40] sm:$0xf]  ;;  %v12930_v10 = vld [vmem:[%s20422_s1 + $0xb4c] sm:$0xf0]  ;;  %v9859_v16 = vor.u32 %v12866_v4, %v9858_v3  ;;  %5937 = vmatpush.bf16.msra.mxu2 %v9987_v2  ;;  %5888 = vmatmul.bf16.gmra.mxu3 %v14233_v14  ;;  %v8484_v63 = vld [vmem:[%s20423_s0 + $0x90] sm:$0xf0] }
  0x5d   :  { %v9970_v11 = vld [vmem:[%s20422_s1 + $0xa20] sm:$0xf]  ;;  %v12894_v12 = vld [vmem:[%s20422_s1 + $0xa2c] sm:$0xf0]  ;;  %v10115_v19 = vor.u32 %v12930_v10, %v10114_v7  ;;  %v8490_v10 = vld [vmem:[%s20423_s0 + $0x28] sm:$0xf] }
  0x5e   :  { %v9714_v17 = vld [vmem:[%s20422_s1 + $0x820] sm:$0xf]  ;;  %v12830_v18 = vld [vmem:[%s20422_s1 + $0x82c] sm:$0xf0]  ;;  %v9971_v20 = vor.u32 %v12894_v12, %v9970_v11  ;;  %5899 = vmatpush.bf16.msra.mxu0 %v9731_v15  ;;  %5918 = vmatpush.bf16.msra.mxu1 %v9859_v16  ;;  %v12531_v11 = vld [vmem:[%s20423_s0 + $0x94] sm:$0xf0] }
  0x5f   :  { %v9842_v21 = vld [vmem:[%s20422_s1 + $0x920] sm:$0xf]  ;;  %v12862_v22 = vld [vmem:[%s20422_s1 + $0x92c] sm:$0xf0]  ;;  %v9715_v29 = vor.u32 %v12830_v18, %v9714_v17  ;;  %5956 = vmatpush.bf16.msra.mxu3 %v10115_v19  ;;  %v12517_v12 = vld [vmem:[%s20423_s0 + $0x2c] sm:$0xf] }
  0x60   :  { %v10098_v23 = vld [vmem:[%s20422_s1 + $0xb20] sm:$0xf]  ;;  %v12926_v24 = vld [vmem:[%s20422_s1 + $0xb2c] sm:$0xf0]  ;;  %v9843_v30 = vor.u32 %v12862_v22, %v9842_v21  ;;  %5938 = vmatpush.bf16.msra.mxu2 %v9971_v20  ;;  %v8492_v16 = vld [vmem:[%s20423_s0 + $0x98] sm:$0xf0] }
  0x61   :  { %v9954_v25 = vld [vmem:[%s20422_s1 + $0xa00] sm:$0xf]  ;;  %v12890_v26 = vld [vmem:[%s20422_s1 + $0xa0c] sm:$0xf0]  ;;  %v10099_v34 = vor.u32 %v12926_v24, %v10098_v23  ;;  %v14358_v24 = vor.u32 %v12516_v61, %v8484_v63 }
  0x62   :  { %v10578_v27 = vld [vmem:[%s20422_s1 + $0xee0] sm:$0xf]  ;;  %v13046_v28 = vld [vmem:[%s20422_s1 + $0xeec] sm:$0xf0]  ;;  %v9955_v35 = vor.u32 %v12890_v26, %v9954_v25  ;;  %5900 = vmatpush.bf16.msra.mxu0 %v9715_v29  ;;  %5919 = vmatpush.bf16.msra.mxu1 %v9843_v30  ;;  %v14371_v29 = vor.u32 %v12517_v12, %v8492_v16 }
  0x63   :  { %v9698_v31 = vld [vmem:[%s20422_s1 + $0x800] sm:$0xf]  ;;  %v12826_v32 = vld [vmem:[%s20422_s1 + $0x80c] sm:$0xf0]  ;;  %v10579_v39 = vor.u32 %v13046_v28, %v10578_v27  ;;  %5957 = vmatpush.bf16.msra.mxu3 %v10099_v34  ;;  %v14369_v28 = vor.u32 %v12531_v11, %v8490_v10  ;;  %v12544_v10 = vld [vmem:[%s20423_s0 + $0x104] sm:$0xf] }
  0x64   :  { %v9826_v33 = vld [vmem:[%s20422_s1 + $0x900] sm:$0xf]  ;;  %v12858_v36 = vld [vmem:[%s20422_s1 + $0x90c] sm:$0xf0]  ;;  %v9699_v47 = vor.u32 %v12826_v32, %v9698_v31  ;;  %5939 = vmatpush.bf16.msra.mxu2 %v9955_v35  ;;  %v8596_v11 = vld [vmem:[%s20423_s0 + $0x170] sm:$0xf0] }
  0x65   :  { %v10082_v37 = vld [vmem:[%s20422_s1 + $0xb00] sm:$0xf]  ;;  %v12922_v38 = vld [vmem:[%s20422_s1 + $0xb0c] sm:$0xf0]  ;;  %v9827_v49 = vor.u32 %v12858_v36, %v9826_v33 }
  0x66   :  { %v10322_v40 = vld [vmem:[%s20422_s1 + $0xce0] sm:$0xf]  ;;  %v12982_v41 = vld [vmem:[%s20422_s1 + $0xcec] sm:$0xf0]  ;;  %v10083_v58 = vor.u32 %v12922_v38, %v10082_v37  ;;  %5901 = vmatpush.bf16.msra.mxu0 %v9699_v47 }
  0x67   :  { %v10450_v42 = vld [vmem:[%s20422_s1 + $0xde0] sm:$0xf]  ;;  %v13014_v43 = vld [vmem:[%s20422_s1 + $0xdec] sm:$0xf0]  ;;  %v10323_v62 = vor.u32 %v12982_v41, %v10322_v40  ;;  %5920 = vmatpush.bf16.msra.mxu1 %v9827_v49  ;;  %5940 = vmatmul.bf16.vlgmr.msra.gmra.mxu2 %v14369_v28 }
  0x68   :  { %v10706_v45 = vld [vmem:[%s20422_s1 + $0xfe0] sm:$0xf]  ;;  %v13078_v46 = vld [vmem:[%s20422_s1 + $0xfec] sm:$0xf0]  ;;  %6008 = vmatpush.bf16.msrb.mxu2 %v10579_v39  ;;  %v10451_v2 = vor.u32 %v13014_v43, %v10450_v42  ;;  %5958 = vmatpush.bf16.msra.mxu3 %v10083_v58 }
  0x69   :  { %v10562_v52 = vld [vmem:[%s20422_s1 + $0xec0] sm:$0xf]  ;;  %v13042_v55 = vld [vmem:[%s20422_s1 + $0xecc] sm:$0xf0]  ;;  %v10707_v3 = vor.u32 %v13078_v46, %v10706_v45 }
  0x6a   :  { %v8482_v59 = vld [vmem:[%s20423_s0 + $0x20] sm:$0xf]  ;;  %v12530_v60 = vld [vmem:[%s20423_s0 + $0x8c] sm:$0xf0]  ;;  %v10563_v15 = vor.u32 %v13042_v55, %v10562_v52  ;;  %5970 = vmatpush.bf16.msrb.mxu0 %v10323_v62  ;;  %5921 = vmatmul.bf16.vlgmr.msra.gmra.mxu1 %v14358_v24 }
  0x6b   :  { %v10306_v4 = vld [vmem:[%s20422_s1 + $0xcc0] sm:$0xf]  ;;  %v12978_v7 = vld [vmem:[%s20422_s1 + $0xccc] sm:$0xf0]  ;;  %v14356_v23 = vor.u32 %v12530_v60, %v8482_v59  ;;  %5989 = vmatpush.bf16.msrb.mxu1 %v10451_v2 }
  0x6c   :  { %v10434_v17 = vld [vmem:[%s20422_s1 + $0xdc0] sm:$0xf]  ;;  %v13010_v18 = vld [vmem:[%s20422_s1 + $0xdcc] sm:$0xf0]  ;;  %v10307_v19 = vor.u32 %v12978_v7, %v10306_v4  ;;  %6027 = vmatpush.bf16.msrb.mxu3 %v10707_v3  ;;  %6009 = vmatpush.bf16.msrb.mxu2 %v10563_v15 }
  0x6d   :  { %v10690_v20 = vld [vmem:[%s20422_s1 + $0xfc0] sm:$0xf]  ;;  %v13074_v21 = vld [vmem:[%s20422_s1 + $0xfcc] sm:$0xf0]  ;;  %v10435_v30 = vor.u32 %v13010_v18, %v10434_v17  ;;  %5902 = vmatmul.bf16.vlgmr.msra.gmra.mxu0 %v14356_v23  ;;  %5959 = vmatmul.bf16.vlgmr.msra.gmra.mxu3 %v14371_v29 }
  0x6e   :  { %v10546_v22 = vld [vmem:[%s20422_s1 + $0xea0] sm:$0xf]  ;;  %v13038_v25 = vld [vmem:[%s20422_s1 + $0xeac] sm:$0xf0]  ;;  %v10691_v31 = vor.u32 %v13074_v21, %v10690_v20  ;;  %5971 = vmatpush.bf16.msrb.mxu0 %v10307_v19 }
  0x6f   :  { %v10290_v26 = vld [vmem:[%s20422_s1 + $0xca0] sm:$0xf]  ;;  %v12974_v27 = vld [vmem:[%s20422_s1 + $0xcac] sm:$0xf0]  ;;  %v10547_v34 = vor.u32 %v13038_v25, %v10546_v22  ;;  %5990 = vmatpush.bf16.msrb.mxu1 %v10435_v30  ;;  %v8602_v22 = vld [vmem:[%s20423_s0 + $0x108] sm:$0xf] }
  0x70   :  { %v10418_v32 = vld [vmem:[%s20422_s1 + $0xda0] sm:$0xf]  ;;  %v13006_v33 = vld [vmem:[%s20422_s1 + $0xdac] sm:$0xf0]  ;;  %v10291_v35 = vor.u32 %v12974_v27, %v10290_v26  ;;  %6028 = vmatpush.bf16.msrb.mxu3 %v10691_v31  ;;  %v12559_v25 = vld [vmem:[%s20423_s0 + $0x174] sm:$0xf0] }
  0x71   :  { %v10674_v36 = vld [vmem:[%s20422_s1 + $0xfa0] sm:$0xf]  ;;  %v13070_v37 = vld [vmem:[%s20422_s1 + $0xfac] sm:$0xf0]  ;;  %v10419_v42 = vor.u32 %v13006_v33, %v10418_v32  ;;  %6010 = vmatpush.bf16.msrb.mxu2 %v10547_v34  ;;  %v12545_v26 = vld [vmem:[%s20423_s0 + $0x10c] sm:$0xf] }
  0x72   :  { %v10530_v38 = vld [vmem:[%s20422_s1 + $0xe80] sm:$0xf]  ;;  %v13034_v39 = vld [vmem:[%s20422_s1 + $0xe8c] sm:$0xf0]  ;;  %v10675_v43 = vor.u32 %v13070_v37, %v10674_v36  ;;  %5972 = vmatpush.bf16.msrb.mxu0 %v10291_v35  ;;  %v8604_v27 = vld [vmem:[%s20423_s0 + $0x178] sm:$0xf0] }
  0x73   :  { %v10274_v40 = vld [vmem:[%s20422_s1 + $0xc80] sm:$0xf]  ;;  %v12970_v41 = vld [vmem:[%s20422_s1 + $0xc8c] sm:$0xf0]  ;;  %v10531_v47 = vor.u32 %v13034_v39, %v10530_v38  ;;  %5991 = vmatpush.bf16.msrb.mxu1 %v10419_v42 }
  0x74   :  { %v10402_v45 = vld [vmem:[%s20422_s1 + $0xd80] sm:$0xf]  ;;  %v13002_v46 = vld [vmem:[%s20422_s1 + $0xd8c] sm:$0xf0]  ;;  %v10275_v49 = vor.u32 %v12970_v41, %v10274_v40  ;;  %6029 = vmatpush.bf16.msrb.mxu3 %v10675_v43  ;;  %v14490_v40 = vor.u32 %v12544_v10, %v8596_v11 }
  0x75   :  { %v10658_v52 = vld [vmem:[%s20422_s1 + $0xf80] sm:$0xf]  ;;  %v13066_v55 = vld [vmem:[%s20422_s1 + $0xf8c] sm:$0xf0]  ;;  %v10403_v62 = vor.u32 %v13002_v46, %v10402_v45  ;;  %6011 = vmatpush.bf16.msrb.mxu2 %v10531_v47  ;;  %v14501_v45 = vor.u32 %v12559_v25, %v8602_v22  ;;  %v14503_v46 = vor.u32 %v12545_v26, %v8604_v27 }
  0x76   :  { %v10514_v58 = vld [vmem:[%s20422_s1 + $0xe60] sm:$0xf]  ;;  %v13030_v59 = vld [vmem:[%s20422_s1 + $0xe6c] sm:$0xf0]  ;;  %v10659_v63 = vor.u32 %v13066_v55, %v10658_v52  ;;  %5973 = vmatpush.bf16.msrb.mxu0 %v10275_v49 }
  0x77   :  { %v10258_v60 = vld [vmem:[%s20422_s1 + $0xc60] sm:$0xf]  ;;  %v12966_v61 = vld [vmem:[%s20422_s1 + $0xc6c] sm:$0xf0]  ;;  %v10515_v12 = vor.u32 %v13030_v59, %v10514_v58  ;;  %5992 = vmatpush.bf16.msrb.mxu1 %v10403_v62  ;;  %5945 = vmatmul.bf16.gmra.mxu2 %v14501_v45 }
  0x78   :  { %v10386_v2 = vld [vmem:[%s20422_s1 + $0xd60] sm:$0xf]  ;;  %v12998_v3 = vld [vmem:[%s20422_s1 + $0xd6c] sm:$0xf0]  ;;  %v10259_v15 = vor.u32 %v12966_v61, %v10258_v60  ;;  %6030 = vmatpush.bf16.msrb.mxu3 %v10659_v63 }
  0x79   :  { %v8594_v4 = vld [vmem:[%s20423_s0 + $0x100] sm:$0xf]  ;;  %v12558_v7 = vld [vmem:[%s20423_s0 + $0x16c] sm:$0xf0]  ;;  %v10387_v30 = vor.u32 %v12998_v3, %v10386_v2  ;;  %6012 = vmatpush.bf16.msrb.mxu2 %v10515_v12 }
  0x7a   :  { %v10642_v16 = vld [vmem:[%s20422_s1 + $0xf60] sm:$0xf]  ;;  %v13062_v17 = vld [vmem:[%s20422_s1 + $0xf6c] sm:$0xf0]  ;;  %5974 = vmatpush.bf16.msrb.mxu0 %v10259_v15  ;;  %v14488_v39 = vor.u32 %v12558_v7, %v8594_v4  ;;  %5926 = vmatmul.bf16.gmra.mxu1 %v14490_v40 }
  0x7b   :  { %v10498_v18 = vld [vmem:[%s20422_s1 + $0xe40] sm:$0xf]  ;;  %v13026_v19 = vld [vmem:[%s20422_s1 + $0xe4c] sm:$0xf0]  ;;  %v10643_v31 = vor.u32 %v13062_v17, %v10642_v16  ;;  %5993 = vmatpush.bf16.msrb.mxu1 %v10387_v30 }
  0x7c   :  { %v10242_v20 = vld [vmem:[%s20422_s1 + $0xc40] sm:$0xf]  ;;  %v12962_v21 = vld [vmem:[%s20422_s1 + $0xc4c] sm:$0xf0]  ;;  %v10499_v34 = vor.u32 %v13026_v19, %v10498_v18 }
  0x7d   :  { %v10370_v32 = vld [vmem:[%s20422_s1 + $0xd40] sm:$0xf]  ;;  %v12994_v33 = vld [vmem:[%s20422_s1 + $0xd4c] sm:$0xf0]  ;;  %v10243_v35 = vor.u32 %v12962_v21, %v10242_v20  ;;  %6031 = vmatpush.bf16.msrb.mxu3 %v10643_v31  ;;  %5907 = vmatmul.bf16.gmra.mxu0 %v14488_v39 }
  0x7e   :  { %v10626_v36 = vld [vmem:[%s20422_s1 + $0xf40] sm:$0xf]  ;;  %v13058_v37 = vld [vmem:[%s20422_s1 + $0xf4c] sm:$0xf0]  ;;  %v10371_v47 = vor.u32 %v12994_v33, %v10370_v32  ;;  %6013 = vmatpush.bf16.msrb.mxu2 %v10499_v34  ;;  %5964 = vmatmul.bf16.gmra.mxu3 %v14503_v46 }
  0x7f   :  { %v10482_v38 = vld [vmem:[%s20422_s1 + $0xe20] sm:$0xf]  ;;  %v13022_v41 = vld [vmem:[%s20422_s1 + $0xe2c] sm:$0xf0]  ;;  %v10627_v49 = vor.u32 %v13058_v37, %v10626_v36  ;;  %5975 = vmatpush.bf16.msrb.mxu0 %v10243_v35 }
  0x80   :  { %v10226_v42 = vld [vmem:[%s20422_s1 + $0xc20] sm:$0xf]  ;;  %v12958_v43 = vld [vmem:[%s20422_s1 + $0xc2c] sm:$0xf0]  ;;  %v10483_v59 = vor.u32 %v13022_v41, %v10482_v38  ;;  %5994 = vmatpush.bf16.msrb.mxu1 %v10371_v47 }
  0x81   :  { %v10354_v52 = vld [vmem:[%s20422_s1 + $0xd20] sm:$0xf]  ;;  %v12990_v55 = vld [vmem:[%s20422_s1 + $0xd2c] sm:$0xf0]  ;;  %v10227_v60 = vor.u32 %v12958_v43, %v10226_v42  ;;  %6032 = vmatpush.bf16.msrb.mxu3 %v10627_v49  ;;  %v12518_v42 = vld [vmem:[%s20423_s0 + $0x34] sm:$0xf] }
  0x82   :  { %v10610_v58 = vld [vmem:[%s20422_s1 + $0xf20] sm:$0xf]  ;;  %v13054_v61 = vld [vmem:[%s20422_s1 + $0xf2c] sm:$0xf0]  ;;  %v10355_v12 = vor.u32 %v12990_v55, %v10354_v52  ;;  %6014 = vmatpush.bf16.msrb.mxu2 %v10483_v59  ;;  %v8500_v43 = vld [vmem:[%s20423_s0 + $0xa0] sm:$0xf0] }
  0x83   :  { %v10466_v62 = vld [vmem:[%s20422_s1 + $0xe00] sm:$0xf]  ;;  %v13018_v63 = vld [vmem:[%s20422_s1 + $0xe0c] sm:$0xf0]  ;;  %v10611_v15 = vor.u32 %v13054_v61, %v10610_v58  ;;  %5976 = vmatpush.bf16.msrb.mxu0 %v10227_v60 }
  0x84   :  { %v10210_v2 = vld [vmem:[%s20422_s1 + $0xc00] sm:$0xf]  ;;  %v12954_v3 = vld [vmem:[%s20422_s1 + $0xc0c] sm:$0xf0]  ;;  %v10467_v19 = vor.u32 %v13018_v63, %v10466_v62  ;;  %5995 = vmatpush.bf16.msrb.mxu1 %v10355_v12  ;;  %v8506_v62 = vld [vmem:[%s20423_s0 + $0x38] sm:$0xf] }
  0x85   :  { %v11090_v4 = vld [vmem:[%s20422_s1 + $0x12e0] sm:$0xf]  ;;  %v13174_v7 = vld [vmem:[%s20422_s1 + $0x12ec] sm:$0xf0]  ;;  %v10211_v20 = vor.u32 %v12954_v3, %v10210_v2  ;;  %6033 = vmatpush.bf16.msrb.mxu3 %v10611_v15  ;;  %v12533_v63 = vld [vmem:[%s20423_s0 + $0xa4] sm:$0xf0] }
  0x86   :  { %v10834_v10 = vld [vmem:[%s20422_s1 + $0x10e0] sm:$0xf]  ;;  %v13110_v11 = vld [vmem:[%s20422_s1 + $0x10ec] sm:$0xf0]  ;;  %v11091_v26 = vor.u32 %v13174_v7, %v11090_v4  ;;  %6015 = vmatpush.bf16.msrb.mxu2 %v10467_v19  ;;  %v12519_v2 = vld [vmem:[%s20423_s0 + $0x3c] sm:$0xf] }
  0x87   :  { %v10338_v16 = vld [vmem:[%s20422_s1 + $0xd00] sm:$0xf]  ;;  %v12986_v17 = vld [vmem:[%s20422_s1 + $0xd0c] sm:$0xf0]  ;;  %v10835_v27 = vor.u32 %v13110_v11, %v10834_v10  ;;  %5977 = vmatpush.bf16.msrb.mxu0 %v10211_v20  ;;  %v8508_v3 = vld [vmem:[%s20423_s0 + $0xa8] sm:$0xf0] }
  0x88   :  { %v10594_v18 = vld [vmem:[%s20422_s1 + $0xf00] sm:$0xf]  ;;  %v13050_v21 = vld [vmem:[%s20422_s1 + $0xf0c] sm:$0xf0]  ;;  %v10339_v36 = vor.u32 %v12986_v17, %v10338_v16 }
  0x89   :  { %v10962_v22 = vld [vmem:[%s20422_s1 + $0x11e0] sm:$0xf]  ;;  %v13142_v25 = vld [vmem:[%s20422_s1 + $0x11ec] sm:$0xf0]  ;;  %v10595_v37 = vor.u32 %v13050_v21, %v10594_v18  ;;  %v14634_v18 = vor.u32 %v12518_v42, %v8500_v43 }
  0x8a   :  { %v11218_v30 = vld [vmem:[%s20422_s1 + $0x13e0] sm:$0xf]  ;;  %v13206_v31 = vld [vmem:[%s20422_s1 + $0x13ec] sm:$0xf0]  ;;  %v10963_v47 = vor.u32 %v13142_v25, %v10962_v22  ;;  %6084 = vmatpush.bf16.msra.mxu2 %v11091_v26  ;;  %5996 = vmatpush.bf16.msrb.mxu1 %v10339_v36  ;;  %v14645_v22 = vor.u32 %v12533_v63, %v8506_v62  ;;  %v14647_v25 = vor.u32 %v12519_v2, %v8508_v3 }
  0x8b   :  { %v11074_v32 = vld [vmem:[%s20422_s1 + $0x12c0] sm:$0xf]  ;;  %v13170_v33 = vld [vmem:[%s20422_s1 + $0x12cc] sm:$0xf0]  ;;  %v11219_v49 = vor.u32 %v13206_v31, %v11218_v30  ;;  %6046 = vmatpush.bf16.msra.mxu0 %v10835_v27  ;;  %6034 = vmatpush.bf16.msrb.mxu3 %v10595_v37 }
  0x8c   :  { %v10818_v34 = vld [vmem:[%s20422_s1 + $0x10c0] sm:$0xf]  ;;  %v13106_v35 = vld [vmem:[%s20422_s1 + $0x10cc] sm:$0xf0]  ;;  %v11075_v55 = vor.u32 %v13170_v33, %v11074_v32  ;;  %6016 = vmatmul.bf16.vlgmr.msrb.gmra.mxu2 %v14645_v22 }
  0x8d   :  { %v8498_v38 = vld [vmem:[%s20423_s0 + $0x30] sm:$0xf]  ;;  %v12532_v41 = vld [vmem:[%s20423_s0 + $0x9c] sm:$0xf0]  ;;  %v10819_v58 = vor.u32 %v13106_v35, %v10818_v34  ;;  %5997 = vmatmul.bf16.vlgmr.msrb.gmra.mxu1 %v14634_v18 }
  0x8e   :  { %v10946_v52 = vld [vmem:[%s20422_s1 + $0x11c0] sm:$0xf]  ;;  %v13138_v59 = vld [vmem:[%s20422_s1 + $0x11cc] sm:$0xf0]  ;;  %6065 = vmatpush.bf16.msra.mxu1 %v10963_v47  ;;  %v14632_v17 = vor.u32 %v12532_v41, %v8498_v38  ;;  %6085 = vmatpush.bf16.msra.mxu2 %v11075_v55 }
  0x8f   :  { %v11202_v60 = vld [vmem:[%s20422_s1 + $0x13c0] sm:$0xf]  ;;  %v13202_v61 = vld [vmem:[%s20422_s1 + $0x13cc] sm:$0xf0]  ;;  %6103 = vmatpush.bf16.msra.mxu3 %v11219_v49  ;;  %v10947_v10 = vor.u32 %v13138_v59, %v10946_v52  ;;  %6047 = vmatpush.bf16.msra.mxu0 %v10819_v58 }
  0x90   :  { %v11058_v4 = vld [vmem:[%s20422_s1 + $0x12a0] sm:$0xf]  ;;  %v13166_v7 = vld [vmem:[%s20422_s1 + $0x12ac] sm:$0xf0]  ;;  %v11203_v11 = vor.u32 %v13202_v61, %v11202_v60  ;;  %5978 = vmatmul.bf16.vlgmr.msrb.gmra.mxu0 %v14632_v17  ;;  %6035 = vmatmul.bf16.vlgmr.msrb.gmra.mxu3 %v14647_v25 }
  0x91   :  { %v10802_v12 = vld [vmem:[%s20422_s1 + $0x10a0] sm:$0xf]  ;;  %v13102_v15 = vld [vmem:[%s20422_s1 + $0x10ac] sm:$0xf0]  ;;  %v11059_v26 = vor.u32 %v13166_v7, %v11058_v4 }
  0x92   :  { %v10930_v16 = vld [vmem:[%s20422_s1 + $0x11a0] sm:$0xf]  ;;  %v13134_v19 = vld [vmem:[%s20422_s1 + $0x11ac] sm:$0xf0]  ;;  %v10803_v27 = vor.u32 %v13102_v15, %v10802_v12  ;;  %6066 = vmatpush.bf16.msra.mxu1 %v10947_v10  ;;  %v12546_v12 = vld [vmem:[%s20423_s0 + $0x114] sm:$0xf] }
  0x93   :  { %v11186_v20 = vld [vmem:[%s20422_s1 + $0x13a0] sm:$0xf]  ;;  %v13198_v21 = vld [vmem:[%s20422_s1 + $0x13ac] sm:$0xf0]  ;;  %6104 = vmatpush.bf16.msra.mxu3 %v11203_v11  ;;  %v10931_v32 = vor.u32 %v13134_v19, %v10930_v16  ;;  %6086 = vmatpush.bf16.msra.mxu2 %v11059_v26  ;;  %v8612_v15 = vld [vmem:[%s20423_s0 + $0x180] sm:$0xf0] }
  0x94   :  { %v11042_v30 = vld [vmem:[%s20422_s1 + $0x1280] sm:$0xf]  ;;  %v13162_v31 = vld [vmem:[%s20422_s1 + $0x128c] sm:$0xf0]  ;;  %v11187_v33 = vor.u32 %v13198_v21, %v11186_v20  ;;  %6048 = vmatpush.bf16.msra.mxu0 %v10803_v27 }
  0x95   :  { %v10786_v34 = vld [vmem:[%s20422_s1 + $0x1080] sm:$0xf]  ;;  %v13098_v35 = vld [vmem:[%s20422_s1 + $0x108c] sm:$0xf0]  ;;  %v11043_v42 = vor.u32 %v13162_v31, %v11042_v30 }
  0x96   :  { %v10914_v36 = vld [vmem:[%s20422_s1 + $0x1180] sm:$0xf]  ;;  %v13130_v37 = vld [vmem:[%s20422_s1 + $0x118c] sm:$0xf0]  ;;  %v10787_v43 = vor.u32 %v13098_v35, %v10786_v34  ;;  %6067 = vmatpush.bf16.msra.mxu1 %v10931_v32  ;;  %v8618_v32 = vld [vmem:[%s20423_s0 + $0x118] sm:$0xf] }
  0x97   :  { %v11170_v38 = vld [vmem:[%s20422_s1 + $0x1380] sm:$0xf]  ;;  %v13194_v41 = vld [vmem:[%s20422_s1 + $0x138c] sm:$0xf0]  ;;  %6105 = vmatpush.bf16.msra.mxu3 %v11187_v33  ;;  %v10915_v52 = vor.u32 %v13130_v37, %v10914_v36  ;;  %6087 = vmatpush.bf16.msra.mxu2 %v11043_v42  ;;  %v12561_v33 = vld [vmem:[%s20423_s0 + $0x184] sm:$0xf0] }
  0x98   :  { %v11026_v47 = vld [vmem:[%s20422_s1 + $0x1260] sm:$0xf]  ;;  %v13158_v49 = vld [vmem:[%s20422_s1 + $0x126c] sm:$0xf0]  ;;  %v11171_v55 = vor.u32 %v13194_v41, %v11170_v38  ;;  %6049 = vmatpush.bf16.msra.mxu0 %v10787_v43  ;;  %v12547_v34 = vld [vmem:[%s20423_s0 + $0x11c] sm:$0xf] }
  0x99   :  { %v10770_v58 = vld [vmem:[%s20422_s1 + $0x1060] sm:$0xf]  ;;  %v13094_v59 = vld [vmem:[%s20422_s1 + $0x106c] sm:$0xf0]  ;;  %v11027_v2 = vor.u32 %v13158_v49, %v11026_v47  ;;  %v8620_v35 = vld [vmem:[%s20423_s0 + $0x188] sm:$0xf0] }
  0x9a   :  { %v10898_v60 = vld [vmem:[%s20422_s1 + $0x1160] sm:$0xf]  ;;  %v13126_v61 = vld [vmem:[%s20422_s1 + $0x116c] sm:$0xf0]  ;;  %v10771_v3 = vor.u32 %v13094_v59, %v10770_v58  ;;  %6068 = vmatpush.bf16.msra.mxu1 %v10915_v52  ;;  %v14766_v58 = vor.u32 %v12546_v12, %v8612_v15 }
  0x9b   :  { %v11154_v62 = vld [vmem:[%s20422_s1 + $0x1360] sm:$0xf]  ;;  %v13190_v63 = vld [vmem:[%s20422_s1 + $0x136c] sm:$0xf0]  ;;  %6106 = vmatpush.bf16.msra.mxu3 %v11171_v55  ;;  %v10899_v16 = vor.u32 %v13126_v61, %v10898_v60  ;;  %6088 = vmatpush.bf16.msra.mxu2 %v11027_v2 }
  0x9c   :  { %v11010_v4 = vld [vmem:[%s20422_s1 + $0x1240] sm:$0xf]  ;;  %v13154_v7 = vld [vmem:[%s20422_s1 + $0x124c] sm:$0xf0]  ;;  %v11155_v19 = vor.u32 %v13190_v63, %v11154_v62  ;;  %6050 = vmatpush.bf16.msra.mxu0 %v10771_v3  ;;  %v14777_v62 = vor.u32 %v12561_v33, %v8618_v32  ;;  %v14779_v63 = vor.u32 %v12547_v34, %v8620_v35 }
  0x9d   :  { %v8610_v10 = vld [vmem:[%s20423_s0 + $0x110] sm:$0xf]  ;;  %v12560_v11 = vld [vmem:[%s20423_s0 + $0x17c] sm:$0xf0]  ;;  %v11011_v36 = vor.u32 %v13154_v7, %v11010_v4  ;;  %6002 = vmatmul.bf16.gmra.mxu1 %v14766_v58 }
  0x9e   :  { %v10754_v20 = vld [vmem:[%s20422_s1 + $0x1040] sm:$0xf]  ;;  %v13090_v21 = vld [vmem:[%s20422_s1 + $0x104c] sm:$0xf0]  ;;  %6069 = vmatpush.bf16.msra.mxu1 %v10899_v16  ;;  %v14764_v55 = vor.u32 %v12560_v11, %v8610_v10  ;;  %20482 = vst [vmem:[#allocation2_spill] sm:$0xff] %v14779_v63  ;;  %6021 = vmatmul.bf16.gmra.mxu2 %v14777_v62 }
  0x9f   :  { %v10882_v26 = vld [vmem:[%s20422_s1 + $0x1140] sm:$0xf]  ;;  %v13122_v27 = vld [vmem:[%s20422_s1 + $0x114c] sm:$0xf0]  ;;  %v10755_v37 = vor.u32 %v13090_v21, %v10754_v20  ;;  %6107 = vmatpush.bf16.msra.mxu3 %v11155_v19  ;;  %6089 = vmatpush.bf16.msra.mxu2 %v11011_v36 }
  0xa0   :  { %v11138_v30 = vld [vmem:[%s20422_s1 + $0x1340] sm:$0xf]  ;;  %v13186_v31 = vld [vmem:[%s20422_s1 + $0x134c] sm:$0xf0]  ;;  %v10883_v42 = vor.u32 %v13122_v27, %v10882_v26  ;;  %5983 = vmatmul.bf16.gmra.mxu0 %v14764_v55  ;;  %6040 = vmatmul.bf16.gmra.mxu3 %v14779_v63 }
  0xa1   :  { %v10994_v38 = vld [vmem:[%s20422_s1 + $0x1220] sm:$0xf]  ;;  %v13150_v41 = vld [vmem:[%s20422_s1 + $0x122c] sm:$0xf0]  ;;  %v11139_v43 = vor.u32 %v13186_v31, %v11138_v30  ;;  %6051 = vmatpush.bf16.msra.mxu0 %v10755_v37 }
  0xa2   :  { %v10738_v47 = vld [vmem:[%s20422_s1 + $0x1020] sm:$0xf]  ;;  %v13086_v49 = vld [vmem:[%s20422_s1 + $0x102c] sm:$0xf0]  ;;  %v10995_v3 = vor.u32 %v13150_v41, %v10994_v38  ;;  %6070 = vmatpush.bf16.msra.mxu1 %v10883_v42 }
  0xa3   :  { %v10866_v52 = vld [vmem:[%s20422_s1 + $0x1120] sm:$0xf]  ;;  %v13118_v59 = vld [vmem:[%s20422_s1 + $0x112c] sm:$0xf0]  ;;  %v10739_v4 = vor.u32 %v13086_v49, %v10738_v47  ;;  %6108 = vmatpush.bf16.msra.mxu3 %v11139_v43 }
  0xa4   :  { %v11122_v60 = vld [vmem:[%s20422_s1 + $0x1320] sm:$0xf]  ;;  %v13182_v61 = vld [vmem:[%s20422_s1 + $0x132c] sm:$0xf0]  ;;  %v10867_v12 = vor.u32 %v13118_v59, %v10866_v52  ;;  %6090 = vmatpush.bf16.msra.mxu2 %v10995_v3 }
  0xa5   :  { %v10978_v2 = vld [vmem:[%s20422_s1 + $0x1200] sm:$0xf]  ;;  %v13146_v7 = vld [vmem:[%s20422_s1 + $0x120c] sm:$0xf0]  ;;  %v11123_v15 = vor.u32 %v13182_v61, %v11122_v60  ;;  %6052 = vmatpush.bf16.msra.mxu0 %v10739_v4 }
  0xa6   :  { %v10722_v10 = vld [vmem:[%s20422_s1 + $0x1000] sm:$0xf]  ;;  %v13082_v11 = vld [vmem:[%s20422_s1 + $0x100c] sm:$0xf0]  ;;  %v10979_v33 = vor.u32 %v13146_v7, %v10978_v2  ;;  %6071 = vmatpush.bf16.msra.mxu1 %v10867_v12 }
  0xa7   :  { %v10850_v16 = vld [vmem:[%s20422_s1 + $0x1100] sm:$0xf]  ;;  %v13114_v19 = vld [vmem:[%s20422_s1 + $0x110c] sm:$0xf0]  ;;  %v10723_v34 = vor.u32 %v13082_v11, %v10722_v10  ;;  %6109 = vmatpush.bf16.msra.mxu3 %v11123_v15 }
  0xa8   :  { %v11106_v20 = vld [vmem:[%s20422_s1 + $0x1300] sm:$0xf]  ;;  %v13178_v21 = vld [vmem:[%s20422_s1 + $0x130c] sm:$0xf0]  ;;  %v10851_v38 = vor.u32 %v13114_v19, %v10850_v16  ;;  %6091 = vmatpush.bf16.msra.mxu2 %v10979_v33  ;;  %v12520_v16 = vld [vmem:[%s20423_s0 + $0x44] sm:$0xf] }
  0xa9   :  { %v11602_v26 = vld [vmem:[%s20422_s1 + $0x16e0] sm:$0xf]  ;;  %v13302_v27 = vld [vmem:[%s20422_s1 + $0x16ec] sm:$0xf0]  ;;  %v11107_v41 = vor.u32 %v13178_v21, %v11106_v20  ;;  %6053 = vmatpush.bf16.msra.mxu0 %v10723_v34  ;;  %v8516_v19 = vld [vmem:[%s20423_s0 + $0xb0] sm:$0xf0] }
  0xaa   :  { %v11346_v30 = vld [vmem:[%s20422_s1 + $0x14e0] sm:$0xf]  ;;  %v13238_v31 = vld [vmem:[%s20422_s1 + $0x14ec] sm:$0xf0]  ;;  %v11603_v43 = vor.u32 %v13302_v27, %v11602_v26  ;;  %6072 = vmatpush.bf16.msra.mxu1 %v10851_v38  ;;  %v8522_v26 = vld [vmem:[%s20423_s0 + $0x48] sm:$0xf] }
  0xab   :  { %v11474_v32 = vld [vmem:[%s20422_s1 + $0x15e0] sm:$0xf]  ;;  %v13270_v35 = vld [vmem:[%s20422_s1 + $0x15ec] sm:$0xf0]  ;;  %v11347_v47 = vor.u32 %v13238_v31, %v11346_v30  ;;  %6110 = vmatpush.bf16.msra.mxu3 %v11107_v41  ;;  %v12535_v27 = vld [vmem:[%s20423_s0 + $0xb4] sm:$0xf0]  ;;  %v5751_v41 = vpop.f32.mrf.mxu0 }
  0xac   :  { %v11730_v36 = vld [vmem:[%s20422_s1 + $0x17e0] sm:$0xf]  ;;  %v13334_v37 = vld [vmem:[%s20422_s1 + $0x17ec] sm:$0xf0]  ;;  %v11475_v59 = vor.u32 %v13270_v35, %v11474_v32  ;;  %6160 = vmatpush.bf16.msrb.mxu2 %v11603_v43  ;;  %v12521_v30 = vld [vmem:[%s20423_s0 + $0x4c] sm:$0xf]  ;;  %v14903_v43 = vor.u32 %v12520_v16, %v8516_v19 }
  0xad   :  { %v972_v42 = vld [vmem:[%s20424_s2] sm:$0xf]  ;;  %v13298_v52 = vld [vmem:[%s20422_s1 + $0x16cc] sm:$0xf0]  ;;  %v11731_v60 = vor.u32 %v13334_v37, %v11730_v36  ;;  %6122 = vmatpush.bf16.msrb.mxu0 %v11347_v47  ;;  %v8524_v33 = vld [vmem:[%s20423_s0 + $0xb8] sm:$0xf0] }
  0xae   :  { %v11586_v49 = vld [vmem:[%s20422_s1 + $0x16c0] sm:$0xf]  ;;  %v13234_v2 = vld [vmem:[%s20422_s1 + $0x14cc] sm:$0xf0]  ;;  %v14860_v11 = vperm.slane %v972_v42, 0  ;;  %6141 = vmatpush.bf16.msrb.mxu1 %v11475_v59  ;;  %20484 = vst [vmem:[#allocation4_spill] sm:$0xff] %v14903_v43 }
  0xaf   :  { %v11330_v61 = vld [vmem:[%s20422_s1 + $0x14c0] sm:$0xf]  ;;  %v13266_v4 = vld [vmem:[%s20422_s1 + $0x15cc] sm:$0xf0]  ;;  %v11587_v20 = vor.u32 %v13298_v52, %v11586_v49  ;;  %6179 = vmatpush.bf16.msrb.mxu3 %v11731_v60  ;;  %v5770_v60 = vpop.f32.mrf.mxu1  ;;  %6073 = vmatmul.bf16.vlgmr.msra.gmra.mxu1 %v14903_v43 }
  0xb0   :  { %v11458_v3 = vld [vmem:[%s20422_s1 + $0x15c0] sm:$0xf]  ;;  %v13330_v10 = vld [vmem:[%s20422_s1 + $0x17cc] sm:$0xf0]  ;;  %v11331_v21 = vor.u32 %v13234_v2, %v11330_v61  ;;  %v5752_v59 = vadd.f32 %v5751_v41, %v14860_v11  ;;  %v14915_v61 = vor.u32 %v12535_v27, %v8522_v26  ;;  %v14917_v2 = vor.u32 %v12521_v30, %v8524_v33 }
  0xb1   :  { %v11714_v7 = vld [vmem:[%s20422_s1 + $0x17c0] sm:$0xf]  ;;  %v12534_v15 = vld [vmem:[%s20423_s0 + $0xac] sm:$0xf0]  ;;  %v11459_v31 = vor.u32 %v13266_v4, %v11458_v3  ;;  %6161 = vmatpush.bf16.msrb.mxu2 %v11587_v20 }
  0xb2   :  { %v8514_v12 = vld [vmem:[%s20423_s0 + $0x40] sm:$0xf]  ;;  %v11715_v32 = vor.u32 %v13330_v10, %v11714_v7  ;;  %v13294_v35 = vld [vmem:[%s20422_s1 + $0x16ac] sm:$0xf0]  ;;  %6123 = vmatpush.bf16.msrb.mxu0 %v11331_v21  ;;  %20485 = vst [vmem:[#allocation5_spill] sm:$0xff] %v14915_v61  ;;  %6092 = vmatmul.bf16.vlgmr.msra.gmra.mxu2 %v14915_v61 }
  0xb3   :  { %v11570_v34 = vld [vmem:[%s20422_s1 + $0x16a0] sm:$0xf]  ;;  %v13230_v37 = vld [vmem:[%s20422_s1 + $0x14ac] sm:$0xf0]  ;;  %v14901_v42 = vor.u32 %v12534_v15, %v8514_v12  ;;  %20486 = vst [vmem:[#allocation6_spill] sm:$0xff] %v14917_v2  ;;  %6142 = vmatpush.bf16.msrb.mxu1 %v11459_v31  ;;  %v5771_v12 = vadd.f32 %v5770_v60, %v5752_v59  ;;  %6111 = vmatmul.bf16.vlgmr.msra.gmra.mxu3 %v14917_v2  ;;  %v5753_v59 = vpop.f32.mrf.mxu0 }
  0xb4   :  { %v11314_v36 = vld [vmem:[%s20422_s1 + $0x14a0] sm:$0xf]  ;;  %v13262_v47 = vld [vmem:[%s20422_s1 + $0x15ac] sm:$0xf0]  ;;  %6180 = vmatpush.bf16.msrb.mxu3 %v11715_v32  ;;  %v11571_v3 = vor.u32 %v13294_v35, %v11570_v34  ;;  %v5789_v35 = vpop.f32.mrf.mxu2 }
  0xb5   :  { %v11442_v38 = vld [vmem:[%s20422_s1 + $0x15a0] sm:$0xf]  ;;  %20483 = vst [vmem:[#allocation3_spill] sm:$0xff] %v14901_v42  ;;  %v13326_v52 = vld [vmem:[%s20422_s1 + $0x17ac] sm:$0xf0]  ;;  %v11315_v4 = vor.u32 %v13230_v37, %v11314_v36  ;;  %6054 = vmatmul.bf16.vlgmr.msra.gmra.mxu0 %v14901_v42 }
  0xb6   :  { %v11698_v49 = vld [vmem:[%s20422_s1 + $0x17a0] sm:$0xf]  ;;  %v13290_v10 = vld [vmem:[%s20422_s1 + $0x168c] sm:$0xf0]  ;;  %v11443_v15 = vor.u32 %v13262_v47, %v11442_v38  ;;  %6162 = vmatpush.bf16.msrb.mxu2 %v11571_v3 }
  0xb7   :  { %v11554_v7 = vld [vmem:[%s20422_s1 + $0x1680] sm:$0xf]  ;;  %v11699_v16 = vor.u32 %v13326_v52, %v11698_v49  ;;  %v13226_v20 = vld [vmem:[%s20422_s1 + $0x148c] sm:$0xf0]  ;;  %6124 = vmatpush.bf16.msrb.mxu0 %v11315_v4  ;;  %v5790_v49 = vadd.f32 %v5789_v35, %v5771_v12  ;;  %v5808_v52 = vpop.f32.mrf.mxu3 }
  0xb8   :  { %v11298_v19 = vld [vmem:[%s20422_s1 + $0x1480] sm:$0xf]  ;;  %v13258_v26 = vld [vmem:[%s20422_s1 + $0x158c] sm:$0xf0]  ;;  %v11555_v31 = vor.u32 %v13290_v10, %v11554_v7  ;;  %6143 = vmatpush.bf16.msrb.mxu1 %v11443_v15  ;;  %v5754_v7 = vadd.f32 %v5753_v59, %v14860_v11  ;;  %v5772_v10 = vpop.f32.mrf.mxu1  ;;  %v8636_v59 = vld [vmem:[%s20423_s0 + $0x198] sm:$0xf0] }
  0xb9   :  { %v11426_v21 = vld [vmem:[%s20422_s1 + $0x1580] sm:$0xf]  ;;  %v13322_v30 = vld [vmem:[%s20422_s1 + $0x178c] sm:$0xf0]  ;;  %v11299_v32 = vor.u32 %v13226_v20, %v11298_v19  ;;  %6181 = vmatpush.bf16.msrb.mxu3 %v11699_v16  ;;  %v14972_v15 = vadd.f32 %v5808_v52, %v5790_v49  ;;  %v12563_v49 = vld [vmem:[%s20423_s0 + $0x194] sm:$0xf0] }
  0xba   :  { %v11682_v27 = vld [vmem:[%s20422_s1 + $0x1780] sm:$0xf]  ;;  %v13286_v34 = vld [vmem:[%s20422_s1 + $0x166c] sm:$0xf0]  ;;  %v11427_v36 = vor.u32 %v13258_v26, %v11426_v21  ;;  %6163 = vmatpush.bf16.msrb.mxu2 %v11555_v31  ;;  %v5773_v21 = vadd.f32 %v5772_v10, %v5754_v7  ;;  %v8628_v31 = vld [vmem:[%s20423_s0 + $0x190] sm:$0xf0] }
  0xbb   :  { %v11538_v33 = vld [vmem:[%s20422_s1 + $0x1660] sm:$0xf]  ;;  %v11683_v37 = vor.u32 %v13322_v30, %v11682_v27  ;;  %v13222_v41 = vld [vmem:[%s20422_s1 + $0x146c] sm:$0xf0]  ;;  %6125 = vmatpush.bf16.msrb.mxu0 %v11299_v32  ;;  %v12548_v30 = vld [vmem:[%s20423_s0 + $0x124] sm:$0xf] }
  0xbc   :  { %v11282_v38 = vld [vmem:[%s20422_s1 + $0x1460] sm:$0xf]  ;;  %v13254_v60 = vld [vmem:[%s20422_s1 + $0x156c] sm:$0xf0]  ;;  %v11539_v12 = vor.u32 %v13286_v34, %v11538_v33  ;;  %6144 = vmatpush.bf16.msrb.mxu1 %v11427_v36  ;;  %v12549_v52 = vld [vmem:[%s20423_s0 + $0x12c] sm:$0xf]  ;;  %v5791_v10 = vpop.f32.mrf.mxu2 }
  0xbd   :  { %v11410_v47 = vld [vmem:[%s20422_s1 + $0x1560] sm:$0xf]  ;;  %v13318_v4 = vld [vmem:[%s20422_s1 + $0x176c] sm:$0xf0]  ;;  %v11283_v16 = vor.u32 %v13222_v41, %v11282_v38  ;;  %6182 = vmatpush.bf16.msrb.mxu3 %v11683_v37 }
  0xbe   :  { %v11666_v3 = vld [vmem:[%s20422_s1 + $0x1760] sm:$0xf]  ;;  %v13282_v20 = vld [vmem:[%s20422_s1 + $0x164c] sm:$0xf0]  ;;  %v11411_v32 = vor.u32 %v13254_v60, %v11410_v47  ;;  %v8634_v47 = vld [vmem:[%s20423_s0 + $0x128] sm:$0xf]  ;;  %6164 = vmatpush.bf16.msrb.mxu2 %v11539_v12 }
  0xbf   :  { %v11522_v19 = vld [vmem:[%s20422_s1 + $0x1640] sm:$0xf]  ;;  %v12562_v27 = vld [vmem:[%s20423_s0 + $0x18c] sm:$0xf0]  ;;  %v11667_v33 = vor.u32 %v13318_v4, %v11666_v3  ;;  %6126 = vmatpush.bf16.msrb.mxu0 %v11283_v16 }
  0xc0   :  { %v8626_v26 = vld [vmem:[%s20423_s0 + $0x120] sm:$0xf]  ;;  %v13218_v35 = vld [vmem:[%s20422_s1 + $0x144c] sm:$0xf0]  ;;  %v11523_v60 = vor.u32 %v13282_v20, %v11522_v19  ;;  %6145 = vmatpush.bf16.msrb.mxu1 %v11411_v32  ;;  %v5792_v20 = vadd.f32 %v5791_v10, %v5773_v21  ;;  %v15039_v32 = vor.u32 %v12548_v30, %v8628_v31 }
  0xc1   :  { %v11266_v34 = vld [vmem:[%s20422_s1 + $0x1440] sm:$0xf]  ;;  %v13250_v37 = vld [vmem:[%s20422_s1 + $0x154c] sm:$0xf0]  ;;  %6183 = vmatpush.bf16.msrb.mxu3 %v11667_v33  ;;  %v15037_v43 = vor.u32 %v12562_v27, %v8626_v26  ;;  %v15053_v26 = vor.u32 %v12549_v52, %v8636_v59 }
  0xc2   :  { %v11394_v36 = vld [vmem:[%s20422_s1 + $0x1540] sm:$0xf]  ;;  %v13314_v41 = vld [vmem:[%s20422_s1 + $0x174c] sm:$0xf0]  ;;  %v11267_v3 = vor.u32 %v13218_v35, %v11266_v34  ;;  %v5810_v34 = vpop.f32.mrf.mxu3  ;;  %v5756_v35 = vpop.f32.mrf.mxu0  ;;  %20488 = vst [vmem:[#allocation8_spill] sm:$0xff] %v15039_v32  ;;  %6165 = vmatpush.bf16.msrb.mxu2 %v11523_v60  ;;  %6078 = vmatmul.bf16.gmra.mxu1 %v15039_v32 }
  0xc3   :  { %v11650_v38 = vld [vmem:[%s20422_s1 + $0x1740] sm:$0xf]  ;;  %v13278_v7 = vld [vmem:[%s20422_s1 + $0x162c] sm:$0xf0]  ;;  %v11395_v2 = vor.u32 %v13250_v37, %v11394_v36  ;;  %20487 = vst [vmem:[#allocation7_spill] sm:$0xff] %v15037_v43  ;;  %v5757_v21 = vadd.f32 %v5756_v35, %v14860_v11  ;;  %v15058_v30 = vadd.f32 %v5810_v34, %v5792_v20  ;;  %6116 = vmatmul.bf16.gmra.mxu3 %v15053_v26 }
  0xc4   :  { %v11506_v4 = vld [vmem:[%s20422_s1 + $0x1620] sm:$0xf]  ;;  %v11651_v61 = vor.u32 %v13314_v41, %v11650_v38  ;;  %v13214_v16 = vld [vmem:[%s20422_s1 + $0x142c] sm:$0xf0]  ;;  %v5775_v38 = vpop.f32.mrf.mxu1  ;;  %v15051_v41 = vor.u32 %v12563_v49, %v8634_v47  ;;  %20490 = vst [vmem:[#allocation10_spill] sm:$0xff] %v15053_v26  ;;  %6127 = vmatpush.bf16.msrb.mxu0 %v11267_v3 }
  0xc5   :  { %v11250_v12 = vld [vmem:[%s20422_s1 + $0x1420] sm:$0xf]  ;;  %v13246_v33 = vld [vmem:[%s20422_s1 + $0x152c] sm:$0xf0]  ;;  %v11507_v31 = vor.u32 %v13278_v7, %v11506_v4  ;;  %v5776_v52 = vadd.f32 %v5775_v38, %v5757_v21  ;;  %6146 = vmatpush.bf16.msrb.mxu1 %v11395_v2  ;;  %6059 = vmatmul.bf16.gmra.mxu0 %v15037_v43  ;;  %v5794_v21 = vpop.f32.mrf.mxu2 }
  0xc6   :  { %v11378_v19 = vld [vmem:[%s20422_s1 + $0x1520] sm:$0xf]  ;;  %v13310_v37 = vld [vmem:[%s20422_s1 + $0x172c] sm:$0xf0]  ;;  %20489 = vst [vmem:[#allocation9_spill] sm:$0xff] %v15051_v41  ;;  %v11251_v10 = vor.u32 %v13214_v16, %v11250_v12  ;;  %6184 = vmatpush.bf16.msrb.mxu3 %v11651_v61  ;;  %6097 = vmatmul.bf16.gmra.mxu2 %v15051_v41 }
  0xc7   :  { %v11634_v36 = vld [vmem:[%s20422_s1 + $0x1720] sm:$0xf]  ;;  %v13274_v42 = vld [vmem:[%s20422_s1 + $0x160c] sm:$0xf0]  ;;  %v11379_v59 = vor.u32 %v13246_v33, %v11378_v19  ;;  %6166 = vmatpush.bf16.msrb.mxu2 %v11507_v31 }
  0xc8   :  { %v11490_v27 = vld [vmem:[%s20422_s1 + $0x1600] sm:$0xf]  ;;  %v13210_v49 = vld [vmem:[%s20422_s1 + $0x140c] sm:$0xf0]  ;;  %v11635_v60 = vor.u32 %v13310_v37, %v11634_v36  ;;  %6128 = vmatpush.bf16.msrb.mxu0 %v11251_v10  ;;  %v5795_v10 = vadd.f32 %v5794_v21, %v5776_v52 }
  0xc9   :  { %v11234_v47 = vld [vmem:[%s20422_s1 + $0x1400] sm:$0xf]  ;;  %v13242_v4 = vld [vmem:[%s20422_s1 + $0x150c] sm:$0xf0]  ;;  %v11491_v34 = vor.u32 %v13274_v42, %v11490_v27  ;;  %6147 = vmatpush.bf16.msrb.mxu1 %v11379_v59 }
  0xca   :  { %v11362_v3 = vld [vmem:[%s20422_s1 + $0x1500] sm:$0xf]  ;;  %v13306_v61 = vld [vmem:[%s20422_s1 + $0x170c] sm:$0xf0]  ;;  %v11235_v35 = vor.u32 %v13210_v49, %v11234_v47  ;;  %6185 = vmatpush.bf16.msrb.mxu3 %v11635_v60  ;;  %v5813_v42 = vpop.f32.mrf.mxu3  ;;  %v5758_v27 = vpop.f32.mrf.mxu0 }
  0xcb   :  { %v11618_v7 = vld [vmem:[%s20422_s1 + $0x1700] sm:$0xf]  ;;  %v13430_v12 = vld [vmem:[%s20422_s1 + $0x1aec] sm:$0xf0]  ;;  %v11363_v38 = vor.u32 %v13242_v4, %v11362_v3  ;;  %v5759_v32 = vadd.f32 %v5758_v27, %v14860_v11  ;;  %6167 = vmatpush.bf16.msrb.mxu2 %v11491_v34  ;;  %v8532_v34 = vld [vmem:[%s20423_s0 + $0xc0] sm:$0xf0] }
  0xcc   :  { %v12114_v2 = vld [vmem:[%s20422_s1 + $0x1ae0] sm:$0xf]  ;;  %v13366_v19 = vld [vmem:[%s20422_s1 + $0x18ec] sm:$0xf0]  ;;  %v11619_v31 = vor.u32 %v13306_v61, %v11618_v7  ;;  %v5777_v43 = vpop.f32.mrf.mxu1  ;;  %v15125_v7 = vadd.f32 %v5813_v42, %v5795_v10  ;;  %6129 = vmatpush.bf16.msrb.mxu0 %v11235_v35  ;;  %v8538_v35 = vld [vmem:[%s20423_s0 + $0x58] sm:$0xf] }
  0xcd   :  { %v11858_v16 = vld [vmem:[%s20422_s1 + $0x18e0] sm:$0xf]  ;;  %v13398_v33 = vld [vmem:[%s20422_s1 + $0x19ec] sm:$0xf0]  ;;  %v12115_v47 = vor.u32 %v13430_v12, %v12114_v2  ;;  %v5778_v12 = vadd.f32 %v5777_v43, %v5759_v32  ;;  %6148 = vmatpush.bf16.msrb.mxu1 %v11363_v38 }
  0xce   :  { %v11986_v20 = vld [vmem:[%s20422_s1 + $0x19e0] sm:$0xf]  ;;  %v13462_v37 = vld [vmem:[%s20422_s1 + $0x1bec] sm:$0xf0]  ;;  %v11859_v49 = vor.u32 %v13366_v19, %v11858_v16  ;;  %6186 = vmatpush.bf16.msrb.mxu3 %v11619_v31  ;;  %v5796_v31 = vpop.f32.mrf.mxu2 }
  0xcf   :  { %v12242_v36 = vld [vmem:[%s20422_s1 + $0x1be0] sm:$0xf]  ;;  %v13426_v41 = vld [vmem:[%s20422_s1 + $0x1acc] sm:$0xf0]  ;;  %v11987_v59 = vor.u32 %v13398_v33, %v11986_v20  ;;  %v12522_v20 = vld [vmem:[%s20423_s0 + $0x54] sm:$0xf]  ;;  %6236 = vmatpush.bf16.msra.mxu2 %v12115_v47  ;;  %v5797_v47 = vadd.f32 %v5796_v31, %v5778_v12 }
  0xd0   :  { %v12098_v26 = vld [vmem:[%s20422_s1 + $0x1ac0] sm:$0xf]  ;;  %v12243_v60 = vor.u32 %v13462_v37, %v12242_v36  ;;  %v13362_v3 = vld [vmem:[%s20422_s1 + $0x18cc] sm:$0xf0]  ;;  %6198 = vmatpush.bf16.msra.mxu0 %v11859_v49  ;;  %v12537_v33 = vld [vmem:[%s20423_s0 + $0xc4] sm:$0xf0] }
  0xd1   :  { %v11842_v52 = vld [vmem:[%s20422_s1 + $0x18c0] sm:$0xf]  ;;  %v13394_v11 = vld [vmem:[%s20422_s1 + $0x19cc] sm:$0xf0]  ;;  %v12099_v43 = vor.u32 %v13426_v41, %v12098_v26  ;;  %v12523_v36 = vld [vmem:[%s20423_s0 + $0x5c] sm:$0xf]  ;;  %6217 = vmatpush.bf16.msra.mxu1 %v11987_v59 }
  0xd2   :  { %v11970_v4 = vld [vmem:[%s20422_s1 + $0x19c0] sm:$0xf]  ;;  %v13458_v2 = vld [vmem:[%s20422_s1 + $0x1bcc] sm:$0xf0]  ;;  %v11843_v32 = vor.u32 %v13362_v3, %v11842_v52  ;;  %6255 = vmatpush.bf16.msra.mxu3 %v12243_v60  ;;  %v8540_v41 = vld [vmem:[%s20423_s0 + $0xc8] sm:$0xf0]  ;;  %v5815_v49 = vpop.f32.mrf.mxu3  ;;  %v15177_v60 = vor.u32 %v12522_v20, %v8532_v34 }
  0xd3   :  { %v12226_v61 = vld [vmem:[%s20422_s1 + $0x1bc0] sm:$0xf]  ;;  %v8530_v16 = vld [vmem:[%s20423_s0 + $0x50] sm:$0xf]  ;;  %v11971_v37 = vor.u32 %v13394_v11, %v11970_v4  ;;  %6237 = vmatpush.bf16.msra.mxu2 %v12099_v43  ;;  %v5827_v11 = vpop.f32.mrf.mxu0  ;;  %v15190_v12 = vor.u32 %v12523_v36, %v8540_v41 }
  0xd4   :  { %v12536_v19 = vld [vmem:[%s20423_s0 + $0xbc] sm:$0xf0]  ;;  %v12227_v21 = vor.u32 %v13458_v2, %v12226_v61  ;;  %v13422_v38 = vld [vmem:[%s20422_s1 + $0x1aac] sm:$0xf0]  ;;  %20492 = vst [vmem:[#allocation12_spill] sm:$0xff] %v15177_v60  ;;  %6199 = vmatpush.bf16.msra.mxu0 %v11843_v32  ;;  %v5846_v61 = vpop.f32.mrf.mxu1  ;;  %v15188_v2 = vor.u32 %v12537_v33, %v8538_v35  ;;  %6149 = vmatmul.bf16.vlgmr.msrb.gmra.mxu1 %v15177_v60 }
  0xd5   :  { %v12082_v26 = vld [vmem:[%s20422_s1 + $0x1aa0] sm:$0xf]  ;;  %v13358_v42 = vld [vmem:[%s20422_s1 + $0x18ac] sm:$0xf0]  ;;  %v15175_v59 = vor.u32 %v12536_v19, %v8530_v16  ;;  %20494 = vst [vmem:[#allocation14_spill] sm:$0xff] %v15190_v12  ;;  %6218 = vmatpush.bf16.msra.mxu1 %v11971_v37  ;;  %v15192_v16 = vadd.f32 %v5815_v49, %v5797_v47  ;;  %v5828_v19 = vadd.f32 %v5827_v11, %v14972_v15 }
  0xd6   :  { %v11826_v10 = vld [vmem:[%s20422_s1 + $0x18a0] sm:$0xf]  ;;  %v13390_v52 = vld [vmem:[%s20422_s1 + $0x19ac] sm:$0xf0]  ;;  %20493 = vst [vmem:[#allocation13_spill] sm:$0xff] %v15188_v2  ;;  %6256 = vmatpush.bf16.msra.mxu3 %v12227_v21  ;;  %v12083_v20 = vor.u32 %v13422_v38, %v12082_v26  ;;  %6168 = vmatmul.bf16.vlgmr.msrb.gmra.mxu2 %v15188_v2  ;;  %v5865_v11 = vpop.f32.mrf.mxu2 }
  0xd7   :  { %v11954_v27 = vld [vmem:[%s20422_s1 + $0x19a0] sm:$0xf]  ;;  %20491 = vst [vmem:[#allocation11_spill] sm:$0xff] %v15175_v59  ;;  %v13454_v4 = vld [vmem:[%s20422_s1 + $0x1bac] sm:$0xf0]  ;;  %v11827_v34 = vor.u32 %v13358_v42, %v11826_v10  ;;  %v5847_v21 = vadd.f32 %v5846_v61, %v5828_v19  ;;  %6130 = vmatmul.bf16.vlgmr.msrb.gmra.mxu0 %v15175_v59  ;;  %6187 = vmatmul.bf16.vlgmr.msrb.gmra.mxu3 %v15190_v12 }
  0xd8   :  { %v12210_v3 = vld [vmem:[%s20422_s1 + $0x1ba0] sm:$0xf]  ;;  %v13418_v32 = vld [vmem:[%s20422_s1 + $0x1a8c] sm:$0xf0]  ;;  %v11955_v35 = vor.u32 %v13390_v52, %v11954_v27  ;;  %6238 = vmatpush.bf16.msra.mxu2 %v12083_v20 }
  0xd9   :  { %v12066_v43 = vld [vmem:[%s20422_s1 + $0x1a80] sm:$0xf]  ;;  %v12211_v33 = vor.u32 %v13454_v4, %v12210_v3  ;;  %v13354_v15 = vld [vmem:[%s20422_s1 + $0x188c] sm:$0xf0]  ;;  %6200 = vmatpush.bf16.msra.mxu0 %v11827_v34 }
  0xda   :  { %v11810_v36 = vld [vmem:[%s20422_s1 + $0x1880] sm:$0xf]  ;;  %v13386_v41 = vld [vmem:[%s20422_s1 + $0x198c] sm:$0xf0]  ;;  %v12067_v31 = vor.u32 %v13418_v32, %v12066_v43  ;;  %6219 = vmatpush.bf16.msra.mxu1 %v11955_v35  ;;  %v5884_v61 = vpop.f32.mrf.mxu3  ;;  %v5866_v43 = vadd.f32 %v5865_v11, %v5847_v21 }
  0xdb   :  { %v11938_v37 = vld [vmem:[%s20422_s1 + $0x1980] sm:$0xf]  ;;  %v13450_v38 = vld [vmem:[%s20422_s1 + $0x1b8c] sm:$0xf0]  ;;  %v11811_v10 = vor.u32 %v13354_v15, %v11810_v36  ;;  %6257 = vmatpush.bf16.msra.mxu3 %v12211_v33  ;;  %v5829_v32 = vpop.f32.mrf.mxu0 }
  0xdc   :  { %v12194_v26 = vld [vmem:[%s20422_s1 + $0x1b80] sm:$0xf]  ;;  %v13414_v27 = vld [vmem:[%s20422_s1 + $0x1a6c] sm:$0xf0]  ;;  %v11939_v47 = vor.u32 %v13386_v41, %v11938_v37  ;;  %v5848_v35 = vpop.f32.mrf.mxu1  ;;  %v5830_v33 = vadd.f32 %v5829_v32, %v15058_v30  ;;  %6239 = vmatpush.bf16.msra.mxu2 %v12067_v31  ;;  %v8644_v31 = vld [vmem:[%s20423_s0 + $0x1a0] sm:$0xf0] }
  0xdd   :  { %v12050_v42 = vld [vmem:[%s20422_s1 + $0x1a60] sm:$0xf]  ;;  %v12195_v49 = vor.u32 %v13450_v38, %v12194_v26  ;;  %v13350_v3 = vld [vmem:[%s20422_s1 + $0x186c] sm:$0xf0]  ;;  %6201 = vmatpush.bf16.msra.mxu0 %v11811_v10  ;;  %v15254_v26 = vadd.f32 %v5884_v61, %v5866_v43  ;;  %v12550_v38 = vld [vmem:[%s20423_s0 + $0x134] sm:$0xf] }
  0xde   :  { %v11794_v52 = vld [vmem:[%s20422_s1 + $0x1860] sm:$0xf]  ;;  %v13382_v19 = vld [vmem:[%s20422_s1 + $0x196c] sm:$0xf0]  ;;  %v12051_v36 = vor.u32 %v13414_v27, %v12050_v42  ;;  %6220 = vmatpush.bf16.msra.mxu1 %v11939_v47  ;;  %v8650_v61 = vld [vmem:[%s20423_s0 + $0x138] sm:$0xf] }
  0xdf   :  { %v11922_v4 = vld [vmem:[%s20422_s1 + $0x1960] sm:$0xf]  ;;  %v13446_v34 = vld [vmem:[%s20422_s1 + $0x1b6c] sm:$0xf0]  ;;  %v11795_v15 = vor.u32 %v13350_v3, %v11794_v52  ;;  %6258 = vmatpush.bf16.msra.mxu3 %v12195_v49  ;;  %v5849_v52 = vadd.f32 %v5848_v35, %v5830_v33 }
  0xe0   :  { %v12178_v20 = vld [vmem:[%s20422_s1 + $0x1b60] sm:$0xf]  ;;  %v13410_v41 = vld [vmem:[%s20422_s1 + $0x1a4c] sm:$0xf0]  ;;  %v11923_v10 = vor.u32 %v13382_v19, %v11922_v4  ;;  %v12565_v19 = vld [vmem:[%s20423_s0 + $0x1a4] sm:$0xf0]  ;;  %6240 = vmatpush.bf16.msra.mxu2 %v12051_v36 }
  0xe1   :  { %v12034_v37 = vld [vmem:[%s20422_s1 + $0x1a40] sm:$0xf]  ;;  %v8642_v30 = vld [vmem:[%s20423_s0 + $0x130] sm:$0xf]  ;;  %v12179_v42 = vor.u32 %v13446_v34, %v12178_v20  ;;  %v12551_v20 = vld [vmem:[%s20423_s0 + $0x13c] sm:$0xf]  ;;  %6202 = vmatpush.bf16.msra.mxu0 %v11795_v15  ;;  %v15326_v59 = vor.u32 %v12565_v19, %v8650_v61 }
  0xe2   :  { %v12564_v21 = vld [vmem:[%s20423_s0 + $0x19c] sm:$0xf0]  ;;  %v13346_v47 = vld [vmem:[%s20422_s1 + $0x184c] sm:$0xf0]  ;;  %v8652_v34 = vld [vmem:[%s20423_s0 + $0x1a8] sm:$0xf0]  ;;  %v12035_v43 = vor.u32 %v13410_v41, %v12034_v37  ;;  %6221 = vmatpush.bf16.msra.mxu1 %v11923_v10  ;;  %v5867_v37 = vpop.f32.mrf.mxu2  ;;  %v5886_v41 = vpop.f32.mrf.mxu3  ;;  %v15315_v10 = vor.u32 %v12550_v38, %v8644_v31 }
  0xe3   :  { %v11778_v27 = vld [vmem:[%s20422_s1 + $0x1840] sm:$0xf]  ;;  %v13378_v3 = vld [vmem:[%s20422_s1 + $0x194c] sm:$0xf0]  ;;  %6259 = vmatpush.bf16.msra.mxu3 %v12179_v42  ;;  %20497 = vst [vmem:[#allocation17_spill] sm:$0xff] %v15326_v59 }
  0xe4   :  { %v11906_v49 = vld [vmem:[%s20422_s1 + $0x1940] sm:$0xf]  ;;  %v13442_v11 = vld [vmem:[%s20422_s1 + $0x1b4c] sm:$0xf0]  ;;  %v11779_v32 = vor.u32 %v13346_v47, %v11778_v27  ;;  %v15313_v27 = vor.u32 %v12564_v21, %v8642_v30  ;;  %20496 = vst [vmem:[#allocation16_spill] sm:$0xff] %v15315_v10  ;;  %v15328_v30 = vor.u32 %v12551_v20, %v8652_v34  ;;  %6241 = vmatpush.bf16.msra.mxu2 %v12035_v43 }
  0xe5   :  { %v12162_v4 = vld [vmem:[%s20422_s1 + $0x1b40] sm:$0xf]  ;;  %v13406_v33 = vld [vmem:[%s20422_s1 + $0x1a2c] sm:$0xf0]  ;;  %v11907_v12 = vor.u32 %v13378_v3, %v11906_v49  ;;  %v5868_v3 = vadd.f32 %v5867_v37, %v5849_v52  ;;  %6154 = vmatmul.bf16.gmra.mxu1 %v15315_v10  ;;  %v12628_v37 = vld [vmem:[%s20422_s1 + $0x1e4] sm:$0xf] }
  0xe6   :  { %v12018_v35 = vld [vmem:[%s20422_s1 + $0x1a20] sm:$0xf]  ;;  %v12163_v2 = vor.u32 %v13442_v11, %v12162_v4  ;;  %v13342_v36 = vld [vmem:[%s20422_s1 + $0x182c] sm:$0xf0]  ;;  %20495 = vst [vmem:[#allocation15_spill] sm:$0xff] %v15313_v27  ;;  %v5832_v4 = vpop.f32.mrf.mxu0  ;;  %v5851_v11 = vpop.f32.mrf.mxu1  ;;  %6203 = vmatpush.bf16.msra.mxu0 %v11779_v32  ;;  %6173 = vmatmul.bf16.gmra.mxu2 %v15326_v59 }
  0xe7   :  { %v11762_v60 = vld [vmem:[%s20422_s1 + $0x1820] sm:$0xf]  ;;  %v13374_v42 = vld [vmem:[%s20422_s1 + $0x192c] sm:$0xf0]  ;;  %20498 = vst [vmem:[#allocation18_spill] sm:$0xff] %v15328_v30  ;;  %v5833_v38 = vadd.f32 %v5832_v4, %v15125_v7  ;;  %v12019_v31 = vor.u32 %v13406_v33, %v12018_v35  ;;  %v15343_v20 = vadd.f32 %v5886_v41, %v5868_v3  ;;  %6222 = vmatpush.bf16.msra.mxu1 %v11907_v12 }
  0xe8   :  { %v11890_v15 = vld [vmem:[%s20422_s1 + $0x1920] sm:$0xf]  ;;  %v13438_v49 = vld [vmem:[%s20422_s1 + $0x1b2c] sm:$0xf0]  ;;  %v11763_v63 = vor.u32 %v13342_v36, %v11762_v60  ;;  %6260 = vmatpush.bf16.msra.mxu3 %v12163_v2  ;;  %6135 = vmatmul.bf16.gmra.mxu0 %v15313_v27  ;;  %v12660_v12 = vld [vmem:[%s20422_s1 + $0x2e4] sm:$0xf] }
  0xe9   :  { %v12146_v47 = vld [vmem:[%s20422_s1 + $0x1b20] sm:$0xf]  ;;  %v13402_v52 = vld [vmem:[%s20422_s1 + $0x1a0c] sm:$0xf0]  ;;  %v11891_v7 = vor.u32 %v13374_v42, %v11890_v15  ;;  %v5852_v35 = vadd.f32 %v5851_v11, %v5833_v38  ;;  %v9044_v33 = vld [vmem:[%s20422_s1 + $0x2f0] sm:$0xf0]  ;;  %6192 = vmatmul.bf16.gmra.mxu3 %v15328_v30  ;;  %6242 = vmatpush.bf16.msra.mxu2 %v12019_v31 }
  0xea   :  { %v12002_v21 = vld [vmem:[%s20422_s1 + $0x1a00] sm:$0xf]  ;;  %v13338_v19 = vld [vmem:[%s20422_s1 + $0x180c] sm:$0xf0]  ;;  %v12147_v34 = vor.u32 %v13438_v49, %v12146_v47  ;;  %v12596_v36 = vld [vmem:[%s20422_s1 + $0xe4] sm:$0xf]  ;;  %6204 = vmatpush.bf16.msra.mxu0 %v11763_v63  ;;  %v5870_v38 = vpop.f32.mrf.mxu2  ;;  %v5889_v63 = vpop.f32.mrf.mxu3 }
  0xeb   :  { %v11746_v61 = vld [vmem:[%s20422_s1 + $0x1800] sm:$0xf]  ;;  %v13370_v43 = vld [vmem:[%s20422_s1 + $0x190c] sm:$0xf0]  ;;  %v8788_v15 = vld [vmem:[%s20422_s1 + $0xf0] sm:$0xf0]  ;;  %v12003_v41 = vor.u32 %v13402_v52, %v12002_v21  ;;  %6223 = vmatpush.bf16.msra.mxu1 %v11891_v7  ;;  %v9047_v21 = vor.u32 %v12660_v12, %v9044_v33 }
  0xec   :  { %v11874_v60 = vld [vmem:[%s20422_s1 + $0x1900] sm:$0xf]  ;;  %v13434_v2 = vld [vmem:[%s20422_s1 + $0x1b0c] sm:$0xf0]  ;;  %v11747_v42 = vor.u32 %v13338_v19, %v11746_v61  ;;  %v8916_v47 = vld [vmem:[%s20422_s1 + $0x1f0] sm:$0xf0]  ;;  %6261 = vmatpush.bf16.msra.mxu3 %v12147_v34  ;;  %v8791_v31 = vor.u32 %v12596_v36, %v8788_v15  ;;  %v5871_v19 = vadd.f32 %v5870_v38, %v5852_v35 }
  0xed   :  { %v12130_v32 = vld [vmem:[%s20422_s1 + $0x1b00] sm:$0xf]  ;;  %v12692_v49 = vld [vmem:[%s20422_s1 + $0x3e4] sm:$0xf]  ;;  %v9172_v3 = vld [vmem:[%s20422_s1 + $0x3f0] sm:$0xf0]  ;;  %v11875_v4 = vor.u32 %v13370_v43, %v11874_v60  ;;  %v8919_v10 = vor.u32 %v12628_v37, %v8916_v47  ;;  %6243 = vmatpush.bf16.msra.mxu2 %v12003_v41 }
  0xee   :  { %v12131_v11 = vor.u32 %v13434_v2, %v12130_v32  ;;  %v12656_v52 = vld [vmem:[%s20422_s1 + $0x2c4] sm:$0xf]  ;;  %v9028_v61 = vld [vmem:[%s20422_s1 + $0x2d0] sm:$0xf0]  ;;  %v5834_v30 = vpop.f32.mrf.mxu0  ;;  %v5853_v59 = vpop.f32.mrf.mxu1  ;;  %v9175_v7 = vor.u32 %v12692_v49, %v9172_v3  ;;  %6205 = vmatpush.bf16.msra.mxu0 %v11747_v42  ;;  %v15410_v33 = vadd.f32 %v5889_v63, %v5871_v19  ;;  %v12538_v36 = vld [vmem:[%s20423_s0 + $0xcc] sm:$0xf0] }
  0xef   :  { %v12592_v34 = vld [vmem:[%s20422_s1 + $0xc4] sm:$0xf]  ;;  %v8772_v60 = vld [vmem:[%s20422_s1 + $0xd0] sm:$0xf0]  ;;  %v5835_v32 = vadd.f32 %v5834_v30, %v15192_v16  ;;  %6224 = vmatpush.bf16.msra.mxu1 %v11875_v4  ;;  %v8546_v16 = vld [vmem:[%s20423_s0 + $0x60] sm:$0xf]  ;;  %v9031_v41 = vor.u32 %v12656_v52, %v9028_v61 }
  0xf0   :  { %v12624_v43 = vld [vmem:[%s20422_s1 + $0x1c4] sm:$0xf]  ;;  %v8900_v35 = vld [vmem:[%s20422_s1 + $0x1d0] sm:$0xf0]  ;;  %6262 = vmatpush.bf16.msra.mxu3 %v12131_v11  ;;  %v8775_v42 = vor.u32 %v12592_v34, %v8772_v60  ;;  %v12539_v47 = vld [vmem:[%s20423_s0 + $0xd4] sm:$0xf0]  ;;  %v15451_v19 = vor.u32 %v12538_v36, %v8546_v16 }
  0xf1   :  { %v12688_v2 = vld [vmem:[%s20422_s1 + $0x3c4] sm:$0xf]  ;;  %v9156_v12 = vld [vmem:[%s20422_s1 + $0x3d0] sm:$0xf0]  ;;  %v5854_v30 = vadd.f32 %v5853_v59, %v5835_v32  ;;  %6312 = vmatpush.bf16.msrb.mxu2 %v9047_v21  ;;  %v8554_v59 = vld [vmem:[%s20423_s0 + $0x68] sm:$0xf]  ;;  %v8903_v3 = vor.u32 %v12624_v43, %v8900_v35 }
  0xf2   :  { %v12524_v15 = vld [vmem:[%s20423_s0 + $0x64] sm:$0xf]  ;;  %v8548_v37 = vld [vmem:[%s20423_s0 + $0xd0] sm:$0xf0]  ;;  %6274 = vmatpush.bf16.msrb.mxu0 %v8791_v31  ;;  %v12525_v49 = vld [vmem:[%s20423_s0 + $0x6c] sm:$0xf]  ;;  %v9159_v4 = vor.u32 %v12688_v2, %v9156_v12  ;;  %v5872_v52 = vpop.f32.mrf.mxu2  ;;  %v5891_v61 = vpop.f32.mrf.mxu3  ;;  %v15464_v12 = vor.u32 %v12539_v47, %v8554_v59 }
  0xf3   :  { %6293 = vmatpush.bf16.msrb.mxu1 %v8919_v10  ;;  %v8556_v11 = vld [vmem:[%s20423_s0 + $0xd8] sm:$0xf0]  ;;  %v12652_v38 = vld [vmem:[%s20422_s1 + $0x2a4] sm:$0xf]  ;;  %v9012_v63 = vld [vmem:[%s20422_s1 + $0x2b0] sm:$0xf0]  ;;  %v5873_v32 = vadd.f32 %v5872_v52, %v5854_v30 }
  0xf4   :  { %6331 = vmatpush.bf16.msrb.mxu3 %v9175_v7  ;;  %v12588_v21 = vld [vmem:[%s20422_s1 + $0xa4] sm:$0xf]  ;;  %v8756_v10 = vld [vmem:[%s20422_s1 + $0xb0] sm:$0xf0]  ;;  %20499 = vst [vmem:[#allocation19_spill] sm:$0xff] %v15451_v19  ;;  %v15453_v7 = vor.u32 %v12524_v15, %v8548_v37  ;;  %v15466_v16 = vor.u32 %v12525_v49, %v8556_v11  ;;  %v9015_v15 = vor.u32 %v12652_v38, %v9012_v63 }
  0xf5   :  { %v12620_v31 = vld [vmem:[%s20422_s1 + $0x1a4] sm:$0xf]  ;;  %6313 = vmatpush.bf16.msrb.mxu2 %v9031_v41  ;;  %v8884_v34 = vld [vmem:[%s20422_s1 + $0x1b0] sm:$0xf0]  ;;  %20501 = vst [vmem:[#allocation21_spill] sm:$0xff] %v15464_v12  ;;  %v8759_v37 = vor.u32 %v12588_v21, %v8756_v10 }
  0xf6   :  { %20500 = vst [vmem:[#allocation20_spill] sm:$0xff] %v15453_v7  ;;  %6275 = vmatpush.bf16.msrb.mxu0 %v8775_v42  ;;  %v12684_v60 = vld [vmem:[%s20422_s1 + $0x3a4] sm:$0xf]  ;;  %v9140_v43 = vld [vmem:[%s20422_s1 + $0x3b0] sm:$0xf0]  ;;  %v5903_v35 = vpop.f32.mrf.mxu0  ;;  %v5922_v2 = vpop.f32.mrf.mxu1  ;;  %v15475_v42 = vadd.f32 %v5891_v61, %v5873_v32  ;;  %v8887_v59 = vor.u32 %v12620_v31, %v8884_v34  ;;  %6225 = vmatmul.bf16.vlgmr.msra.gmra.mxu1 %v15453_v7 }
  0xf7   :  { %20502 = vst [vmem:[#allocation22_spill] sm:$0xff] %v15466_v16  ;;  %6294 = vmatpush.bf16.msrb.mxu1 %v8903_v3  ;;  %v5904_v36 = vadd.f32 %v5903_v35, %v15254_v26  ;;  %v12648_v41 = vld [vmem:[%s20422_s1 + $0x284] sm:$0xf]  ;;  %v8996_v30 = vld [vmem:[%s20422_s1 + $0x290] sm:$0xf0]  ;;  %v9143_v47 = vor.u32 %v12684_v60, %v9140_v43  ;;  %6244 = vmatmul.bf16.vlgmr.msra.gmra.mxu2 %v15464_v12 }
  0xf8   :  { %6332 = vmatpush.bf16.msrb.mxu3 %v9159_v4  ;;  %v12584_v49 = vld [vmem:[%s20422_s1 + $0x84] sm:$0xf]  ;;  %v8740_v26 = vld [vmem:[%s20422_s1 + $0x90] sm:$0xf0]  ;;  %6206 = vmatmul.bf16.vlgmr.msra.gmra.mxu0 %v15451_v19  ;;  %v8999_v21 = vor.u32 %v12648_v41, %v8996_v30 }
  0xf9   :  { %v12616_v3 = vld [vmem:[%s20422_s1 + $0x184] sm:$0xf]  ;;  %v5923_v4 = vadd.f32 %v5922_v2, %v5904_v36  ;;  %v8868_v11 = vld [vmem:[%s20422_s1 + $0x190] sm:$0xf0]  ;;  %6263 = vmatmul.bf16.vlgmr.msra.gmra.mxu3 %v15466_v16  ;;  %6314 = vmatpush.bf16.msrb.mxu2 %v9015_v15  ;;  %v8743_v10 = vor.u32 %v12584_v49, %v8740_v26 }
  0xfa   :  { %v12680_v38 = vld [vmem:[%s20422_s1 + $0x384] sm:$0xf]  ;;  %v9124_v63 = vld [vmem:[%s20422_s1 + $0x390] sm:$0xf0]  ;;  %6276 = vmatpush.bf16.msrb.mxu0 %v8759_v37  ;;  %v8871_v61 = vor.u32 %v12616_v3, %v8868_v11  ;;  %v5941_v35 = vpop.f32.mrf.mxu2  ;;  %v5960_v2 = vpop.f32.mrf.mxu3 }
  0xfb   :  { %v12644_v31 = vld [vmem:[%s20422_s1 + $0x264] sm:$0xf]  ;;  %v8980_v52 = vld [vmem:[%s20422_s1 + $0x270] sm:$0xf0]  ;;  %6295 = vmatpush.bf16.msrb.mxu1 %v8887_v59  ;;  %v9127_v34 = vor.u32 %v12680_v38, %v9124_v63  ;;  %v5942_v41 = vadd.f32 %v5941_v35, %v5923_v4  ;;  %v12566_v4 = vld [vmem:[%s20423_s0 + $0x1ac] sm:$0xf0] }
  0xfc   :  { %6333 = vmatpush.bf16.msrb.mxu3 %v9143_v47  ;;  %v12580_v60 = vld [vmem:[%s20422_s1 + $0x64] sm:$0xf]  ;;  %v8724_v43 = vld [vmem:[%s20422_s1 + $0x70] sm:$0xf0]  ;;  %v8983_v49 = vor.u32 %v12644_v31, %v8980_v52 }
  0xfd   :  { %v12612_v32 = vld [vmem:[%s20422_s1 + $0x164] sm:$0xf]  ;;  %v8852_v36 = vld [vmem:[%s20422_s1 + $0x170] sm:$0xf0]  ;;  %6315 = vmatpush.bf16.msrb.mxu2 %v8999_v21  ;;  %v8727_v26 = vor.u32 %v12580_v60, %v8724_v43  ;;  %v15530_v38 = vadd.f32 %v5960_v2, %v5942_v41  ;;  %v8666_v2 = vld [vmem:[%s20423_s0 + $0x148] sm:$0xf] }
  0xfe   :  { %v12676_v15 = vld [vmem:[%s20422_s1 + $0x364] sm:$0xf]  ;;  %v9108_v37 = vld [vmem:[%s20422_s1 + $0x370] sm:$0xf0]  ;;  %v5905_v30 = vpop.f32.mrf.mxu0  ;;  %v5924_v59 = vpop.f32.mrf.mxu1  ;;  %6277 = vmatpush.bf16.msrb.mxu0 %v8743_v10  ;;  %v8855_v10 = vor.u32 %v12612_v32, %v8852_v36  ;;  %v12567_v36 = vld [vmem:[%s20423_s0 + $0x1b4] sm:$0xf0] }
  0xff   :  { %v5906_v47 = vadd.f32 %v5905_v30, %v15343_v20  ;;  %v12640_v3 = vld [vmem:[%s20422_s1 + $0x244] sm:$0xf]  ;;  %v8964_v11 = vld [vmem:[%s20422_s1 + $0x250] sm:$0xf0]  ;;  %6296 = vmatpush.bf16.msrb.mxu1 %v8871_v61  ;;  %v8658_v20 = vld [vmem:[%s20423_s0 + $0x140] sm:$0xf]  ;;  %v9111_v31 = vor.u32 %v12676_v15, %v9108_v37  ;;  %v15602_v19 = vor.u32 %v12567_v36, %v8666_v2 }
 0x100   :  { %6334 = vmatpush.bf16.msrb.mxu3 %v9127_v34  ;;  %v12552_v63 = vld [vmem:[%s20423_s0 + $0x144] sm:$0xf]  ;;  %v8660_v21 = vld [vmem:[%s20423_s0 + $0x1b0] sm:$0xf0]  ;;  %v12553_v15 = vld [vmem:[%s20423_s0 + $0x14c] sm:$0xf]  ;;  %v8967_v41 = vor.u32 %v12640_v3, %v8964_v11 }
 0x101   :  { %v12576_v52 = vld [vmem:[%s20422_s1 + $0x44] sm:$0xf]  ;;  %v8708_v61 = vld [vmem:[%s20422_s1 + $0x50] sm:$0xf0]  ;;  %v5925_v60 = vadd.f32 %v5924_v59, %v5906_v47  ;;  %v8668_v37 = vld [vmem:[%s20423_s0 + $0x1b8] sm:$0xf0]  ;;  %6316 = vmatpush.bf16.msrb.mxu2 %v8983_v49 }
 0x102   :  { %v12608_v34 = vld [vmem:[%s20422_s1 + $0x144] sm:$0xf]  ;;  %v8836_v43 = vld [vmem:[%s20422_s1 + $0x150] sm:$0xf0]  ;;  %6278 = vmatpush.bf16.msrb.mxu0 %v8727_v26  ;;  %v8711_v30 = vor.u32 %v12576_v52, %v8708_v61  ;;  %v5943_v3 = vpop.f32.mrf.mxu2  ;;  %v5962_v11 = vpop.f32.mrf.mxu3  ;;  %v15589_v52 = vor.u32 %v12566_v4, %v8658_v20  ;;  %20505 = vst [vmem:[#allocation25_spill] sm:$0xff] %v15602_v19  ;;  %v15604_v20 = vor.u32 %v12553_v15, %v8668_v37 }
 0x103   :  { %v12672_v32 = vld [vmem:[%s20422_s1 + $0x344] sm:$0xf]  ;;  %v9092_v35 = vld [vmem:[%s20422_s1 + $0x350] sm:$0xf0]  ;;  %6297 = vmatpush.bf16.msrb.mxu1 %v8855_v10  ;;  %v8839_v16 = vor.u32 %v12608_v34, %v8836_v43  ;;  %v15591_v10 = vor.u32 %v12552_v63, %v8660_v21  ;;  %v5944_v43 = vadd.f32 %v5943_v3, %v5925_v60 }
 0x104   :  { %v12636_v59 = vld [vmem:[%s20422_s1 + $0x224] sm:$0xf]  ;;  %v8948_v47 = vld [vmem:[%s20422_s1 + $0x230] sm:$0xf0]  ;;  %6335 = vmatpush.bf16.msrb.mxu3 %v9111_v31  ;;  %v9095_v12 = vor.u32 %v12672_v32, %v9092_v35  ;;  %20503 = vst [vmem:[#allocation23_spill] sm:$0xff] %v15589_v52 }
 0x105   :  { %v12572_v7 = vld [vmem:[%s20422_s1 + $0x24] sm:$0xf]  ;;  %v8692_v49 = vld [vmem:[%s20422_s1 + $0x30] sm:$0xf0]  ;;  %20504 = vst [vmem:[#allocation24_spill] sm:$0xff] %v15591_v10  ;;  %6317 = vmatpush.bf16.msrb.mxu2 %v8967_v41  ;;  %v8951_v21 = vor.u32 %v12636_v59, %v8948_v47  ;;  %v15619_v15 = vadd.f32 %v5962_v11, %v5944_v43 }
 0x106   :  { %v12604_v26 = vld [vmem:[%s20422_s1 + $0x124] sm:$0xf]  ;;  %v8820_v31 = vld [vmem:[%s20422_s1 + $0x130] sm:$0xf0]  ;;  %v5908_v32 = vpop.f32.mrf.mxu0  ;;  %v5927_v35 = vpop.f32.mrf.mxu1  ;;  %20506 = vst [vmem:[#allocation26_spill] sm:$0xff] %v15604_v20  ;;  %6279 = vmatpush.bf16.msrb.mxu0 %v8711_v30  ;;  %v8695_v27 = vor.u32 %v12572_v7, %v8692_v49  ;;  %6230 = vmatmul.bf16.gmra.mxu1 %v15591_v10 }
 0x107   :  { %v12668_v61 = vld [vmem:[%s20422_s1 + $0x324] sm:$0xf]  ;;  %v9076_v34 = vld [vmem:[%s20422_s1 + $0x330] sm:$0xf0]  ;;  %v5909_v63 = vadd.f32 %v5908_v32, %v15410_v33  ;;  %6298 = vmatpush.bf16.msrb.mxu1 %v8839_v16  ;;  %v8823_v33 = vor.u32 %v12604_v26, %v8820_v31  ;;  %6249 = vmatmul.bf16.gmra.mxu2 %v15602_v19 }
 0x108   :  { %v12632_v4 = vld [vmem:[%s20422_s1 + $0x204] sm:$0xf]  ;;  %v8932_v60 = vld [vmem:[%s20422_s1 + $0x210] sm:$0xf0]  ;;  %6336 = vmatpush.bf16.msrb.mxu3 %v9095_v12  ;;  %v9079_v37 = vor.u32 %v12668_v61, %v9076_v34  ;;  %6211 = vmatmul.bf16.gmra.mxu0 %v15589_v52 }
 0x109   :  { %v12568_v2 = vld [vmem:[%s20422_s1 + $0x4] sm:$0xf]  ;;  %v8676_v36 = vld [vmem:[%s20422_s1 + $0x10] sm:$0xf0]  ;;  %v5928_v59 = vadd.f32 %v5927_v35, %v5909_v63  ;;  %6268 = vmatmul.bf16.gmra.mxu3 %v15604_v20  ;;  %6318 = vmatpush.bf16.msrb.mxu2 %v8951_v21  ;;  %v8935_v11 = vor.u32 %v12632_v4, %v8932_v60 }
 0x10a   :  { %v12600_v7 = vld [vmem:[%s20422_s1 + $0x104] sm:$0xf]  ;;  %v8804_v41 = vld [vmem:[%s20422_s1 + $0x110] sm:$0xf0]  ;;  %6280 = vmatpush.bf16.msrb.mxu0 %v8695_v27  ;;  %v8679_v31 = vor.u32 %v12568_v2, %v8676_v36  ;;  %v5946_v63 = vpop.f32.mrf.mxu2  ;;  %v5965_v27 = vpop.f32.mrf.mxu3 }
 0x10b   :  { %v12664_v30 = vld [vmem:[%s20422_s1 + $0x304] sm:$0xf]  ;;  %v9060_v12 = vld [vmem:[%s20422_s1 + $0x310] sm:$0xf0]  ;;  %6299 = vmatpush.bf16.msrb.mxu1 %v8823_v33  ;;  %v8807_v32 = vor.u32 %v12600_v7, %v8804_v41  ;;  %v5947_v36 = vadd.f32 %v5946_v63, %v5928_v59 }
 0x10c   :  { %v12788_v16 = vld [vmem:[%s20422_s1 + $0x6e4] sm:$0xf]  ;;  %v9556_v47 = vld [vmem:[%s20422_s1 + $0x6f0] sm:$0xf0]  ;;  %6337 = vmatpush.bf16.msrb.mxu3 %v9079_v37  ;;  %v9063_v35 = vor.u32 %v12664_v30, %v9060_v12 }
 0x10d   :  { %v12724_v49 = vld [vmem:[%s20422_s1 + $0x4e4] sm:$0xf]  ;;  %v9300_v26 = vld [vmem:[%s20422_s1 + $0x4f0] sm:$0xf0]  ;;  %v9559_v4 = vor.u32 %v12788_v16, %v9556_v47  ;;  %6319 = vmatpush.bf16.msrb.mxu2 %v8935_v11  ;;  %v15686_v47 = vadd.f32 %v5965_v27, %v5947_v36 }
 0x10e   :  { %v12756_v3 = vld [vmem:[%s20422_s1 + $0x5e4] sm:$0xf]  ;;  %v9428_v61 = vld [vmem:[%s20422_s1 + $0x5f0] sm:$0xf0]  ;;  %v9303_v21 = vor.u32 %v12724_v49, %v9300_v26  ;;  %v5910_v20 = vpop.f32.mrf.mxu0  ;;  %v5929_v19 = vpop.f32.mrf.mxu1  ;;  %6281 = vmatpush.bf16.msrb.mxu0 %v8679_v31 }
 0x10f   :  { %v12820_v34 = vld [vmem:[%s20422_s1 + $0x7e4] sm:$0xf]  ;;  %v9684_v43 = vld [vmem:[%s20422_s1 + $0x7f0] sm:$0xf0]  ;;  %v9431_v10 = vor.u32 %v12756_v3, %v9428_v61  ;;  %v5911_v30 = vadd.f32 %v5910_v20, %v15475_v42  ;;  %6300 = vmatpush.bf16.msrb.mxu1 %v8807_v32 }
 0x110   :  { %v12784_v60 = vld [vmem:[%s20422_s1 + $0x6c4] sm:$0xf]  ;;  %v9540_v2 = vld [vmem:[%s20422_s1 + $0x6d0] sm:$0xf0]  ;;  %v9687_v33 = vor.u32 %v12820_v34, %v9684_v43  ;;  %6338 = vmatpush.bf16.msrb.mxu3 %v9063_v35 }
 0x111   :  { %v12720_v37 = vld [vmem:[%s20422_s1 + $0x4c4] sm:$0xf]  ;;  %v9284_v7 = vld [vmem:[%s20422_s1 + $0x4d0] sm:$0xf0]  ;;  %v5930_v49 = vadd.f32 %v5929_v19, %v5911_v30  ;;  %6388 = vmatpush.bf16.msra.mxu2 %v9559_v4  ;;  %v9543_v42 = vor.u32 %v12784_v60, %v9540_v2 }
 0x112   :  { %v12752_v41 = vld [vmem:[%s20422_s1 + $0x5c4] sm:$0xf]  ;;  %v9412_v59 = vld [vmem:[%s20422_s1 + $0x5d0] sm:$0xf0]  ;;  %6350 = vmatpush.bf16.msra.mxu0 %v9303_v21  ;;  %v9287_v20 = vor.u32 %v12720_v37, %v9284_v7  ;;  %v5948_v34 = vpop.f32.mrf.mxu2  ;;  %v5967_v43 = vpop.f32.mrf.mxu3 }
 0x113   :  { %v12816_v12 = vld [vmem:[%s20422_s1 + $0x7c4] sm:$0xf]  ;;  %v9668_v16 = vld [vmem:[%s20422_s1 + $0x7d0] sm:$0xf0]  ;;  %6369 = vmatpush.bf16.msra.mxu1 %v9431_v10  ;;  %v9415_v26 = vor.u32 %v12752_v41, %v9412_v59  ;;  %v5949_v27 = vadd.f32 %v5948_v34, %v5930_v49 }
 0x114   :  { %6407 = vmatpush.bf16.msra.mxu3 %v9687_v33  ;;  %v9671_v3 = vor.u32 %v12816_v12, %v9668_v16  ;;  %v12780_v11 = vld [vmem:[%s20422_s1 + $0x6a4] sm:$0xf]  ;;  %v9524_v31 = vld [vmem:[%s20422_s1 + $0x6b0] sm:$0xf0] }
 0x115   :  { %v12716_v19 = vld [vmem:[%s20422_s1 + $0x4a4] sm:$0xf]  ;;  %v9268_v61 = vld [vmem:[%s20422_s1 + $0x4b0] sm:$0xf0]  ;;  %6389 = vmatpush.bf16.msra.mxu2 %v9543_v42  ;;  %v9527_v2 = vor.u32 %v12780_v11, %v9524_v31  ;;  %v15719_v7 = vadd.f32 %v5967_v43, %v5949_v27 }
 0x116   :  { %v12748_v10 = vld [vmem:[%s20422_s1 + $0x5a4] sm:$0xf]  ;;  %6351 = vmatpush.bf16.msra.mxu0 %v9287_v20  ;;  %v9396_v32 = vld [vmem:[%s20422_s1 + $0x5b0] sm:$0xf0]  ;;  %v5979_v4 = vpop.f32.mrf.mxu0  ;;  %v5998_v21 = vpop.f32.mrf.mxu1  ;;  %v9271_v36 = vor.u32 %v12716_v19, %v9268_v61  ;;  %6301 = vmatmul.bf16.vlgmr.msrb.gmra.mxu1 %v13809_v53 }
 0x117   :  { %v12812_v35 = vld [vmem:[%s20422_s1 + $0x7a4] sm:$0xf]  ;;  %v9652_v63 = vld [vmem:[%s20422_s1 + $0x7b0] sm:$0xf0]  ;;  %6370 = vmatpush.bf16.msra.mxu1 %v9415_v26  ;;  %v5980_v60 = vadd.f32 %v5979_v4, %v15530_v38  ;;  %v9399_v41 = vor.u32 %v12748_v10, %v9396_v32  ;;  %6320 = vmatmul.bf16.vlgmr.msrb.gmra.mxu2 %v13811_v54 }
 0x118   :  { %6408 = vmatpush.bf16.msra.mxu3 %v9671_v3  ;;  %v12776_v33 = vld [vmem:[%s20422_s1 + $0x684] sm:$0xf]  ;;  %v9508_v37 = vld [vmem:[%s20422_s1 + $0x690] sm:$0xf0]  ;;  %v9655_v30 = vor.u32 %v12812_v35, %v9652_v63  ;;  %6282 = vmatmul.bf16.vlgmr.msrb.gmra.mxu0 %v13798_v48 }
 0x119   :  { %v12712_v59 = vld [vmem:[%s20422_s1 + $0x484] sm:$0xf]  ;;  %v9252_v38 = vld [vmem:[%s20422_s1 + $0x490] sm:$0xf0]  ;;  %v5999_v16 = vadd.f32 %v5998_v21, %v5980_v60  ;;  %6339 = vmatmul.bf16.vlgmr.msrb.gmra.mxu3 %v13819_v57  ;;  %6390 = vmatpush.bf16.msra.mxu2 %v9527_v2  ;;  %v9511_v26 = vor.u32 %v12776_v33, %v9508_v37 }
 0x11a   :  { %v12744_v12 = vld [vmem:[%s20422_s1 + $0x584] sm:$0xf]  ;;  %v9380_v49 = vld [vmem:[%s20422_s1 + $0x590] sm:$0xf0]  ;;  %6352 = vmatpush.bf16.msra.mxu0 %v9271_v36  ;;  %v9255_v3 = vor.u32 %v12712_v59, %v9252_v38  ;;  %v6017_v32 = vpop.f32.mrf.mxu2  ;;  %v6036_v35 = vpop.f32.mrf.mxu3 }
 0x11b   :  { %v12808_v42 = vld [vmem:[%s20422_s1 + $0x784] sm:$0xf]  ;;  %v9636_v20 = vld [vmem:[%s20422_s1 + $0x790] sm:$0xf0]  ;;  %6371 = vmatpush.bf16.msra.mxu1 %v9399_v41  ;;  %v9383_v19 = vor.u32 %v12744_v12, %v9380_v49  ;;  %v6018_v21 = vadd.f32 %v6017_v32, %v5999_v16 }
 0x11c   :  { %v12772_v11 = vld [vmem:[%s20422_s1 + $0x664] sm:$0xf]  ;;  %v9492_v31 = vld [vmem:[%s20422_s1 + $0x670] sm:$0xf0]  ;;  %6409 = vmatpush.bf16.msra.mxu3 %v9655_v30  ;;  %v9639_v61 = vor.u32 %v12808_v42, %v9636_v20 }
 0x11d   :  { %v12708_v10 = vld [vmem:[%s20422_s1 + $0x464] sm:$0xf]  ;;  %v9236_v34 = vld [vmem:[%s20422_s1 + $0x470] sm:$0xf0]  ;;  %6391 = vmatpush.bf16.msra.mxu2 %v9511_v26  ;;  %v9495_v33 = vor.u32 %v12772_v11, %v9492_v31  ;;  %v15774_v59 = vadd.f32 %v6036_v35, %v6018_v21 }
 0x11e   :  { %v12740_v43 = vld [vmem:[%s20422_s1 + $0x564] sm:$0xf]  ;;  %v9364_v63 = vld [vmem:[%s20422_s1 + $0x570] sm:$0xf0]  ;;  %v5981_v60 = vpop.f32.mrf.mxu0  ;;  %v6000_v2 = vpop.f32.mrf.mxu1  ;;  %6353 = vmatpush.bf16.msra.mxu0 %v9255_v3  ;;  %v9239_v37 = vor.u32 %v12708_v10, %v9236_v34 }
 0x11f   :  { %v12804_v27 = vld [vmem:[%s20422_s1 + $0x764] sm:$0xf]  ;;  %v9620_v4 = vld [vmem:[%s20422_s1 + $0x770] sm:$0xf0]  ;;  %v5982_v36 = vadd.f32 %v5981_v60, %v15619_v15  ;;  %6372 = vmatpush.bf16.msra.mxu1 %v9383_v19  ;;  %v9367_v38 = vor.u32 %v12740_v43, %v9364_v63 }
 0x120   :  { %v12768_v41 = vld [vmem:[%s20422_s1 + $0x644] sm:$0xf]  ;;  %v9476_v30 = vld [vmem:[%s20422_s1 + $0x650] sm:$0xf0]  ;;  %6410 = vmatpush.bf16.msra.mxu3 %v9639_v61  ;;  %v9623_v12 = vor.u32 %v12804_v27, %v9620_v4 }
 0x121   :  { %v12704_v15 = vld [vmem:[%s20422_s1 + $0x444] sm:$0xf]  ;;  %v9220_v16 = vld [vmem:[%s20422_s1 + $0x450] sm:$0xf0]  ;;  %v6001_v42 = vadd.f32 %v6000_v2, %v5982_v36  ;;  %6392 = vmatpush.bf16.msra.mxu2 %v9495_v33  ;;  %v9479_v11 = vor.u32 %v12768_v41, %v9476_v30 }
 0x122   :  { %v12736_v49 = vld [vmem:[%s20422_s1 + $0x544] sm:$0xf]  ;;  %v9348_v20 = vld [vmem:[%s20422_s1 + $0x550] sm:$0xf0]  ;;  %6354 = vmatpush.bf16.msra.mxu0 %v9239_v37  ;;  %v9223_v31 = vor.u32 %v12704_v15, %v9220_v16  ;;  %v6019_v63 = vpop.f32.mrf.mxu2  ;;  %v6038_v27 = vpop.f32.mrf.mxu3 }
 0x123   :  { %v12800_v26 = vld [vmem:[%s20422_s1 + $0x744] sm:$0xf]  ;;  %v9604_v3 = vld [vmem:[%s20422_s1 + $0x750] sm:$0xf0]  ;;  %6373 = vmatpush.bf16.msra.mxu1 %v9367_v38  ;;  %v9351_v10 = vor.u32 %v12736_v49, %v9348_v20  ;;  %v6020_v2 = vadd.f32 %v6019_v63, %v6001_v42 }
 0x124   :  { %v12764_v19 = vld [vmem:[%s20422_s1 + $0x624] sm:$0xf]  ;;  %v9460_v61 = vld [vmem:[%s20422_s1 + $0x630] sm:$0xf0]  ;;  %6411 = vmatpush.bf16.msra.mxu3 %v9623_v12  ;;  %v9607_v34 = vor.u32 %v12800_v26, %v9604_v3 }
 0x125   :  { %v12700_v43 = vld [vmem:[%s20422_s1 + $0x424] sm:$0xf]  ;;  %v9204_v32 = vld [vmem:[%s20422_s1 + $0x430] sm:$0xf0]  ;;  %6393 = vmatpush.bf16.msra.mxu2 %v9479_v11  ;;  %v9463_v30 = vor.u32 %v12764_v19, %v9460_v61  ;;  %v15831_v49 = vadd.f32 %v6038_v27, %v6020_v2 }
 0x126   :  { %v12732_v35 = vld [vmem:[%s20422_s1 + $0x524] sm:$0xf]  ;;  %v9332_v4 = vld [vmem:[%s20422_s1 + $0x530] sm:$0xf0]  ;;  %v5984_v36 = vpop.f32.mrf.mxu0  ;;  %v6003_v33 = vpop.f32.mrf.mxu1  ;;  %6355 = vmatpush.bf16.msra.mxu0 %v9223_v31  ;;  %v9207_v38 = vor.u32 %v12700_v43, %v9204_v32  ;;  %6306 = vmatmul.bf16.gmra.mxu1 %v13941_v50 }
 0x127   :  { %v12796_v21 = vld [vmem:[%s20422_s1 + $0x724] sm:$0xf]  ;;  %v9588_v60 = vld [vmem:[%s20422_s1 + $0x730] sm:$0xf0]  ;;  %v5985_v41 = vadd.f32 %v5984_v36, %v15686_v47  ;;  %6374 = vmatpush.bf16.msra.mxu1 %v9351_v10  ;;  %v9335_v47 = vor.u32 %v12732_v35, %v9332_v4  ;;  %6325 = vmatmul.bf16.gmra.mxu2 %v13943_v51 }
 0x128   :  { %v12760_v37 = vld [vmem:[%s20422_s1 + $0x604] sm:$0xf]  ;;  %v9444_v12 = vld [vmem:[%s20422_s1 + $0x610] sm:$0xf0]  ;;  %6412 = vmatpush.bf16.msra.mxu3 %v9607_v34  ;;  %v9591_v42 = vor.u32 %v12796_v21, %v9588_v60  ;;  %6287 = vmatmul.bf16.gmra.mxu0 %v13930_v44 }
 0x129   :  { %v12696_v15 = vld [vmem:[%s20422_s1 + $0x404] sm:$0xf]  ;;  %v9188_v16 = vld [vmem:[%s20422_s1 + $0x410] sm:$0xf0]  ;;  %v6004_v11 = vadd.f32 %v6003_v33, %v5985_v41  ;;  %6344 = vmatmul.bf16.gmra.mxu3 %v13951_v56  ;;  %6394 = vmatpush.bf16.msra.mxu2 %v9463_v30  ;;  %v9447_v32 = vor.u32 %v12760_v37, %v9444_v12 }
 0x12a   :  { %v12728_v20 = vld [vmem:[%s20422_s1 + $0x504] sm:$0xf]  ;;  %v9316_v26 = vld [vmem:[%s20422_s1 + $0x510] sm:$0xf0]  ;;  %6356 = vmatpush.bf16.msra.mxu0 %v9207_v38  ;;  %v9191_v35 = vor.u32 %v12696_v15, %v9188_v16  ;;  %v6022_v2 = vpop.f32.mrf.mxu2  ;;  %v6041_v36 = vpop.f32.mrf.mxu3 }
 0x12b   :  { %v12792_v3 = vld [vmem:[%s20422_s1 + $0x704] sm:$0xf]  ;;  %v9572_v31 = vld [vmem:[%s20422_s1 + $0x710] sm:$0xf0]  ;;  %6375 = vmatpush.bf16.msra.mxu1 %v9335_v47  ;;  %v9319_v21 = vor.u32 %v12728_v20, %v9316_v26  ;;  %v6023_v38 = vadd.f32 %v6022_v2, %v6004_v11 }
 0x12c   :  { %v12916_v19 = vld [vmem:[%s20422_s1 + $0xae4] sm:$0xf]  ;;  %v10068_v61 = vld [vmem:[%s20422_s1 + $0xaf0] sm:$0xf0]  ;;  %6413 = vmatpush.bf16.msra.mxu3 %v9591_v42  ;;  %v9575_v60 = vor.u32 %v12792_v3, %v9572_v31 }
 0x12d   :  { %v12852_v10 = vld [vmem:[%s20422_s1 + $0x8e4] sm:$0xf]  ;;  %v9812_v34 = vld [vmem:[%s20422_s1 + $0x8f0] sm:$0xf0]  ;;  %v10071_v33 = vor.u32 %v12916_v19, %v10068_v61  ;;  %6395 = vmatpush.bf16.msra.mxu2 %v9447_v32  ;;  %v15898_v61 = vadd.f32 %v6041_v36, %v6023_v38 }
 0x12e   :  { %v12884_v43 = vld [vmem:[%s20422_s1 + $0x9e4] sm:$0xf]  ;;  %v9940_v63 = vld [vmem:[%s20422_s1 + $0x9f0] sm:$0xf0]  ;;  %v9815_v37 = vor.u32 %v12852_v10, %v9812_v34  ;;  %v5986_v12 = vpop.f32.mrf.mxu0  ;;  %v6005_v15 = vpop.f32.mrf.mxu1  ;;  %6357 = vmatpush.bf16.msra.mxu0 %v9191_v35 }
 0x12f   :  { %v12948_v27 = vld [vmem:[%s20422_s1 + $0xbe4] sm:$0xf]  ;;  %v10196_v4 = vld [vmem:[%s20422_s1 + $0xbf0] sm:$0xf0]  ;;  %v9943_v16 = vor.u32 %v12884_v43, %v9940_v63  ;;  %v5987_v3 = vadd.f32 %v5986_v12, %v15719_v7  ;;  %6376 = vmatpush.bf16.msra.mxu1 %v9319_v21 }
 0x130   :  { %v12912_v41 = vld [vmem:[%s20422_s1 + $0xac4] sm:$0xf]  ;;  %v10052_v30 = vld [vmem:[%s20422_s1 + $0xad0] sm:$0xf0]  ;;  %v10199_v47 = vor.u32 %v12948_v27, %v10196_v4  ;;  %6414 = vmatpush.bf16.msra.mxu3 %v9575_v60 }
 0x131   :  { %v12848_v42 = vld [vmem:[%s20422_s1 + $0x8c4] sm:$0xf]  ;;  %v9796_v20 = vld [vmem:[%s20422_s1 + $0x8d0] sm:$0xf0]  ;;  %v6006_v10 = vadd.f32 %v6005_v15, %v5987_v3  ;;  %6464 = vmatpush.bf16.msrb.mxu2 %v10071_v33  ;;  %v10055_v7 = vor.u32 %v12912_v41, %v10052_v30 }
 0x132   :  { %v12880_v26 = vld [vmem:[%s20422_s1 + $0x9c4] sm:$0xf]  ;;  %v9924_v11 = vld [vmem:[%s20422_s1 + $0x9d0] sm:$0xf0]  ;;  %6426 = vmatpush.bf16.msrb.mxu0 %v9815_v37  ;;  %v9799_v34 = vor.u32 %v12848_v42, %v9796_v20  ;;  %v6024_v60 = vpop.f32.mrf.mxu2  ;;  %v6043_v2 = vpop.f32.mrf.mxu3 }
 0x133   :  { %v12944_v31 = vld [vmem:[%s20422_s1 + $0xbc4] sm:$0xf]  ;;  %v10180_v19 = vld [vmem:[%s20422_s1 + $0xbd0] sm:$0xf0]  ;;  %6445 = vmatpush.bf16.msrb.mxu1 %v9943_v16  ;;  %v9927_v43 = vor.u32 %v12880_v26, %v9924_v11  ;;  %v6025_v41 = vadd.f32 %v6024_v60, %v6006_v10 }
 0x134   :  { %6483 = vmatpush.bf16.msrb.mxu3 %v10199_v47  ;;  %v10183_v32 = vor.u32 %v12944_v31, %v10180_v19  ;;  %v12908_v35 = vld [vmem:[%s20422_s1 + $0xaa4] sm:$0xf]  ;;  %v10036_v63 = vld [vmem:[%s20422_s1 + $0xab0] sm:$0xf0] }
 0x135   :  { %v12844_v27 = vld [vmem:[%s20422_s1 + $0x8a4] sm:$0xf]  ;;  %v9780_v4 = vld [vmem:[%s20422_s1 + $0x8b0] sm:$0xf0]  ;;  %6465 = vmatpush.bf16.msrb.mxu2 %v10055_v7  ;;  %v10039_v15 = vor.u32 %v12908_v35, %v10036_v63  ;;  %v15931_v20 = vadd.f32 %v6043_v2, %v6025_v41 }
 0x136   :  { %v12876_v21 = vld [vmem:[%s20422_s1 + $0x9a4] sm:$0xf]  ;;  %6427 = vmatpush.bf16.msrb.mxu0 %v9799_v34  ;;  %v9908_v36 = vld [vmem:[%s20422_s1 + $0x9b0] sm:$0xf0]  ;;  %v6055_v30 = vpop.f32.mrf.mxu0  ;;  %v6074_v38 = vpop.f32.mrf.mxu1  ;;  %v9783_v16 = vor.u32 %v12844_v27, %v9780_v4  ;;  %6377 = vmatmul.bf16.vlgmr.msra.gmra.mxu1 %v14088_v1 }
 0x137   :  { %v12940_v33 = vld [vmem:[%s20422_s1 + $0xba4] sm:$0xf]  ;;  %v10164_v37 = vld [vmem:[%s20422_s1 + $0xbb0] sm:$0xf0]  ;;  %6446 = vmatpush.bf16.msrb.mxu1 %v9927_v43  ;;  %v6056_v12 = vadd.f32 %v6055_v30, %v15774_v59  ;;  %v9911_v26 = vor.u32 %v12876_v21, %v9908_v36  ;;  %6396 = vmatmul.bf16.vlgmr.msra.gmra.mxu2 %v14099_v5 }
 0x138   :  { %6484 = vmatpush.bf16.msrb.mxu3 %v10183_v32  ;;  %v12904_v47 = vld [vmem:[%s20422_s1 + $0xa84] sm:$0xf]  ;;  %v10020_v42 = vld [vmem:[%s20422_s1 + $0xa90] sm:$0xf0]  ;;  %v10167_v3 = vor.u32 %v12940_v33, %v10164_v37  ;;  %6358 = vmatmul.bf16.vlgmr.msra.gmra.mxu0 %v14086_v0 }
 0x139   :  { %v12840_v11 = vld [vmem:[%s20422_s1 + $0x884] sm:$0xf]  ;;  %v9764_v59 = vld [vmem:[%s20422_s1 + $0x890] sm:$0xf0]  ;;  %v6075_v19 = vadd.f32 %v6074_v38, %v6056_v12  ;;  %6415 = vmatmul.bf16.vlgmr.msra.gmra.mxu3 %v14101_v6  ;;  %6466 = vmatpush.bf16.msrb.mxu2 %v10039_v15  ;;  %v10023_v43 = vor.u32 %v12904_v47, %v10020_v42 }
 0x13a   :  { %v12872_v31 = vld [vmem:[%s20422_s1 + $0x984] sm:$0xf]  ;;  %v9892_v10 = vld [vmem:[%s20422_s1 + $0x990] sm:$0xf0]  ;;  %6428 = vmatpush.bf16.msrb.mxu0 %v9783_v16  ;;  %v9767_v32 = vor.u32 %v12840_v11, %v9764_v59  ;;  %v6093_v36 = vpop.f32.mrf.mxu2  ;;  %v6112_v33 = vpop.f32.mrf.mxu3 }
 0x13b   :  { %v12936_v7 = vld [vmem:[%s20422_s1 + $0xb84] sm:$0xf]  ;;  %v10148_v34 = vld [vmem:[%s20422_s1 + $0xb90] sm:$0xf0]  ;;  %6447 = vmatpush.bf16.msrb.mxu1 %v9911_v26  ;;  %v9895_v27 = vor.u32 %v12872_v31, %v9892_v10  ;;  %v6094_v38 = vadd.f32 %v6093_v36, %v6075_v19 }
 0x13c   :  { %v12900_v35 = vld [vmem:[%s20422_s1 + $0xa64] sm:$0xf]  ;;  %v10004_v63 = vld [vmem:[%s20422_s1 + $0xa70] sm:$0xf0]  ;;  %6485 = vmatpush.bf16.msrb.mxu3 %v10167_v3  ;;  %v10151_v4 = vor.u32 %v12936_v7, %v10148_v34 }
 0x13d   :  { %v12836_v21 = vld [vmem:[%s20422_s1 + $0x864] sm:$0xf]  ;;  %v9748_v60 = vld [vmem:[%s20422_s1 + $0x870] sm:$0xf0]  ;;  %6467 = vmatpush.bf16.msrb.mxu2 %v10023_v43  ;;  %v10007_v47 = vor.u32 %v12900_v35, %v10004_v63  ;;  %v15986_v11 = vadd.f32 %v6112_v33, %v6094_v38 }
 0x13e   :  { %v12868_v2 = vld [vmem:[%s20422_s1 + $0x964] sm:$0xf]  ;;  %v9876_v37 = vld [vmem:[%s20422_s1 + $0x970] sm:$0xf0]  ;;  %v6057_v12 = vpop.f32.mrf.mxu0  ;;  %v6076_v15 = vpop.f32.mrf.mxu1  ;;  %6429 = vmatpush.bf16.msrb.mxu0 %v9767_v32  ;;  %v9751_v42 = vor.u32 %v12836_v21, %v9748_v60 }
 0x13f   :  { %v12932_v41 = vld [vmem:[%s20422_s1 + $0xb64] sm:$0xf]  ;;  %v10132_v30 = vld [vmem:[%s20422_s1 + $0xb70] sm:$0xf0]  ;;  %v6058_v16 = vadd.f32 %v6057_v12, %v15831_v49  ;;  %6448 = vmatpush.bf16.msrb.mxu1 %v9895_v27  ;;  %v9879_v59 = vor.u32 %v12868_v2, %v9876_v37 }
 0x140   :  { %v12896_v26 = vld [vmem:[%s20422_s1 + $0xa44] sm:$0xf]  ;;  %v9988_v3 = vld [vmem:[%s20422_s1 + $0xa50] sm:$0xf0]  ;;  %6486 = vmatpush.bf16.msrb.mxu3 %v10151_v4  ;;  %v10135_v31 = vor.u32 %v12932_v41, %v10132_v30 }
 0x141   :  { %v12832_v49 = vld [vmem:[%s20422_s1 + $0x844] sm:$0xf]  ;;  %v9732_v19 = vld [vmem:[%s20422_s1 + $0x850] sm:$0xf0]  ;;  %v6077_v7 = vadd.f32 %v6076_v15, %v6058_v16  ;;  %6468 = vmatpush.bf16.msrb.mxu2 %v10007_v47  ;;  %v9991_v35 = vor.u32 %v12896_v26, %v9988_v3 }
 0x142   :  { %v12864_v10 = vld [vmem:[%s20422_s1 + $0x944] sm:$0xf]  ;;  %v9860_v34 = vld [vmem:[%s20422_s1 + $0x950] sm:$0xf0]  ;;  %6430 = vmatpush.bf16.msrb.mxu0 %v9751_v42  ;;  %v9735_v63 = vor.u32 %v12832_v49, %v9732_v19  ;;  %v6095_v37 = vpop.f32.mrf.mxu2  ;;  %v6114_v41 = vpop.f32.mrf.mxu3 }
 0x143   :  { %v12928_v43 = vld [vmem:[%s20422_s1 + $0xb44] sm:$0xf]  ;;  %v10116_v32 = vld [vmem:[%s20422_s1 + $0xb50] sm:$0xf0]  ;;  %6449 = vmatpush.bf16.msrb.mxu1 %v9879_v59  ;;  %v9863_v21 = vor.u32 %v12864_v10, %v9860_v34  ;;  %v6096_v15 = vadd.f32 %v6095_v37, %v6077_v7 }
 0x144   :  { %v12892_v27 = vld [vmem:[%s20422_s1 + $0xa24] sm:$0xf]  ;;  %v9972_v4 = vld [vmem:[%s20422_s1 + $0xa30] sm:$0xf0]  ;;  %6487 = vmatpush.bf16.msrb.mxu3 %v10135_v31  ;;  %v10119_v60 = vor.u32 %v12928_v43, %v10116_v32 }
 0x145   :  { %v12828_v2 = vld [vmem:[%s20422_s1 + $0x824] sm:$0xf]  ;;  %v9716_v36 = vld [vmem:[%s20422_s1 + $0x830] sm:$0xf0]  ;;  %6469 = vmatpush.bf16.msrb.mxu2 %v9991_v35  ;;  %v9975_v3 = vor.u32 %v12892_v27, %v9972_v4  ;;  %v16043_v10 = vadd.f32 %v6114_v41, %v6096_v15 }
 0x146   :  { %v12860_v33 = vld [vmem:[%s20422_s1 + $0x924] sm:$0xf]  ;;  %v9844_v30 = vld [vmem:[%s20422_s1 + $0x930] sm:$0xf0]  ;;  %v6060_v16 = vpop.f32.mrf.mxu0  ;;  %v6079_v47 = vpop.f32.mrf.mxu1  ;;  %6431 = vmatpush.bf16.msrb.mxu0 %v9735_v63  ;;  %v9719_v59 = vor.u32 %v12828_v2, %v9716_v36  ;;  %6382 = vmatmul.bf16.gmra.mxu1 %v14220_v9 }
 0x147   :  { %v12924_v38 = vld [vmem:[%s20422_s1 + $0xb24] sm:$0xf]  ;;  %v10100_v12 = vld [vmem:[%s20422_s1 + $0xb30] sm:$0xf0]  ;;  %v6061_v26 = vadd.f32 %v6060_v16, %v15898_v61  ;;  %6450 = vmatpush.bf16.msrb.mxu1 %v9863_v21  ;;  %v9847_v61 = vor.u32 %v12860_v33, %v9844_v30  ;;  %6401 = vmatmul.bf16.gmra.mxu2 %v14231_v13 }
 0x148   :  { %v12888_v42 = vld [vmem:[%s20422_s1 + $0xa04] sm:$0xf]  ;;  %v9956_v31 = vld [vmem:[%s20422_s1 + $0xa10] sm:$0xf0]  ;;  %6488 = vmatpush.bf16.msrb.mxu3 %v10119_v60  ;;  %v10103_v7 = vor.u32 %v12924_v38, %v10100_v12  ;;  %6363 = vmatmul.bf16.gmra.mxu0 %v14218_v8 }
 0x149   :  { %v12824_v49 = vld [vmem:[%s20422_s1 + $0x804] sm:$0xf]  ;;  %v9700_v19 = vld [vmem:[%s20422_s1 + $0x810] sm:$0xf0]  ;;  %v6080_v35 = vadd.f32 %v6079_v47, %v6061_v26  ;;  %6420 = vmatmul.bf16.gmra.mxu3 %v14233_v14  ;;  %6470 = vmatpush.bf16.msrb.mxu2 %v9975_v3  ;;  %v9959_v36 = vor.u32 %v12888_v42, %v9956_v31 }
 0x14a   :  { %v12856_v34 = vld [vmem:[%s20422_s1 + $0x904] sm:$0xf]  ;;  %v9828_v43 = vld [vmem:[%s20422_s1 + $0x910] sm:$0xf0]  ;;  %6432 = vmatpush.bf16.msrb.mxu0 %v9719_v59  ;;  %v9703_v33 = vor.u32 %v12824_v49, %v9700_v19  ;;  %v6098_v15 = vpop.f32.mrf.mxu2  ;;  %v6117_v16 = vpop.f32.mrf.mxu3 }
 0x14b   :  { %v12920_v32 = vld [vmem:[%s20422_s1 + $0xb04] sm:$0xf]  ;;  %v10084_v63 = vld [vmem:[%s20422_s1 + $0xb10] sm:$0xf0]  ;;  %6451 = vmatpush.bf16.msrb.mxu1 %v9847_v61  ;;  %v9831_v38 = vor.u32 %v12856_v34, %v9828_v43  ;;  %v6099_v59 = vadd.f32 %v6098_v15, %v6080_v35 }
 0x14c   :  { %v13044_v27 = vld [vmem:[%s20422_s1 + $0xee4] sm:$0xf]  ;;  %v10580_v4 = vld [vmem:[%s20422_s1 + $0xef0] sm:$0xf0]  ;;  %6489 = vmatpush.bf16.msrb.mxu3 %v10103_v7  ;;  %v10087_v12 = vor.u32 %v12920_v32, %v10084_v63 }
 0x14d   :  { %v12980_v21 = vld [vmem:[%s20422_s1 + $0xce4] sm:$0xf]  ;;  %v10324_v60 = vld [vmem:[%s20422_s1 + $0xcf0] sm:$0xf0]  ;;  %v10583_v47 = vor.u32 %v13044_v27, %v10580_v4  ;;  %6471 = vmatpush.bf16.msrb.mxu2 %v9959_v36  ;;  %v16110_v4 = vadd.f32 %v6117_v16, %v6099_v59 }
 0x14e   :  { %v13012_v2 = vld [vmem:[%s20422_s1 + $0xde4] sm:$0xf]  ;;  %v10452_v37 = vld [vmem:[%s20422_s1 + $0xdf0] sm:$0xf0]  ;;  %v10327_v42 = vor.u32 %v12980_v21, %v10324_v60  ;;  %v6062_v31 = vpop.f32.mrf.mxu0  ;;  %v6081_v49 = vpop.f32.mrf.mxu1  ;;  %6433 = vmatpush.bf16.msrb.mxu0 %v9703_v33 }
 0x14f   :  { %v13076_v41 = vld [vmem:[%s20422_s1 + $0xfe4] sm:$0xf]  ;;  %v10708_v30 = vld [vmem:[%s20422_s1 + $0xff0] sm:$0xf0]  ;;  %v10455_v19 = vor.u32 %v13012_v2, %v10452_v37  ;;  %v6063_v32 = vadd.f32 %v6062_v31, %v15931_v20  ;;  %6452 = vmatpush.bf16.msrb.mxu1 %v9831_v38 }
 0x150   :  { %v13040_v26 = vld [vmem:[%s20422_s1 + $0xec4] sm:$0xf]  ;;  %v10564_v3 = vld [vmem:[%s20422_s1 + $0xed0] sm:$0xf0]  ;;  %v10711_v61 = vor.u32 %v13076_v41, %v10708_v30  ;;  %6490 = vmatpush.bf16.msrb.mxu3 %v10087_v12 }
 0x151   :  { %v12976_v7 = vld [vmem:[%s20422_s1 + $0xcc4] sm:$0xf]  ;;  %v10308_v34 = vld [vmem:[%s20422_s1 + $0xcd0] sm:$0xf0]  ;;  %v6082_v21 = vadd.f32 %v6081_v49, %v6063_v32  ;;  %6540 = vmatpush.bf16.msra.mxu2 %v10583_v47  ;;  %v10567_v20 = vor.u32 %v13040_v26, %v10564_v3 }
 0x152   :  { %v13008_v43 = vld [vmem:[%s20422_s1 + $0xdc4] sm:$0xf]  ;;  %v10436_v35 = vld [vmem:[%s20422_s1 + $0xdd0] sm:$0xf0]  ;;  %6502 = vmatpush.bf16.msra.mxu0 %v10327_v42  ;;  %v10311_v60 = vor.u32 %v12976_v7, %v10308_v34  ;;  %v6100_v12 = vpop.f32.mrf.mxu2  ;;  %v6119_v15 = vpop.f32.mrf.mxu3 }
 0x153   :  { %v13072_v63 = vld [vmem:[%s20422_s1 + $0xfc4] sm:$0xf]  ;;  %v10692_v27 = vld [vmem:[%s20422_s1 + $0xfd0] sm:$0xf0]  ;;  %6521 = vmatpush.bf16.msra.mxu1 %v10455_v19  ;;  %v10439_v2 = vor.u32 %v13008_v43, %v10436_v35  ;;  %v6101_v26 = vadd.f32 %v6100_v12, %v6082_v21 }
 0x154   :  { %6559 = vmatpush.bf16.msra.mxu3 %v10711_v61  ;;  %v10695_v36 = vor.u32 %v13072_v63, %v10692_v27  ;;  %v13036_v33 = vld [vmem:[%s20422_s1 + $0xea4] sm:$0xf]  ;;  %v10548_v37 = vld [vmem:[%s20422_s1 + $0xeb0] sm:$0xf0] }
 0x155   :  { %v12972_v41 = vld [vmem:[%s20422_s1 + $0xca4] sm:$0xf]  ;;  %v10292_v30 = vld [vmem:[%s20422_s1 + $0xcb0] sm:$0xf0]  ;;  %6541 = vmatpush.bf16.msra.mxu2 %v10567_v20  ;;  %v10551_v49 = vor.u32 %v13036_v33, %v10548_v37  ;;  %v16143_v34 = vadd.f32 %v6119_v15, %v6101_v26 }
 0x156   :  { %v13004_v38 = vld [vmem:[%s20422_s1 + $0xda4] sm:$0xf]  ;;  %6503 = vmatpush.bf16.msra.mxu0 %v10311_v60  ;;  %v10420_v16 = vld [vmem:[%s20422_s1 + $0xdb0] sm:$0xf0]  ;;  %v6131_v3 = vpop.f32.mrf.mxu0  ;;  %v6150_v59 = vpop.f32.mrf.mxu1  ;;  %v10295_v19 = vor.u32 %v12972_v41, %v10292_v30  ;;  %6453 = vmatmul.bf16.vlgmr.msrb.gmra.mxu1 %v14358_v24 }
 0x157   :  { %v13068_v47 = vld [vmem:[%s20422_s1 + $0xfa4] sm:$0xf]  ;;  %v10676_v42 = vld [vmem:[%s20422_s1 + $0xfb0] sm:$0xf0]  ;;  %6522 = vmatpush.bf16.msra.mxu1 %v10439_v2  ;;  %v6132_v31 = vadd.f32 %v6131_v3, %v15986_v11  ;;  %v10423_v43 = vor.u32 %v13004_v38, %v10420_v16  ;;  %6472 = vmatmul.bf16.vlgmr.msrb.gmra.mxu2 %v14369_v28 }
 0x158   :  { %6560 = vmatpush.bf16.msra.mxu3 %v10695_v36  ;;  %v13032_v61 = vld [vmem:[%s20422_s1 + $0xe84] sm:$0xf]  ;;  %v10532_v7 = vld [vmem:[%s20422_s1 + $0xe90] sm:$0xf0]  ;;  %v10679_v32 = vor.u32 %v13068_v47, %v10676_v42  ;;  %6434 = vmatmul.bf16.vlgmr.msrb.gmra.mxu0 %v14356_v23 }
 0x159   :  { %v12968_v35 = vld [vmem:[%s20422_s1 + $0xc84] sm:$0xf]  ;;  %v10276_v11 = vld [vmem:[%s20422_s1 + $0xc90] sm:$0xf0]  ;;  %v6151_v27 = vadd.f32 %v6150_v59, %v6132_v31  ;;  %6491 = vmatmul.bf16.vlgmr.msrb.gmra.mxu3 %v14371_v29  ;;  %6542 = vmatpush.bf16.msra.mxu2 %v10551_v49  ;;  %v10535_v2 = vor.u32 %v13032_v61, %v10532_v7 }
 0x15a   :  { %v13000_v63 = vld [vmem:[%s20422_s1 + $0xd84] sm:$0xf]  ;;  %v10404_v21 = vld [vmem:[%s20422_s1 + $0xd90] sm:$0xf0]  ;;  %6504 = vmatpush.bf16.msra.mxu0 %v10295_v19  ;;  %v10279_v36 = vor.u32 %v12968_v35, %v10276_v11  ;;  %v6169_v16 = vpop.f32.mrf.mxu2  ;;  %v6188_v47 = vpop.f32.mrf.mxu3 }
 0x15b   :  { %v13064_v20 = vld [vmem:[%s20422_s1 + $0xf84] sm:$0xf]  ;;  %v10660_v60 = vld [vmem:[%s20422_s1 + $0xf90] sm:$0xf0]  ;;  %6523 = vmatpush.bf16.msra.mxu1 %v10423_v43  ;;  %v10407_v41 = vor.u32 %v13000_v63, %v10404_v21  ;;  %v6170_v59 = vadd.f32 %v6169_v16, %v6151_v27 }
 0x15c   :  { %v13028_v33 = vld [vmem:[%s20422_s1 + $0xe64] sm:$0xf]  ;;  %v10516_v37 = vld [vmem:[%s20422_s1 + $0xe70] sm:$0xf0]  ;;  %6561 = vmatpush.bf16.msra.mxu3 %v10679_v32  ;;  %v10663_v30 = vor.u32 %v13064_v20, %v10660_v60 }
 0x15d   :  { %v12964_v38 = vld [vmem:[%s20422_s1 + $0xc64] sm:$0xf]  ;;  %v10260_v12 = vld [vmem:[%s20422_s1 + $0xc70] sm:$0xf0]  ;;  %6543 = vmatpush.bf16.msra.mxu2 %v10535_v2  ;;  %v10519_v61 = vor.u32 %v13028_v33, %v10516_v37  ;;  %v16198_v35 = vadd.f32 %v6188_v47, %v6170_v59 }
 0x15e   :  { %v12996_v15 = vld [vmem:[%s20422_s1 + $0xd64] sm:$0xf]  ;;  %v10388_v42 = vld [vmem:[%s20422_s1 + $0xd70] sm:$0xf0]  ;;  %v6133_v31 = vpop.f32.mrf.mxu0  ;;  %v6152_v49 = vpop.f32.mrf.mxu1  ;;  %6505 = vmatpush.bf16.msra.mxu0 %v10279_v36  ;;  %v10263_v7 = vor.u32 %v12964_v38, %v10260_v12 }
 0x15f   :  { %v13060_v26 = vld [vmem:[%s20422_s1 + $0xf64] sm:$0xf]  ;;  %v10644_v3 = vld [vmem:[%s20422_s1 + $0xf70] sm:$0xf0]  ;;  %v6134_v19 = vadd.f32 %v6133_v31, %v16043_v10  ;;  %6524 = vmatpush.bf16.msra.mxu1 %v10407_v41  ;;  %v10391_v11 = vor.u32 %v12996_v15, %v10388_v42 }
 0x160   :  { %v13024_v43 = vld [vmem:[%s20422_s1 + $0xe44] sm:$0xf]  ;;  %v10500_v32 = vld [vmem:[%s20422_s1 + $0xe50] sm:$0xf0]  ;;  %6562 = vmatpush.bf16.msra.mxu3 %v10663_v30  ;;  %v10647_v63 = vor.u32 %v13060_v26, %v10644_v3 }
 0x161   :  { %v12960_v10 = vld [vmem:[%s20422_s1 + $0xc44] sm:$0xf]  ;;  %v10244_v27 = vld [vmem:[%s20422_s1 + $0xc50] sm:$0xf0]  ;;  %v6153_v20 = vadd.f32 %v6152_v49, %v6134_v19  ;;  %6544 = vmatpush.bf16.msra.mxu2 %v10519_v61  ;;  %v10503_v33 = vor.u32 %v13024_v43, %v10500_v32 }
 0x162   :  { %v12992_v21 = vld [vmem:[%s20422_s1 + $0xd44] sm:$0xf]  ;;  %v10372_v60 = vld [vmem:[%s20422_s1 + $0xd50] sm:$0xf0]  ;;  %6506 = vmatpush.bf16.msra.mxu0 %v10263_v7  ;;  %v10247_v37 = vor.u32 %v12960_v10, %v10244_v27  ;;  %v6171_v42 = vpop.f32.mrf.mxu2  ;;  %v6190_v26 = vpop.f32.mrf.mxu3 }
 0x163   :  { %v13056_v2 = vld [vmem:[%s20422_s1 + $0xf44] sm:$0xf]  ;;  %v10628_v36 = vld [vmem:[%s20422_s1 + $0xf50] sm:$0xf0]  ;;  %6525 = vmatpush.bf16.msra.mxu1 %v10391_v11  ;;  %v10375_v38 = vor.u32 %v12992_v21, %v10372_v60  ;;  %v6172_v49 = vadd.f32 %v6171_v42, %v6153_v20 }
 0x164   :  { %v13020_v41 = vld [vmem:[%s20422_s1 + $0xe24] sm:$0xf]  ;;  %v10484_v30 = vld [vmem:[%s20422_s1 + $0xe30] sm:$0xf0]  ;;  %6563 = vmatpush.bf16.msra.mxu3 %v10647_v63  ;;  %v10631_v12 = vor.u32 %v13056_v2, %v10628_v36 }
 0x165   :  { %v12956_v15 = vld [vmem:[%s20422_s1 + $0xc24] sm:$0xf]  ;;  %v10228_v16 = vld [vmem:[%s20422_s1 + $0xc30] sm:$0xf0]  ;;  %6545 = vmatpush.bf16.msra.mxu2 %v10503_v33  ;;  %v10487_v32 = vor.u32 %v13020_v41, %v10484_v30  ;;  %v16255_v21 = vadd.f32 %v6190_v26, %v6172_v49 }
 0x166   :  { %v12988_v47 = vld [vmem:[%s20422_s1 + $0xd24] sm:$0xf]  ;;  %v10356_v3 = vld [vmem:[%s20422_s1 + $0xd30] sm:$0xf0]  ;;  %v6136_v19 = vpop.f32.mrf.mxu0  ;;  %v6155_v61 = vpop.f32.mrf.mxu1  ;;  %6507 = vmatpush.bf16.msra.mxu0 %v10247_v37  ;;  %v10231_v11 = vor.u32 %v12956_v15, %v10228_v16  ;;  %6458 = vmatmul.bf16.gmra.mxu1 %v14490_v40 }
 0x167   :  { %v13052_v59 = vld [vmem:[%s20422_s1 + $0xf24] sm:$0xf]  ;;  %v10612_v31 = vld [vmem:[%s20422_s1 + $0xf30] sm:$0xf0]  ;;  %v6137_v43 = vadd.f32 %v6136_v19, %v16110_v4  ;;  %6526 = vmatpush.bf16.msra.mxu1 %v10375_v38  ;;  %v10359_v4 = vor.u32 %v12988_v47, %v10356_v3  ;;  %6477 = vmatmul.bf16.gmra.mxu2 %v14501_v45 }
 0x168   :  { %v13016_v7 = vld [vmem:[%s20422_s1 + $0xe04] sm:$0xf]  ;;  %v10468_v63 = vld [vmem:[%s20422_s1 + $0xe10] sm:$0xf0]  ;;  %6564 = vmatpush.bf16.msra.mxu3 %v10631_v12  ;;  %v10615_v20 = vor.u32 %v13052_v59, %v10612_v31  ;;  %6439 = vmatmul.bf16.gmra.mxu0 %v14488_v39 }
 0x169   :  { %v12952_v10 = vld [vmem:[%s20422_s1 + $0xc04] sm:$0xf]  ;;  %v10212_v27 = vld [vmem:[%s20422_s1 + $0xc10] sm:$0xf0]  ;;  %v6156_v33 = vadd.f32 %v6155_v61, %v6137_v43  ;;  %6496 = vmatmul.bf16.gmra.mxu3 %v14503_v46  ;;  %6546 = vmatpush.bf16.msra.mxu2 %v10487_v32  ;;  %v10471_v16 = vor.u32 %v13016_v7, %v10468_v63 }
 0x16a   :  { %v12984_v60 = vld [vmem:[%s20422_s1 + $0xd04] sm:$0xf]  ;;  %v10340_v2 = vld [vmem:[%s20422_s1 + $0xd10] sm:$0xf0]  ;;  %6508 = vmatpush.bf16.msra.mxu0 %v10231_v11  ;;  %v10215_v47 = vor.u32 %v12952_v10, %v10212_v27  ;;  %v6174_v49 = vpop.f32.mrf.mxu2 }
 0x16b   :  { %v13048_v36 = vld [vmem:[%s20422_s1 + $0xf04] sm:$0xf]  ;;  %v10596_v37 = vld [vmem:[%s20422_s1 + $0xf10] sm:$0xf0]  ;;  %6527 = vmatpush.bf16.msra.mxu1 %v10359_v4  ;;  %v10343_v59 = vor.u32 %v12984_v60, %v10340_v2  ;;  %v6175_v11 = vadd.f32 %v6174_v49, %v6156_v33 }
 0x16c   :  { %v13172_v41 = vld [vmem:[%s20422_s1 + $0x12e4] sm:$0xf]  ;;  %v11092_v30 = vld [vmem:[%s20422_s1 + $0x12f0] sm:$0xf0]  ;;  %6565 = vmatpush.bf16.msra.mxu3 %v10615_v20  ;;  %v10599_v31 = vor.u32 %v13048_v36, %v10596_v37  ;;  %v6193_v19 = vpop.f32.mrf.mxu3 }
 0x16d   :  { %v13108_v38 = vld [vmem:[%s20422_s1 + $0x10e4] sm:$0xf]  ;;  %v10836_v12 = vld [vmem:[%s20422_s1 + $0x10f0] sm:$0xf0]  ;;  %v11095_v61 = vor.u32 %v13172_v41, %v11092_v30  ;;  %6547 = vmatpush.bf16.msra.mxu2 %v10471_v16  ;;  %v16322_v30 = vadd.f32 %v6193_v19, %v6175_v11 }
 0x16e   :  { %v13140_v15 = vld [vmem:[%s20422_s1 + $0x11e4] sm:$0xf]  ;;  %v10964_v42 = vld [vmem:[%s20422_s1 + $0x11f0] sm:$0xf0]  ;;  %v10839_v7 = vor.u32 %v13108_v38, %v10836_v12  ;;  %v6138_v63 = vpop.f32.mrf.mxu0  ;;  %v6157_v10 = vpop.f32.mrf.mxu1  ;;  %6509 = vmatpush.bf16.msra.mxu0 %v10215_v47 }
 0x16f   :  { %v13204_v26 = vld [vmem:[%s20422_s1 + $0x13e4] sm:$0xf]  ;;  %v11220_v3 = vld [vmem:[%s20422_s1 + $0x13f0] sm:$0xf0]  ;;  %v10967_v27 = vor.u32 %v13140_v15, %v10964_v42  ;;  %v6139_v36 = vadd.f32 %v6138_v63, %v16143_v34  ;;  %6528 = vmatpush.bf16.msra.mxu1 %v10343_v59 }
 0x170   :  { %v13168_v43 = vld [vmem:[%s20422_s1 + $0x12c4] sm:$0xf]  ;;  %v11076_v32 = vld [vmem:[%s20422_s1 + $0x12d0] sm:$0xf0]  ;;  %v11223_v4 = vor.u32 %v13204_v26, %v11220_v3  ;;  %6566 = vmatpush.bf16.msra.mxu3 %v10599_v31 }
 0x171   :  { %v13104_v20 = vld [vmem:[%s20422_s1 + $0x10c4] sm:$0xf]  ;;  %v10820_v60 = vld [vmem:[%s20422_s1 + $0x10d0] sm:$0xf0]  ;;  %v6158_v38 = vadd.f32 %v6157_v10, %v6139_v36  ;;  %6616 = vmatpush.bf16.msrb.mxu2 %v11095_v61  ;;  %v11079_v34 = vor.u32 %v13168_v43, %v11076_v32 }
 0x172   :  { %v13136_v2 = vld [vmem:[%s20422_s1 + $0x11c4] sm:$0xf]  ;;  %v10948_v33 = vld [vmem:[%s20422_s1 + $0x11d0] sm:$0xf0]  ;;  %6578 = vmatpush.bf16.msrb.mxu0 %v10839_v7  ;;  %v10823_v12 = vor.u32 %v13104_v20, %v10820_v60  ;;  %v6176_v31 = vpop.f32.mrf.mxu2 }
 0x173   :  { %v13200_v37 = vld [vmem:[%s20422_s1 + $0x13c4] sm:$0xf]  ;;  %v11204_v41 = vld [vmem:[%s20422_s1 + $0x13d0] sm:$0xf0]  ;;  %6597 = vmatpush.bf16.msrb.mxu1 %v10967_v27  ;;  %v10951_v15 = vor.u32 %v13136_v2, %v10948_v33  ;;  %v6177_v43 = vadd.f32 %v6176_v31, %v6158_v38 }
 0x174   :  { %6635 = vmatpush.bf16.msrb.mxu3 %v11223_v4  ;;  %v11207_v16 = vor.u32 %v13200_v37, %v11204_v41  ;;  %v13164_v47 = vld [vmem:[%s20422_s1 + $0x12a4] sm:$0xf]  ;;  %v11060_v42 = vld [vmem:[%s20422_s1 + $0x12b0] sm:$0xf0]  ;;  %v6195_v49 = vpop.f32.mrf.mxu3 }
 0x175   :  { %v13100_v26 = vld [vmem:[%s20422_s1 + $0x10a4] sm:$0xf]  ;;  %v10804_v3 = vld [vmem:[%s20422_s1 + $0x10b0] sm:$0xf0]  ;;  %6617 = vmatpush.bf16.msrb.mxu2 %v11079_v34  ;;  %v11063_v10 = vor.u32 %v13164_v47, %v11060_v42  ;;  %v16355_v60 = vadd.f32 %v6195_v49, %v6177_v43 }
 0x176   :  { %v13132_v59 = vld [vmem:[%s20422_s1 + $0x11a4] sm:$0xf]  ;;  %6579 = vmatpush.bf16.msrb.mxu0 %v10823_v12  ;;  %v10932_v19 = vld [vmem:[%s20422_s1 + $0x11b0] sm:$0xf0]  ;;  %v6207_v32 = vpop.f32.mrf.mxu0  ;;  %v6226_v11 = vpop.f32.mrf.mxu1  ;;  %v10807_v27 = vor.u32 %v13100_v26, %v10804_v3  ;;  %6529 = vmatmul.bf16.vlgmr.msra.gmra.mxu1 %v14634_v18 }
 0x177   :  { %v13196_v61 = vld [vmem:[%s20422_s1 + $0x13a4] sm:$0xf]  ;;  %v11188_v7 = vld [vmem:[%s20422_s1 + $0x13b0] sm:$0xf0]  ;;  %6598 = vmatpush.bf16.msrb.mxu1 %v10951_v15  ;;  %v6208_v63 = vadd.f32 %v6207_v32, %v16198_v35  ;;  %v10935_v2 = vor.u32 %v13132_v59, %v10932_v19  ;;  %6548 = vmatmul.bf16.vlgmr.msra.gmra.mxu2 %v14645_v22 }
 0x178   :  { %6636 = vmatpush.bf16.msrb.mxu3 %v11207_v16  ;;  %v13160_v4 = vld [vmem:[%s20422_s1 + $0x1284] sm:$0xf]  ;;  %v11044_v20 = vld [vmem:[%s20422_s1 + $0x1290] sm:$0xf0]  ;;  %v11191_v36 = vor.u32 %v13196_v61, %v11188_v7  ;;  %6510 = vmatmul.bf16.vlgmr.msra.gmra.mxu0 %v14632_v17 }
 0x179   :  { %v13096_v33 = vld [vmem:[%s20422_s1 + $0x1084] sm:$0xf]  ;;  %v10788_v35 = vld [vmem:[%s20422_s1 + $0x1090] sm:$0xf0]  ;;  %v6227_v41 = vadd.f32 %v6226_v11, %v6208_v63  ;;  %6567 = vmatmul.bf16.vlgmr.msra.gmra.mxu3 %v14647_v25  ;;  %6618 = vmatpush.bf16.msrb.mxu2 %v11063_v10  ;;  %v11047_v15 = vor.u32 %v13160_v4, %v11044_v20 }
 0x17a   :  { %v13128_v37 = vld [vmem:[%s20422_s1 + $0x1184] sm:$0xf]  ;;  %v10916_v38 = vld [vmem:[%s20422_s1 + $0x1190] sm:$0xf0]  ;;  %6580 = vmatpush.bf16.msrb.mxu0 %v10807_v27  ;;  %v10791_v16 = vor.u32 %v13096_v33, %v10788_v35  ;;  %v6245_v19 = vpop.f32.mrf.mxu2 }
 0x17b   :  { %v13192_v34 = vld [vmem:[%s20422_s1 + $0x1384] sm:$0xf]  ;;  %v11172_v12 = vld [vmem:[%s20422_s1 + $0x1390] sm:$0xf0]  ;;  %6599 = vmatpush.bf16.msrb.mxu1 %v10935_v2  ;;  %v10919_v26 = vor.u32 %v13128_v37, %v10916_v38  ;;  %v6246_v11 = vadd.f32 %v6245_v19, %v6227_v41 }
 0x17c   :  { %v13156_v47 = vld [vmem:[%s20422_s1 + $0x1264] sm:$0xf]  ;;  %v11028_v42 = vld [vmem:[%s20422_s1 + $0x1270] sm:$0xf0]  ;;  %6637 = vmatpush.bf16.msrb.mxu3 %v11191_v36  ;;  %v11175_v3 = vor.u32 %v13192_v34, %v11172_v12  ;;  %v6264_v61 = vpop.f32.mrf.mxu3 }
 0x17d   :  { %v13092_v59 = vld [vmem:[%s20422_s1 + $0x1064] sm:$0xf]  ;;  %v10772_v31 = vld [vmem:[%s20422_s1 + $0x1070] sm:$0xf0]  ;;  %6619 = vmatpush.bf16.msrb.mxu2 %v11047_v15  ;;  %v11031_v4 = vor.u32 %v13156_v47, %v11028_v42  ;;  %v16410_v33 = vadd.f32 %v6264_v61, %v6246_v11 }
 0x17e   :  { %v13124_v49 = vld [vmem:[%s20422_s1 + $0x1164] sm:$0xf]  ;;  %v10900_v7 = vld [vmem:[%s20422_s1 + $0x1170] sm:$0xf0]  ;;  %v6209_v63 = vpop.f32.mrf.mxu0  ;;  %v6228_v10 = vpop.f32.mrf.mxu1  ;;  %6581 = vmatpush.bf16.msrb.mxu0 %v10791_v16  ;;  %v10775_v20 = vor.u32 %v13092_v59, %v10772_v31 }
 0x17f   :  { %v13188_v43 = vld [vmem:[%s20422_s1 + $0x1364] sm:$0xf]  ;;  %v11156_v32 = vld [vmem:[%s20422_s1 + $0x1370] sm:$0xf0]  ;;  %v6210_v27 = vadd.f32 %v6209_v63, %v16255_v21  ;;  %6600 = vmatpush.bf16.msrb.mxu1 %v10919_v26  ;;  %v10903_v35 = vor.u32 %v13124_v49, %v10900_v7 }
 0x180   :  { %v13152_v2 = vld [vmem:[%s20422_s1 + $0x1244] sm:$0xf]  ;;  %v11012_v36 = vld [vmem:[%s20422_s1 + $0x1250] sm:$0xf0]  ;;  %6638 = vmatpush.bf16.msrb.mxu3 %v11175_v3  ;;  %v11159_v37 = vor.u32 %v13188_v43, %v11156_v32 }
 0x181   :  { %v13088_v21 = vld [vmem:[%s20422_s1 + $0x1044] sm:$0xf]  ;;  %v10756_v41 = vld [vmem:[%s20422_s1 + $0x1050] sm:$0xf0]  ;;  %v6229_v34 = vadd.f32 %v6228_v10, %v6210_v27  ;;  %6620 = vmatpush.bf16.msrb.mxu2 %v11031_v4  ;;  %v11015_v47 = vor.u32 %v13152_v2, %v11012_v36 }
 0x182   :  { %v13120_v38 = vld [vmem:[%s20422_s1 + $0x1144] sm:$0xf]  ;;  %v10884_v12 = vld [vmem:[%s20422_s1 + $0x1150] sm:$0xf0]  ;;  %6582 = vmatpush.bf16.msrb.mxu0 %v10775_v20  ;;  %v10759_v42 = vor.u32 %v13088_v21, %v10756_v41  ;;  %v6247_v7 = vpop.f32.mrf.mxu2 }
 0x183   :  { %v13184_v15 = vld [vmem:[%s20422_s1 + $0x1344] sm:$0xf]  ;;  %v11140_v16 = vld [vmem:[%s20422_s1 + $0x1350] sm:$0xf0]  ;;  %6601 = vmatpush.bf16.msrb.mxu1 %v10903_v35  ;;  %v10887_v59 = vor.u32 %v13120_v38, %v10884_v12  ;;  %v6248_v10 = vadd.f32 %v6247_v7, %v6229_v34 }
 0x184   :  { %v13148_v26 = vld [vmem:[%s20422_s1 + $0x1224] sm:$0xf]  ;;  %v10996_v3 = vld [vmem:[%s20422_s1 + $0x1230] sm:$0xf0]  ;;  %6639 = vmatpush.bf16.msrb.mxu3 %v11159_v37  ;;  %v11143_v31 = vor.u32 %v13184_v15, %v11140_v16  ;;  %v6266_v43 = vpop.f32.mrf.mxu3 }
 0x185   :  { %v13084_v49 = vld [vmem:[%s20422_s1 + $0x1024] sm:$0xf]  ;;  %v10740_v19 = vld [vmem:[%s20422_s1 + $0x1030] sm:$0xf0]  ;;  %6621 = vmatpush.bf16.msrb.mxu2 %v11015_v47  ;;  %v10999_v35 = vor.u32 %v13148_v26, %v10996_v3  ;;  %v6267_v34 = vadd.f32 %v6266_v43, %v6248_v10 }
 0x186   :  { %v13116_v61 = vld [vmem:[%s20422_s1 + $0x1124] sm:$0xf]  ;;  %v10868_v32 = vld [vmem:[%s20422_s1 + $0x1130] sm:$0xf0]  ;;  %v6212_v27 = vpop.f32.mrf.mxu0  ;;  %v6231_v4 = vpop.f32.mrf.mxu1  ;;  %6583 = vmatpush.bf16.msrb.mxu0 %v10759_v42  ;;  %v10743_v37 = vor.u32 %v13084_v49, %v10740_v19  ;;  %6534 = vmatmul.bf16.gmra.mxu1 %v14766_v58 }
 0x187   :  { %v13180_v11 = vld [vmem:[%s20422_s1 + $0x1324] sm:$0xf]  ;;  %v11124_v63 = vld [vmem:[%s20422_s1 + $0x1330] sm:$0xf0]  ;;  %v6213_v36 = vadd.f32 %v6212_v27, %v16322_v30  ;;  %6602 = vmatpush.bf16.msrb.mxu1 %v10887_v59  ;;  %v10871_v30 = vor.u32 %v13116_v61, %v10868_v32  ;;  %v7874_v49 = vmax.f32 %v6267_v34, 0.0  ;;  %6553 = vmatmul.bf16.gmra.mxu2 %v14777_v62 }
 0x188   :  { %v13144_v20 = vld [vmem:[%s20422_s1 + $0x1204] sm:$0xf]  ;;  %v10980_v2 = vld [vmem:[%s20422_s1 + $0x1210] sm:$0xf0]  ;;  %6640 = vmatpush.bf16.msrb.mxu3 %v11143_v31  ;;  %v11127_v12 = vor.u32 %v13180_v11, %v11124_v63  ;;  %6515 = vmatmul.bf16.gmra.mxu0 %v14764_v55  ;;  %v7870_v31 = vmax.f32 %v16410_v33, 0.0 }
 0x189   :  { %v13080_v21 = vld [vmem:[%s20422_s1 + $0x1004] sm:$0xf]  ;;  %v10724_v41 = vld [vmem:[%s20422_s1 + $0x1010] sm:$0xf0]  ;;  %v6232_v42 = vadd.f32 %v6231_v4, %v6213_v36  ;;  %6622 = vmatpush.bf16.msrb.mxu2 %v10999_v35  ;;  %v10983_v43 = vor.u32 %v13144_v20, %v10980_v2 }
 0x18a   :  { %v13112_v38 = vld [vmem:[%s20422_s1 + $0x1104] sm:$0xf]  ;;  %v10852_v15 = vld [vmem:[%s20422_s1 + $0x1110] sm:$0xf0]  ;;  %6584 = vmatpush.bf16.msrb.mxu0 %v10743_v37  ;;  %v10727_v32 = vor.u32 %v13080_v21, %v10724_v41  ;;  %v16508_v10 = vpack.c.bf16 %v7874_v49, %v7870_v31  ;;  %v6250_v20 = vpop.f32.mrf.mxu2 }
 0x18b   :  { %v13176_v16 = vld [vmem:[%s20422_s1 + $0x1304] sm:$0xf]  ;;  %v11108_v47 = vld [vmem:[%s20422_s1 + $0x1310] sm:$0xf0]  ;;  %6603 = vmatpush.bf16.msrb.mxu1 %v10871_v30  ;;  %v10855_v27 = vor.u32 %v13112_v38, %v10852_v15  ;;  %v6251_v41 = vadd.f32 %v6250_v20, %v6232_v42 }
 0x18c   :  { %v13300_v26 = vld [vmem:[%s20422_s1 + $0x16e4] sm:$0xf]  ;;  %v11604_v3 = vld [vmem:[%s20422_s1 + $0x16f0] sm:$0xf0]  ;;  %20508 = vst [vmem:[#allocation27_spill] sm:$0xff] %v16508_v10  ;;  %6641 = vmatpush.bf16.msrb.mxu3 %v11127_v12  ;;  %v11111_v4 = vor.u32 %v13176_v16, %v11108_v47  ;;  %v6269_v2 = vpop.f32.mrf.mxu3 }
 0x18d   :  { %v13236_v59 = vld [vmem:[%s20422_s1 + $0x14e4] sm:$0xf]  ;;  %v11348_v61 = vld [vmem:[%s20422_s1 + $0x14f0] sm:$0xf0]  ;;  %v11607_v36 = vor.u32 %v13300_v26, %v11604_v3  ;;  %6623 = vmatpush.bf16.msrb.mxu2 %v10983_v43  ;;  %v16535_v3 = vadd.f32 %v6269_v2, %v6251_v41 }
 0x18e   :  { %v20507_v19 = vld [vmem:[#allocation2_spill] sm:$0xff]  ;;  %v11476_v33 = vld [vmem:[%s20422_s1 + $0x15f0] sm:$0xf0]  ;;  %v11351_v35 = vor.u32 %v13236_v59, %v11348_v61  ;;  %v6214_v34 = vpop.f32.mrf.mxu0  ;;  %v6233_v31 = vpop.f32.mrf.mxu1  ;;  %6585 = vmatpush.bf16.msrb.mxu0 %v10727_v32 }
 0x18f   :  { %6572 = vmatmul.bf16.gmra.mxu3 %v20507_v19  ;;  %v13268_v7 = vld [vmem:[%s20422_s1 + $0x15e4] sm:$0xf]  ;;  %v11732_v63 = vld [vmem:[%s20422_s1 + $0x17f0] sm:$0xf0]  ;;  %v6215_v16 = vadd.f32 %v6214_v34, %v16355_v60  ;;  %6604 = vmatpush.bf16.msrb.mxu1 %v10855_v27  ;;  %v13528_v32 = vld [vmem:[%s20424_s2] sm:$0xf] }
 0x190   :  { %v13332_v11 = vld [vmem:[%s20422_s1 + $0x17e4] sm:$0xf]  ;;  %v11588_v21 = vld [vmem:[%s20422_s1 + $0x16d0] sm:$0xf0]  ;;  %v11479_v49 = vor.u32 %v13268_v7, %v11476_v33  ;;  %6642 = vmatpush.bf16.msrb.mxu3 %v11111_v4  ;;  %v16540_v33 = vperm.slane %v13528_v32, 1 }
 0x191   :  { %v13296_v37 = vld [vmem:[%s20422_s1 + $0x16c4] sm:$0xf]  ;;  %v11735_v30 = vor.u32 %v13332_v11, %v11732_v63  ;;  %v11332_v12 = vld [vmem:[%s20422_s1 + $0x14d0] sm:$0xf0]  ;;  %v6234_v59 = vadd.f32 %v6233_v31, %v6215_v16  ;;  %6692 = vmatpush.bf16.msra.mxu2 %v11607_v36 }
 0x192   :  { %v13232_v38 = vld [vmem:[%s20422_s1 + $0x14c4] sm:$0xf]  ;;  %v11460_v47 = vld [vmem:[%s20422_s1 + $0x15d0] sm:$0xf0]  ;;  %6654 = vmatpush.bf16.msra.mxu0 %v11351_v35  ;;  %v11591_v60 = vor.u32 %v13296_v37, %v11588_v21  ;;  %v6252_v2 = vpop.f32.mrf.mxu2 }
 0x193   :  { %v13264_v15 = vld [vmem:[%s20422_s1 + $0x15c4] sm:$0xf]  ;;  %v11716_v26 = vld [vmem:[%s20422_s1 + $0x17d0] sm:$0xf0]  ;;  %v11335_v61 = vor.u32 %v13232_v38, %v11332_v12  ;;  %6673 = vmatpush.bf16.msra.mxu1 %v11479_v49  ;;  %v6253_v41 = vadd.f32 %v6252_v2, %v6234_v59 }
 0x194   :  { %v13328_v42 = vld [vmem:[%s20422_s1 + $0x17c4] sm:$0xf]  ;;  %6711 = vmatpush.bf16.msra.mxu3 %v11735_v30  ;;  %v11463_v7 = vor.u32 %v13264_v15, %v11460_v47  ;;  %v11572_v63 = vld [vmem:[%s20422_s1 + $0x16b0] sm:$0xf0]  ;;  %v6271_v36 = vpop.f32.mrf.mxu3 }
 0x195   :  { %v11719_v43 = vor.u32 %v13328_v42, %v11716_v26  ;;  %v13292_v11 = vld [vmem:[%s20422_s1 + $0x16a4] sm:$0xf]  ;;  %v11316_v4 = vld [vmem:[%s20422_s1 + $0x14b0] sm:$0xf0]  ;;  %6693 = vmatpush.bf16.msra.mxu2 %v11591_v60  ;;  %v6272_v16 = vadd.f32 %v6271_v36, %v6253_v41 }
 0x196   :  { %v13228_v27 = vld [vmem:[%s20422_s1 + $0x14a4] sm:$0xf]  ;;  %6655 = vmatpush.bf16.msra.mxu0 %v11335_v61  ;;  %v11444_v35 = vld [vmem:[%s20422_s1 + $0x15b0] sm:$0xf0]  ;;  %v6283_v34 = vpop.f32.mrf.mxu0  ;;  %v6302_v31 = vpop.f32.mrf.mxu1  ;;  %v11575_v30 = vor.u32 %v13292_v11, %v11572_v63 }
 0x197   :  { %v13260_v20 = vld [vmem:[%s20422_s1 + $0x15a4] sm:$0xf]  ;;  %v11700_v21 = vld [vmem:[%s20422_s1 + $0x17b0] sm:$0xf0]  ;;  %6674 = vmatpush.bf16.msra.mxu1 %v11463_v7  ;;  %v6284_v49 = vadd.f32 %v6283_v34, %v16540_v33  ;;  %v11319_v38 = vor.u32 %v13228_v27, %v11316_v4  ;;  %v20509_v7 = vld [vmem:[#allocation3_spill] sm:$0xff]  ;;  %v7878_v27 = vmax.f32 %v16535_v3, 0.0 }
 0x198   :  { %v13324_v37 = vld [vmem:[%s20422_s1 + $0x17a4] sm:$0xf]  ;;  %6712 = vmatpush.bf16.msra.mxu3 %v11719_v43  ;;  %v11556_v15 = vld [vmem:[%s20422_s1 + $0x1690] sm:$0xf0]  ;;  %v11447_v47 = vor.u32 %v13260_v20, %v11444_v35  ;;  %6586 = vmatmul.bf16.vlgmr.msrb.gmra.mxu0 %v20509_v7  ;;  %v7882_v4 = vmax.f32 %v6272_v16, 0.0  ;;  %v20511_v20 = vld [vmem:[#allocation5_spill] sm:$0xff] }
 0x199   :  { %v13288_v12 = vld [vmem:[%s20422_s1 + $0x1684] sm:$0xf]  ;;  %v11703_v42 = vor.u32 %v13324_v37, %v11700_v21  ;;  %v11300_v59 = vld [vmem:[%s20422_s1 + $0x1490] sm:$0xf0]  ;;  %v6303_v61 = vadd.f32 %v6302_v31, %v6284_v49  ;;  %6624 = vmatmul.bf16.vlgmr.msrb.gmra.mxu2 %v20511_v20 }
 0x19a   :  { %v13224_v26 = vld [vmem:[%s20422_s1 + $0x1484] sm:$0xf]  ;;  %v20510_v43 = vld [vmem:[#allocation4_spill] sm:$0xff]  ;;  %6694 = vmatpush.bf16.msra.mxu2 %v11575_v30  ;;  %6656 = vmatpush.bf16.msra.mxu0 %v11319_v38  ;;  %v11559_v36 = vor.u32 %v13288_v12, %v11556_v15  ;;  %v16611_v30 = vpack.c.bf16 %v7882_v4, %v7878_v27  ;;  %v6321_v38 = vpop.f32.mrf.mxu2 }
 0x19b   :  { %v13256_v60 = vld [vmem:[%s20422_s1 + $0x1584] sm:$0xf]  ;;  %6605 = vmatmul.bf16.vlgmr.msrb.gmra.mxu1 %v20510_v43  ;;  %v11428_v32 = vld [vmem:[%s20422_s1 + $0x1590] sm:$0xf0]  ;;  %v11303_v35 = vor.u32 %v13224_v26, %v11300_v59 }
 0x19c   :  { %v13320_v11 = vld [vmem:[%s20422_s1 + $0x1784] sm:$0xf]  ;;  %v11684_v63 = vld [vmem:[%s20422_s1 + $0x1790] sm:$0xf0]  ;;  %6675 = vmatpush.bf16.msra.mxu1 %v11447_v47  ;;  %6713 = vmatpush.bf16.msra.mxu3 %v11703_v42  ;;  %v11431_v3 = vor.u32 %v13256_v60, %v11428_v32  ;;  %20513 = vst [vmem:[#allocation28_spill] sm:$0xff] %v16611_v30  ;;  %v6340_v12 = vpop.f32.mrf.mxu3  ;;  %v6322_v42 = vadd.f32 %v6321_v38, %v6303_v61 }
 0x19d   :  { %v20512_v2 = vld [vmem:[#allocation6_spill] sm:$0xff]  ;;  %v11540_v21 = vld [vmem:[%s20422_s1 + $0x1670] sm:$0xf0]  ;;  %v11687_v41 = vor.u32 %v13320_v11, %v11684_v63 }
 0x19e   :  { %v13284_v37 = vld [vmem:[%s20422_s1 + $0x1664] sm:$0xf]  ;;  %v11284_v31 = vld [vmem:[%s20422_s1 + $0x1470] sm:$0xf0]  ;;  %v6285_v26 = vpop.f32.mrf.mxu0  ;;  %v6304_v59 = vpop.f32.mrf.mxu1  ;;  %6695 = vmatpush.bf16.msra.mxu2 %v11559_v36  ;;  %6657 = vmatpush.bf16.msra.mxu0 %v11303_v35  ;;  %v16629_v4 = vadd.f32 %v6340_v12, %v6322_v42 }
 0x19f   :  { %6643 = vmatmul.bf16.vlgmr.msrb.gmra.mxu3 %v20512_v2  ;;  %v13220_v34 = vld [vmem:[%s20422_s1 + $0x1464] sm:$0xf]  ;;  %v11412_v15 = vld [vmem:[%s20422_s1 + $0x1570] sm:$0xf0]  ;;  %v6286_v60 = vadd.f32 %v6285_v26, %v16540_v33  ;;  %v11543_v32 = vor.u32 %v13284_v37, %v11540_v21 }
 0x1a0   :  { %v13252_v49 = vld [vmem:[%s20422_s1 + $0x1564] sm:$0xf]  ;;  %v11668_v47 = vld [vmem:[%s20422_s1 + $0x1770] sm:$0xf0]  ;;  %v11287_v11 = vor.u32 %v13220_v34, %v11284_v31  ;;  %6676 = vmatpush.bf16.msra.mxu1 %v11431_v3  ;;  %6714 = vmatpush.bf16.msra.mxu3 %v11687_v41 }
 0x1a1   :  { %v13316_v16 = vld [vmem:[%s20422_s1 + $0x1764] sm:$0xf]  ;;  %v11524_v27 = vld [vmem:[%s20422_s1 + $0x1650] sm:$0xf0]  ;;  %v11415_v61 = vor.u32 %v13252_v49, %v11412_v15  ;;  %v6305_v21 = vadd.f32 %v6304_v59, %v6286_v60 }
 0x1a2   :  { %v13280_v63 = vld [vmem:[%s20422_s1 + $0x1644] sm:$0xf]  ;;  %v11671_v38 = vor.u32 %v13316_v16, %v11668_v47  ;;  %v11268_v35 = vld [vmem:[%s20422_s1 + $0x1450] sm:$0xf0]  ;;  %6696 = vmatpush.bf16.msra.mxu2 %v11543_v32  ;;  %6658 = vmatpush.bf16.msra.mxu0 %v11287_v11  ;;  %v6323_v60 = vpop.f32.mrf.mxu2 }
 0x1a3   :  { %v13216_v36 = vld [vmem:[%s20422_s1 + $0x1444] sm:$0xf]  ;;  %v11396_v3 = vld [vmem:[%s20422_s1 + $0x1550] sm:$0xf0]  ;;  %v11527_v31 = vor.u32 %v13280_v63, %v11524_v27 }
 0x1a4   :  { %v13248_v37 = vld [vmem:[%s20422_s1 + $0x1544] sm:$0xf]  ;;  %v11652_v34 = vld [vmem:[%s20422_s1 + $0x1750] sm:$0xf0]  ;;  %v11271_v49 = vor.u32 %v13216_v36, %v11268_v35  ;;  %6677 = vmatpush.bf16.msra.mxu1 %v11415_v61  ;;  %6715 = vmatpush.bf16.msra.mxu3 %v11671_v38  ;;  %v6342_v32 = vpop.f32.mrf.mxu3  ;;  %v6324_v61 = vadd.f32 %v6323_v60, %v6305_v21 }
 0x1a5   :  { %v13312_v41 = vld [vmem:[%s20422_s1 + $0x1744] sm:$0xf]  ;;  %v11508_v15 = vld [vmem:[%s20422_s1 + $0x1630] sm:$0xf0]  ;;  %v11399_v16 = vor.u32 %v13248_v37, %v11396_v3 }
 0x1a6   :  { %v13276_v12 = vld [vmem:[%s20422_s1 + $0x1624] sm:$0xf]  ;;  %v11655_v47 = vor.u32 %v13312_v41, %v11652_v34  ;;  %v11252_v26 = vld [vmem:[%s20422_s1 + $0x1430] sm:$0xf0]  ;;  %v6288_v38 = vpop.f32.mrf.mxu0  ;;  %v6307_v36 = vpop.f32.mrf.mxu1  ;;  %6697 = vmatpush.bf16.msra.mxu2 %v11527_v31  ;;  %6659 = vmatpush.bf16.msra.mxu0 %v11271_v49  ;;  %v16686_v30 = vadd.f32 %v6342_v32, %v6324_v61 }
 0x1a7   :  { %v13212_v42 = vld [vmem:[%s20422_s1 + $0x1424] sm:$0xf]  ;;  %v11380_v11 = vld [vmem:[%s20422_s1 + $0x1530] sm:$0xf0]  ;;  %v6289_v37 = vadd.f32 %v6288_v38, %v16540_v33  ;;  %v11511_v3 = vor.u32 %v13276_v12, %v11508_v15  ;;  %v20514_v38 = vld [vmem:[#allocation7_spill] sm:$0xff] }
 0x1a8   :  { %v13244_v59 = vld [vmem:[%s20422_s1 + $0x1524] sm:$0xf]  ;;  %v11636_v27 = vld [vmem:[%s20422_s1 + $0x1730] sm:$0xf0]  ;;  %v11255_v41 = vor.u32 %v13212_v42, %v11252_v26  ;;  %6678 = vmatpush.bf16.msra.mxu1 %v11399_v16  ;;  %6716 = vmatpush.bf16.msra.mxu3 %v11655_v47 }
 0x1a9   :  { %v13308_v63 = vld [vmem:[%s20422_s1 + $0x1724] sm:$0xf]  ;;  %v11492_v34 = vld [vmem:[%s20422_s1 + $0x1610] sm:$0xf0]  ;;  %v11383_v31 = vor.u32 %v13244_v59, %v11380_v11  ;;  %v6308_v26 = vadd.f32 %v6307_v36, %v6289_v37  ;;  %6591 = vmatmul.bf16.gmra.mxu0 %v20514_v38  ;;  %v20516_v11 = vld [vmem:[#allocation9_spill] sm:$0xff] }
 0x1aa   :  { %v13272_v35 = vld [vmem:[%s20422_s1 + $0x1604] sm:$0xf]  ;;  %v11236_v60 = vld [vmem:[%s20422_s1 + $0x1410] sm:$0xf0]  ;;  %v11639_v49 = vor.u32 %v13308_v63, %v11636_v27  ;;  %6629 = vmatmul.bf16.gmra.mxu2 %v20516_v11  ;;  %6660 = vmatpush.bf16.msra.mxu0 %v11255_v41 }
 0x1ab   :  { %v13208_v21 = vld [vmem:[%s20422_s1 + $0x1404] sm:$0xf]  ;;  %v11364_v15 = vld [vmem:[%s20422_s1 + $0x1510] sm:$0xf0]  ;;  %6698 = vmatpush.bf16.msra.mxu2 %v11511_v3  ;;  %v11495_v37 = vor.u32 %v13272_v35, %v11492_v34  ;;  %v6326_v3 = vpop.f32.mrf.mxu2 }
 0x1ac   :  { %v13240_v12 = vld [vmem:[%s20422_s1 + $0x1504] sm:$0xf]  ;;  %v20515_v32 = vld [vmem:[#allocation8_spill] sm:$0xff]  ;;  %v11239_v10 = vor.u32 %v13208_v21, %v11236_v60  ;;  %6679 = vmatpush.bf16.msra.mxu1 %v11383_v31  ;;  %6717 = vmatpush.bf16.msra.mxu3 %v11639_v49  ;;  %v6345_v41 = vpop.f32.mrf.mxu3  ;;  %v6327_v20 = vadd.f32 %v6326_v3, %v6308_v26 }
 0x1ad   :  { %v13304_v42 = vld [vmem:[%s20422_s1 + $0x1704] sm:$0xf]  ;;  %6610 = vmatmul.bf16.gmra.mxu1 %v20515_v32  ;;  %v11620_v16 = vld [vmem:[%s20422_s1 + $0x1710] sm:$0xf0]  ;;  %v11367_v38 = vor.u32 %v13240_v12, %v11364_v15 }
 0x1ae   :  { %v13428_v47 = vld [vmem:[%s20422_s1 + $0x1ae4] sm:$0xf]  ;;  %v12116_v59 = vld [vmem:[%s20422_s1 + $0x1af0] sm:$0xf0]  ;;  %v11623_v2 = vor.u32 %v13304_v42, %v11620_v16  ;;  %v6290_v43 = vpop.f32.mrf.mxu0  ;;  %v6309_v7 = vpop.f32.mrf.mxu1  ;;  %6661 = vmatpush.bf16.msra.mxu0 %v11239_v10 }
 0x1af   :  { %v20517_v63 = vld [vmem:[#allocation10_spill] sm:$0xff]  ;;  %v11860_v61 = vld [vmem:[%s20422_s1 + $0x18f0] sm:$0xf0]  ;;  %v12119_v35 = vor.u32 %v13428_v47, %v12116_v59  ;;  %v6291_v42 = vadd.f32 %v6290_v43, %v16540_v33  ;;  %6699 = vmatpush.bf16.msra.mxu2 %v11495_v37  ;;  %v16753_v47 = vadd.f32 %v6345_v41, %v6327_v20 }
 0x1b0   :  { %6648 = vmatmul.bf16.gmra.mxu3 %v20517_v63  ;;  %v13364_v27 = vld [vmem:[%s20422_s1 + $0x18e4] sm:$0xf]  ;;  %v11988_v63 = vld [vmem:[%s20422_s1 + $0x19f0] sm:$0xf0]  ;;  %6680 = vmatpush.bf16.msra.mxu1 %v11367_v38 }
 0x1b1   :  { %v13396_v36 = vld [vmem:[%s20422_s1 + $0x19e4] sm:$0xf]  ;;  %v12244_v32 = vld [vmem:[%s20422_s1 + $0x1bf0] sm:$0xf0]  ;;  %v11863_v34 = vor.u32 %v13364_v27, %v11860_v61  ;;  %6718 = vmatpush.bf16.msra.mxu3 %v11623_v2  ;;  %v6310_v59 = vadd.f32 %v6309_v7, %v6291_v42 }
 0x1b2   :  { %v13460_v11 = vld [vmem:[%s20422_s1 + $0x1be4] sm:$0xf]  ;;  %v12100_v60 = vld [vmem:[%s20422_s1 + $0x1ad0] sm:$0xf0]  ;;  %v11991_v19 = vor.u32 %v13396_v36, %v11988_v63 }
 0x1b3   :  { %v13424_v21 = vld [vmem:[%s20422_s1 + $0x1ac4] sm:$0xf]  ;;  %v12247_v31 = vor.u32 %v13460_v11, %v12244_v32  ;;  %v11844_v12 = vld [vmem:[%s20422_s1 + $0x18d0] sm:$0xf0]  ;;  %6768 = vmatpush.bf16.msrb.mxu2 %v12119_v35  ;;  %6730 = vmatpush.bf16.msrb.mxu0 %v11863_v34  ;;  %v6328_v38 = vpop.f32.mrf.mxu2 }
 0x1b4   :  { %v13360_v49 = vld [vmem:[%s20422_s1 + $0x18c4] sm:$0xf]  ;;  %v11972_v26 = vld [vmem:[%s20422_s1 + $0x19d0] sm:$0xf0]  ;;  %v12103_v10 = vor.u32 %v13424_v21, %v12100_v60  ;;  %6749 = vmatpush.bf16.msrb.mxu1 %v11991_v19  ;;  %v6347_v27 = vpop.f32.mrf.mxu3  ;;  %v6329_v3 = vadd.f32 %v6328_v38, %v6310_v59  ;;  %v20518_v59 = vld [vmem:[#allocation11_spill] sm:$0xff] }
 0x1b5   :  { %v13392_v15 = vld [vmem:[%s20422_s1 + $0x19c4] sm:$0xf]  ;;  %v12228_v16 = vld [vmem:[%s20422_s1 + $0x1bd0] sm:$0xf0]  ;;  %v11847_v33 = vor.u32 %v13360_v49, %v11844_v12  ;;  %6787 = vmatpush.bf16.msrb.mxu3 %v12247_v31 }
 0x1b6   :  { %v13456_v32 = vld [vmem:[%s20422_s1 + $0x1bc4] sm:$0xf]  ;;  %v11975_v43 = vor.u32 %v13392_v15, %v11972_v26  ;;  %v12084_v20 = vld [vmem:[%s20422_s1 + $0x1ab0] sm:$0xf0]  ;;  %v6359_v41 = vpop.f32.mrf.mxu0  ;;  %v6378_v35 = vpop.f32.mrf.mxu1  ;;  %v16786_v12 = vadd.f32 %v6347_v27, %v6329_v3 }
 0x1b7   :  { %v12231_v11 = vor.u32 %v13456_v32, %v12228_v16  ;;  %v13420_v63 = vld [vmem:[%s20422_s1 + $0x1aa4] sm:$0xf]  ;;  %v11828_v2 = vld [vmem:[%s20422_s1 + $0x18b0] sm:$0xf0]  ;;  %6769 = vmatpush.bf16.msrb.mxu2 %v12103_v10  ;;  %6731 = vmatpush.bf16.msrb.mxu0 %v11847_v33  ;;  %v6360_v34 = vadd.f32 %v6359_v41, %v16629_v4 }
 0x1b8   :  { %v13356_v7 = vld [vmem:[%s20422_s1 + $0x18a4] sm:$0xf]  ;;  %v11956_v61 = vld [vmem:[%s20422_s1 + $0x19b0] sm:$0xf0]  ;;  %6750 = vmatpush.bf16.msrb.mxu1 %v11975_v43  ;;  %v12087_v21 = vor.u32 %v13420_v63, %v12084_v20  ;;  %v20520_v63 = vld [vmem:[#allocation13_spill] sm:$0xff] }
 0x1b9   :  { %v13388_v19 = vld [vmem:[%s20422_s1 + $0x19a4] sm:$0xf]  ;;  %v12212_v37 = vld [vmem:[%s20422_s1 + $0x1bb0] sm:$0xf0]  ;;  %6788 = vmatpush.bf16.msrb.mxu3 %v12231_v11  ;;  %v11831_v60 = vor.u32 %v13356_v7, %v11828_v2  ;;  %v6379_v16 = vadd.f32 %v6378_v35, %v6360_v34  ;;  %6662 = vmatmul.bf16.vlgmr.msra.gmra.mxu0 %v20518_v59 }
 0x1ba   :  { %v13452_v36 = vld [vmem:[%s20422_s1 + $0x1ba4] sm:$0xf]  ;;  %v12068_v49 = vld [vmem:[%s20422_s1 + $0x1a90] sm:$0xf0]  ;;  %v11959_v15 = vor.u32 %v13388_v19, %v11956_v61  ;;  %6700 = vmatmul.bf16.vlgmr.msra.gmra.mxu2 %v20520_v63 }
 0x1bb   :  { %v13416_v31 = vld [vmem:[%s20422_s1 + $0x1a84] sm:$0xf]  ;;  %v12215_v42 = vor.u32 %v13452_v36, %v12212_v37  ;;  %v11812_v4 = vld [vmem:[%s20422_s1 + $0x1890] sm:$0xf0]  ;;  %6770 = vmatpush.bf16.msrb.mxu2 %v12087_v21  ;;  %6732 = vmatpush.bf16.msrb.mxu0 %v11831_v60  ;;  %v6397_v41 = vpop.f32.mrf.mxu2 }
 0x1bc   :  { %v13352_v26 = vld [vmem:[%s20422_s1 + $0x1884] sm:$0xf]  ;;  %v20519_v10 = vld [vmem:[#allocation12_spill] sm:$0xff]  ;;  %v12071_v7 = vor.u32 %v13416_v31, %v12068_v49  ;;  %6751 = vmatpush.bf16.msrb.mxu1 %v11959_v15  ;;  %v6416_v35 = vpop.f32.mrf.mxu3  ;;  %v6398_v31 = vadd.f32 %v6397_v41, %v6379_v16 }
 0x1bd   :  { %v13384_v32 = vld [vmem:[%s20422_s1 + $0x1984] sm:$0xf]  ;;  %6681 = vmatmul.bf16.vlgmr.msra.gmra.mxu1 %v20519_v10  ;;  %v11940_v33 = vld [vmem:[%s20422_s1 + $0x1990] sm:$0xf0]  ;;  %v11815_v2 = vor.u32 %v13352_v26, %v11812_v4  ;;  %6789 = vmatpush.bf16.msrb.mxu3 %v12215_v42 }
 0x1be   :  { %v13448_v43 = vld [vmem:[%s20422_s1 + $0x1b84] sm:$0xf]  ;;  %v12196_v11 = vld [vmem:[%s20422_s1 + $0x1b90] sm:$0xf0]  ;;  %v11943_v27 = vor.u32 %v13384_v32, %v11940_v33  ;;  %v6361_v49 = vpop.f32.mrf.mxu0  ;;  %v6380_v15 = vpop.f32.mrf.mxu1 }
 0x1bf   :  { %v20521_v20 = vld [vmem:[#allocation14_spill] sm:$0xff]  ;;  %v12052_v38 = vld [vmem:[%s20422_s1 + $0x1a70] sm:$0xf0]  ;;  %v12199_v61 = vor.u32 %v13448_v43, %v12196_v11  ;;  %v6362_v42 = vadd.f32 %v6361_v49, %v16686_v30  ;;  %6771 = vmatpush.bf16.msrb.mxu2 %v12071_v7  ;;  %6733 = vmatpush.bf16.msrb.mxu0 %v11815_v2  ;;  %v16841_v43 = vadd.f32 %v6416_v35, %v6398_v31 }
 0x1c0   :  { %6719 = vmatmul.bf16.vlgmr.msra.gmra.mxu3 %v20521_v20  ;;  %v13412_v19 = vld [vmem:[%s20422_s1 + $0x1a64] sm:$0xf]  ;;  %v11796_v37 = vld [vmem:[%s20422_s1 + $0x1870] sm:$0xf0]  ;;  %6752 = vmatpush.bf16.msrb.mxu1 %v11943_v27 }
 0x1c1   :  { %v13348_v36 = vld [vmem:[%s20422_s1 + $0x1864] sm:$0xf]  ;;  %v11924_v34 = vld [vmem:[%s20422_s1 + $0x1970] sm:$0xf0]  ;;  %v12055_v26 = vor.u32 %v13412_v19, %v12052_v38  ;;  %6790 = vmatpush.bf16.msrb.mxu3 %v12199_v61  ;;  %v6381_v19 = vadd.f32 %v6380_v15, %v6362_v42 }
 0x1c2   :  { %v13380_v3 = vld [vmem:[%s20422_s1 + $0x1964] sm:$0xf]  ;;  %v12180_v60 = vld [vmem:[%s20422_s1 + $0x1b70] sm:$0xf0]  ;;  %v11799_v4 = vor.u32 %v13348_v36, %v11796_v37 }
 0x1c3   :  { %v13444_v21 = vld [vmem:[%s20422_s1 + $0x1b64] sm:$0xf]  ;;  %v12036_v33 = vld [vmem:[%s20422_s1 + $0x1a50] sm:$0xf0]  ;;  %v11927_v16 = vor.u32 %v13380_v3, %v11924_v34  ;;  %6772 = vmatpush.bf16.msrb.mxu2 %v12055_v26  ;;  %v6399_v49 = vpop.f32.mrf.mxu2 }
 0x1c4   :  { %v13408_v32 = vld [vmem:[%s20422_s1 + $0x1a44] sm:$0xf]  ;;  %v12183_v11 = vor.u32 %v13444_v21, %v12180_v60  ;;  %v11780_v7 = vld [vmem:[%s20422_s1 + $0x1850] sm:$0xf0]  ;;  %6734 = vmatpush.bf16.msrb.mxu0 %v11799_v4  ;;  %v6418_v15 = vpop.f32.mrf.mxu3 }
 0x1c5   :  { %v13344_v30 = vld [vmem:[%s20422_s1 + $0x1844] sm:$0xf]  ;;  %v11908_v38 = vld [vmem:[%s20422_s1 + $0x1950] sm:$0xf0]  ;;  %v12039_v36 = vor.u32 %v13408_v32, %v12036_v33  ;;  %6753 = vmatpush.bf16.msrb.mxu1 %v11927_v16  ;;  %v6400_v32 = vadd.f32 %v6399_v49, %v6381_v19 }
 0x1c6   :  { %v13376_v2 = vld [vmem:[%s20422_s1 + $0x1944] sm:$0xf]  ;;  %v12164_v61 = vld [vmem:[%s20422_s1 + $0x1b50] sm:$0xf0]  ;;  %v11783_v37 = vor.u32 %v13344_v30, %v11780_v7  ;;  %6791 = vmatpush.bf16.msrb.mxu3 %v12183_v11  ;;  %v6364_v33 = vpop.f32.mrf.mxu0  ;;  %v6383_v16 = vpop.f32.mrf.mxu1 }
 0x1c7   :  { %v13440_v27 = vld [vmem:[%s20422_s1 + $0x1b44] sm:$0xf]  ;;  %v12020_v41 = vld [vmem:[%s20422_s1 + $0x1a30] sm:$0xf0]  ;;  %v11911_v35 = vor.u32 %v13376_v2, %v11908_v38  ;;  %v6365_v30 = vadd.f32 %v6364_v33, %v16753_v47  ;;  %6773 = vmatpush.bf16.msrb.mxu2 %v12039_v36 }
 0x1c8   :  { %v13404_v3 = vld [vmem:[%s20422_s1 + $0x1a24] sm:$0xf]  ;;  %v12167_v34 = vor.u32 %v13440_v27, %v12164_v61  ;;  %v11764_v60 = vld [vmem:[%s20422_s1 + $0x1830] sm:$0xf0]  ;;  %6735 = vmatpush.bf16.msrb.mxu0 %v11783_v37  ;;  %v16898_v61 = vadd.f32 %v6418_v15, %v6400_v32  ;;  %v20524_v15 = vld [vmem:[#allocation17_spill] sm:$0xff] }
 0x1c9   :  { %v13340_v21 = vld [vmem:[%s20422_s1 + $0x1824] sm:$0xf]  ;;  %v11892_v42 = vld [vmem:[%s20422_s1 + $0x1930] sm:$0xf0]  ;;  %v12023_v7 = vor.u32 %v13404_v3, %v12020_v41  ;;  %6754 = vmatpush.bf16.msrb.mxu1 %v11911_v35  ;;  %v8922_v32 = vld [vmem:[%s20422_s1 + $0x1e8] sm:$0xf] }
 0x1ca   :  { %v13372_v31 = vld [vmem:[%s20422_s1 + $0x1924] sm:$0xf]  ;;  %v12148_v4 = vld [vmem:[%s20422_s1 + $0x1b30] sm:$0xf0]  ;;  %v11767_v2 = vor.u32 %v13340_v21, %v11764_v60  ;;  %6792 = vmatpush.bf16.msrb.mxu3 %v12167_v34  ;;  %v6384_v21 = vadd.f32 %v6383_v16, %v6365_v30  ;;  %v20522_v60 = vld [vmem:[#allocation15_spill] sm:$0xff]  ;;  %6705 = vmatmul.bf16.gmra.mxu2 %v20524_v15 }
 0x1cb   :  { %v13436_v26 = vld [vmem:[%s20422_s1 + $0x1b24] sm:$0xf]  ;;  %v12004_v38 = vld [vmem:[%s20422_s1 + $0x1a10] sm:$0xf0]  ;;  %v11895_v47 = vor.u32 %v13372_v31, %v11892_v42  ;;  %6667 = vmatmul.bf16.gmra.mxu0 %v20522_v60  ;;  %v9050_v34 = vld [vmem:[%s20422_s1 + $0x2e8] sm:$0xf]  ;;  %6774 = vmatpush.bf16.msrb.mxu2 %v12023_v7  ;;  %v6402_v7 = vpop.f32.mrf.mxu2 }
 0x1cc   :  { %v13400_v11 = vld [vmem:[%s20422_s1 + $0x1a04] sm:$0xf]  ;;  %v11748_v27 = vld [vmem:[%s20422_s1 + $0x1810] sm:$0xf0]  ;;  %v12151_v36 = vor.u32 %v13436_v26, %v12148_v4  ;;  %v12663_v31 = vld [vmem:[%s20422_s1 + $0x2f4] sm:$0xf0]  ;;  %6736 = vmatpush.bf16.msrb.mxu0 %v11767_v2  ;;  %v6421_v2 = vpop.f32.mrf.mxu3  ;;  %v6403_v20 = vadd.f32 %v6402_v7, %v6384_v21 }
 0x1cd   :  { %v13336_v19 = vld [vmem:[%s20422_s1 + $0x1804] sm:$0xf]  ;;  %v11876_v3 = vld [vmem:[%s20422_s1 + $0x1910] sm:$0xf0]  ;;  %v8794_v26 = vld [vmem:[%s20422_s1 + $0xe8] sm:$0xf]  ;;  %v12007_v33 = vor.u32 %v13400_v11, %v12004_v38  ;;  %6755 = vmatpush.bf16.msrb.mxu1 %v11895_v47  ;;  %v9051_v11 = vor.u32 %v12663_v31, %v9050_v34 }
 0x1ce   :  { %v13368_v37 = vld [vmem:[%s20422_s1 + $0x1904] sm:$0xf]  ;;  %v20523_v49 = vld [vmem:[#allocation16_spill] sm:$0xff]  ;;  %v12599_v4 = vld [vmem:[%s20422_s1 + $0xf4] sm:$0xf0]  ;;  %v11751_v16 = vor.u32 %v13336_v19, %v11748_v27  ;;  %6793 = vmatpush.bf16.msrb.mxu3 %v12151_v36  ;;  %v6366_v63 = vpop.f32.mrf.mxu0  ;;  %v6385_v10 = vpop.f32.mrf.mxu1  ;;  %v16965_v31 = vadd.f32 %v6421_v2, %v6403_v20 }
 0x1cf   :  { %v13432_v41 = vld [vmem:[%s20422_s1 + $0x1b04] sm:$0xf]  ;;  %6686 = vmatmul.bf16.gmra.mxu1 %v20523_v49  ;;  %v12132_v35 = vld [vmem:[%s20422_s1 + $0x1b10] sm:$0xf0]  ;;  %v12631_v30 = vld [vmem:[%s20422_s1 + $0x1f4] sm:$0xf0]  ;;  %v11879_v49 = vor.u32 %v13368_v37, %v11876_v3  ;;  %v8795_v38 = vor.u32 %v12599_v4, %v8794_v26  ;;  %6775 = vmatpush.bf16.msrb.mxu2 %v12007_v33 }
 0x1d0   :  { %v20525_v42 = vld [vmem:[#allocation18_spill] sm:$0xff]  ;;  %v12695_v15 = vld [vmem:[%s20422_s1 + $0x3f4] sm:$0xf0]  ;;  %v12135_v60 = vor.u32 %v13432_v41, %v12132_v35  ;;  %v9034_v19 = vld [vmem:[%s20422_s1 + $0x2c8] sm:$0xf]  ;;  %v8923_v59 = vor.u32 %v12631_v30, %v8922_v32  ;;  %v6367_v41 = vadd.f32 %v6366_v63, %v16786_v12  ;;  %6737 = vmatpush.bf16.msrb.mxu0 %v11751_v16 }
 0x1d1   :  { %6724 = vmatmul.bf16.gmra.mxu3 %v20525_v42  ;;  %v9178_v42 = vld [vmem:[%s20422_s1 + $0x3e8] sm:$0xf]  ;;  %v12659_v27 = vld [vmem:[%s20422_s1 + $0x2d4] sm:$0xf0]  ;;  %6756 = vmatpush.bf16.msrb.mxu1 %v11879_v49 }
 0x1d2   :  { %v9179_v47 = vor.u32 %v12695_v15, %v9178_v42  ;;  %v8778_v36 = vld [vmem:[%s20422_s1 + $0xc8] sm:$0xf]  ;;  %v12595_v37 = vld [vmem:[%s20422_s1 + $0xd4] sm:$0xf0]  ;;  %6794 = vmatpush.bf16.msrb.mxu3 %v12135_v60  ;;  %v6386_v15 = vadd.f32 %v6385_v10, %v6367_v41  ;;  %v9035_v12 = vor.u32 %v12659_v27, %v9034_v19 }
 0x1d3   :  { %v8906_v3 = vld [vmem:[%s20422_s1 + $0x1c8] sm:$0xf]  ;;  %v12627_v21 = vld [vmem:[%s20422_s1 + $0x1d4] sm:$0xf0]  ;;  %6844 = vmatpush.bf16.msra.mxu2 %v9051_v11  ;;  %v8779_v63 = vor.u32 %v12595_v37, %v8778_v36  ;;  %v6404_v49 = vpop.f32.mrf.mxu2 }
 0x1d4   :  { %v9162_v35 = vld [vmem:[%s20422_s1 + $0x3c8] sm:$0xf]  ;;  %v12691_v34 = vld [vmem:[%s20422_s1 + $0x3d4] sm:$0xf0]  ;;  %6806 = vmatpush.bf16.msra.mxu0 %v8795_v38  ;;  %v8907_v42 = vor.u32 %v12627_v21, %v8906_v3  ;;  %v6423_v32 = vpop.f32.mrf.mxu3  ;;  %v6405_v7 = vadd.f32 %v6404_v49, %v6386_v15 }
 0x1d5   :  { %6825 = vmatpush.bf16.msra.mxu1 %v8923_v59  ;;  %v9163_v26 = vor.u32 %v12691_v34, %v9162_v35  ;;  %v9018_v4 = vld [vmem:[%s20422_s1 + $0x2a8] sm:$0xf]  ;;  %v12655_v20 = vld [vmem:[%s20422_s1 + $0x2b4] sm:$0xf0] }
 0x1d6   :  { %6863 = vmatpush.bf16.msra.mxu3 %v9179_v47  ;;  %v8762_v10 = vld [vmem:[%s20422_s1 + $0xa8] sm:$0xf]  ;;  %v12591_v60 = vld [vmem:[%s20422_s1 + $0xb4] sm:$0xf0]  ;;  %v6435_v2 = vpop.f32.mrf.mxu0  ;;  %v6454_v11 = vpop.f32.mrf.mxu1  ;;  %v9019_v19 = vor.u32 %v12655_v20, %v9018_v4  ;;  %v16998_v37 = vadd.f32 %v6423_v32, %v6405_v7  ;;  %v20529_v20 = vld [vmem:[#allocation22_spill] sm:$0xff] }
 0x1d7   :  { %v8890_v59 = vld [vmem:[%s20422_s1 + $0x1a8] sm:$0xf]  ;;  %6845 = vmatpush.bf16.msra.mxu2 %v9035_v12  ;;  %v12623_v33 = vld [vmem:[%s20422_s1 + $0x1b4] sm:$0xf0]  ;;  %v6436_v38 = vadd.f32 %v6435_v2, %v16841_v43  ;;  %v8763_v27 = vor.u32 %v12591_v60, %v8762_v10  ;;  %v20527_v12 = vld [vmem:[#allocation20_spill] sm:$0xff] }
 0x1d8   :  { %6807 = vmatpush.bf16.msra.mxu0 %v8779_v63  ;;  %v9146_v16 = vld [vmem:[%s20422_s1 + $0x3a8] sm:$0xf]  ;;  %v12687_v30 = vld [vmem:[%s20422_s1 + $0x3b4] sm:$0xf0]  ;;  %v8891_v3 = vor.u32 %v12623_v33, %v8890_v59 }
 0x1d9   :  { %6826 = vmatpush.bf16.msra.mxu1 %v8907_v42  ;;  %v9002_v47 = vld [vmem:[%s20422_s1 + $0x288] sm:$0xf]  ;;  %v12651_v36 = vld [vmem:[%s20422_s1 + $0x294] sm:$0xf0]  ;;  %v9147_v41 = vor.u32 %v12687_v30, %v9146_v16  ;;  %v6455_v34 = vadd.f32 %v6454_v11, %v6436_v38 }
 0x1da   :  { %6864 = vmatpush.bf16.msra.mxu3 %v9163_v26  ;;  %v8746_v21 = vld [vmem:[%s20422_s1 + $0x88] sm:$0xf]  ;;  %v12587_v43 = vld [vmem:[%s20422_s1 + $0x94] sm:$0xf0]  ;;  %v9003_v10 = vor.u32 %v12651_v36, %v9002_v47 }
 0x1db   :  { %v8874_v35 = vld [vmem:[%s20422_s1 + $0x188] sm:$0xf]  ;;  %v12619_v63 = vld [vmem:[%s20422_s1 + $0x194] sm:$0xf0]  ;;  %6846 = vmatpush.bf16.msra.mxu2 %v9019_v19  ;;  %v8747_v60 = vor.u32 %v12587_v43, %v8746_v21  ;;  %v6473_v2 = vpop.f32.mrf.mxu2 }
 0x1dc   :  { %v20526_v15 = vld [vmem:[#allocation19_spill] sm:$0xff]  ;;  %v12683_v26 = vld [vmem:[%s20422_s1 + $0x394] sm:$0xf0]  ;;  %6808 = vmatpush.bf16.msra.mxu0 %v8763_v27  ;;  %v8875_v32 = vor.u32 %v12619_v63, %v8874_v35  ;;  %v6492_v11 = vpop.f32.mrf.mxu3  ;;  %v6474_v47 = vadd.f32 %v6473_v2, %v6455_v34 }
 0x1dd   :  { %6738 = vmatmul.bf16.vlgmr.msrb.gmra.mxu0 %v20526_v15  ;;  %v9130_v42 = vld [vmem:[%s20422_s1 + $0x388] sm:$0xf]  ;;  %v20528_v4 = vld [vmem:[#allocation21_spill] sm:$0xff]  ;;  %6827 = vmatpush.bf16.msra.mxu1 %v8891_v3 }
 0x1de   :  { %6776 = vmatmul.bf16.vlgmr.msrb.gmra.mxu2 %v20528_v4  ;;  %v8986_v59 = vld [vmem:[%s20422_s1 + $0x268] sm:$0xf]  ;;  %v12647_v49 = vld [vmem:[%s20422_s1 + $0x274] sm:$0xf0]  ;;  %6865 = vmatpush.bf16.msra.mxu3 %v9147_v41  ;;  %v9131_v33 = vor.u32 %v12683_v26, %v9130_v42  ;;  %v6437_v36 = vpop.f32.mrf.mxu0  ;;  %v6456_v3 = vpop.f32.mrf.mxu1  ;;  %v17053_v42 = vadd.f32 %v6492_v11, %v6474_v47 }
 0x1df   :  { %6757 = vmatmul.bf16.vlgmr.msrb.gmra.mxu1 %v20527_v12  ;;  %v8730_v16 = vld [vmem:[%s20422_s1 + $0x68] sm:$0xf]  ;;  %v12583_v30 = vld [vmem:[%s20422_s1 + $0x74] sm:$0xf0]  ;;  %v6438_v41 = vadd.f32 %v6437_v36, %v16898_v61  ;;  %6847 = vmatpush.bf16.msra.mxu2 %v9003_v10  ;;  %v8987_v21 = vor.u32 %v12647_v49, %v8986_v59 }
 0x1e0   :  { %v8858_v7 = vld [vmem:[%s20422_s1 + $0x168] sm:$0xf]  ;;  %v12615_v38 = vld [vmem:[%s20422_s1 + $0x174] sm:$0xf0]  ;;  %6809 = vmatpush.bf16.msra.mxu0 %v8747_v60  ;;  %v8731_v43 = vor.u32 %v12583_v30, %v8730_v16 }
 0x1e1   :  { %6795 = vmatmul.bf16.vlgmr.msrb.gmra.mxu3 %v20529_v20  ;;  %v9114_v19 = vld [vmem:[%s20422_s1 + $0x368] sm:$0xf]  ;;  %v12679_v27 = vld [vmem:[%s20422_s1 + $0x374] sm:$0xf0]  ;;  %6828 = vmatpush.bf16.msra.mxu1 %v8875_v32  ;;  %v8859_v34 = vor.u32 %v12615_v38, %v8858_v7  ;;  %v6457_v59 = vadd.f32 %v6456_v3, %v6438_v41 }
 0x1e2   :  { %v8970_v35 = vld [vmem:[%s20422_s1 + $0x248] sm:$0xf]  ;;  %v12643_v63 = vld [vmem:[%s20422_s1 + $0x254] sm:$0xf0]  ;;  %6866 = vmatpush.bf16.msra.mxu3 %v9131_v33  ;;  %v9115_v26 = vor.u32 %v12679_v27, %v9114_v19 }
 0x1e3   :  { %v8714_v61 = vld [vmem:[%s20422_s1 + $0x48] sm:$0xf]  ;;  %v12579_v10 = vld [vmem:[%s20422_s1 + $0x54] sm:$0xf0]  ;;  %6848 = vmatpush.bf16.msra.mxu2 %v8987_v21  ;;  %v8971_v16 = vor.u32 %v12643_v63, %v8970_v35  ;;  %v6475_v36 = vpop.f32.mrf.mxu2 }
 0x1e4   :  { %v8842_v60 = vld [vmem:[%s20422_s1 + $0x148] sm:$0xf]  ;;  %v12611_v49 = vld [vmem:[%s20422_s1 + $0x154] sm:$0xf0]  ;;  %6810 = vmatpush.bf16.msra.mxu0 %v8731_v43  ;;  %v8715_v30 = vor.u32 %v12579_v10, %v8714_v61  ;;  %v6494_v3 = vpop.f32.mrf.mxu3  ;;  %v6476_v35 = vadd.f32 %v6475_v36, %v6457_v59 }
 0x1e5   :  { %v9098_v32 = vld [vmem:[%s20422_s1 + $0x348] sm:$0xf]  ;;  %v12675_v33 = vld [vmem:[%s20422_s1 + $0x354] sm:$0xf0]  ;;  %6829 = vmatpush.bf16.msra.mxu1 %v8859_v34  ;;  %v8843_v11 = vor.u32 %v12611_v49, %v8842_v60 }
 0x1e6   :  { %v8954_v7 = vld [vmem:[%s20422_s1 + $0x228] sm:$0xf]  ;;  %v12639_v2 = vld [vmem:[%s20422_s1 + $0x234] sm:$0xf0]  ;;  %6867 = vmatpush.bf16.msra.mxu3 %v9115_v26  ;;  %v9099_v38 = vor.u32 %v12675_v33, %v9098_v32  ;;  %v6440_v63 = vpop.f32.mrf.mxu0  ;;  %v6459_v34 = vpop.f32.mrf.mxu1  ;;  %v17110_v33 = vadd.f32 %v6494_v3, %v6476_v35  ;;  %v20532_v3 = vld [vmem:[#allocation26_spill] sm:$0xff] }
 0x1e7   :  { %v8698_v19 = vld [vmem:[%s20422_s1 + $0x28] sm:$0xf]  ;;  %v12575_v27 = vld [vmem:[%s20422_s1 + $0x34] sm:$0xf0]  ;;  %v6441_v61 = vadd.f32 %v6440_v63, %v16965_v31  ;;  %6849 = vmatpush.bf16.msra.mxu2 %v8971_v16  ;;  %v8955_v10 = vor.u32 %v12639_v2, %v8954_v7 }
 0x1e8   :  { %v8826_v47 = vld [vmem:[%s20422_s1 + $0x128] sm:$0xf]  ;;  %v12607_v41 = vld [vmem:[%s20422_s1 + $0x134] sm:$0xf0]  ;;  %6811 = vmatpush.bf16.msra.mxu0 %v8715_v30  ;;  %v8699_v60 = vor.u32 %v12575_v27, %v8698_v19  ;;  %v20530_v27 = vld [vmem:[#allocation24_spill] sm:$0xff] }
 0x1e9   :  { %v9082_v21 = vld [vmem:[%s20422_s1 + $0x328] sm:$0xf]  ;;  %v12671_v43 = vld [vmem:[%s20422_s1 + $0x334] sm:$0xf0]  ;;  %6830 = vmatpush.bf16.msra.mxu1 %v8843_v11  ;;  %v8827_v31 = vor.u32 %v12607_v41, %v8826_v47  ;;  %v6460_v19 = vadd.f32 %v6459_v34, %v6441_v61 }
 0x1ea   :  { %v8938_v26 = vld [vmem:[%s20422_s1 + $0x208] sm:$0xf]  ;;  %v12635_v49 = vld [vmem:[%s20422_s1 + $0x214] sm:$0xf0]  ;;  %6868 = vmatpush.bf16.msra.mxu3 %v9099_v38  ;;  %v9083_v16 = vor.u32 %v12671_v43, %v9082_v21 }
 0x1eb   :  { %v8682_v59 = vld [vmem:[%s20422_s1 + $0x8] sm:$0xf]  ;;  %v12571_v32 = vld [vmem:[%s20422_s1 + $0x14] sm:$0xf0]  ;;  %6850 = vmatpush.bf16.msra.mxu2 %v8955_v10  ;;  %v8939_v35 = vor.u32 %v12635_v49, %v8938_v26  ;;  %v6478_v10 = vpop.f32.mrf.mxu2 }
 0x1ec   :  { %v8810_v30 = vld [vmem:[%s20422_s1 + $0x108] sm:$0xf]  ;;  %v12603_v7 = vld [vmem:[%s20422_s1 + $0x114] sm:$0xf0]  ;;  %6812 = vmatpush.bf16.msra.mxu0 %v8699_v60  ;;  %v8683_v63 = vor.u32 %v12571_v32, %v8682_v59  ;;  %v6497_v60 = vpop.f32.mrf.mxu3 }
 0x1ed   :  { %v9066_v2 = vld [vmem:[%s20422_s1 + $0x308] sm:$0xf]  ;;  %6743 = vmatmul.bf16.gmra.mxu0 %v15589_v52  ;;  %v12667_v11 = vld [vmem:[%s20422_s1 + $0x314] sm:$0xf0]  ;;  %6831 = vmatpush.bf16.msra.mxu1 %v8827_v31  ;;  %v6479_v52 = vadd.f32 %v6478_v10, %v6460_v19 }
 0x1ee   :  { %v9562_v38 = vld [vmem:[%s20422_s1 + $0x6e8] sm:$0xf]  ;;  %v12791_v47 = vld [vmem:[%s20422_s1 + $0x6f4] sm:$0xf0]  ;;  %6869 = vmatpush.bf16.msra.mxu3 %v9083_v16  ;;  %v6442_v20 = vpop.f32.mrf.mxu0  ;;  %v6461_v4 = vpop.f32.mrf.mxu1 }
 0x1ef   :  { %6762 = vmatmul.bf16.gmra.mxu1 %v20530_v27  ;;  %v20531_v36 = vld [vmem:[#allocation25_spill] sm:$0xff]  ;;  %v9306_v41 = vld [vmem:[%s20422_s1 + $0x4e8] sm:$0xf]  ;;  %v9067_v27 = vor.u32 %v12667_v11, %v9066_v2  ;;  %v9563_v26 = vor.u32 %v12791_v47, %v9562_v38  ;;  %v6443_v2 = vadd.f32 %v6442_v20, %v16998_v37  ;;  %6851 = vmatpush.bf16.msra.mxu2 %v8939_v35 }
 0x1f0   :  { %6781 = vmatmul.bf16.gmra.mxu2 %v20531_v36  ;;  %v12727_v21 = vld [vmem:[%s20422_s1 + $0x4f4] sm:$0xf0]  ;;  %v9434_v43 = vld [vmem:[%s20422_s1 + $0x5e8] sm:$0xf]  ;;  %v8811_v36 = vor.u32 %v12603_v7, %v8810_v30  ;;  %6813 = vmatpush.bf16.msra.mxu0 %v8683_v63  ;;  %v17177_v47 = vadd.f32 %v6497_v60, %v6479_v52 }
 0x1f1   :  { %6800 = vmatmul.bf16.gmra.mxu3 %v20532_v3  ;;  %v12759_v34 = vld [vmem:[%s20422_s1 + $0x5f4] sm:$0xf0]  ;;  %v9690_v61 = vld [vmem:[%s20422_s1 + $0x7e8] sm:$0xf]  ;;  %v9307_v49 = vor.u32 %v12727_v21, %v9306_v41 }
 0x1f2   :  { %v12823_v3 = vld [vmem:[%s20422_s1 + $0x7f4] sm:$0xf0]  ;;  %v9546_v59 = vld [vmem:[%s20422_s1 + $0x6c8] sm:$0xf]  ;;  %v9435_v12 = vor.u32 %v12759_v34, %v9434_v43  ;;  %6832 = vmatpush.bf16.msra.mxu1 %v8811_v36  ;;  %6870 = vmatpush.bf16.msra.mxu3 %v9067_v27 }
 0x1f3   :  { %v12787_v32 = vld [vmem:[%s20422_s1 + $0x6d4] sm:$0xf0]  ;;  %v9691_v31 = vor.u32 %v12823_v3, %v9690_v61  ;;  %v9290_v16 = vld [vmem:[%s20422_s1 + $0x4c8] sm:$0xf]  ;;  %v6462_v3 = vadd.f32 %v6461_v4, %v6443_v2  ;;  %6920 = vmatpush.bf16.msrb.mxu2 %v9563_v26  ;;  %v6480_v36 = vpop.f32.mrf.mxu2 }
 0x1f4   :  { %v12723_v30 = vld [vmem:[%s20422_s1 + $0x4d4] sm:$0xf0]  ;;  %v9418_v7 = vld [vmem:[%s20422_s1 + $0x5c8] sm:$0xf]  ;;  %6882 = vmatpush.bf16.msrb.mxu0 %v9307_v49  ;;  %v9547_v37 = vor.u32 %v12787_v32, %v9546_v59  ;;  %v6499_v35 = vpop.f32.mrf.mxu3 }
 0x1f5   :  { %v12755_v19 = vld [vmem:[%s20422_s1 + $0x5d4] sm:$0xf0]  ;;  %v9674_v11 = vld [vmem:[%s20422_s1 + $0x7c8] sm:$0xf]  ;;  %v9291_v20 = vor.u32 %v12723_v30, %v9290_v16  ;;  %v6481_v10 = vadd.f32 %v6480_v36, %v6462_v3 }
 0x1f6   :  { %v12819_v38 = vld [vmem:[%s20422_s1 + $0x7d4] sm:$0xf0]  ;;  %6901 = vmatpush.bf16.msrb.mxu1 %v9435_v12  ;;  %6939 = vmatpush.bf16.msrb.mxu3 %v9691_v31  ;;  %v9419_v41 = vor.u32 %v12755_v19, %v9418_v7  ;;  %v9530_v43 = vld [vmem:[%s20422_s1 + $0x6a8] sm:$0xf]  ;;  %v6511_v60 = vpop.f32.mrf.mxu0  ;;  %v6530_v26 = vpop.f32.mrf.mxu1 }
 0x1f7   :  { %v9675_v21 = vor.u32 %v12819_v38, %v9674_v11  ;;  %v12783_v52 = vld [vmem:[%s20422_s1 + $0x6b4] sm:$0xf0]  ;;  %v9274_v4 = vld [vmem:[%s20422_s1 + $0x4a8] sm:$0xf]  ;;  %6921 = vmatpush.bf16.msrb.mxu2 %v9547_v37  ;;  %v6512_v49 = vadd.f32 %v6511_v60, %v17053_v42  ;;  %v17210_v30 = vadd.f32 %v6499_v35, %v6481_v10 }
 0x1f8   :  { %v12719_v27 = vld [vmem:[%s20422_s1 + $0x4b4] sm:$0xf0]  ;;  %v9402_v12 = vld [vmem:[%s20422_s1 + $0x5a8] sm:$0xf]  ;;  %6883 = vmatpush.bf16.msrb.mxu0 %v9291_v20  ;;  %v9531_v59 = vor.u32 %v12783_v52, %v9530_v43 }
 0x1f9   :  { %v12751_v63 = vld [vmem:[%s20422_s1 + $0x5b4] sm:$0xf0]  ;;  %v9658_v34 = vld [vmem:[%s20422_s1 + $0x7a8] sm:$0xf]  ;;  %v9275_v32 = vor.u32 %v12719_v27, %v9274_v4  ;;  %v6531_v38 = vadd.f32 %v6530_v26, %v6512_v49 }
 0x1fa   :  { %v12815_v61 = vld [vmem:[%s20422_s1 + $0x7b4] sm:$0xf0]  ;;  %6902 = vmatpush.bf16.msrb.mxu1 %v9419_v41  ;;  %6940 = vmatpush.bf16.msrb.mxu3 %v9675_v21  ;;  %v9514_v31 = vld [vmem:[%s20422_s1 + $0x688] sm:$0xf]  ;;  %v9403_v7 = vor.u32 %v12751_v63, %v9402_v12 }
 0x1fb   :  { %v12779_v16 = vld [vmem:[%s20422_s1 + $0x694] sm:$0xf0]  ;;  %v9659_v2 = vor.u32 %v12815_v61, %v9658_v34  ;;  %v9258_v19 = vld [vmem:[%s20422_s1 + $0x488] sm:$0xf]  ;;  %6922 = vmatpush.bf16.msrb.mxu2 %v9531_v59  ;;  %v6549_v63 = vpop.f32.mrf.mxu2 }
 0x1fc   :  { %v12715_v42 = vld [vmem:[%s20422_s1 + $0x494] sm:$0xf0]  ;;  %v9386_v11 = vld [vmem:[%s20422_s1 + $0x588] sm:$0xf]  ;;  %6884 = vmatpush.bf16.msrb.mxu0 %v9275_v32  ;;  %v9515_v41 = vor.u32 %v12779_v16, %v9514_v31  ;;  %v6568_v34 = vpop.f32.mrf.mxu3  ;;  %v6550_v26 = vadd.f32 %v6549_v63, %v6531_v38 }
 0x1fd   :  { %6814 = vmatmul.bf16.vlgmr.msra.gmra.mxu0 %v13798_v48  ;;  %v12747_v3 = vld [vmem:[%s20422_s1 + $0x594] sm:$0xf0]  ;;  %v9642_v37 = vld [vmem:[%s20422_s1 + $0x788] sm:$0xf]  ;;  %v9259_v21 = vor.u32 %v12715_v42, %v9258_v19 }
 0x1fe   :  { %v12811_v20 = vld [vmem:[%s20422_s1 + $0x794] sm:$0xf0]  ;;  %v9498_v43 = vld [vmem:[%s20422_s1 + $0x668] sm:$0xf]  ;;  %6903 = vmatpush.bf16.msrb.mxu1 %v9403_v7  ;;  %6941 = vmatpush.bf16.msrb.mxu3 %v9659_v2  ;;  %v9387_v4 = vor.u32 %v12747_v3, %v9386_v11  ;;  %v6513_v49 = vpop.f32.mrf.mxu0  ;;  %v6532_v59 = vpop.f32.mrf.mxu1  ;;  %v17265_v19 = vadd.f32 %v6568_v34, %v6550_v26 }
 0x1ff   :  { %6833 = vmatmul.bf16.vlgmr.msra.gmra.mxu1 %v13809_v53  ;;  %v12775_v52 = vld [vmem:[%s20422_s1 + $0x674] sm:$0xf0]  ;;  %v9643_v27 = vor.u32 %v12811_v20, %v9642_v37  ;;  %v9242_v12 = vld [vmem:[%s20422_s1 + $0x468] sm:$0xf]  ;;  %v6514_v32 = vadd.f32 %v6513_v49, %v17110_v33  ;;  %6923 = vmatpush.bf16.msrb.mxu2 %v9515_v41 }
 0x200   :  { %6852 = vmatmul.bf16.vlgmr.msra.gmra.mxu2 %v13811_v54  ;;  %v12711_v36 = vld [vmem:[%s20422_s1 + $0x474] sm:$0xf0]  ;;  %v9370_v35 = vld [vmem:[%s20422_s1 + $0x568] sm:$0xf]  ;;  %6885 = vmatpush.bf16.msrb.mxu0 %v9259_v21  ;;  %v9499_v31 = vor.u32 %v12775_v52, %v9498_v43 }
 0x201   :  { %6871 = vmatmul.bf16.vlgmr.msra.gmra.mxu3 %v13819_v57  ;;  %v12743_v61 = vld [vmem:[%s20422_s1 + $0x574] sm:$0xf0]  ;;  %v9626_v10 = vld [vmem:[%s20422_s1 + $0x768] sm:$0xf]  ;;  %v9243_v16 = vor.u32 %v12711_v36, %v9242_v12  ;;  %v6533_v37 = vadd.f32 %v6532_v59, %v6514_v32 }
 0x202   :  { %v12807_v60 = vld [vmem:[%s20422_s1 + $0x774] sm:$0xf0]  ;;  %v9482_v7 = vld [vmem:[%s20422_s1 + $0x648] sm:$0xf]  ;;  %6904 = vmatpush.bf16.msrb.mxu1 %v9387_v4  ;;  %6942 = vmatpush.bf16.msrb.mxu3 %v9643_v27  ;;  %v9371_v42 = vor.u32 %v12743_v61, %v9370_v35 }
 0x203   :  { %v12771_v2 = vld [vmem:[%s20422_s1 + $0x654] sm:$0xf0]  ;;  %v9627_v11 = vor.u32 %v12807_v60, %v9626_v10  ;;  %v9226_v33 = vld [vmem:[%s20422_s1 + $0x448] sm:$0xf]  ;;  %6924 = vmatpush.bf16.msrb.mxu2 %v9499_v31  ;;  %v6551_v61 = vpop.f32.mrf.mxu2 }
 0x204   :  { %v12707_v38 = vld [vmem:[%s20422_s1 + $0x454] sm:$0xf0]  ;;  %v9354_v3 = vld [vmem:[%s20422_s1 + $0x548] sm:$0xf]  ;;  %6886 = vmatpush.bf16.msrb.mxu0 %v9243_v16  ;;  %v9483_v43 = vor.u32 %v12771_v2, %v9482_v7  ;;  %v6570_v10 = vpop.f32.mrf.mxu3  ;;  %v6552_v59 = vadd.f32 %v6551_v61, %v6533_v37 }
 0x205   :  { %v12739_v20 = vld [vmem:[%s20422_s1 + $0x554] sm:$0xf0]  ;;  %v9610_v41 = vld [vmem:[%s20422_s1 + $0x748] sm:$0xf]  ;;  %v9227_v52 = vor.u32 %v12707_v38, %v9226_v33 }
 0x206   :  { %v12803_v21 = vld [vmem:[%s20422_s1 + $0x754] sm:$0xf0]  ;;  %v9466_v4 = vld [vmem:[%s20422_s1 + $0x628] sm:$0xf]  ;;  %6905 = vmatpush.bf16.msrb.mxu1 %v9371_v42  ;;  %6943 = vmatpush.bf16.msrb.mxu3 %v9627_v11  ;;  %v9355_v12 = vor.u32 %v12739_v20, %v9354_v3  ;;  %v6516_v32 = vpop.f32.mrf.mxu0  ;;  %v6535_v31 = vpop.f32.mrf.mxu1  ;;  %v17322_v3 = vadd.f32 %v6570_v10, %v6552_v59 }
 0x207   :  { %v12767_v27 = vld [vmem:[%s20422_s1 + $0x634] sm:$0xf0]  ;;  %v9611_v36 = vor.u32 %v12803_v21, %v9610_v41  ;;  %v9210_v35 = vld [vmem:[%s20422_s1 + $0x428] sm:$0xf]  ;;  %v6517_v7 = vadd.f32 %v6516_v32, %v17177_v47  ;;  %6925 = vmatpush.bf16.msrb.mxu2 %v9483_v43 }
 0x208   :  { %v12703_v63 = vld [vmem:[%s20422_s1 + $0x434] sm:$0xf0]  ;;  %v9338_v34 = vld [vmem:[%s20422_s1 + $0x528] sm:$0xf]  ;;  %6887 = vmatpush.bf16.msrb.mxu0 %v9227_v52  ;;  %v9467_v2 = vor.u32 %v12767_v27, %v9466_v4 }
 0x209   :  { %v12735_v60 = vld [vmem:[%s20422_s1 + $0x534] sm:$0xf0]  ;;  %v9594_v26 = vld [vmem:[%s20422_s1 + $0x728] sm:$0xf]  ;;  %v9211_v42 = vor.u32 %v12703_v63, %v9210_v35  ;;  %v6536_v43 = vadd.f32 %v6535_v31, %v6517_v7 }
 0x20a   :  { %v12799_v49 = vld [vmem:[%s20422_s1 + $0x734] sm:$0xf0]  ;;  %v9450_v16 = vld [vmem:[%s20422_s1 + $0x608] sm:$0xf]  ;;  %6906 = vmatpush.bf16.msrb.mxu1 %v9355_v12  ;;  %6944 = vmatpush.bf16.msrb.mxu3 %v9611_v36  ;;  %v9339_v47 = vor.u32 %v12735_v60, %v9338_v34 }
 0x20b   :  { %v12763_v11 = vld [vmem:[%s20422_s1 + $0x614] sm:$0xf0]  ;;  %v9194_v33 = vld [vmem:[%s20422_s1 + $0x408] sm:$0xf]  ;;  %v9595_v37 = vor.u32 %v12799_v49, %v9594_v26  ;;  %6926 = vmatpush.bf16.msrb.mxu2 %v9467_v2  ;;  %v6554_v59 = vpop.f32.mrf.mxu2 }
 0x20c   :  { %v12699_v38 = vld [vmem:[%s20422_s1 + $0x414] sm:$0xf0]  ;;  %v9322_v20 = vld [vmem:[%s20422_s1 + $0x508] sm:$0xf]  ;;  %6888 = vmatpush.bf16.msrb.mxu0 %v9211_v42  ;;  %v9451_v63 = vor.u32 %v12763_v11, %v9450_v16  ;;  %v6555_v42 = vadd.f32 %v6554_v59, %v6536_v43 }
 0x20d   :  { %v12731_v41 = vld [vmem:[%s20422_s1 + $0x514] sm:$0xf0]  ;;  %v9578_v21 = vld [vmem:[%s20422_s1 + $0x708] sm:$0xf]  ;;  %6819 = vmatmul.bf16.gmra.mxu0 %v13930_v44  ;;  %v9195_v34 = vor.u32 %v12699_v38, %v9194_v33 }
 0x20e   :  { %v12795_v52 = vld [vmem:[%s20422_s1 + $0x714] sm:$0xf0]  ;;  %v10074_v4 = vld [vmem:[%s20422_s1 + $0xae8] sm:$0xf]  ;;  %6907 = vmatpush.bf16.msrb.mxu1 %v9339_v47  ;;  %6945 = vmatpush.bf16.msrb.mxu3 %v9595_v37  ;;  %v9323_v26 = vor.u32 %v12731_v41, %v9322_v20  ;;  %v6518_v11 = vpop.f32.mrf.mxu0  ;;  %v6537_v33 = vpop.f32.mrf.mxu1 }
 0x20f   :  { %6838 = vmatmul.bf16.gmra.mxu1 %v13941_v50  ;;  %v12919_v27 = vld [vmem:[%s20422_s1 + $0xaf4] sm:$0xf0]  ;;  %v9818_v12 = vld [vmem:[%s20422_s1 + $0x8e8] sm:$0xf]  ;;  %v9579_v49 = vor.u32 %v12795_v52, %v9578_v21  ;;  %v6519_v21 = vadd.f32 %v6518_v11, %v17210_v30  ;;  %6927 = vmatpush.bf16.msrb.mxu2 %v9451_v63 }
 0x210   :  { %6857 = vmatmul.bf16.gmra.mxu2 %v13943_v51  ;;  %v12855_v36 = vld [vmem:[%s20422_s1 + $0x8f4] sm:$0xf0]  ;;  %v9946_v35 = vld [vmem:[%s20422_s1 + $0x9e8] sm:$0xf]  ;;  %v10075_v31 = vor.u32 %v12919_v27, %v10074_v4  ;;  %6889 = vmatpush.bf16.msrb.mxu0 %v9195_v34 }
 0x211   :  { %6876 = vmatmul.bf16.gmra.mxu3 %v13951_v56  ;;  %v12887_v61 = vld [vmem:[%s20422_s1 + $0x9f4] sm:$0xf0]  ;;  %v10202_v10 = vld [vmem:[%s20422_s1 + $0xbe8] sm:$0xf]  ;;  %v9819_v16 = vor.u32 %v12855_v36, %v9818_v12  ;;  %v6538_v12 = vadd.f32 %v6537_v33, %v6519_v21 }
 0x212   :  { %v12951_v60 = vld [vmem:[%s20422_s1 + $0xbf4] sm:$0xf0]  ;;  %v6573_v32 = vpop.f32.mrf.mxu3  ;;  %v10058_v7 = vld [vmem:[%s20422_s1 + $0xac8] sm:$0xf]  ;;  %v9947_v38 = vor.u32 %v12887_v61, %v9946_v35  ;;  %6908 = vmatpush.bf16.msrb.mxu1 %v9323_v26  ;;  %6946 = vmatpush.bf16.msrb.mxu3 %v9579_v49 }
 0x213   :  { %v12915_v2 = vld [vmem:[%s20422_s1 + $0xad4] sm:$0xf0]  ;;  %v10203_v47 = vor.u32 %v12951_v60, %v10202_v10  ;;  %v9802_v37 = vld [vmem:[%s20422_s1 + $0x8c8] sm:$0xf]  ;;  %v17389_v27 = vadd.f32 %v6573_v32, %v6555_v42  ;;  %6996 = vmatpush.bf16.msra.mxu2 %v10075_v31  ;;  %v6556_v49 = vpop.f32.mrf.mxu2 }
 0x214   :  { %v12851_v20 = vld [vmem:[%s20422_s1 + $0x8d4] sm:$0xf0]  ;;  %v9930_v41 = vld [vmem:[%s20422_s1 + $0x9c8] sm:$0xf]  ;;  %6958 = vmatpush.bf16.msra.mxu0 %v9819_v16  ;;  %v10059_v30 = vor.u32 %v12915_v2, %v10058_v7  ;;  %v6557_v7 = vadd.f32 %v6556_v49, %v6538_v12 }
 0x215   :  { %v12883_v43 = vld [vmem:[%s20422_s1 + $0x9d4] sm:$0xf0]  ;;  %v10186_v52 = vld [vmem:[%s20422_s1 + $0xbc8] sm:$0xf]  ;;  %v9803_v36 = vor.u32 %v12851_v20, %v9802_v37 }
 0x216   :  { %v12947_v4 = vld [vmem:[%s20422_s1 + $0xbd4] sm:$0xf0]  ;;  %6977 = vmatpush.bf16.msra.mxu1 %v9947_v38  ;;  %7015 = vmatpush.bf16.msra.mxu3 %v10203_v47  ;;  %v9931_v35 = vor.u32 %v12883_v43, %v9930_v41  ;;  %v10042_v34 = vld [vmem:[%s20422_s1 + $0xaa8] sm:$0xf]  ;;  %v6587_v2 = vpop.f32.mrf.mxu0 }
 0x217   :  { %v10187_v63 = vor.u32 %v12947_v4, %v10186_v52  ;;  %v12911_v61 = vld [vmem:[%s20422_s1 + $0xab4] sm:$0xf0]  ;;  %v9786_v10 = vld [vmem:[%s20422_s1 + $0x8a8] sm:$0xf]  ;;  %6997 = vmatpush.bf16.msra.mxu2 %v10059_v30  ;;  %v6588_v11 = vadd.f32 %v6587_v2, %v17265_v19 }
 0x218   :  { %v12847_v60 = vld [vmem:[%s20422_s1 + $0x8b4] sm:$0xf0]  ;;  %v9914_v26 = vld [vmem:[%s20422_s1 + $0x9a8] sm:$0xf]  ;;  %6959 = vmatpush.bf16.msra.mxu0 %v9803_v36  ;;  %v6606_v42 = vpop.f32.mrf.mxu1  ;;  %v10043_v33 = vor.u32 %v12911_v61, %v10042_v34 }
 0x219   :  { %v12879_v32 = vld [vmem:[%s20422_s1 + $0x9b4] sm:$0xf0]  ;;  %v10170_v31 = vld [vmem:[%s20422_s1 + $0xba8] sm:$0xf]  ;;  %v9787_v38 = vor.u32 %v12847_v60, %v9786_v10  ;;  %v6607_v4 = vadd.f32 %v6606_v42, %v6588_v11 }
 0x21a   :  { %v6575_v59 = vpop.f32.mrf.mxu3  ;;  %v12943_v16 = vld [vmem:[%s20422_s1 + $0xbb4] sm:$0xf0]  ;;  %6978 = vmatpush.bf16.msra.mxu1 %v9931_v35  ;;  %7016 = vmatpush.bf16.msra.mxu3 %v10187_v63  ;;  %v10026_v47 = vld [vmem:[%s20422_s1 + $0xa88] sm:$0xf]  ;;  %v9915_v41 = vor.u32 %v12879_v32, %v9914_v26 }
 0x21b   :  { %v12907_v37 = vld [vmem:[%s20422_s1 + $0xa94] sm:$0xf0]  ;;  %v17422_v20 = vadd.f32 %v6575_v59, %v6557_v7  ;;  %v10171_v21 = vor.u32 %v12943_v16, %v10170_v31  ;;  %v9770_v43 = vld [vmem:[%s20422_s1 + $0x888] sm:$0xf]  ;;  %6998 = vmatpush.bf16.msra.mxu2 %v10043_v33 }
 0x21c   :  { %v12843_v19 = vld [vmem:[%s20422_s1 + $0x894] sm:$0xf0]  ;;  %v9898_v52 = vld [vmem:[%s20422_s1 + $0x988] sm:$0xf]  ;;  %6960 = vmatpush.bf16.msra.mxu0 %v9787_v38  ;;  %v10027_v35 = vor.u32 %v12907_v37, %v10026_v47  ;;  %v6625_v32 = vpop.f32.mrf.mxu2 }
 0x21d   :  { %6890 = vmatmul.bf16.vlgmr.msrb.gmra.mxu0 %v14086_v0  ;;  %v12875_v12 = vld [vmem:[%s20422_s1 + $0x994] sm:$0xf0]  ;;  %v10154_v30 = vld [vmem:[%s20422_s1 + $0xb88] sm:$0xf]  ;;  %v9771_v63 = vor.u32 %v12843_v19, %v9770_v43  ;;  %v6626_v42 = vadd.f32 %v6625_v32, %v6607_v4 }
 0x21e   :  { %v12939_v36 = vld [vmem:[%s20422_s1 + $0xb94] sm:$0xf0]  ;;  %v10010_v34 = vld [vmem:[%s20422_s1 + $0xa68] sm:$0xf]  ;;  %6979 = vmatpush.bf16.msra.mxu1 %v9915_v41  ;;  %7017 = vmatpush.bf16.msra.mxu3 %v10171_v21  ;;  %v9899_v10 = vor.u32 %v12875_v12, %v9898_v52  ;;  %v6589_v11 = vpop.f32.mrf.mxu0 }
 0x21f   :  { %6909 = vmatmul.bf16.vlgmr.msrb.gmra.mxu1 %v14088_v1  ;;  %v12903_v61 = vld [vmem:[%s20422_s1 + $0xa74] sm:$0xf0]  ;;  %v10155_v60 = vor.u32 %v12939_v36, %v10154_v30  ;;  %v9754_v26 = vld [vmem:[%s20422_s1 + $0x868] sm:$0xf]  ;;  %v6590_v38 = vadd.f32 %v6589_v11, %v17322_v3  ;;  %6999 = vmatpush.bf16.msra.mxu2 %v10027_v35 }
 0x220   :  { %6928 = vmatmul.bf16.vlgmr.msrb.gmra.mxu2 %v14099_v5  ;;  %v12839_v49 = vld [vmem:[%s20422_s1 + $0x874] sm:$0xf0]  ;;  %v9882_v59 = vld [vmem:[%s20422_s1 + $0x968] sm:$0xf]  ;;  %v6608_v33 = vpop.f32.mrf.mxu1  ;;  %6961 = vmatpush.bf16.msra.mxu0 %v9771_v63  ;;  %v10011_v47 = vor.u32 %v12903_v61, %v10010_v34 }
 0x221   :  { %6947 = vmatmul.bf16.vlgmr.msrb.gmra.mxu3 %v14101_v6  ;;  %v12871_v16 = vld [vmem:[%s20422_s1 + $0x974] sm:$0xf0]  ;;  %v10138_v7 = vld [vmem:[%s20422_s1 + $0xb68] sm:$0xf]  ;;  %v9755_v37 = vor.u32 %v12839_v49, %v9754_v26  ;;  %v6609_v30 = vadd.f32 %v6608_v33, %v6590_v38 }
 0x222   :  { %v6644_v31 = vpop.f32.mrf.mxu3  ;;  %v12935_v2 = vld [vmem:[%s20422_s1 + $0xb74] sm:$0xf0]  ;;  %v9994_v41 = vld [vmem:[%s20422_s1 + $0xa48] sm:$0xf]  ;;  %6980 = vmatpush.bf16.msra.mxu1 %v9899_v10  ;;  %7018 = vmatpush.bf16.msra.mxu3 %v10155_v60  ;;  %v9883_v19 = vor.u32 %v12871_v16, %v9882_v59 }
 0x223   :  { %v12899_v21 = vld [vmem:[%s20422_s1 + $0xa54] sm:$0xf0]  ;;  %v17477_v43 = vadd.f32 %v6644_v31, %v6626_v42  ;;  %v10139_v52 = vor.u32 %v12935_v2, %v10138_v7  ;;  %v9738_v3 = vld [vmem:[%s20422_s1 + $0x848] sm:$0xf]  ;;  %7000 = vmatpush.bf16.msra.mxu2 %v10011_v47 }
 0x224   :  { %v12835_v4 = vld [vmem:[%s20422_s1 + $0x854] sm:$0xf0]  ;;  %v9866_v12 = vld [vmem:[%s20422_s1 + $0x948] sm:$0xf]  ;;  %6962 = vmatpush.bf16.msra.mxu0 %v9755_v37  ;;  %v9995_v34 = vor.u32 %v12899_v21, %v9994_v41  ;;  %v6627_v16 = vpop.f32.mrf.mxu2 }
 0x225   :  { %v12867_v36 = vld [vmem:[%s20422_s1 + $0x954] sm:$0xf0]  ;;  %v10122_v35 = vld [vmem:[%s20422_s1 + $0xb48] sm:$0xf]  ;;  %v9739_v61 = vor.u32 %v12835_v4, %v9738_v3  ;;  %v6628_v33 = vadd.f32 %v6627_v16, %v6609_v30 }
 0x226   :  { %v12931_v63 = vld [vmem:[%s20422_s1 + $0xb54] sm:$0xf0]  ;;  %v9978_v10 = vld [vmem:[%s20422_s1 + $0xa28] sm:$0xf]  ;;  %6981 = vmatpush.bf16.msra.mxu1 %v9883_v19  ;;  %7019 = vmatpush.bf16.msra.mxu3 %v10139_v52  ;;  %v9867_v26 = vor.u32 %v12867_v36, %v9866_v12  ;;  %v6592_v38 = vpop.f32.mrf.mxu0 }
 0x227   :  { %v12895_v60 = vld [vmem:[%s20422_s1 + $0xa34] sm:$0xf0]  ;;  %v10123_v49 = vor.u32 %v12931_v63, %v10122_v35  ;;  %v9722_v59 = vld [vmem:[%s20422_s1 + $0x828] sm:$0xf]  ;;  %v6593_v41 = vadd.f32 %v6592_v38, %v17389_v27  ;;  %7001 = vmatpush.bf16.msra.mxu2 %v9995_v34 }
 0x228   :  { %v12831_v32 = vld [vmem:[%s20422_s1 + $0x834] sm:$0xf0]  ;;  %v9850_v31 = vld [vmem:[%s20422_s1 + $0x928] sm:$0xf]  ;;  %6963 = vmatpush.bf16.msra.mxu0 %v9739_v61  ;;  %v9979_v21 = vor.u32 %v12895_v60, %v9978_v10 }
 0x229   :  { %v12863_v2 = vld [vmem:[%s20422_s1 + $0x934] sm:$0xf0]  ;;  %v10106_v42 = vld [vmem:[%s20422_s1 + $0xb28] sm:$0xf]  ;;  %v9723_v19 = vor.u32 %v12831_v32, %v9722_v59 }
 0x22a   :  { %v6646_v7 = vpop.f32.mrf.mxu3  ;;  %v12927_v11 = vld [vmem:[%s20422_s1 + $0xb34] sm:$0xf0]  ;;  %v6611_v47 = vpop.f32.mrf.mxu1  ;;  %v9962_v37 = vld [vmem:[%s20422_s1 + $0xa08] sm:$0xf]  ;;  %6982 = vmatpush.bf16.msra.mxu1 %v9867_v26  ;;  %7020 = vmatpush.bf16.msra.mxu3 %v10123_v49  ;;  %v9851_v27 = vor.u32 %v12863_v2, %v9850_v31 }
 0x22b   :  { %v12891_v52 = vld [vmem:[%s20422_s1 + $0xa14] sm:$0xf0]  ;;  %v9706_v3 = vld [vmem:[%s20422_s1 + $0x808] sm:$0xf]  ;;  %v17534_v12 = vadd.f32 %v6646_v7, %v6628_v33  ;;  %v10107_v30 = vor.u32 %v12927_v11, %v10106_v42  ;;  %v6612_v34 = vadd.f32 %v6611_v47, %v6593_v41  ;;  %7002 = vmatpush.bf16.msra.mxu2 %v9979_v21 }
 0x22c   :  { %v12827_v4 = vld [vmem:[%s20422_s1 + $0x814] sm:$0xf0]  ;;  %v9834_v36 = vld [vmem:[%s20422_s1 + $0x908] sm:$0xf]  ;;  %6964 = vmatpush.bf16.msra.mxu0 %v9723_v19  ;;  %v9963_v32 = vor.u32 %v12891_v52, %v9962_v37 }
 0x22d   :  { %v12859_v35 = vld [vmem:[%s20422_s1 + $0x914] sm:$0xf0]  ;;  %v10090_v63 = vld [vmem:[%s20422_s1 + $0xb08] sm:$0xf]  ;;  %6895 = vmatmul.bf16.gmra.mxu0 %v14218_v8  ;;  %v9707_v31 = vor.u32 %v12827_v4, %v9706_v3  ;;  %v6630_v33 = vpop.f32.mrf.mxu2 }
 0x22e   :  { %v12923_v61 = vld [vmem:[%s20422_s1 + $0xb14] sm:$0xf0]  ;;  %v10586_v10 = vld [vmem:[%s20422_s1 + $0xee8] sm:$0xf]  ;;  %6983 = vmatpush.bf16.msra.mxu1 %v9851_v27  ;;  %7021 = vmatpush.bf16.msra.mxu3 %v10107_v30  ;;  %v9835_v42 = vor.u32 %v12859_v35, %v9834_v36  ;;  %v6631_v19 = vadd.f32 %v6630_v33, %v6612_v34  ;;  %v6594_v52 = vpop.f32.mrf.mxu0 }
 0x22f   :  { %6914 = vmatmul.bf16.gmra.mxu1 %v14220_v9  ;;  %v13047_v60 = vld [vmem:[%s20422_s1 + $0xef4] sm:$0xf0]  ;;  %v10330_v26 = vld [vmem:[%s20422_s1 + $0xce8] sm:$0xf]  ;;  %v10091_v11 = vor.u32 %v12923_v61, %v10090_v63  ;;  %v6595_v63 = vadd.f32 %v6594_v52, %v17422_v20  ;;  %7003 = vmatpush.bf16.msra.mxu2 %v9963_v32 }
 0x230   :  { %6933 = vmatmul.bf16.gmra.mxu2 %v14231_v13  ;;  %v12983_v49 = vld [vmem:[%s20422_s1 + $0xcf4] sm:$0xf0]  ;;  %v10458_v59 = vld [vmem:[%s20422_s1 + $0xde8] sm:$0xf]  ;;  %v10587_v47 = vor.u32 %v13047_v60, %v10586_v10  ;;  %6965 = vmatpush.bf16.msra.mxu0 %v9707_v31 }
 0x231   :  { %6952 = vmatmul.bf16.gmra.mxu3 %v14233_v14  ;;  %v13015_v16 = vld [vmem:[%s20422_s1 + $0xdf4] sm:$0xf0]  ;;  %v10714_v7 = vld [vmem:[%s20422_s1 + $0xfe8] sm:$0xf]  ;;  %v10331_v37 = vor.u32 %v12983_v49, %v10330_v26 }
 0x232   :  { %v13079_v2 = vld [vmem:[%s20422_s1 + $0xff4] sm:$0xf0]  ;;  %v10570_v41 = vld [vmem:[%s20422_s1 + $0xec8] sm:$0xf]  ;;  %v6613_v3 = vpop.f32.mrf.mxu1  ;;  %v10459_v4 = vor.u32 %v13015_v16, %v10458_v59  ;;  %6984 = vmatpush.bf16.msra.mxu1 %v9835_v42  ;;  %7022 = vmatpush.bf16.msra.mxu3 %v10091_v11 }
 0x233   :  { %v6649_v38 = vpop.f32.mrf.mxu3  ;;  %v13043_v21 = vld [vmem:[%s20422_s1 + $0xed4] sm:$0xf0]  ;;  %v10715_v27 = vor.u32 %v13079_v2, %v10714_v7  ;;  %v10314_v30 = vld [vmem:[%s20422_s1 + $0xcc8] sm:$0xf]  ;;  %v6614_v26 = vadd.f32 %v6613_v3, %v6595_v63  ;;  %7072 = vmatpush.bf16.msrb.mxu2 %v10587_v47 }
 0x234   :  { %v12979_v36 = vld [vmem:[%s20422_s1 + $0xcd4] sm:$0xf0]  ;;  %v10442_v35 = vld [vmem:[%s20422_s1 + $0xdc8] sm:$0xf]  ;;  %v17601_v60 = vadd.f32 %v6649_v38, %v6631_v19  ;;  %7034 = vmatpush.bf16.msrb.mxu0 %v10331_v37  ;;  %v10571_v20 = vor.u32 %v13043_v21, %v10570_v41 }
 0x235   :  { %v13011_v34 = vld [vmem:[%s20422_s1 + $0xdd4] sm:$0xf0]  ;;  %v10698_v61 = vld [vmem:[%s20422_s1 + $0xfc8] sm:$0xf]  ;;  %v10315_v49 = vor.u32 %v12979_v36, %v10314_v30  ;;  %v6632_v11 = vpop.f32.mrf.mxu2 }
 0x236   :  { %v13075_v10 = vld [vmem:[%s20422_s1 + $0xfd4] sm:$0xf0]  ;;  %7053 = vmatpush.bf16.msrb.mxu1 %v10459_v4  ;;  %7091 = vmatpush.bf16.msrb.mxu3 %v10715_v27  ;;  %v10443_v59 = vor.u32 %v13011_v34, %v10442_v35  ;;  %v10554_v31 = vld [vmem:[%s20422_s1 + $0xea8] sm:$0xf]  ;;  %v6633_v41 = vadd.f32 %v6632_v11, %v6614_v26  ;;  %v6663_v21 = vpop.f32.mrf.mxu0 }
 0x237   :  { %v10699_v32 = vor.u32 %v13075_v10, %v10698_v61  ;;  %v13039_v16 = vld [vmem:[%s20422_s1 + $0xeb4] sm:$0xf0]  ;;  %v10298_v7 = vld [vmem:[%s20422_s1 + $0xca8] sm:$0xf]  ;;  %7073 = vmatpush.bf16.msrb.mxu2 %v10571_v20  ;;  %v6664_v52 = vadd.f32 %v6663_v21, %v17477_v43 }
 0x238   :  { %v12975_v2 = vld [vmem:[%s20422_s1 + $0xcb4] sm:$0xf0]  ;;  %v10426_v42 = vld [vmem:[%s20422_s1 + $0xda8] sm:$0xf]  ;;  %7035 = vmatpush.bf16.msrb.mxu0 %v10315_v49  ;;  %v10555_v3 = vor.u32 %v13039_v16, %v10554_v31 }
 0x239   :  { %v13007_v38 = vld [vmem:[%s20422_s1 + $0xdb4] sm:$0xf0]  ;;  %v10682_v47 = vld [vmem:[%s20422_s1 + $0xfa8] sm:$0xf]  ;;  %v10299_v4 = vor.u32 %v12975_v2, %v10298_v7 }
 0x23a   :  { %v13071_v37 = vld [vmem:[%s20422_s1 + $0xfb4] sm:$0xf0]  ;;  %v6682_v19 = vpop.f32.mrf.mxu1  ;;  %7054 = vmatpush.bf16.msrb.mxu1 %v10443_v59  ;;  %7092 = vmatpush.bf16.msrb.mxu3 %v10699_v32  ;;  %v10538_v27 = vld [vmem:[%s20422_s1 + $0xe88] sm:$0xf]  ;;  %v10427_v35 = vor.u32 %v13007_v38, %v10426_v42 }
 0x23b   :  { %v6651_v33 = vpop.f32.mrf.mxu3  ;;  %v13035_v30 = vld [vmem:[%s20422_s1 + $0xe94] sm:$0xf0]  ;;  %v10683_v63 = vor.u32 %v13071_v37, %v10682_v47  ;;  %v10282_v34 = vld [vmem:[%s20422_s1 + $0xc88] sm:$0xf]  ;;  %v6683_v10 = vadd.f32 %v6682_v19, %v6664_v52  ;;  %7074 = vmatpush.bf16.msrb.mxu2 %v10555_v3 }
 0x23c   :  { %v17634_v36 = vadd.f32 %v6651_v33, %v6633_v41  ;;  %v12971_v43 = vld [vmem:[%s20422_s1 + $0xc94] sm:$0xf0]  ;;  %v10410_v61 = vld [vmem:[%s20422_s1 + $0xd88] sm:$0xf]  ;;  %7036 = vmatpush.bf16.msrb.mxu0 %v10299_v4  ;;  %v10539_v59 = vor.u32 %v13035_v30, %v10538_v27 }
 0x23d   :  { %6966 = vmatmul.bf16.vlgmr.msra.gmra.mxu0 %v14356_v23  ;;  %v13003_v26 = vld [vmem:[%s20422_s1 + $0xd94] sm:$0xf0]  ;;  %v10666_v20 = vld [vmem:[%s20422_s1 + $0xf88] sm:$0xf]  ;;  %v10283_v32 = vor.u32 %v12971_v43, %v10282_v34  ;;  %v6701_v38 = vpop.f32.mrf.mxu2 }
 0x23e   :  { %v13067_v49 = vld [vmem:[%s20422_s1 + $0xf94] sm:$0xf0]  ;;  %v10522_v31 = vld [vmem:[%s20422_s1 + $0xe68] sm:$0xf]  ;;  %7055 = vmatpush.bf16.msrb.mxu1 %v10427_v35  ;;  %7093 = vmatpush.bf16.msrb.mxu3 %v10683_v63  ;;  %v10411_v7 = vor.u32 %v13003_v26, %v10410_v61  ;;  %v6702_v19 = vadd.f32 %v6701_v38, %v6683_v10  ;;  %v6665_v52 = vpop.f32.mrf.mxu0 }
 0x23f   :  { %6985 = vmatmul.bf16.vlgmr.msra.gmra.mxu1 %v14358_v24  ;;  %v13031_v16 = vld [vmem:[%s20422_s1 + $0xe74] sm:$0xf0]  ;;  %v10667_v2 = vor.u32 %v13067_v49, %v10666_v20  ;;  %v10266_v42 = vld [vmem:[%s20422_s1 + $0xc68] sm:$0xf]  ;;  %v6666_v4 = vadd.f32 %v6665_v52, %v17534_v12  ;;  %7075 = vmatpush.bf16.msrb.mxu2 %v10539_v59 }
 0x240   :  { %7004 = vmatmul.bf16.vlgmr.msra.gmra.mxu2 %v14369_v28  ;;  %v12967_v11 = vld [vmem:[%s20422_s1 + $0xc74] sm:$0xf0]  ;;  %v10394_v33 = vld [vmem:[%s20422_s1 + $0xd68] sm:$0xf]  ;;  %7037 = vmatpush.bf16.msrb.mxu0 %v10283_v32  ;;  %v10523_v27 = vor.u32 %v13031_v16, %v10522_v31 }
 0x241   :  { %7023 = vmatmul.bf16.vlgmr.msra.gmra.mxu3 %v14371_v29  ;;  %v12999_v37 = vld [vmem:[%s20422_s1 + $0xd74] sm:$0xf0]  ;;  %v10650_v41 = vld [vmem:[%s20422_s1 + $0xf68] sm:$0xf]  ;;  %v10267_v30 = vor.u32 %v12967_v11, %v10266_v42 }
 0x242   :  { %v13063_v21 = vld [vmem:[%s20422_s1 + $0xf74] sm:$0xf0]  ;;  %v6684_v3 = vpop.f32.mrf.mxu1  ;;  %v10506_v35 = vld [vmem:[%s20422_s1 + $0xe48] sm:$0xf]  ;;  %7056 = vmatpush.bf16.msrb.mxu1 %v10411_v7  ;;  %7094 = vmatpush.bf16.msrb.mxu3 %v10667_v2  ;;  %v10395_v43 = vor.u32 %v12999_v37, %v10394_v33 }
 0x243   :  { %v6720_v47 = vpop.f32.mrf.mxu3  ;;  %v13027_v63 = vld [vmem:[%s20422_s1 + $0xe54] sm:$0xf0]  ;;  %v10651_v61 = vor.u32 %v13063_v21, %v10650_v41  ;;  %v10250_v12 = vld [vmem:[%s20422_s1 + $0xc48] sm:$0xf]  ;;  %v6685_v20 = vadd.f32 %v6684_v3, %v6666_v4  ;;  %7076 = vmatpush.bf16.msrb.mxu2 %v10523_v27 }
 0x244   :  { %v17689_v34 = vadd.f32 %v6720_v47, %v6702_v19  ;;  %v12963_v10 = vld [vmem:[%s20422_s1 + $0xc54] sm:$0xf0]  ;;  %v10378_v26 = vld [vmem:[%s20422_s1 + $0xd48] sm:$0xf]  ;;  %7038 = vmatpush.bf16.msrb.mxu0 %v10267_v30  ;;  %v10507_v31 = vor.u32 %v13027_v63, %v10506_v35 }
 0x245   :  { %v12995_v49 = vld [vmem:[%s20422_s1 + $0xd54] sm:$0xf0]  ;;  %v10634_v59 = vld [vmem:[%s20422_s1 + $0xf48] sm:$0xf]  ;;  %v10251_v16 = vor.u32 %v12963_v10, %v10250_v12  ;;  %v6703_v37 = vpop.f32.mrf.mxu2 }
 0x246   :  { %v13059_v32 = vld [vmem:[%s20422_s1 + $0xf54] sm:$0xf0]  ;;  %v10490_v7 = vld [vmem:[%s20422_s1 + $0xe28] sm:$0xf]  ;;  %7057 = vmatpush.bf16.msrb.mxu1 %v10395_v43  ;;  %7095 = vmatpush.bf16.msrb.mxu3 %v10651_v61  ;;  %v10379_v42 = vor.u32 %v12995_v49, %v10378_v26  ;;  %v6704_v3 = vadd.f32 %v6703_v37, %v6685_v20 }
 0x247   :  { %v13023_v2 = vld [vmem:[%s20422_s1 + $0xe34] sm:$0xf0]  ;;  %v10635_v11 = vor.u32 %v13059_v32, %v10634_v59  ;;  %v10234_v33 = vld [vmem:[%s20422_s1 + $0xc28] sm:$0xf]  ;;  %7077 = vmatpush.bf16.msrb.mxu2 %v10507_v31 }
 0x248   :  { %v12959_v38 = vld [vmem:[%s20422_s1 + $0xc34] sm:$0xf0]  ;;  %v10362_v47 = vld [vmem:[%s20422_s1 + $0xd28] sm:$0xf]  ;;  %v6668_v4 = vpop.f32.mrf.mxu0  ;;  %7039 = vmatpush.bf16.msrb.mxu0 %v10251_v16  ;;  %v10491_v63 = vor.u32 %v13023_v2, %v10490_v7 }
 0x249   :  { %v12991_v21 = vld [vmem:[%s20422_s1 + $0xd34] sm:$0xf0]  ;;  %v10618_v19 = vld [vmem:[%s20422_s1 + $0xf28] sm:$0xf]  ;;  %v6669_v35 = vadd.f32 %v6668_v4, %v17601_v60  ;;  %v10235_v43 = vor.u32 %v12959_v38, %v10234_v33 }
 0x24a   :  { %v13055_v52 = vld [vmem:[%s20422_s1 + $0xf34] sm:$0xf0]  ;;  %v10474_v30 = vld [vmem:[%s20422_s1 + $0xe08] sm:$0xf]  ;;  %7058 = vmatpush.bf16.msrb.mxu1 %v10379_v42  ;;  %7096 = vmatpush.bf16.msrb.mxu3 %v10635_v11  ;;  %v10363_v60 = vor.u32 %v12991_v21, %v10362_v47 }
 0x24b   :  { %v6722_v41 = vpop.f32.mrf.mxu3  ;;  %v13019_v61 = vld [vmem:[%s20422_s1 + $0xe14] sm:$0xf0]  ;;  %v10218_v12 = vld [vmem:[%s20422_s1 + $0xc08] sm:$0xf]  ;;  %v10619_v20 = vor.u32 %v13055_v52, %v10618_v19  ;;  %7078 = vmatpush.bf16.msrb.mxu2 %v10491_v63 }
 0x24c   :  { %v6687_v27 = vpop.f32.mrf.mxu1  ;;  %v12955_v10 = vld [vmem:[%s20422_s1 + $0xc14] sm:$0xf0]  ;;  %v17746_v26 = vadd.f32 %v6722_v41, %v6704_v3  ;;  %v10346_v49 = vld [vmem:[%s20422_s1 + $0xd08] sm:$0xf]  ;;  %7040 = vmatpush.bf16.msrb.mxu0 %v10235_v43  ;;  %v10475_v38 = vor.u32 %v13019_v61, %v10474_v30 }
 0x24d   :  { %v12987_v59 = vld [vmem:[%s20422_s1 + $0xd14] sm:$0xf0]  ;;  %v10602_v32 = vld [vmem:[%s20422_s1 + $0xf08] sm:$0xf]  ;;  %v6688_v31 = vadd.f32 %v6687_v27, %v6669_v35  ;;  %6971 = vmatmul.bf16.gmra.mxu0 %v14488_v39  ;;  %v10219_v47 = vor.u32 %v12955_v10, %v10218_v12  ;;  %v6706_v3 = vpop.f32.mrf.mxu2 }
 0x24e   :  { %v13051_v16 = vld [vmem:[%s20422_s1 + $0xf14] sm:$0xf0]  ;;  %v11098_v7 = vld [vmem:[%s20422_s1 + $0x12e8] sm:$0xf]  ;;  %7059 = vmatpush.bf16.msrb.mxu1 %v10363_v60  ;;  %7097 = vmatpush.bf16.msrb.mxu3 %v10619_v20  ;;  %v10347_v19 = vor.u32 %v12987_v59, %v10346_v49 }
 0x24f   :  { %6990 = vmatmul.bf16.gmra.mxu1 %v14490_v40  ;;  %v13175_v2 = vld [vmem:[%s20422_s1 + $0x12f4] sm:$0xf0]  ;;  %v10842_v42 = vld [vmem:[%s20422_s1 + $0x10e8] sm:$0xf]  ;;  %v10603_v52 = vor.u32 %v13051_v16, %v10602_v32  ;;  %v6707_v43 = vadd.f32 %v6706_v3, %v6688_v31  ;;  %7079 = vmatpush.bf16.msrb.mxu2 %v10475_v38 }
 0x250   :  { %7009 = vmatmul.bf16.gmra.mxu2 %v14501_v45  ;;  %v13111_v11 = vld [vmem:[%s20422_s1 + $0x10f4] sm:$0xf0]  ;;  %v10970_v33 = vld [vmem:[%s20422_s1 + $0x11e8] sm:$0xf]  ;;  %v11099_v27 = vor.u32 %v13175_v2, %v11098_v7  ;;  %v6670_v61 = vpop.f32.mrf.mxu0  ;;  %7041 = vmatpush.bf16.msrb.mxu0 %v10219_v47 }
 0x251   :  { %7028 = vmatmul.bf16.gmra.mxu3 %v14503_v46  ;;  %v13143_v37 = vld [vmem:[%s20422_s1 + $0x11f4] sm:$0xf0]  ;;  %v11226_v41 = vld [vmem:[%s20422_s1 + $0x13e8] sm:$0xf]  ;;  %v10843_v30 = vor.u32 %v13111_v11, %v10842_v42  ;;  %v6671_v32 = vadd.f32 %v6670_v61, %v17634_v36 }
 0x252   :  { %v13207_v21 = vld [vmem:[%s20422_s1 + $0x13f4] sm:$0xf0]  ;;  %v11082_v35 = vld [vmem:[%s20422_s1 + $0x12c8] sm:$0xf]  ;;  %v10971_v10 = vor.u32 %v13143_v37, %v10970_v33  ;;  %7060 = vmatpush.bf16.msrb.mxu1 %v10347_v19  ;;  %7098 = vmatpush.bf16.msrb.mxu3 %v10603_v52 }
 0x253   :  { %v13171_v63 = vld [vmem:[%s20422_s1 + $0x12d4] sm:$0xf0]  ;;  %v11227_v60 = vor.u32 %v13207_v21, %v11226_v41  ;;  %v10826_v20 = vld [vmem:[%s20422_s1 + $0x10c8] sm:$0xf]  ;;  %7148 = vmatpush.bf16.msra.mxu2 %v11099_v27 }
 0x254   :  { %v6725_v4 = vpop.f32.mrf.mxu3  ;;  %v6689_v12 = vpop.f32.mrf.mxu1  ;;  %v13107_v49 = vld [vmem:[%s20422_s1 + $0x10d4] sm:$0xf0]  ;;  %v10954_v59 = vld [vmem:[%s20422_s1 + $0x11c8] sm:$0xf]  ;;  %7110 = vmatpush.bf16.msra.mxu0 %v10843_v30  ;;  %v11083_v36 = vor.u32 %v13171_v63, %v11082_v35 }
 0x255   :  { %v13139_v31 = vld [vmem:[%s20422_s1 + $0x11d4] sm:$0xf0]  ;;  %v11210_v16 = vld [vmem:[%s20422_s1 + $0x13c8] sm:$0xf]  ;;  %v17813_v2 = vadd.f32 %v6725_v4, %v6707_v43  ;;  %v6690_v42 = vadd.f32 %v6689_v12, %v6671_v32  ;;  %v10827_v11 = vor.u32 %v13107_v49, %v10826_v20  ;;  %v6708_v52 = vpop.f32.mrf.mxu2 }
 0x256   :  { %v13203_v7 = vld [vmem:[%s20422_s1 + $0x13d4] sm:$0xf0]  ;;  %7129 = vmatpush.bf16.msra.mxu1 %v10971_v10  ;;  %7167 = vmatpush.bf16.msra.mxu3 %v11227_v60  ;;  %v10955_v33 = vor.u32 %v13139_v31, %v10954_v59  ;;  %v11066_v47 = vld [vmem:[%s20422_s1 + $0x12a8] sm:$0xf] }
 0x257   :  { %v11211_v38 = vor.u32 %v13203_v7, %v11210_v16  ;;  %v13167_v37 = vld [vmem:[%s20422_s1 + $0x12b4] sm:$0xf0]  ;;  %v10810_v41 = vld [vmem:[%s20422_s1 + $0x10a8] sm:$0xf]  ;;  %7149 = vmatpush.bf16.msra.mxu2 %v11083_v36  ;;  %v6709_v35 = vadd.f32 %v6708_v52, %v6690_v42 }
 0x258   :  { %v13103_v21 = vld [vmem:[%s20422_s1 + $0x10b4] sm:$0xf0]  ;;  %v10938_v19 = vld [vmem:[%s20422_s1 + $0x11a8] sm:$0xf]  ;;  %7111 = vmatpush.bf16.msra.mxu0 %v10827_v11  ;;  %v11067_v12 = vor.u32 %v13167_v37, %v11066_v47 }
 0x259   :  { %v13135_v4 = vld [vmem:[%s20422_s1 + $0x11b4] sm:$0xf0]  ;;  %v11194_v27 = vld [vmem:[%s20422_s1 + $0x13a8] sm:$0xf]  ;;  %v10811_v10 = vor.u32 %v13103_v21, %v10810_v41 }
 0x25a   :  { %v13199_v30 = vld [vmem:[%s20422_s1 + $0x13b4] sm:$0xf0]  ;;  %v6739_v63 = vpop.f32.mrf.mxu0  ;;  %7130 = vmatpush.bf16.msra.mxu1 %v10955_v33  ;;  %7168 = vmatpush.bf16.msra.mxu3 %v11211_v38  ;;  %v11050_v60 = vld [vmem:[%s20422_s1 + $0x1288] sm:$0xf]  ;;  %v10939_v59 = vor.u32 %v13135_v4, %v10938_v19 }
 0x25b   :  { %v6740_v61 = vadd.f32 %v6739_v63, %v17689_v34  ;;  %v13163_v20 = vld [vmem:[%s20422_s1 + $0x1294] sm:$0xf0]  ;;  %v11195_v32 = vor.u32 %v13199_v30, %v11194_v27  ;;  %v10794_v31 = vld [vmem:[%s20422_s1 + $0x1088] sm:$0xf]  ;;  %7150 = vmatpush.bf16.msra.mxu2 %v11067_v12 }
 0x25c   :  { %v6727_v3 = vpop.f32.mrf.mxu3  ;;  %v6758_v43 = vpop.f32.mrf.mxu1  ;;  %v13099_v34 = vld [vmem:[%s20422_s1 + $0x1094] sm:$0xf0]  ;;  %v10922_v16 = vld [vmem:[%s20422_s1 + $0x1188] sm:$0xf]  ;;  %7112 = vmatpush.bf16.msra.mxu0 %v10811_v10  ;;  %v11051_v33 = vor.u32 %v13163_v20, %v11050_v60 }
 0x25d   :  { %v17846_v49 = vadd.f32 %v6727_v3, %v6709_v35  ;;  %v6759_v7 = vadd.f32 %v6758_v43, %v6740_v61  ;;  %7042 = vmatmul.bf16.vlgmr.msrb.gmra.mxu0 %v14632_v17  ;;  %v13131_v42 = vld [vmem:[%s20422_s1 + $0x1194] sm:$0xf0]  ;;  %v11178_v36 = vld [vmem:[%s20422_s1 + $0x1388] sm:$0xf]  ;;  %v10795_v38 = vor.u32 %v13099_v34, %v10794_v31 }
 0x25e   :  { %v13195_v11 = vld [vmem:[%s20422_s1 + $0x1394] sm:$0xf0]  ;;  %v11034_v47 = vld [vmem:[%s20422_s1 + $0x1268] sm:$0xf]  ;;  %7131 = vmatpush.bf16.msra.mxu1 %v10939_v59  ;;  %7169 = vmatpush.bf16.msra.mxu3 %v11195_v32  ;;  %v10923_v41 = vor.u32 %v13131_v42, %v10922_v16 }
 0x25f   :  { %7061 = vmatmul.bf16.vlgmr.msrb.gmra.mxu1 %v14634_v18  ;;  %v13159_v37 = vld [vmem:[%s20422_s1 + $0x1274] sm:$0xf0]  ;;  %v11179_v21 = vor.u32 %v13195_v11, %v11178_v36  ;;  %v10778_v19 = vld [vmem:[%s20422_s1 + $0x1068] sm:$0xf]  ;;  %7151 = vmatpush.bf16.msra.mxu2 %v11051_v33 }
 0x260   :  { %7080 = vmatmul.bf16.vlgmr.msrb.gmra.mxu2 %v14645_v22  ;;  %v13095_v52 = vld [vmem:[%s20422_s1 + $0x1074] sm:$0xf0]  ;;  %v10906_v3 = vld [vmem:[%s20422_s1 + $0x1168] sm:$0xf]  ;;  %7113 = vmatpush.bf16.msra.mxu0 %v10795_v38  ;;  %v11035_v60 = vor.u32 %v13159_v37, %v11034_v47 }
 0x261   :  { %7099 = vmatmul.bf16.vlgmr.msrb.gmra.mxu3 %v14647_v25  ;;  %v6777_v4 = vpop.f32.mrf.mxu2  ;;  %v13127_v30 = vld [vmem:[%s20422_s1 + $0x1174] sm:$0xf0]  ;;  %v11162_v35 = vld [vmem:[%s20422_s1 + $0x1368] sm:$0xf]  ;;  %v10779_v20 = vor.u32 %v13095_v52, %v10778_v19 }
 0x262   :  { %v13191_v63 = vld [vmem:[%s20422_s1 + $0x1374] sm:$0xf0]  ;;  %v6778_v43 = vadd.f32 %v6777_v4, %v6759_v7  ;;  %v6741_v61 = vpop.f32.mrf.mxu0  ;;  %v11018_v59 = vld [vmem:[%s20422_s1 + $0x1248] sm:$0xf]  ;;  %7132 = vmatpush.bf16.msra.mxu1 %v10923_v41  ;;  %7170 = vmatpush.bf16.msra.mxu3 %v11179_v21  ;;  %v10907_v34 = vor.u32 %v13127_v30, %v10906_v3 }
 0x263   :  { %v6742_v10 = vadd.f32 %v6741_v61, %v17746_v26  ;;  %v13155_v32 = vld [vmem:[%s20422_s1 + $0x1254] sm:$0xf0]  ;;  %v11163_v16 = vor.u32 %v13191_v63, %v11162_v35  ;;  %v10762_v26 = vld [vmem:[%s20422_s1 + $0x1048] sm:$0xf]  ;;  %7152 = vmatpush.bf16.msra.mxu2 %v11035_v60 }
 0x264   :  { %v6796_v27 = vpop.f32.mrf.mxu3  ;;  %v6760_v12 = vpop.f32.mrf.mxu1  ;;  %v13091_v7 = vld [vmem:[%s20422_s1 + $0x1054] sm:$0xf0]  ;;  %v10890_v42 = vld [vmem:[%s20422_s1 + $0x1148] sm:$0xf]  ;;  %7114 = vmatpush.bf16.msra.mxu0 %v10779_v20  ;;  %v11019_v47 = vor.u32 %v13155_v32, %v11018_v59 }
 0x265   :  { %v17901_v31 = vadd.f32 %v6796_v27, %v6778_v43  ;;  %v6761_v36 = vadd.f32 %v6760_v12, %v6742_v10  ;;  %v13123_v11 = vld [vmem:[%s20422_s1 + $0x1154] sm:$0xf0]  ;;  %v11146_v33 = vld [vmem:[%s20422_s1 + $0x1348] sm:$0xf]  ;;  %v10763_v37 = vor.u32 %v13091_v7, %v10762_v26 }
 0x266   :  { %v13187_v38 = vld [vmem:[%s20422_s1 + $0x1354] sm:$0xf0]  ;;  %v11002_v41 = vld [vmem:[%s20422_s1 + $0x1228] sm:$0xf]  ;;  %7133 = vmatpush.bf16.msra.mxu1 %v10907_v34  ;;  %7171 = vmatpush.bf16.msra.mxu3 %v11163_v16  ;;  %v10891_v19 = vor.u32 %v13123_v11, %v10890_v42 }
 0x267   :  { %v13151_v21 = vld [vmem:[%s20422_s1 + $0x1234] sm:$0xf0]  ;;  %v11147_v52 = vor.u32 %v13187_v38, %v11146_v33  ;;  %v10746_v3 = vld [vmem:[%s20422_s1 + $0x1028] sm:$0xf]  ;;  %7153 = vmatpush.bf16.msra.mxu2 %v11019_v47 }
 0x268   :  { %v13087_v4 = vld [vmem:[%s20422_s1 + $0x1034] sm:$0xf0]  ;;  %v10874_v27 = vld [vmem:[%s20422_s1 + $0x1128] sm:$0xf]  ;;  %7115 = vmatpush.bf16.msra.mxu0 %v10763_v37  ;;  %v11003_v34 = vor.u32 %v13151_v21, %v11002_v41 }
 0x269   :  { %v6779_v30 = vpop.f32.mrf.mxu2  ;;  %v13119_v63 = vld [vmem:[%s20422_s1 + $0x1134] sm:$0xf0]  ;;  %v11130_v43 = vld [vmem:[%s20422_s1 + $0x1328] sm:$0xf]  ;;  %v10747_v16 = vor.u32 %v13087_v4, %v10746_v3  ;;  %v20533_v4 = vld [vmem:[#allocation2_spill] sm:$0xff] }
 0x26a   :  { %v13183_v61 = vld [vmem:[%s20422_s1 + $0x1334] sm:$0xf0]  ;;  %v6780_v12 = vadd.f32 %v6779_v30, %v6761_v36  ;;  %v6744_v10 = vpop.f32.mrf.mxu0  ;;  %v10986_v20 = vld [vmem:[%s20422_s1 + $0x1208] sm:$0xf]  ;;  %7134 = vmatpush.bf16.msra.mxu1 %v10891_v19  ;;  %7172 = vmatpush.bf16.msra.mxu3 %v11147_v52  ;;  %v7871_v52 = vmax.f32 %v17901_v31, 0.0 }
 0x26b   :  { %v13147_v59 = vld [vmem:[%s20422_s1 + $0x1214] sm:$0xf0]  ;;  %v6745_v32 = vadd.f32 %v6744_v10, %v17813_v2  ;;  %v10730_v26 = vld [vmem:[%s20422_s1 + $0x1008] sm:$0xf]  ;;  %v10875_v2 = vor.u32 %v13119_v63, %v10874_v27  ;;  %v11131_v11 = vor.u32 %v13183_v61, %v11130_v43  ;;  %7154 = vmatpush.bf16.msra.mxu2 %v11003_v34 }
 0x26c   :  { %v6798_v35 = vpop.f32.mrf.mxu3  ;;  %v6763_v60 = vpop.f32.mrf.mxu1  ;;  %v13083_v7 = vld [vmem:[%s20422_s1 + $0x1014] sm:$0xf0]  ;;  %v10858_v42 = vld [vmem:[%s20422_s1 + $0x1108] sm:$0xf]  ;;  %7116 = vmatpush.bf16.msra.mxu0 %v10747_v16 }
 0x26d   :  { %v6799_v36 = vadd.f32 %v6798_v35, %v6780_v12  ;;  %v13115_v33 = vld [vmem:[%s20422_s1 + $0x1114] sm:$0xf0]  ;;  %v11114_v38 = vld [vmem:[%s20422_s1 + $0x1308] sm:$0xf]  ;;  %v6764_v37 = vadd.f32 %v6763_v60, %v6745_v32  ;;  %7047 = vmatmul.bf16.gmra.mxu0 %v14764_v55  ;;  %v10987_v35 = vor.u32 %v13147_v59, %v10986_v20  ;;  %v10731_v63 = vor.u32 %v13083_v7, %v10730_v26 }
 0x26e   :  { %v13179_v47 = vld [vmem:[%s20422_s1 + $0x1314] sm:$0xf0]  ;;  %v11610_v41 = vld [vmem:[%s20422_s1 + $0x16e8] sm:$0xf]  ;;  %7135 = vmatpush.bf16.msra.mxu1 %v10875_v2  ;;  %7173 = vmatpush.bf16.msra.mxu3 %v11131_v11  ;;  %v10859_v10 = vor.u32 %v13115_v33, %v10858_v42 }
 0x26f   :  { %7066 = vmatmul.bf16.gmra.mxu1 %v14766_v58  ;;  %v13303_v21 = vld [vmem:[%s20422_s1 + $0x16f4] sm:$0xf0]  ;;  %v11354_v19 = vld [vmem:[%s20422_s1 + $0x14e8] sm:$0xf]  ;;  %v7875_v3 = vmax.f32 %v6799_v36, 0.0  ;;  %v11115_v60 = vor.u32 %v13179_v47, %v11114_v38  ;;  %7155 = vmatpush.bf16.msra.mxu2 %v10987_v35 }
 0x270   :  { %7085 = vmatmul.bf16.gmra.mxu2 %v14777_v62  ;;  %v13239_v27 = vld [vmem:[%s20422_s1 + $0x14f4] sm:$0xf0]  ;;  %v11482_v30 = vld [vmem:[%s20422_s1 + $0x15e8] sm:$0xf]  ;;  %v11611_v32 = vor.u32 %v13303_v21, %v11610_v41  ;;  %7117 = vmatpush.bf16.msra.mxu0 %v10731_v63  ;;  %v13529_v63 = vld [vmem:[%s20424_s2] sm:$0xf] }
 0x271   :  { %7104 = vmatmul.bf16.gmra.mxu3 %v20533_v4  ;;  %v13271_v31 = vld [vmem:[%s20422_s1 + $0x15f4] sm:$0xf0]  ;;  %v11738_v43 = vld [vmem:[%s20422_s1 + $0x17e8] sm:$0xf]  ;;  %v17999_v12 = vpack.c.bf16 %v7875_v3, %v7871_v52  ;;  %v11355_v34 = vor.u32 %v13239_v27, %v11354_v19 }
 0x272   :  { %v13335_v61 = vld [vmem:[%s20422_s1 + $0x17f4] sm:$0xf0]  ;;  %v11594_v16 = vld [vmem:[%s20422_s1 + $0x16c8] sm:$0xf]  ;;  %v6746_v36 = vpop.f32.mrf.mxu0  ;;  %v11483_v3 = vor.u32 %v13271_v31, %v11482_v30  ;;  %7136 = vmatpush.bf16.msra.mxu1 %v10859_v10  ;;  %7174 = vmatpush.bf16.msra.mxu3 %v11115_v60  ;;  %v18031_v31 = vperm.slane %v13529_v63, 2 }
 0x273   :  { %20534 = vst [vmem:[#allocation19_spill] sm:$0xff] %v17999_v12  ;;  %v6782_v20 = vpop.f32.mrf.mxu2  ;;  %v13299_v26 = vld [vmem:[%s20422_s1 + $0x16d4] sm:$0xf0]  ;;  %v11739_v2 = vor.u32 %v13335_v61, %v11738_v43  ;;  %v11338_v42 = vld [vmem:[%s20422_s1 + $0x14c8] sm:$0xf]  ;;  %v6747_v38 = vadd.f32 %v6746_v36, %v17846_v49  ;;  %7224 = vmatpush.bf16.msrb.mxu2 %v11611_v32 }
 0x274   :  { %v6801_v59 = vpop.f32.mrf.mxu3  ;;  %v6783_v7 = vadd.f32 %v6782_v20, %v6764_v37  ;;  %v6765_v52 = vpop.f32.mrf.mxu1  ;;  %v13235_v11 = vld [vmem:[%s20422_s1 + $0x14d4] sm:$0xf0]  ;;  %v11466_v33 = vld [vmem:[%s20422_s1 + $0x15c8] sm:$0xf]  ;;  %7186 = vmatpush.bf16.msrb.mxu0 %v11355_v34  ;;  %v11595_v49 = vor.u32 %v13299_v26, %v11594_v16 }
 0x275   :  { %v13267_v47 = vld [vmem:[%s20422_s1 + $0x15d4] sm:$0xf0]  ;;  %v11722_v37 = vld [vmem:[%s20422_s1 + $0x17c8] sm:$0xf]  ;;  %v6766_v19 = vadd.f32 %v6765_v52, %v6747_v38  ;;  %v11339_v27 = vor.u32 %v13235_v11, %v11338_v42 }
 0x276   :  { %v13331_v41 = vld [vmem:[%s20422_s1 + $0x17d4] sm:$0xf0]  ;;  %v18026_v21 = vadd.f32 %v6801_v59, %v6783_v7  ;;  %7205 = vmatpush.bf16.msrb.mxu1 %v11483_v3  ;;  %7243 = vmatpush.bf16.msrb.mxu3 %v11739_v2  ;;  %v11467_v30 = vor.u32 %v13267_v47, %v11466_v33  ;;  %v11578_v43 = vld [vmem:[%s20422_s1 + $0x16a8] sm:$0xf] }
 0x277   :  { %v11723_v35 = vor.u32 %v13331_v41, %v11722_v37  ;;  %v13295_v61 = vld [vmem:[%s20422_s1 + $0x16b4] sm:$0xf0]  ;;  %v11322_v10 = vld [vmem:[%s20422_s1 + $0x14a8] sm:$0xf]  ;;  %7225 = vmatpush.bf16.msrb.mxu2 %v11595_v49 }
 0x278   :  { %v13231_v60 = vld [vmem:[%s20422_s1 + $0x14b4] sm:$0xf0]  ;;  %v11450_v20 = vld [vmem:[%s20422_s1 + $0x15a8] sm:$0xf]  ;;  %7187 = vmatpush.bf16.msrb.mxu0 %v11339_v27  ;;  %v11579_v2 = vor.u32 %v13295_v61, %v11578_v43 }
 0x279   :  { %v13263_v34 = vld [vmem:[%s20422_s1 + $0x15b4] sm:$0xf0]  ;;  %v11706_v16 = vld [vmem:[%s20422_s1 + $0x17a8] sm:$0xf]  ;;  %v11323_v42 = vor.u32 %v13231_v60, %v11322_v10  ;;  %v7879_v10 = vmax.f32 %v18026_v21, 0.0 }
 0x27a   :  { %v13327_v26 = vld [vmem:[%s20422_s1 + $0x17b4] sm:$0xf0]  ;;  %v6815_v36 = vpop.f32.mrf.mxu0  ;;  %7206 = vmatpush.bf16.msrb.mxu1 %v11467_v30  ;;  %7244 = vmatpush.bf16.msrb.mxu3 %v11723_v35  ;;  %v11562_v11 = vld [vmem:[%s20422_s1 + $0x1688] sm:$0xf]  ;;  %v11451_v47 = vor.u32 %v13263_v34, %v11450_v20  ;;  %v20536_v35 = vld [vmem:[#allocation4_spill] sm:$0xff] }
 0x27b   :  { %v6784_v59 = vpop.f32.mrf.mxu2  ;;  %v6816_v3 = vadd.f32 %v6815_v36, %v18031_v31  ;;  %v13291_v33 = vld [vmem:[%s20422_s1 + $0x1694] sm:$0xf0]  ;;  %v11707_v37 = vor.u32 %v13327_v26, %v11706_v16  ;;  %v11306_v41 = vld [vmem:[%s20422_s1 + $0x1488] sm:$0xf]  ;;  %7226 = vmatpush.bf16.msrb.mxu2 %v11579_v2 }
 0x27c   :  { %v6803_v32 = vpop.f32.mrf.mxu3  ;;  %v6785_v7 = vadd.f32 %v6784_v59, %v6766_v19  ;;  %v6834_v52 = vpop.f32.mrf.mxu1  ;;  %v13227_v19 = vld [vmem:[%s20422_s1 + $0x1494] sm:$0xf0]  ;;  %v11434_v49 = vld [vmem:[%s20422_s1 + $0x1588] sm:$0xf]  ;;  %v20538_v59 = vld [vmem:[#allocation6_spill] sm:$0xff]  ;;  %7188 = vmatpush.bf16.msrb.mxu0 %v11323_v42 }
 0x27d   :  { %v6835_v27 = vadd.f32 %v6834_v52, %v6816_v3  ;;  %v20535_v30 = vld [vmem:[#allocation3_spill] sm:$0xff]  ;;  %v13259_v63 = vld [vmem:[%s20422_s1 + $0x1594] sm:$0xf0]  ;;  %v11307_v34 = vor.u32 %v13227_v19, %v11306_v41 }
 0x27e   :  { %v6804_v38 = vadd.f32 %v6803_v32, %v6785_v7  ;;  %7118 = vmatmul.bf16.vlgmr.msra.gmra.mxu0 %v20535_v30  ;;  %v11690_v43 = vld [vmem:[%s20422_s1 + $0x1788] sm:$0xf]  ;;  %v13323_v61 = vld [vmem:[%s20422_s1 + $0x1794] sm:$0xf0]  ;;  %v11563_v32 = vor.u32 %v13291_v33, %v11562_v11  ;;  %7207 = vmatpush.bf16.msrb.mxu1 %v11451_v47  ;;  %v11435_v21 = vor.u32 %v13259_v63, %v11434_v49 }
 0x27f   :  { %7137 = vmatmul.bf16.vlgmr.msra.gmra.mxu1 %v20536_v35  ;;  %v20537_v20 = vld [vmem:[#allocation5_spill] sm:$0xff]  ;;  %v11546_v16 = vld [vmem:[%s20422_s1 + $0x1668] sm:$0xf]  ;;  %7245 = vmatpush.bf16.msrb.mxu3 %v11707_v37  ;;  %v11691_v7 = vor.u32 %v13323_v61, %v11690_v43 }
 0x280   :  { %v7883_v60 = vmax.f32 %v6804_v38, 0.0  ;;  %7156 = vmatmul.bf16.vlgmr.msra.gmra.mxu2 %v20537_v20  ;;  %v13287_v26 = vld [vmem:[%s20422_s1 + $0x1674] sm:$0xf0]  ;;  %v11290_v36 = vld [vmem:[%s20422_s1 + $0x1468] sm:$0xf]  ;;  %7189 = vmatpush.bf16.msrb.mxu0 %v11307_v34 }
 0x281   :  { %7175 = vmatmul.bf16.vlgmr.msra.gmra.mxu3 %v20538_v59  ;;  %v13223_v52 = vld [vmem:[%s20422_s1 + $0x1474] sm:$0xf0]  ;;  %v11418_v3 = vld [vmem:[%s20422_s1 + $0x1568] sm:$0xf]  ;;  %7227 = vmatpush.bf16.msrb.mxu2 %v11563_v32  ;;  %v11547_v63 = vor.u32 %v13287_v26, %v11546_v16 }
 0x282   :  { %v18102_v2 = vpack.c.bf16 %v7883_v60, %v7879_v10  ;;  %v13255_v33 = vld [vmem:[%s20422_s1 + $0x1574] sm:$0xf0]  ;;  %v11674_v38 = vld [vmem:[%s20422_s1 + $0x1768] sm:$0xf]  ;;  %v6817_v41 = vpop.f32.mrf.mxu0  ;;  %v11291_v43 = vor.u32 %v13223_v52, %v11290_v36  ;;  %7208 = vmatpush.bf16.msrb.mxu1 %v11435_v21 }
 0x283   :  { %v6853_v42 = vpop.f32.mrf.mxu2  ;;  %v13319_v47 = vld [vmem:[%s20422_s1 + $0x1774] sm:$0xf0]  ;;  %v6818_v49 = vadd.f32 %v6817_v41, %v18031_v31  ;;  %v11530_v61 = vld [vmem:[%s20422_s1 + $0x1648] sm:$0xf]  ;;  %7246 = vmatpush.bf16.msrb.mxu3 %v11691_v7 }
 0x284   :  { %20539 = vst [vmem:[#allocation29_spill] sm:$0xff] %v18102_v2  ;;  %v6872_v11 = vpop.f32.mrf.mxu3  ;;  %v6854_v37 = vadd.f32 %v6853_v42, %v6835_v27  ;;  %v6836_v19 = vpop.f32.mrf.mxu1  ;;  %v13283_v10 = vld [vmem:[%s20422_s1 + $0x1654] sm:$0xf0]  ;;  %v11419_v27 = vor.u32 %v13255_v33, %v11418_v3  ;;  %v11675_v42 = vor.u32 %v13319_v47, %v11674_v38  ;;  %v11274_v32 = vld [vmem:[%s20422_s1 + $0x1448] sm:$0xf]  ;;  %7190 = vmatpush.bf16.msrb.mxu0 %v11291_v43 }
 0x285   :  { %v13219_v34 = vld [vmem:[%s20422_s1 + $0x1454] sm:$0xf0]  ;;  %v11402_v16 = vld [vmem:[%s20422_s1 + $0x1548] sm:$0xf]  ;;  %v6837_v26 = vadd.f32 %v6836_v19, %v6818_v49  ;;  %7228 = vmatpush.bf16.msrb.mxu2 %v11547_v63  ;;  %v11531_v52 = vor.u32 %v13283_v10, %v11530_v61 }
 0x286   :  { %v18120_v60 = vadd.f32 %v6872_v11, %v6854_v37  ;;  %v13251_v21 = vld [vmem:[%s20422_s1 + $0x1554] sm:$0xf0]  ;;  %v11658_v7 = vld [vmem:[%s20422_s1 + $0x1748] sm:$0xf]  ;;  %v11275_v3 = vor.u32 %v13219_v34, %v11274_v32  ;;  %7209 = vmatpush.bf16.msrb.mxu1 %v11419_v27 }
 0x287   :  { %v13315_v36 = vld [vmem:[%s20422_s1 + $0x1754] sm:$0xf0]  ;;  %v11514_v11 = vld [vmem:[%s20422_s1 + $0x1628] sm:$0xf]  ;;  %7247 = vmatpush.bf16.msrb.mxu3 %v11675_v42  ;;  %v11403_v38 = vor.u32 %v13251_v21, %v11402_v16 }
 0x288   :  { %v13279_v33 = vld [vmem:[%s20422_s1 + $0x1634] sm:$0xf0]  ;;  %v11659_v47 = vor.u32 %v13315_v36, %v11658_v7  ;;  %v11258_v37 = vld [vmem:[%s20422_s1 + $0x1428] sm:$0xf]  ;;  %7191 = vmatpush.bf16.msrb.mxu0 %v11275_v3 }
 0x289   :  { %v13215_v41 = vld [vmem:[%s20422_s1 + $0x1434] sm:$0xf0]  ;;  %v11386_v19 = vld [vmem:[%s20422_s1 + $0x1528] sm:$0xf]  ;;  %7229 = vmatpush.bf16.msrb.mxu2 %v11531_v52  ;;  %v11515_v21 = vor.u32 %v13279_v33, %v11514_v11 }
 0x28a   :  { %v13247_v43 = vld [vmem:[%s20422_s1 + $0x1534] sm:$0xf0]  ;;  %v11642_v61 = vld [vmem:[%s20422_s1 + $0x1728] sm:$0xf]  ;;  %v6820_v42 = vpop.f32.mrf.mxu0  ;;  %v11259_v7 = vor.u32 %v13215_v41, %v11258_v37  ;;  %7210 = vmatpush.bf16.msrb.mxu1 %v11403_v38 }
 0x28b   :  { %v6855_v49 = vpop.f32.mrf.mxu2  ;;  %v13311_v10 = vld [vmem:[%s20422_s1 + $0x1734] sm:$0xf0]  ;;  %v11498_v34 = vld [vmem:[%s20422_s1 + $0x1608] sm:$0xf]  ;;  %v6821_v16 = vadd.f32 %v6820_v42, %v18031_v31  ;;  %7248 = vmatpush.bf16.msrb.mxu3 %v11659_v47  ;;  %v11387_v52 = vor.u32 %v13247_v43, %v11386_v19 }
 0x28c   :  { %v6874_v63 = vpop.f32.mrf.mxu3  ;;  %v6856_v27 = vadd.f32 %v6855_v49, %v6837_v26  ;;  %v6839_v32 = vpop.f32.mrf.mxu1  ;;  %v13275_v36 = vld [vmem:[%s20422_s1 + $0x1614] sm:$0xf0]  ;;  %v11242_v26 = vld [vmem:[%s20422_s1 + $0x1408] sm:$0xf]  ;;  %v11643_v3 = vor.u32 %v13311_v10, %v11642_v61  ;;  %v20543_v61 = vld [vmem:[#allocation10_spill] sm:$0xff]  ;;  %7192 = vmatpush.bf16.msrb.mxu0 %v11259_v7 }
 0x28d   :  { %v13211_v49 = vld [vmem:[%s20422_s1 + $0x1414] sm:$0xf0]  ;;  %v11370_v11 = vld [vmem:[%s20422_s1 + $0x1508] sm:$0xf]  ;;  %v6840_v41 = vadd.f32 %v6839_v32, %v6821_v16  ;;  %7230 = vmatpush.bf16.msrb.mxu2 %v11515_v21  ;;  %v11499_v16 = vor.u32 %v13275_v36, %v11498_v34 }
 0x28e   :  { %v18177_v2 = vadd.f32 %v6874_v63, %v6856_v27  ;;  %v13243_v33 = vld [vmem:[%s20422_s1 + $0x1514] sm:$0xf0]  ;;  %v11626_v37 = vld [vmem:[%s20422_s1 + $0x1708] sm:$0xf]  ;;  %v20541_v63 = vld [vmem:[#allocation8_spill] sm:$0xff]  ;;  %v11243_v12 = vor.u32 %v13211_v49, %v11242_v26  ;;  %7211 = vmatpush.bf16.msrb.mxu1 %v11387_v52 }
 0x28f   :  { %v20540_v42 = vld [vmem:[#allocation7_spill] sm:$0xff]  ;;  %7142 = vmatmul.bf16.gmra.mxu1 %v20541_v63  ;;  %v13307_v38 = vld [vmem:[%s20422_s1 + $0x1714] sm:$0xf0]  ;;  %7249 = vmatpush.bf16.msrb.mxu3 %v11643_v3 }
 0x290   :  { %7123 = vmatmul.bf16.gmra.mxu0 %v20540_v42  ;;  %v12122_v47 = vld [vmem:[%s20422_s1 + $0x1ae8] sm:$0xf]  ;;  %v13431_v19 = vld [vmem:[%s20422_s1 + $0x1af4] sm:$0xf0]  ;;  %v11371_v42 = vor.u32 %v13243_v33, %v11370_v11  ;;  %v11627_v59 = vor.u32 %v13307_v38, %v11626_v37 }
 0x291   :  { %v20542_v43 = vld [vmem:[#allocation9_spill] sm:$0xff]  ;;  %7180 = vmatmul.bf16.gmra.mxu3 %v20543_v61  ;;  %v11866_v10 = vld [vmem:[%s20422_s1 + $0x18e8] sm:$0xf]  ;;  %v12123_v34 = vor.u32 %v13431_v19, %v12122_v47  ;;  %7231 = vmatpush.bf16.msrb.mxu2 %v11499_v16 }
 0x292   :  { %7161 = vmatmul.bf16.gmra.mxu2 %v20542_v43  ;;  %v13367_v27 = vld [vmem:[%s20422_s1 + $0x18f4] sm:$0xf0]  ;;  %v11994_v32 = vld [vmem:[%s20422_s1 + $0x19e8] sm:$0xf]  ;;  %v6822_v35 = vpop.f32.mrf.mxu0  ;;  %7193 = vmatpush.bf16.msrb.mxu0 %v11243_v12 }
 0x293   :  { %v13399_v61 = vld [vmem:[%s20422_s1 + $0x19f4] sm:$0xf0]  ;;  %v12250_v43 = vld [vmem:[%s20422_s1 + $0x1be8] sm:$0xf]  ;;  %v6858_v21 = vpop.f32.mrf.mxu2  ;;  %v11867_v36 = vor.u32 %v13367_v27, %v11866_v10  ;;  %v6823_v37 = vadd.f32 %v6822_v35, %v18031_v31  ;;  %7212 = vmatpush.bf16.msrb.mxu1 %v11371_v42  ;;  %7250 = vmatpush.bf16.msrb.mxu3 %v11627_v59 }
 0x294   :  { %v13463_v63 = vld [vmem:[%s20422_s1 + $0x1bf4] sm:$0xf0]  ;;  %v6877_v7 = vpop.f32.mrf.mxu3  ;;  %v12106_v26 = vld [vmem:[%s20422_s1 + $0x1ac8] sm:$0xf]  ;;  %v6859_v20 = vadd.f32 %v6858_v21, %v6840_v41  ;;  %v6841_v30 = vpop.f32.mrf.mxu1  ;;  %v11995_v4 = vor.u32 %v13399_v61, %v11994_v32 }
 0x295   :  { %v13427_v49 = vld [vmem:[%s20422_s1 + $0x1ad4] sm:$0xf0]  ;;  %v12251_v52 = vor.u32 %v13463_v63, %v12250_v43  ;;  %v11850_v3 = vld [vmem:[%s20422_s1 + $0x18c8] sm:$0xf]  ;;  %v6842_v19 = vadd.f32 %v6841_v30, %v6823_v37  ;;  %7300 = vmatpush.bf16.msra.mxu2 %v12123_v34 }
 0x296   :  { %v13363_v11 = vld [vmem:[%s20422_s1 + $0x18d4] sm:$0xf0]  ;;  %v11978_v33 = vld [vmem:[%s20422_s1 + $0x19c8] sm:$0xf]  ;;  %v18244_v47 = vadd.f32 %v6877_v7, %v6859_v20  ;;  %7262 = vmatpush.bf16.msra.mxu0 %v11867_v36  ;;  %v12107_v12 = vor.u32 %v13427_v49, %v12106_v26 }
 0x297   :  { %v13395_v41 = vld [vmem:[%s20422_s1 + $0x19d4] sm:$0xf0]  ;;  %v12234_v63 = vld [vmem:[%s20422_s1 + $0x1bc8] sm:$0xf]  ;;  %v11851_v31 = vor.u32 %v13363_v11, %v11850_v3  ;;  %7281 = vmatpush.bf16.msra.mxu1 %v11995_v4  ;;  %7319 = vmatpush.bf16.msra.mxu3 %v12251_v52 }
 0x298   :  { %v13459_v38 = vld [vmem:[%s20422_s1 + $0x1bd4] sm:$0xf0]  ;;  %v11979_v35 = vor.u32 %v13395_v41, %v11978_v33  ;;  %v12090_v61 = vld [vmem:[%s20422_s1 + $0x1aa8] sm:$0xf] }
 0x299   :  { %v12235_v43 = vor.u32 %v13459_v38, %v12234_v63  ;;  %v13423_v20 = vld [vmem:[%s20422_s1 + $0x1ab4] sm:$0xf0]  ;;  %v11834_v30 = vld [vmem:[%s20422_s1 + $0x18a8] sm:$0xf]  ;;  %7301 = vmatpush.bf16.msra.mxu2 %v12107_v12  ;;  %v20545_v12 = vld [vmem:[#allocation12_spill] sm:$0xff] }
 0x29a   :  { %v13359_v59 = vld [vmem:[%s20422_s1 + $0x18b4] sm:$0xf0]  ;;  %v11962_v4 = vld [vmem:[%s20422_s1 + $0x19a8] sm:$0xf]  ;;  %7263 = vmatpush.bf16.msra.mxu0 %v11851_v31  ;;  %v6891_v7 = vpop.f32.mrf.mxu0  ;;  %v12091_v26 = vor.u32 %v13423_v20, %v12090_v61  ;;  %v20547_v20 = vld [vmem:[#allocation14_spill] sm:$0xff] }
 0x29b   :  { %v6860_v42 = vpop.f32.mrf.mxu2  ;;  %v13391_v27 = vld [vmem:[%s20422_s1 + $0x19b4] sm:$0xf0]  ;;  %v12218_v32 = vld [vmem:[%s20422_s1 + $0x1ba8] sm:$0xf]  ;;  %7282 = vmatpush.bf16.msra.mxu1 %v11979_v35  ;;  %7320 = vmatpush.bf16.msra.mxu3 %v12235_v43  ;;  %v6892_v36 = vadd.f32 %v6891_v7, %v18120_v60  ;;  %v11835_v49 = vor.u32 %v13359_v59, %v11834_v30 }
 0x29c   :  { %v6879_v10 = vpop.f32.mrf.mxu3  ;;  %v13455_v16 = vld [vmem:[%s20422_s1 + $0x1bb4] sm:$0xf0]  ;;  %v6861_v21 = vadd.f32 %v6860_v42, %v6842_v19  ;;  %v6910_v34 = vpop.f32.mrf.mxu1  ;;  %v12074_v52 = vld [vmem:[%s20422_s1 + $0x1a88] sm:$0xf]  ;;  %v11963_v33 = vor.u32 %v13391_v27, %v11962_v4 }
 0x29d   :  { %v13419_v3 = vld [vmem:[%s20422_s1 + $0x1a94] sm:$0xf0]  ;;  %v12219_v37 = vor.u32 %v13455_v16, %v12218_v32  ;;  %v11818_v41 = vld [vmem:[%s20422_s1 + $0x1888] sm:$0xf]  ;;  %v6911_v38 = vadd.f32 %v6910_v34, %v6892_v36  ;;  %7302 = vmatpush.bf16.msra.mxu2 %v12091_v26 }
 0x29e   :  { %v18277_v11 = vadd.f32 %v6879_v10, %v6861_v21  ;;  %v13355_v60 = vld [vmem:[%s20422_s1 + $0x1894] sm:$0xf0]  ;;  %v11946_v63 = vld [vmem:[%s20422_s1 + $0x1988] sm:$0xf]  ;;  %7264 = vmatpush.bf16.msra.mxu0 %v11835_v49  ;;  %v12075_v30 = vor.u32 %v13419_v3, %v12074_v52 }
 0x29f   :  { %v20544_v19 = vld [vmem:[#allocation11_spill] sm:$0xff]  ;;  %7213 = vmatmul.bf16.vlgmr.msrb.gmra.mxu1 %v20545_v12  ;;  %v13387_v31 = vld [vmem:[%s20422_s1 + $0x1994] sm:$0xf0]  ;;  %v11819_v59 = vor.u32 %v13355_v60, %v11818_v41  ;;  %7321 = vmatpush.bf16.msra.mxu3 %v12219_v37 }
 0x2a0   :  { %7194 = vmatmul.bf16.vlgmr.msrb.gmra.mxu0 %v20544_v19  ;;  %v12202_v35 = vld [vmem:[%s20422_s1 + $0x1b88] sm:$0xf]  ;;  %v13451_v43 = vld [vmem:[%s20422_s1 + $0x1b94] sm:$0xf0]  ;;  %7283 = vmatpush.bf16.msra.mxu1 %v11963_v33  ;;  %v11947_v10 = vor.u32 %v13387_v31, %v11946_v63 }
 0x2a1   :  { %v20546_v61 = vld [vmem:[#allocation13_spill] sm:$0xff]  ;;  %7251 = vmatmul.bf16.vlgmr.msrb.gmra.mxu3 %v20547_v20  ;;  %v12058_v4 = vld [vmem:[%s20422_s1 + $0x1a68] sm:$0xf]  ;;  %v12203_v27 = vor.u32 %v13451_v43, %v12202_v35  ;;  %7303 = vmatpush.bf16.msra.mxu2 %v12075_v30 }
 0x2a2   :  { %7232 = vmatmul.bf16.vlgmr.msrb.gmra.mxu2 %v20546_v61  ;;  %v13415_v42 = vld [vmem:[%s20422_s1 + $0x1a74] sm:$0xf0]  ;;  %v11802_v32 = vld [vmem:[%s20422_s1 + $0x1868] sm:$0xf]  ;;  %v6893_v3 = vpop.f32.mrf.mxu0  ;;  %7265 = vmatpush.bf16.msra.mxu0 %v11819_v59 }
 0x2a3   :  { %v13351_v16 = vld [vmem:[%s20422_s1 + $0x1874] sm:$0xf0]  ;;  %v11930_v21 = vld [vmem:[%s20422_s1 + $0x1968] sm:$0xf]  ;;  %v6929_v7 = vpop.f32.mrf.mxu2  ;;  %v6894_v37 = vadd.f32 %v6893_v3, %v18177_v2  ;;  %v12059_v41 = vor.u32 %v13415_v42, %v12058_v4  ;;  %7322 = vmatpush.bf16.msra.mxu3 %v12203_v27 }
 0x2a4   :  { %v6948_v34 = vpop.f32.mrf.mxu3  ;;  %v13383_v36 = vld [vmem:[%s20422_s1 + $0x1974] sm:$0xf0]  ;;  %v12186_v26 = vld [vmem:[%s20422_s1 + $0x1b68] sm:$0xf]  ;;  %v6930_v52 = vadd.f32 %v6929_v7, %v6911_v38  ;;  %v6912_v33 = vpop.f32.mrf.mxu1  ;;  %v11803_v60 = vor.u32 %v13351_v16, %v11802_v32  ;;  %7284 = vmatpush.bf16.msra.mxu1 %v11947_v10 }
 0x2a5   :  { %v13447_v49 = vld [vmem:[%s20422_s1 + $0x1b74] sm:$0xf0]  ;;  %v12042_v63 = vld [vmem:[%s20422_s1 + $0x1a48] sm:$0xf]  ;;  %v11931_v38 = vor.u32 %v13383_v36, %v11930_v21  ;;  %v6913_v4 = vadd.f32 %v6912_v33, %v6894_v37  ;;  %7304 = vmatpush.bf16.msra.mxu2 %v12059_v41 }
 0x2a6   :  { %v13411_v31 = vld [vmem:[%s20422_s1 + $0x1a54] sm:$0xf0]  ;;  %v18332_v35 = vadd.f32 %v6948_v34, %v6930_v52  ;;  %v12187_v43 = vor.u32 %v13447_v49, %v12186_v26  ;;  %v11786_v2 = vld [vmem:[%s20422_s1 + $0x1848] sm:$0xf]  ;;  %7266 = vmatpush.bf16.msra.mxu0 %v11803_v60 }
 0x2a7   :  { %v13347_v30 = vld [vmem:[%s20422_s1 + $0x1854] sm:$0xf0]  ;;  %v11914_v59 = vld [vmem:[%s20422_s1 + $0x1948] sm:$0xf]  ;;  %v12043_v32 = vor.u32 %v13411_v31, %v12042_v63 }
 0x2a8   :  { %v13379_v42 = vld [vmem:[%s20422_s1 + $0x1954] sm:$0xf0]  ;;  %v12170_v10 = vld [vmem:[%s20422_s1 + $0x1b48] sm:$0xf]  ;;  %v11787_v16 = vor.u32 %v13347_v30, %v11786_v2  ;;  %7285 = vmatpush.bf16.msra.mxu1 %v11931_v38  ;;  %7323 = vmatpush.bf16.msra.mxu3 %v12187_v43 }
 0x2a9   :  { %v13443_v27 = vld [vmem:[%s20422_s1 + $0x1b54] sm:$0xf0]  ;;  %v12026_v21 = vld [vmem:[%s20422_s1 + $0x1a28] sm:$0xf]  ;;  %v11915_v34 = vor.u32 %v13379_v42, %v11914_v59  ;;  %7305 = vmatpush.bf16.msra.mxu2 %v12043_v32 }
 0x2aa   :  { %v13407_v7 = vld [vmem:[%s20422_s1 + $0x1a34] sm:$0xf0]  ;;  %v12171_v36 = vor.u32 %v13443_v27, %v12170_v10  ;;  %v11770_v26 = vld [vmem:[%s20422_s1 + $0x1828] sm:$0xf]  ;;  %v6896_v31 = vpop.f32.mrf.mxu0  ;;  %7267 = vmatpush.bf16.msra.mxu0 %v11787_v16 }
 0x2ab   :  { %v13343_v49 = vld [vmem:[%s20422_s1 + $0x1834] sm:$0xf0]  ;;  %v11898_v52 = vld [vmem:[%s20422_s1 + $0x1928] sm:$0xf]  ;;  %v6931_v3 = vpop.f32.mrf.mxu2  ;;  %v6897_v2 = vadd.f32 %v6896_v31, %v18244_v47  ;;  %v12027_v30 = vor.u32 %v13407_v7, %v12026_v21 }
 0x2ac   :  { %v6950_v33 = vpop.f32.mrf.mxu3  ;;  %v13375_v37 = vld [vmem:[%s20422_s1 + $0x1934] sm:$0xf0]  ;;  %v12154_v41 = vld [vmem:[%s20422_s1 + $0x1b28] sm:$0xf]  ;;  %v6932_v63 = vadd.f32 %v6931_v3, %v6913_v4  ;;  %v6915_v38 = vpop.f32.mrf.mxu1  ;;  %v11771_v59 = vor.u32 %v13343_v49, %v11770_v26  ;;  %7286 = vmatpush.bf16.msra.mxu1 %v11915_v34  ;;  %7324 = vmatpush.bf16.msra.mxu3 %v12171_v36  ;;  %v20549_v3 = vld [vmem:[#allocation16_spill] sm:$0xff] }
 0x2ad   :  { %v13439_v60 = vld [vmem:[%s20422_s1 + $0x1b34] sm:$0xf0]  ;;  %v12010_v43 = vld [vmem:[%s20422_s1 + $0x1a08] sm:$0xf]  ;;  %v11899_v47 = vor.u32 %v13375_v37, %v11898_v52  ;;  %v6916_v26 = vadd.f32 %v6915_v38, %v6897_v2  ;;  %v12661_v36 = vld [vmem:[%s20422_s1 + $0x2ec] sm:$0xf]  ;;  %7306 = vmatpush.bf16.msra.mxu2 %v12027_v30 }
 0x2ae   :  { %v13403_v42 = vld [vmem:[%s20422_s1 + $0x1a14] sm:$0xf0]  ;;  %v11754_v4 = vld [vmem:[%s20422_s1 + $0x1808] sm:$0xf]  ;;  %v18389_v27 = vadd.f32 %v6950_v33, %v6932_v63  ;;  %v12155_v32 = vor.u32 %v13439_v60, %v12154_v41  ;;  %v9052_v52 = vld [vmem:[%s20422_s1 + $0x2f8] sm:$0xf0]  ;;  %7268 = vmatpush.bf16.msra.mxu0 %v11771_v59 }
 0x2af   :  { %v13339_v10 = vld [vmem:[%s20422_s1 + $0x1814] sm:$0xf0]  ;;  %v11882_v16 = vld [vmem:[%s20422_s1 + $0x1908] sm:$0xf]  ;;  %7218 = vmatmul.bf16.gmra.mxu1 %v20549_v3  ;;  %v20551_v37 = vld [vmem:[#allocation18_spill] sm:$0xff]  ;;  %v12011_v31 = vor.u32 %v13403_v42, %v12010_v43  ;;  %v9055_v43 = vor.u32 %v12661_v36, %v9052_v52 }
 0x2b0   :  { %v13371_v21 = vld [vmem:[%s20422_s1 + $0x1914] sm:$0xf0]  ;;  %v12138_v7 = vld [vmem:[%s20422_s1 + $0x1b08] sm:$0xf]  ;;  %v12597_v41 = vld [vmem:[%s20422_s1 + $0xec] sm:$0xf]  ;;  %v11755_v38 = vor.u32 %v13339_v10, %v11754_v4  ;;  %7287 = vmatpush.bf16.msra.mxu1 %v11899_v47  ;;  %7325 = vmatpush.bf16.msra.mxu3 %v12155_v32 }
 0x2b1   :  { %v20548_v49 = vld [vmem:[#allocation15_spill] sm:$0xff]  ;;  %v13435_v34 = vld [vmem:[%s20422_s1 + $0x1b14] sm:$0xf0]  ;;  %7256 = vmatmul.bf16.gmra.mxu3 %v20551_v37  ;;  %v8796_v60 = vld [vmem:[%s20422_s1 + $0xf8] sm:$0xf0]  ;;  %v11883_v3 = vor.u32 %v13371_v21, %v11882_v16  ;;  %7307 = vmatpush.bf16.msra.mxu2 %v12011_v31 }
 0x2b2   :  { %7199 = vmatmul.bf16.gmra.mxu0 %v20548_v49  ;;  %v20550_v33 = vld [vmem:[#allocation17_spill] sm:$0xff]  ;;  %v12629_v63 = vld [vmem:[%s20422_s1 + $0x1ec] sm:$0xf]  ;;  %v12139_v49 = vor.u32 %v13435_v34, %v12138_v7  ;;  %v8799_v42 = vor.u32 %v12597_v41, %v8796_v60  ;;  %v6898_v61 = vpop.f32.mrf.mxu0 }
 0x2b3   :  { %7237 = vmatmul.bf16.gmra.mxu2 %v20550_v33  ;;  %v8924_v2 = vld [vmem:[%s20422_s1 + $0x1f8] sm:$0xf0]  ;;  %v12693_v37 = vld [vmem:[%s20422_s1 + $0x3ec] sm:$0xf]  ;;  %v6934_v30 = vpop.f32.mrf.mxu2  ;;  %v6899_v7 = vadd.f32 %v6898_v61, %v18277_v11  ;;  %7269 = vmatpush.bf16.msra.mxu0 %v11755_v38 }
 0x2b4   :  { %v9180_v33 = vld [vmem:[%s20422_s1 + $0x3f8] sm:$0xf0]  ;;  %v6953_v59 = vpop.f32.mrf.mxu3  ;;  %v12657_v4 = vld [vmem:[%s20422_s1 + $0x2cc] sm:$0xf]  ;;  %v6935_v20 = vadd.f32 %v6934_v30, %v6916_v26  ;;  %v6917_v12 = vpop.f32.mrf.mxu1  ;;  %v8927_v19 = vor.u32 %v12629_v63, %v8924_v2  ;;  %7288 = vmatpush.bf16.msra.mxu1 %v11883_v3  ;;  %7326 = vmatpush.bf16.msra.mxu3 %v12139_v49 }
 0x2b5   :  { %v9036_v10 = vld [vmem:[%s20422_s1 + $0x2d8] sm:$0xf0]  ;;  %v9183_v47 = vor.u32 %v12693_v37, %v9180_v33  ;;  %v12593_v32 = vld [vmem:[%s20422_s1 + $0xcc] sm:$0xf]  ;;  %v6918_v33 = vadd.f32 %v6917_v12, %v6899_v7  ;;  %7376 = vmatpush.bf16.msrb.mxu2 %v9055_v43 }
 0x2b6   :  { %v8780_v16 = vld [vmem:[%s20422_s1 + $0xd8] sm:$0xf0]  ;;  %v12625_v21 = vld [vmem:[%s20422_s1 + $0x1cc] sm:$0xf]  ;;  %v18456_v52 = vadd.f32 %v6953_v59, %v6935_v20  ;;  %v9039_v11 = vor.u32 %v12657_v4, %v9036_v10 }
 0x2b7   :  { %v8908_v26 = vld [vmem:[%s20422_s1 + $0x1d8] sm:$0xf0]  ;;  %v12689_v34 = vld [vmem:[%s20422_s1 + $0x3cc] sm:$0xf]  ;;  %7338 = vmatpush.bf16.msrb.mxu0 %v8799_v42  ;;  %v8783_v61 = vor.u32 %v12593_v32, %v8780_v16 }
 0x2b8   :  { %v9164_v36 = vld [vmem:[%s20422_s1 + $0x3d8] sm:$0xf0]  ;;  %7357 = vmatpush.bf16.msrb.mxu1 %v8927_v19  ;;  %7395 = vmatpush.bf16.msrb.mxu3 %v9183_v47  ;;  %v8911_v37 = vor.u32 %v12625_v21, %v8908_v26  ;;  %v12653_v60 = vld [vmem:[%s20422_s1 + $0x2ac] sm:$0xf] }
 0x2b9   :  { %v9167_v41 = vor.u32 %v12689_v34, %v9164_v36  ;;  %v9020_v20 = vld [vmem:[%s20422_s1 + $0x2b8] sm:$0xf0]  ;;  %v12589_v12 = vld [vmem:[%s20422_s1 + $0xac] sm:$0xf]  ;;  %7377 = vmatpush.bf16.msrb.mxu2 %v9039_v11 }
 0x2ba   :  { %v8764_v49 = vld [vmem:[%s20422_s1 + $0xb8] sm:$0xf0]  ;;  %v12621_v19 = vld [vmem:[%s20422_s1 + $0x1ac] sm:$0xf]  ;;  %v6967_v59 = vpop.f32.mrf.mxu0  ;;  %v9023_v4 = vor.u32 %v12653_v60, %v9020_v20  ;;  %v20554_v60 = vld [vmem:[#allocation22_spill] sm:$0xff] }
 0x2bb   :  { %v6936_v3 = vpop.f32.mrf.mxu2  ;;  %7339 = vmatpush.bf16.msrb.mxu0 %v8783_v61  ;;  %v8892_v31 = vld [vmem:[%s20422_s1 + $0x1b8] sm:$0xf0]  ;;  %v12685_v38 = vld [vmem:[%s20422_s1 + $0x3ac] sm:$0xf]  ;;  %v6968_v42 = vadd.f32 %v6967_v59, %v18332_v35  ;;  %v8767_v10 = vor.u32 %v12589_v12, %v8764_v49 }
 0x2bc   :  { %v6955_v63 = vpop.f32.mrf.mxu3  ;;  %v9148_v2 = vld [vmem:[%s20422_s1 + $0x3b8] sm:$0xf0]  ;;  %v6937_v30 = vadd.f32 %v6936_v3, %v6918_v33  ;;  %v6986_v43 = vpop.f32.mrf.mxu1  ;;  %7358 = vmatpush.bf16.msrb.mxu1 %v8911_v37  ;;  %7396 = vmatpush.bf16.msrb.mxu3 %v9167_v41  ;;  %v12649_v47 = vld [vmem:[%s20422_s1 + $0x28c] sm:$0xf]  ;;  %v8895_v21 = vor.u32 %v12621_v19, %v8892_v31  ;;  %v20552_v33 = vld [vmem:[#allocation20_spill] sm:$0xff] }
 0x2bd   :  { %v9004_v32 = vld [vmem:[%s20422_s1 + $0x298] sm:$0xf0]  ;;  %v9151_v7 = vor.u32 %v12685_v38, %v9148_v2  ;;  %v12585_v26 = vld [vmem:[%s20422_s1 + $0x8c] sm:$0xf]  ;;  %v6987_v36 = vadd.f32 %v6986_v43, %v6968_v42  ;;  %7378 = vmatpush.bf16.msrb.mxu2 %v9023_v4 }
 0x2be   :  { %v18489_v16 = vadd.f32 %v6955_v63, %v6937_v30  ;;  %v8748_v35 = vld [vmem:[%s20422_s1 + $0x98] sm:$0xf0]  ;;  %v12617_v34 = vld [vmem:[%s20422_s1 + $0x18c] sm:$0xf]  ;;  %v9007_v20 = vor.u32 %v12649_v47, %v9004_v32 }
 0x2bf   :  { %7289 = vmatmul.bf16.vlgmr.msra.gmra.mxu1 %v20552_v33  ;;  %v8876_v11 = vld [vmem:[%s20422_s1 + $0x198] sm:$0xf0]  ;;  %v12681_v61 = vld [vmem:[%s20422_s1 + $0x38c] sm:$0xf]  ;;  %7340 = vmatpush.bf16.msrb.mxu0 %v8767_v10  ;;  %v8751_v12 = vor.u32 %v12585_v26, %v8748_v35 }
 0x2c0   :  { %v9132_v37 = vld [vmem:[%s20422_s1 + $0x398] sm:$0xf0]  ;;  %v12645_v49 = vld [vmem:[%s20422_s1 + $0x26c] sm:$0xf]  ;;  %7359 = vmatpush.bf16.msrb.mxu1 %v8895_v21  ;;  %7397 = vmatpush.bf16.msrb.mxu3 %v9151_v7  ;;  %v8879_v3 = vor.u32 %v12617_v34, %v8876_v11 }
 0x2c1   :  { %v20553_v41 = vld [vmem:[#allocation21_spill] sm:$0xff]  ;;  %7327 = vmatmul.bf16.vlgmr.msra.gmra.mxu3 %v20554_v60  ;;  %v9135_v63 = vor.u32 %v12681_v61, %v9132_v37  ;;  %v12581_v31 = vld [vmem:[%s20422_s1 + $0x6c] sm:$0xf]  ;;  %7379 = vmatpush.bf16.msrb.mxu2 %v9007_v20 }
 0x2c2   :  { %7270 = vmatmul.bf16.vlgmr.msra.gmra.mxu0 %v20526_v15  ;;  %v8988_v19 = vld [vmem:[%s20422_s1 + $0x278] sm:$0xf0]  ;;  %v12613_v2 = vld [vmem:[%s20422_s1 + $0x16c] sm:$0xf]  ;;  %v6969_v47 = vpop.f32.mrf.mxu0 }
 0x2c3   :  { %7308 = vmatmul.bf16.vlgmr.msra.gmra.mxu2 %v20553_v41  ;;  %v8732_v38 = vld [vmem:[%s20422_s1 + $0x78] sm:$0xf0]  ;;  %v7005_v30 = vpop.f32.mrf.mxu2  ;;  %v12677_v42 = vld [vmem:[%s20422_s1 + $0x36c] sm:$0xf]  ;;  %v6970_v21 = vadd.f32 %v6969_v47, %v18389_v27  ;;  %7341 = vmatpush.bf16.msrb.mxu0 %v8751_v12  ;;  %v8991_v7 = vor.u32 %v12645_v49, %v8988_v19 }
 0x2c4   :  { %v7024_v59 = vpop.f32.mrf.mxu3  ;;  %v8860_v43 = vld [vmem:[%s20422_s1 + $0x178] sm:$0xf0]  ;;  %v7006_v10 = vadd.f32 %v7005_v30, %v6987_v36  ;;  %v6988_v32 = vpop.f32.mrf.mxu1  ;;  %v8735_v26 = vor.u32 %v12581_v31, %v8732_v38  ;;  %v12641_v35 = vld [vmem:[%s20422_s1 + $0x24c] sm:$0xf]  ;;  %7360 = vmatpush.bf16.msrb.mxu1 %v8879_v3  ;;  %7398 = vmatpush.bf16.msrb.mxu3 %v9135_v63 }
 0x2c5   :  { %v9116_v4 = vld [vmem:[%s20422_s1 + $0x378] sm:$0xf0]  ;;  %v8863_v36 = vor.u32 %v12613_v2, %v8860_v43  ;;  %v12577_v27 = vld [vmem:[%s20422_s1 + $0x4c] sm:$0xf]  ;;  %v6989_v12 = vadd.f32 %v6988_v32, %v6970_v21  ;;  %7380 = vmatpush.bf16.msrb.mxu2 %v8991_v7 }
 0x2c6   :  { %v8972_v34 = vld [vmem:[%s20422_s1 + $0x258] sm:$0xf0]  ;;  %v18544_v11 = vadd.f32 %v7024_v59, %v7006_v10  ;;  %v9119_v61 = vor.u32 %v12677_v42, %v9116_v4  ;;  %v12609_v20 = vld [vmem:[%s20422_s1 + $0x14c] sm:$0xf] }
 0x2c7   :  { %v8716_v37 = vld [vmem:[%s20422_s1 + $0x58] sm:$0xf0]  ;;  %v12673_v19 = vld [vmem:[%s20422_s1 + $0x34c] sm:$0xf]  ;;  %7342 = vmatpush.bf16.msrb.mxu0 %v8735_v26  ;;  %v8975_v63 = vor.u32 %v12641_v35, %v8972_v34 }
 0x2c8   :  { %v8844_v49 = vld [vmem:[%s20422_s1 + $0x158] sm:$0xf0]  ;;  %v8719_v31 = vor.u32 %v12577_v27, %v8716_v37  ;;  %v12637_v38 = vld [vmem:[%s20422_s1 + $0x22c] sm:$0xf]  ;;  %7361 = vmatpush.bf16.msrb.mxu1 %v8863_v36  ;;  %7399 = vmatpush.bf16.msrb.mxu3 %v9119_v61 }
 0x2c9   :  { %v9100_v3 = vld [vmem:[%s20422_s1 + $0x358] sm:$0xf0]  ;;  %v8847_v30 = vor.u32 %v12609_v20, %v8844_v49  ;;  %v12573_v43 = vld [vmem:[%s20422_s1 + $0x2c] sm:$0xf]  ;;  %7381 = vmatpush.bf16.msrb.mxu2 %v8975_v63 }
 0x2ca   :  { %v8956_v2 = vld [vmem:[%s20422_s1 + $0x238] sm:$0xf0]  ;;  %v9103_v59 = vor.u32 %v12673_v19, %v9100_v3  ;;  %v12605_v4 = vld [vmem:[%s20422_s1 + $0x12c] sm:$0xf]  ;;  %v6972_v35 = vpop.f32.mrf.mxu0 }
 0x2cb   :  { %v8700_v42 = vld [vmem:[%s20422_s1 + $0x38] sm:$0xf0]  ;;  %v7007_v10 = vpop.f32.mrf.mxu2  ;;  %v12669_v21 = vld [vmem:[%s20422_s1 + $0x32c] sm:$0xf]  ;;  %v6973_v61 = vadd.f32 %v6972_v35, %v18456_v52  ;;  %7343 = vmatpush.bf16.msrb.mxu0 %v8719_v31  ;;  %v8959_v27 = vor.u32 %v12637_v38, %v8956_v2 }
 0x2cc   :  { %v7026_v47 = vpop.f32.mrf.mxu3  ;;  %v8828_v32 = vld [vmem:[%s20422_s1 + $0x138] sm:$0xf0]  ;;  %v7008_v26 = vadd.f32 %v7007_v10, %v6989_v12  ;;  %v6991_v34 = vpop.f32.mrf.mxu1  ;;  %v12633_v36 = vld [vmem:[%s20422_s1 + $0x20c] sm:$0xf]  ;;  %v8703_v37 = vor.u32 %v12573_v43, %v8700_v42  ;;  %7362 = vmatpush.bf16.msrb.mxu1 %v8847_v30  ;;  %7400 = vmatpush.bf16.msrb.mxu3 %v9103_v59  ;;  %v20556_v42 = vld [vmem:[#allocation24_spill] sm:$0xff] }
 0x2cd   :  { %v9084_v7 = vld [vmem:[%s20422_s1 + $0x338] sm:$0xf0]  ;;  %v12569_v12 = vld [vmem:[%s20422_s1 + $0xc] sm:$0xf]  ;;  %v8831_v52 = vor.u32 %v12605_v4, %v8828_v32  ;;  %v6992_v2 = vadd.f32 %v6991_v34, %v6973_v61  ;;  %7382 = vmatpush.bf16.msrb.mxu2 %v8959_v27 }
 0x2ce   :  { %v8940_v20 = vld [vmem:[%s20422_s1 + $0x218] sm:$0xf0]  ;;  %v18601_v19 = vadd.f32 %v7026_v47, %v7008_v26  ;;  %v9087_v3 = vor.u32 %v12669_v21, %v9084_v7  ;;  %v12601_v63 = vld [vmem:[%s20422_s1 + $0x10c] sm:$0xf]  ;;  %v20558_v47 = vld [vmem:[#allocation26_spill] sm:$0xff] }
 0x2cf   :  { %v8684_v49 = vld [vmem:[%s20422_s1 + $0x18] sm:$0xf0]  ;;  %v12665_v38 = vld [vmem:[%s20422_s1 + $0x30c] sm:$0xf]  ;;  %7294 = vmatmul.bf16.gmra.mxu1 %v20556_v42  ;;  %7344 = vmatpush.bf16.msrb.mxu0 %v8703_v37  ;;  %v8943_v26 = vor.u32 %v12633_v36, %v8940_v20 }
 0x2d0   :  { %v8812_v31 = vld [vmem:[%s20422_s1 + $0x118] sm:$0xf0]  ;;  %v20555_v43 = vld [vmem:[#allocation23_spill] sm:$0xff]  ;;  %v8687_v35 = vor.u32 %v12569_v12, %v8684_v49  ;;  %7363 = vmatpush.bf16.msrb.mxu1 %v8831_v52  ;;  %7401 = vmatpush.bf16.msrb.mxu3 %v9087_v3 }
 0x2d1   :  { %v9068_v30 = vld [vmem:[%s20422_s1 + $0x318] sm:$0xf0]  ;;  %v12789_v59 = vld [vmem:[%s20422_s1 + $0x6ec] sm:$0xf]  ;;  %7332 = vmatmul.bf16.gmra.mxu3 %v20558_v47  ;;  %7383 = vmatpush.bf16.msrb.mxu2 %v8943_v26 }
 0x2d2   :  { %7275 = vmatmul.bf16.gmra.mxu0 %v20555_v43  ;;  %v9564_v4 = vld [vmem:[%s20422_s1 + $0x6f8] sm:$0xf0]  ;;  %v12725_v32 = vld [vmem:[%s20422_s1 + $0x4ec] sm:$0xf]  ;;  %v9071_v42 = vor.u32 %v12665_v38, %v9068_v30  ;;  %v6974_v60 = vpop.f32.mrf.mxu0 }
 0x2d3   :  { %v20557_v10 = vld [vmem:[#allocation25_spill] sm:$0xff]  ;;  %v12757_v7 = vld [vmem:[%s20422_s1 + $0x5ec] sm:$0xf]  ;;  %v7010_v27 = vpop.f32.mrf.mxu2  ;;  %v9567_v36 = vor.u32 %v12789_v59, %v9564_v4  ;;  %v6975_v38 = vadd.f32 %v6974_v60, %v18489_v16  ;;  %7345 = vmatpush.bf16.msrb.mxu0 %v8687_v35 }
 0x2d4   :  { %7313 = vmatmul.bf16.gmra.mxu2 %v20557_v10  ;;  %v9308_v21 = vld [vmem:[%s20422_s1 + $0x4f8] sm:$0xf0]  ;;  %v12821_v61 = vld [vmem:[%s20422_s1 + $0x7ec] sm:$0xf]  ;;  %v8815_v10 = vor.u32 %v12601_v63, %v8812_v31  ;;  %v7029_v37 = vpop.f32.mrf.mxu3  ;;  %v7011_v43 = vadd.f32 %v7010_v27, %v6992_v2  ;;  %v6993_v41 = vpop.f32.mrf.mxu1  ;;  %7402 = vmatpush.bf16.msrb.mxu3 %v9071_v42 }
 0x2d5   :  { %v9436_v34 = vld [vmem:[%s20422_s1 + $0x5f8] sm:$0xf0]  ;;  %v9311_v20 = vor.u32 %v12725_v32, %v9308_v21  ;;  %v12785_v12 = vld [vmem:[%s20422_s1 + $0x6cc] sm:$0xf]  ;;  %7452 = vmatpush.bf16.msra.mxu2 %v9567_v36 }
 0x2d6   :  { %v9692_v47 = vld [vmem:[%s20422_s1 + $0x7f8] sm:$0xf0]  ;;  %v9439_v33 = vor.u32 %v12757_v7, %v9436_v34  ;;  %v12721_v3 = vld [vmem:[%s20422_s1 + $0x4cc] sm:$0xf]  ;;  %v18668_v4 = vadd.f32 %v7029_v37, %v7011_v43  ;;  %7364 = vmatpush.bf16.msrb.mxu1 %v8815_v10 }
 0x2d7   :  { %v9548_v49 = vld [vmem:[%s20422_s1 + $0x6d8] sm:$0xf0]  ;;  %v9695_v52 = vor.u32 %v12821_v61, %v9692_v47  ;;  %v12753_v31 = vld [vmem:[%s20422_s1 + $0x5cc] sm:$0xf]  ;;  %v6994_v47 = vadd.f32 %v6993_v41, %v6975_v38  ;;  %7414 = vmatpush.bf16.msra.mxu0 %v9311_v20 }
 0x2d8   :  { %v9292_v63 = vld [vmem:[%s20422_s1 + $0x4d8] sm:$0xf0]  ;;  %v12817_v30 = vld [vmem:[%s20422_s1 + $0x7cc] sm:$0xf]  ;;  %v9551_v16 = vor.u32 %v12785_v12, %v9548_v49 }
 0x2d9   :  { %v9420_v2 = vld [vmem:[%s20422_s1 + $0x5d8] sm:$0xf0]  ;;  %v9295_v60 = vor.u32 %v12721_v3, %v9292_v63  ;;  %7471 = vmatpush.bf16.msra.mxu3 %v9695_v52  ;;  %v12781_v7 = vld [vmem:[%s20422_s1 + $0x6ac] sm:$0xf] }
 0x2da   :  { %v9676_v59 = vld [vmem:[%s20422_s1 + $0x7d8] sm:$0xf0]  ;;  %7433 = vmatpush.bf16.msra.mxu1 %v9439_v33  ;;  %v9423_v32 = vor.u32 %v12753_v31, %v9420_v2  ;;  %v12717_v41 = vld [vmem:[%s20422_s1 + $0x4ac] sm:$0xf]  ;;  %7453 = vmatpush.bf16.msra.mxu2 %v9551_v16  ;;  %v7043_v37 = vpop.f32.mrf.mxu0 }
 0x2db   :  { %v9679_v21 = vor.u32 %v12817_v30, %v9676_v59  ;;  %v9532_v43 = vld [vmem:[%s20422_s1 + $0x6b8] sm:$0xf0]  ;;  %v12749_v33 = vld [vmem:[%s20422_s1 + $0x5ac] sm:$0xf]  ;;  %v7012_v10 = vpop.f32.mrf.mxu2  ;;  %7415 = vmatpush.bf16.msra.mxu0 %v9295_v60  ;;  %v7044_v20 = vadd.f32 %v7043_v37, %v18544_v11 }
 0x2dc   :  { %v9276_v42 = vld [vmem:[%s20422_s1 + $0x4b8] sm:$0xf0]  ;;  %v7031_v26 = vpop.f32.mrf.mxu3  ;;  %v12813_v34 = vld [vmem:[%s20422_s1 + $0x7ac] sm:$0xf]  ;;  %v7013_v27 = vadd.f32 %v7012_v10, %v6994_v47  ;;  %v7062_v36 = vpop.f32.mrf.mxu1  ;;  %v9535_v12 = vor.u32 %v12781_v7, %v9532_v43 }
 0x2dd   :  { %v9404_v35 = vld [vmem:[%s20422_s1 + $0x5b8] sm:$0xf0]  ;;  %7472 = vmatpush.bf16.msra.mxu3 %v9679_v21  ;;  %v9279_v49 = vor.u32 %v12717_v41, %v9276_v42  ;;  %v12777_v52 = vld [vmem:[%s20422_s1 + $0x68c] sm:$0xf]  ;;  %v7063_v59 = vadd.f32 %v7062_v36, %v7044_v20 }
 0x2de   :  { %v9660_v61 = vld [vmem:[%s20422_s1 + $0x7b8] sm:$0xf0]  ;;  %7434 = vmatpush.bf16.msra.mxu1 %v9423_v32  ;;  %v18701_v63 = vadd.f32 %v7031_v26, %v7013_v27  ;;  %v9407_v31 = vor.u32 %v12749_v33, %v9404_v35  ;;  %v12713_v2 = vld [vmem:[%s20422_s1 + $0x48c] sm:$0xf]  ;;  %7454 = vmatpush.bf16.msra.mxu2 %v9535_v12 }
 0x2df   :  { %v9516_v3 = vld [vmem:[%s20422_s1 + $0x698] sm:$0xf0]  ;;  %v9663_v38 = vor.u32 %v12813_v34, %v9660_v61  ;;  %v12745_v30 = vld [vmem:[%s20422_s1 + $0x58c] sm:$0xf]  ;;  %7365 = vmatmul.bf16.vlgmr.msrb.gmra.mxu1 %v13809_v53  ;;  %7416 = vmatpush.bf16.msra.mxu0 %v9279_v49 }
 0x2e0   :  { %v9260_v11 = vld [vmem:[%s20422_s1 + $0x498] sm:$0xf0]  ;;  %v12809_v16 = vld [vmem:[%s20422_s1 + $0x78c] sm:$0xf] }
 0x2e1   :  { %v9388_v47 = vld [vmem:[%s20422_s1 + $0x598] sm:$0xf0]  ;;  %7403 = vmatmul.bf16.vlgmr.msrb.gmra.mxu3 %v13819_v57  ;;  %v9263_v53 = vor.u32 %v12713_v2, %v9260_v11  ;;  %v12773_v32 = vld [vmem:[%s20422_s1 + $0x66c] sm:$0xf] }
 0x2e2   :  { %7346 = vmatmul.bf16.vlgmr.msrb.gmra.mxu0 %v13798_v48  ;;  %v9644_v60 = vld [vmem:[%s20422_s1 + $0x798] sm:$0xf0]  ;;  %v9519_v48 = vor.u32 %v12777_v52, %v9516_v3  ;;  %7435 = vmatpush.bf16.msra.mxu1 %v9407_v31  ;;  %v9391_v7 = vor.u32 %v12745_v30, %v9388_v47  ;;  %v12741_v41 = vld [vmem:[%s20422_s1 + $0x56c] sm:$0xf]  ;;  %v7045_v61 = vpop.f32.mrf.mxu0 }
 0x2e3   :  { %v9500_v21 = vld [vmem:[%s20422_s1 + $0x678] sm:$0xf0]  ;;  %7473 = vmatpush.bf16.msra.mxu3 %v9663_v38  ;;  %v9647_v43 = vor.u32 %v12809_v16, %v9644_v60  ;;  %v7081_v42 = vpop.f32.mrf.mxu2  ;;  %v12805_v26 = vld [vmem:[%s20422_s1 + $0x76c] sm:$0xf]  ;;  %v7046_v37 = vadd.f32 %v7045_v61, %v18601_v19  ;;  %7417 = vmatpush.bf16.msra.mxu0 %v9263_v53 }
 0x2e4   :  { %7384 = vmatmul.bf16.vlgmr.msrb.gmra.mxu2 %v13811_v54  ;;  %v12709_v54 = vld [vmem:[%s20422_s1 + $0x46c] sm:$0xf]  ;;  %v9244_v57 = vld [vmem:[%s20422_s1 + $0x478] sm:$0xf0]  ;;  %v7100_v33 = vpop.f32.mrf.mxu3  ;;  %v7082_v34 = vadd.f32 %v7081_v42, %v7063_v59  ;;  %v7064_v27 = vpop.f32.mrf.mxu1  ;;  %v9503_v36 = vor.u32 %v12773_v32, %v9500_v21 }
 0x2e5   :  { %v9372_v10 = vld [vmem:[%s20422_s1 + $0x578] sm:$0xf0]  ;;  %7455 = vmatpush.bf16.msra.mxu2 %v9519_v48  ;;  %v9247_v20 = vor.u32 %v12709_v54, %v9244_v57  ;;  %v12769_v12 = vld [vmem:[%s20422_s1 + $0x64c] sm:$0xf]  ;;  %v7065_v11 = vadd.f32 %v7064_v27, %v7046_v37 }
 0x2e6   :  { %v9628_v35 = vld [vmem:[%s20422_s1 + $0x778] sm:$0xf0]  ;;  %v18756_v52 = vadd.f32 %v7100_v33, %v7082_v34  ;;  %7436 = vmatpush.bf16.msra.mxu1 %v9391_v7  ;;  %v9375_v3 = vor.u32 %v12741_v41, %v9372_v10  ;;  %v12705_v19 = vld [vmem:[%s20422_s1 + $0x44c] sm:$0xf] }
 0x2e7   :  { %v9484_v49 = vld [vmem:[%s20422_s1 + $0x658] sm:$0xf0]  ;;  %7474 = vmatpush.bf16.msra.mxu3 %v9647_v43  ;;  %v9631_v31 = vor.u32 %v12805_v26, %v9628_v35  ;;  %v12737_v2 = vld [vmem:[%s20422_s1 + $0x54c] sm:$0xf]  ;;  %7418 = vmatpush.bf16.msra.mxu0 %v9247_v20 }
 0x2e8   :  { %v9228_v38 = vld [vmem:[%s20422_s1 + $0x458] sm:$0xf0]  ;;  %v12801_v59 = vld [vmem:[%s20422_s1 + $0x74c] sm:$0xf]  ;;  %v9487_v16 = vor.u32 %v12769_v12, %v9484_v49 }
 0x2e9   :  { %v9356_v30 = vld [vmem:[%s20422_s1 + $0x558] sm:$0xf0]  ;;  %7456 = vmatpush.bf16.msra.mxu2 %v9503_v36  ;;  %v9231_v60 = vor.u32 %v12705_v19, %v9228_v38  ;;  %v12765_v48 = vld [vmem:[%s20422_s1 + $0x62c] sm:$0xf] }
 0x2ea   :  { %v9612_v47 = vld [vmem:[%s20422_s1 + $0x758] sm:$0xf0]  ;;  %7437 = vmatpush.bf16.msra.mxu1 %v9375_v3  ;;  %v9359_v32 = vor.u32 %v12737_v2, %v9356_v30  ;;  %v12701_v7 = vld [vmem:[%s20422_s1 + $0x42c] sm:$0xf]  ;;  %v7048_v35 = vpop.f32.mrf.mxu0 }
 0x2eb   :  { %v9468_v53 = vld [vmem:[%s20422_s1 + $0x638] sm:$0xf0]  ;;  %7475 = vmatpush.bf16.msra.mxu3 %v9631_v31  ;;  %v9615_v21 = vor.u32 %v12801_v59, %v9612_v47  ;;  %v12733_v54 = vld [vmem:[%s20422_s1 + $0x52c] sm:$0xf]  ;;  %v7083_v57 = vpop.f32.mrf.mxu2  ;;  %v7049_v27 = vadd.f32 %v7048_v35, %v18668_v4  ;;  %7419 = vmatpush.bf16.msra.mxu0 %v9231_v60 }
 0x2ec   :  { %v9212_v43 = vld [vmem:[%s20422_s1 + $0x438] sm:$0xf0]  ;;  %v7102_v41 = vpop.f32.mrf.mxu3  ;;  %v12797_v33 = vld [vmem:[%s20422_s1 + $0x72c] sm:$0xf]  ;;  %v7084_v26 = vadd.f32 %v7083_v57, %v7065_v11  ;;  %v7067_v34 = vpop.f32.mrf.mxu1  ;;  %v9471_v37 = vor.u32 %v12765_v48, %v9468_v53 }
 0x2ed   :  { %v9340_v42 = vld [vmem:[%s20422_s1 + $0x538] sm:$0xf0]  ;;  %v12761_v61 = vld [vmem:[%s20422_s1 + $0x60c] sm:$0xf]  ;;  %7457 = vmatpush.bf16.msra.mxu2 %v9487_v16  ;;  %v9215_v36 = vor.u32 %v12701_v7, %v9212_v43  ;;  %v7068_v11 = vadd.f32 %v7067_v34, %v7049_v27 }
 0x2ee   :  { %v9596_v10 = vld [vmem:[%s20422_s1 + $0x738] sm:$0xf0]  ;;  %v12697_v12 = vld [vmem:[%s20422_s1 + $0x40c] sm:$0xf]  ;;  %v18813_v3 = vadd.f32 %v7102_v41, %v7084_v26  ;;  %7438 = vmatpush.bf16.msra.mxu1 %v9359_v32  ;;  %v9343_v4 = vor.u32 %v12733_v54, %v9340_v42 }
 0x2ef   :  { %v9452_v20 = vld [vmem:[%s20422_s1 + $0x618] sm:$0xf0]  ;;  %7476 = vmatpush.bf16.msra.mxu3 %v9615_v21  ;;  %v9599_v31 = vor.u32 %v12797_v33, %v9596_v10  ;;  %v12729_v19 = vld [vmem:[%s20422_s1 + $0x50c] sm:$0xf]  ;;  %7370 = vmatmul.bf16.gmra.mxu1 %v13941_v50 }
 0x2f0   :  { %v9196_v49 = vld [vmem:[%s20422_s1 + $0x418] sm:$0xf0]  ;;  %v12793_v2 = vld [vmem:[%s20422_s1 + $0x70c] sm:$0xf]  ;;  %7420 = vmatpush.bf16.msra.mxu0 %v9215_v36  ;;  %v9455_v60 = vor.u32 %v12761_v61, %v9452_v20 }
 0x2f1   :  { %v9324_v38 = vld [vmem:[%s20422_s1 + $0x518] sm:$0xf0]  ;;  %v12917_v59 = vld [vmem:[%s20422_s1 + $0xaec] sm:$0xf]  ;;  %7408 = vmatmul.bf16.gmra.mxu3 %v13951_v56  ;;  %7458 = vmatpush.bf16.msra.mxu2 %v9471_v37  ;;  %v9199_v48 = vor.u32 %v12697_v12, %v9196_v49 }
 0x2f2   :  { %7351 = vmatmul.bf16.gmra.mxu0 %v13930_v44  ;;  %v9580_v30 = vld [vmem:[%s20422_s1 + $0x718] sm:$0xf0]  ;;  %v12853_v44 = vld [vmem:[%s20422_s1 + $0x8ec] sm:$0xf]  ;;  %7439 = vmatpush.bf16.msra.mxu1 %v9343_v4  ;;  %v9327_v32 = vor.u32 %v12729_v19, %v9324_v38  ;;  %v7050_v10 = vpop.f32.mrf.mxu0 }
 0x2f3   :  { %v10076_v47 = vld [vmem:[%s20422_s1 + $0xaf8] sm:$0xf0]  ;;  %v12885_v16 = vld [vmem:[%s20422_s1 + $0x9ec] sm:$0xf]  ;;  %7477 = vmatpush.bf16.msra.mxu3 %v9599_v31  ;;  %v9583_v21 = vor.u32 %v12793_v2, %v9580_v30  ;;  %v7086_v7 = vpop.f32.mrf.mxu2  ;;  %v7051_v36 = vadd.f32 %v7050_v10, %v18701_v63 }
 0x2f4   :  { %7389 = vmatmul.bf16.gmra.mxu2 %v13943_v51  ;;  %v9820_v50 = vld [vmem:[%s20422_s1 + $0x8f8] sm:$0xf0]  ;;  %v12949_v56 = vld [vmem:[%s20422_s1 + $0xbec] sm:$0xf]  ;;  %v7105_v43 = vpop.f32.mrf.mxu3  ;;  %v10079_v54 = vor.u32 %v12917_v59, %v10076_v47  ;;  %v7087_v33 = vadd.f32 %v7086_v7, %v7068_v11  ;;  %v7069_v26 = vpop.f32.mrf.mxu1  ;;  %7421 = vmatpush.bf16.msra.mxu0 %v9199_v48 }
 0x2f5   :  { %v9948_v51 = vld [vmem:[%s20422_s1 + $0x9f8] sm:$0xf0]  ;;  %v9823_v57 = vor.u32 %v12853_v44, %v9820_v50  ;;  %v12913_v41 = vld [vmem:[%s20422_s1 + $0xacc] sm:$0xf]  ;;  %7459 = vmatpush.bf16.msra.mxu2 %v9455_v60  ;;  %v7070_v31 = vadd.f32 %v7069_v26, %v7051_v36 }
 0x2f6   :  { %v10204_v53 = vld [vmem:[%s20422_s1 + $0xbf8] sm:$0xf0]  ;;  %v9951_v35 = vor.u32 %v12885_v16, %v9948_v51  ;;  %v12849_v61 = vld [vmem:[%s20422_s1 + $0x8cc] sm:$0xf]  ;;  %v18880_v4 = vadd.f32 %v7105_v43, %v7087_v33  ;;  %7440 = vmatpush.bf16.msra.mxu1 %v9327_v32 }
 0x2f7   :  { %v10060_v42 = vld [vmem:[%s20422_s1 + $0xad8] sm:$0xf0]  ;;  %v10207_v34 = vor.u32 %v12949_v56, %v10204_v53  ;;  %v12881_v37 = vld [vmem:[%s20422_s1 + $0x9cc] sm:$0xf]  ;;  %7478 = vmatpush.bf16.msra.mxu3 %v9583_v21 }
 0x2f8   :  { %v9804_v27 = vld [vmem:[%s20422_s1 + $0x8d8] sm:$0xf0]  ;;  %v12945_v12 = vld [vmem:[%s20422_s1 + $0xbcc] sm:$0xf]  ;;  %7490 = vmatpush.bf16.msrb.mxu0 %v9823_v57  ;;  %v10063_v63 = vor.u32 %v12913_v41, %v10060_v42 }
 0x2f9   :  { %v9932_v20 = vld [vmem:[%s20422_s1 + $0x9d8] sm:$0xf0]  ;;  %7528 = vmatpush.bf16.msrb.mxu2 %v10079_v54  ;;  %v9807_v19 = vor.u32 %v12849_v61, %v9804_v27  ;;  %v12909_v11 = vld [vmem:[%s20422_s1 + $0xaac] sm:$0xf] }
 0x2fa   :  { %v10188_v49 = vld [vmem:[%s20422_s1 + $0xbd8] sm:$0xf0]  ;;  %7509 = vmatpush.bf16.msrb.mxu1 %v9951_v35  ;;  %v9935_v38 = vor.u32 %v12881_v37, %v9932_v20  ;;  %v12845_v59 = vld [vmem:[%s20422_s1 + $0x8ac] sm:$0xf] }
 0x2fb   :  { %7547 = vmatpush.bf16.msrb.mxu3 %v10207_v34  ;;  %v10191_v2 = vor.u32 %v12945_v12, %v10188_v49  ;;  %v10044_v30 = vld [vmem:[%s20422_s1 + $0xab8] sm:$0xf0]  ;;  %v12877_v44 = vld [vmem:[%s20422_s1 + $0x9ac] sm:$0xf]  ;;  %v7088_v50 = vpop.f32.mrf.mxu2  ;;  %v7119_v53 = vpop.f32.mrf.mxu0 }
 0x2fc   :  { %v9788_v47 = vld [vmem:[%s20422_s1 + $0x8b8] sm:$0xf0]  ;;  %v7107_v16 = vpop.f32.mrf.mxu3  ;;  %7491 = vmatpush.bf16.msrb.mxu0 %v9807_v19  ;;  %v12941_v48 = vld [vmem:[%s20422_s1 + $0xbac] sm:$0xf]  ;;  %v7089_v56 = vadd.f32 %v7088_v50, %v7070_v31  ;;  %v7138_v32 = vpop.f32.mrf.mxu1  ;;  %v7120_v21 = vadd.f32 %v7119_v53, %v18756_v52  ;;  %v10047_v7 = vor.u32 %v12909_v11, %v10044_v30 }
 0x2fd   :  { %7529 = vmatpush.bf16.msrb.mxu2 %v10063_v63  ;;  %v9916_v60 = vld [vmem:[%s20422_s1 + $0x9b8] sm:$0xf0]  ;;  %v9791_v43 = vor.u32 %v12845_v59, %v9788_v47  ;;  %v12905_v54 = vld [vmem:[%s20422_s1 + $0xa8c] sm:$0xf] }
 0x2fe   :  { %v10172_v51 = vld [vmem:[%s20422_s1 + $0xbb8] sm:$0xf0]  ;;  %7510 = vmatpush.bf16.msrb.mxu1 %v9935_v38  ;;  %v18913_v41 = vadd.f32 %v7107_v16, %v7089_v56  ;;  %v9919_v42 = vor.u32 %v12877_v44, %v9916_v60  ;;  %v12841_v10 = vld [vmem:[%s20422_s1 + $0x88c] sm:$0xf]  ;;  %v7139_v35 = vadd.f32 %v7138_v32, %v7120_v21 }
 0x2ff   :  { %7548 = vmatpush.bf16.msrb.mxu3 %v10191_v2  ;;  %v10028_v57 = vld [vmem:[%s20422_s1 + $0xa98] sm:$0xf0]  ;;  %v10175_v33 = vor.u32 %v12941_v48, %v10172_v51  ;;  %v12873_v26 = vld [vmem:[%s20422_s1 + $0x98c] sm:$0xf]  ;;  %7441 = vmatmul.bf16.vlgmr.msra.gmra.mxu1 %v14088_v1 }
 0x300   :  { %v9772_v52 = vld [vmem:[%s20422_s1 + $0x898] sm:$0xf0]  ;;  %v12937_v61 = vld [vmem:[%s20422_s1 + $0xb8c] sm:$0xf]  ;;  %7492 = vmatpush.bf16.msrb.mxu0 %v9791_v43 }
 0x301   :  { %v9900_v34 = vld [vmem:[%s20422_s1 + $0x998] sm:$0xf0]  ;;  %7479 = vmatmul.bf16.vlgmr.msra.gmra.mxu3 %v14101_v6  ;;  %7530 = vmatpush.bf16.msrb.mxu2 %v10047_v7  ;;  %v9775_v1 = vor.u32 %v12841_v10, %v9772_v52  ;;  %v12901_v37 = vld [vmem:[%s20422_s1 + $0xa6c] sm:$0xf] }
 0x302   :  { %7422 = vmatmul.bf16.vlgmr.msra.gmra.mxu0 %v14086_v0  ;;  %v10156_v27 = vld [vmem:[%s20422_s1 + $0xb98] sm:$0xf0]  ;;  %v10031_v0 = vor.u32 %v12905_v54, %v10028_v57  ;;  %7511 = vmatpush.bf16.msrb.mxu1 %v9919_v42  ;;  %v9903_v20 = vor.u32 %v12873_v26, %v9900_v34  ;;  %v12869_v49 = vld [vmem:[%s20422_s1 + $0x96c] sm:$0xf] }
 0x303   :  { %v10012_v36 = vld [vmem:[%s20422_s1 + $0xa78] sm:$0xf0]  ;;  %7549 = vmatpush.bf16.msrb.mxu3 %v10175_v33  ;;  %v10159_v12 = vor.u32 %v12937_v61, %v10156_v27  ;;  %v7157_v31 = vpop.f32.mrf.mxu2  ;;  %v12933_v38 = vld [vmem:[%s20422_s1 + $0xb6c] sm:$0xf]  ;;  %v7121_v30 = vpop.f32.mrf.mxu0 }
 0x304   :  { %7460 = vmatmul.bf16.vlgmr.msra.gmra.mxu2 %v14099_v5  ;;  %v12837_v5 = vld [vmem:[%s20422_s1 + $0x86c] sm:$0xf]  ;;  %v9756_v6 = vld [vmem:[%s20422_s1 + $0x878] sm:$0xf0]  ;;  %v7176_v63 = vpop.f32.mrf.mxu3  ;;  %v7158_v11 = vadd.f32 %v7157_v31, %v7139_v35  ;;  %v7140_v59 = vpop.f32.mrf.mxu1  ;;  %v7122_v47 = vadd.f32 %v7121_v30, %v18813_v3  ;;  %7493 = vmatpush.bf16.msrb.mxu0 %v9775_v1  ;;  %v10015_v44 = vor.u32 %v12901_v37, %v10012_v36 }
 0x305   :  { %v9884_v19 = vld [vmem:[%s20422_s1 + $0x978] sm:$0xf0]  ;;  %7531 = vmatpush.bf16.msrb.mxu2 %v10031_v0  ;;  %v9759_v50 = vor.u32 %v12837_v5, %v9756_v6  ;;  %v12897_v16 = vld [vmem:[%s20422_s1 + $0xa4c] sm:$0xf] }
 0x306   :  { %v10140_v2 = vld [vmem:[%s20422_s1 + $0xb78] sm:$0xf0]  ;;  %v18968_v48 = vadd.f32 %v7176_v63, %v7158_v11  ;;  %7512 = vmatpush.bf16.msrb.mxu1 %v9903_v20  ;;  %v9887_v51 = vor.u32 %v12869_v49, %v9884_v19  ;;  %v12833_v3 = vld [vmem:[%s20422_s1 + $0x84c] sm:$0xf]  ;;  %v7141_v21 = vadd.f32 %v7140_v59, %v7122_v47 }
 0x307   :  { %v9996_v60 = vld [vmem:[%s20422_s1 + $0xa58] sm:$0xf0]  ;;  %7550 = vmatpush.bf16.msrb.mxu3 %v10159_v12  ;;  %v10143_v56 = vor.u32 %v12933_v38, %v10140_v2  ;;  %v12865_v32 = vld [vmem:[%s20422_s1 + $0x94c] sm:$0xf] }
 0x308   :  { %v9740_v53 = vld [vmem:[%s20422_s1 + $0x858] sm:$0xf0]  ;;  %v12929_v43 = vld [vmem:[%s20422_s1 + $0xb4c] sm:$0xf]  ;;  %7494 = vmatpush.bf16.msrb.mxu0 %v9759_v50  ;;  %v9999_v57 = vor.u32 %v12897_v16, %v9996_v60 }
 0x309   :  { %v9868_v7 = vld [vmem:[%s20422_s1 + $0x958] sm:$0xf0]  ;;  %7532 = vmatpush.bf16.msrb.mxu2 %v10015_v44  ;;  %v9743_v42 = vor.u32 %v12833_v3, %v9740_v53  ;;  %v12893_v33 = vld [vmem:[%s20422_s1 + $0xa2c] sm:$0xf] }
 0x30a   :  { %v10124_v54 = vld [vmem:[%s20422_s1 + $0xb58] sm:$0xf0]  ;;  %7513 = vmatpush.bf16.msrb.mxu1 %v9887_v51  ;;  %v9871_v52 = vor.u32 %v12865_v32, %v9868_v7  ;;  %v12829_v35 = vld [vmem:[%s20422_s1 + $0x82c] sm:$0xf] }
 0x30b   :  { %v9980_v10 = vld [vmem:[%s20422_s1 + $0xa38] sm:$0xf0]  ;;  %7551 = vmatpush.bf16.msrb.mxu3 %v10143_v56  ;;  %v10127_v26 = vor.u32 %v12929_v43, %v10124_v54  ;;  %v12861_v61 = vld [vmem:[%s20422_s1 + $0x92c] sm:$0xf]  ;;  %v7159_v27 = vpop.f32.mrf.mxu2 }
 0x30c   :  { %v9724_v34 = vld [vmem:[%s20422_s1 + $0x838] sm:$0xf0]  ;;  %v7178_v0 = vpop.f32.mrf.mxu3  ;;  %v12925_v37 = vld [vmem:[%s20422_s1 + $0xb2c] sm:$0xf]  ;;  %v7160_v20 = vadd.f32 %v7159_v27, %v7141_v21  ;;  %v7143_v5 = vpop.f32.mrf.mxu1  ;;  %7495 = vmatpush.bf16.msrb.mxu0 %v9743_v42  ;;  %v9983_v31 = vor.u32 %v12893_v33, %v9980_v10 }
 0x30d   :  { %v9852_v1 = vld [vmem:[%s20422_s1 + $0x938] sm:$0xf0]  ;;  %v7124_v12 = vpop.f32.mrf.mxu0  ;;  %v12889_v6 = vld [vmem:[%s20422_s1 + $0xa0c] sm:$0xf]  ;;  %7533 = vmatpush.bf16.msrb.mxu2 %v9999_v57  ;;  %v9727_v63 = vor.u32 %v12829_v35, %v9724_v34 }
 0x30e   :  { %v10108_v36 = vld [vmem:[%s20422_s1 + $0xb38] sm:$0xf0]  ;;  %v7125_v49 = vadd.f32 %v7124_v12, %v18880_v4  ;;  %v12825_v38 = vld [vmem:[%s20422_s1 + $0x80c] sm:$0xf]  ;;  %v19025_v11 = vadd.f32 %v7178_v0, %v7160_v20  ;;  %7514 = vmatpush.bf16.msrb.mxu1 %v9871_v52  ;;  %v9855_v4 = vor.u32 %v12861_v61, %v9852_v1 }
 0x30f   :  { %v9964_v19 = vld [vmem:[%s20422_s1 + $0xa18] sm:$0xf0]  ;;  %7552 = vmatpush.bf16.msrb.mxu3 %v10127_v26  ;;  %v10111_v30 = vor.u32 %v12925_v37, %v10108_v36  ;;  %v12857_v59 = vld [vmem:[%s20422_s1 + $0x90c] sm:$0xf]  ;;  %7446 = vmatmul.bf16.gmra.mxu1 %v14220_v9 }
 0x310   :  { %v9708_v2 = vld [vmem:[%s20422_s1 + $0x818] sm:$0xf0]  ;;  %v12921_v44 = vld [vmem:[%s20422_s1 + $0xb0c] sm:$0xf]  ;;  %v7144_v50 = vadd.f32 %v7143_v5, %v7125_v49  ;;  %7496 = vmatpush.bf16.msrb.mxu0 %v9727_v63  ;;  %v9967_v3 = vor.u32 %v12889_v6, %v9964_v19 }
 0x311   :  { %v9836_v47 = vld [vmem:[%s20422_s1 + $0x918] sm:$0xf0]  ;;  %v13045_v60 = vld [vmem:[%s20422_s1 + $0xeec] sm:$0xf]  ;;  %7484 = vmatmul.bf16.gmra.mxu3 %v14233_v14  ;;  %7534 = vmatpush.bf16.msrb.mxu2 %v9983_v31  ;;  %v9711_v53 = vor.u32 %v12825_v38, %v9708_v2 }
 0x312   :  { %7427 = vmatmul.bf16.gmra.mxu0 %v14218_v8  ;;  %v10092_v16 = vld [vmem:[%s20422_s1 + $0xb18] sm:$0xf0]  ;;  %v12981_v8 = vld [vmem:[%s20422_s1 + $0xcec] sm:$0xf]  ;;  %7515 = vmatpush.bf16.msrb.mxu1 %v9855_v4  ;;  %v9839_v21 = vor.u32 %v12857_v59, %v9836_v47 }
 0x313   :  { %v10588_v51 = vld [vmem:[%s20422_s1 + $0xef8] sm:$0xf0]  ;;  %v13013_v56 = vld [vmem:[%s20422_s1 + $0xdec] sm:$0xf]  ;;  %7553 = vmatpush.bf16.msrb.mxu3 %v10111_v30  ;;  %v10095_v7 = vor.u32 %v12921_v44, %v10092_v16 }
 0x314   :  { %7465 = vmatmul.bf16.gmra.mxu2 %v14231_v13  ;;  %v10332_v9 = vld [vmem:[%s20422_s1 + $0xcf8] sm:$0xf0]  ;;  %v13077_v14 = vld [vmem:[%s20422_s1 + $0xfec] sm:$0xf]  ;;  %v7181_v54 = vpop.f32.mrf.mxu3  ;;  %v10591_v57 = vor.u32 %v13045_v60, %v10588_v51  ;;  %v7145_v35 = vpop.f32.mrf.mxu1  ;;  %7497 = vmatpush.bf16.msrb.mxu0 %v9711_v53 }
 0x315   :  { %v10460_v13 = vld [vmem:[%s20422_s1 + $0xdf8] sm:$0xf0]  ;;  %v7162_v43 = vpop.f32.mrf.mxu2  ;;  %v10335_v42 = vor.u32 %v12981_v8, %v10332_v9  ;;  %v13041_v33 = vld [vmem:[%s20422_s1 + $0xecc] sm:$0xf]  ;;  %v7126_v26 = vpop.f32.mrf.mxu0  ;;  %7535 = vmatpush.bf16.msrb.mxu2 %v9967_v3 }
 0x316   :  { %v10716_v32 = vld [vmem:[%s20422_s1 + $0xff8] sm:$0xf0]  ;;  %v7163_v52 = vadd.f32 %v7162_v43, %v7144_v50  ;;  %v10463_v34 = vor.u32 %v13013_v56, %v10460_v13  ;;  %v12977_v27 = vld [vmem:[%s20422_s1 + $0xccc] sm:$0xf]  ;;  %v7127_v37 = vadd.f32 %v7126_v26, %v18913_v41  ;;  %7516 = vmatpush.bf16.msrb.mxu1 %v9839_v21 }
 0x317   :  { %v10572_v10 = vld [vmem:[%s20422_s1 + $0xed8] sm:$0xf0]  ;;  %v10719_v61 = vor.u32 %v13077_v14, %v10716_v32  ;;  %v13009_v1 = vld [vmem:[%s20422_s1 + $0xdcc] sm:$0xf]  ;;  %7554 = vmatpush.bf16.msrb.mxu3 %v10095_v7 }
 0x318   :  { %v10316_v0 = vld [vmem:[%s20422_s1 + $0xcd8] sm:$0xf0]  ;;  %v13073_v20 = vld [vmem:[%s20422_s1 + $0xfcc] sm:$0xf]  ;;  %v19092_v5 = vadd.f32 %v7181_v54, %v7163_v52  ;;  %v7146_v6 = vadd.f32 %v7145_v35, %v7127_v37  ;;  %7566 = vmatpush.bf16.msra.mxu0 %v10335_v42  ;;  %v10575_v41 = vor.u32 %v13041_v33, %v10572_v10 }
 0x319   :  { %v10444_v36 = vld [vmem:[%s20422_s1 + $0xdd8] sm:$0xf0]  ;;  %7604 = vmatpush.bf16.msra.mxu2 %v10591_v57  ;;  %v10319_v49 = vor.u32 %v12977_v27, %v10316_v0  ;;  %v13037_v19 = vld [vmem:[%s20422_s1 + $0xeac] sm:$0xf] }
 0x31a   :  { %v10700_v12 = vld [vmem:[%s20422_s1 + $0xfd8] sm:$0xf0]  ;;  %7585 = vmatpush.bf16.msra.mxu1 %v10463_v34  ;;  %v10447_v31 = vor.u32 %v13009_v1, %v10444_v36  ;;  %v12973_v2 = vld [vmem:[%s20422_s1 + $0xcac] sm:$0xf] }
 0x31b   :  { %7623 = vmatpush.bf16.msra.mxu3 %v10719_v61  ;;  %v10703_v63 = vor.u32 %v13073_v20, %v10700_v12  ;;  %v10556_v38 = vld [vmem:[%s20422_s1 + $0xeb8] sm:$0xf0]  ;;  %v13005_v30 = vld [vmem:[%s20422_s1 + $0xdac] sm:$0xf] }
 0x31c   :  { %v10300_v4 = vld [vmem:[%s20422_s1 + $0xcb8] sm:$0xf0]  ;;  %v7183_v47 = vpop.f32.mrf.mxu3  ;;  %7567 = vmatpush.bf16.msra.mxu0 %v10319_v49  ;;  %v13069_v50 = vld [vmem:[%s20422_s1 + $0xfac] sm:$0xf]  ;;  %v7214_v8 = vpop.f32.mrf.mxu1  ;;  %v10559_v56 = vor.u32 %v13037_v19, %v10556_v38 }
 0x31d   :  { %v7164_v59 = vpop.f32.mrf.mxu2  ;;  %7605 = vmatpush.bf16.msra.mxu2 %v10575_v41  ;;  %v10428_v44 = vld [vmem:[%s20422_s1 + $0xdb8] sm:$0xf0]  ;;  %v7195_v51 = vpop.f32.mrf.mxu0  ;;  %v10303_v3 = vor.u32 %v12973_v2, %v10300_v4  ;;  %v13033_v53 = vld [vmem:[%s20422_s1 + $0xe8c] sm:$0xf] }
 0x31e   :  { %v10684_v16 = vld [vmem:[%s20422_s1 + $0xfb8] sm:$0xf0]  ;;  %v7165_v60 = vadd.f32 %v7164_v59, %v7146_v6  ;;  %7586 = vmatpush.bf16.msra.mxu1 %v10447_v31  ;;  %v7196_v9 = vadd.f32 %v7195_v51, %v18968_v48  ;;  %v10431_v32 = vor.u32 %v13005_v30, %v10428_v44  ;;  %v12969_v7 = vld [vmem:[%s20422_s1 + $0xc8c] sm:$0xf] }
 0x31f   :  { %7624 = vmatpush.bf16.msra.mxu3 %v10703_v63  ;;  %v10540_v13 = vld [vmem:[%s20422_s1 + $0xe98] sm:$0xf0]  ;;  %v10687_v21 = vor.u32 %v13069_v50, %v10684_v16  ;;  %v13001_v43 = vld [vmem:[%s20422_s1 + $0xd8c] sm:$0xf]  ;;  %7517 = vmatmul.bf16.vlgmr.msrb.gmra.mxu1 %v14358_v24 }
 0x320   :  { %v19125_v14 = vadd.f32 %v7183_v47, %v7165_v60  ;;  %v10284_v48 = vld [vmem:[%s20422_s1 + $0xc98] sm:$0xf0]  ;;  %v7215_v54 = vadd.f32 %v7214_v8, %v7196_v9  ;;  %v13065_v42 = vld [vmem:[%s20422_s1 + $0xf8c] sm:$0xf]  ;;  %7568 = vmatpush.bf16.msra.mxu0 %v10303_v3 }
 0x321   :  { %v10412_v57 = vld [vmem:[%s20422_s1 + $0xd98] sm:$0xf0]  ;;  %7555 = vmatmul.bf16.vlgmr.msrb.gmra.mxu3 %v14371_v29  ;;  %7606 = vmatpush.bf16.msra.mxu2 %v10559_v56  ;;  %v10287_v24 = vor.u32 %v12969_v7, %v10284_v48  ;;  %v13029_v10 = vld [vmem:[%s20422_s1 + $0xe6c] sm:$0xf] }
 0x322   :  { %7498 = vmatmul.bf16.vlgmr.msrb.gmra.mxu0 %v14356_v23  ;;  %v10668_v33 = vld [vmem:[%s20422_s1 + $0xf98] sm:$0xf0]  ;;  %v10543_v23 = vor.u32 %v13033_v53, %v10540_v13  ;;  %7587 = vmatpush.bf16.msra.mxu1 %v10431_v32  ;;  %v10415_v26 = vor.u32 %v13001_v43, %v10412_v57  ;;  %v12997_v34 = vld [vmem:[%s20422_s1 + $0xd6c] sm:$0xf] }
 0x323   :  { %v10524_v52 = vld [vmem:[%s20422_s1 + $0xe78] sm:$0xf0]  ;;  %7625 = vmatpush.bf16.msra.mxu3 %v10687_v21  ;;  %v10671_v35 = vor.u32 %v13065_v42, %v10668_v33  ;;  %v13061_v1 = vld [vmem:[%s20422_s1 + $0xf6c] sm:$0xf] }
 0x324   :  { %7536 = vmatmul.bf16.vlgmr.msrb.gmra.mxu2 %v14369_v28  ;;  %v12965_v28 = vld [vmem:[%s20422_s1 + $0xc6c] sm:$0xf]  ;;  %v10268_v29 = vld [vmem:[%s20422_s1 + $0xc78] sm:$0xf0]  ;;  %v7252_v27 = vpop.f32.mrf.mxu3  ;;  %v7216_v12 = vpop.f32.mrf.mxu1  ;;  %7569 = vmatpush.bf16.msra.mxu0 %v10287_v24  ;;  %v10527_v41 = vor.u32 %v13029_v10, %v10524_v52 }
 0x325   :  { %v7233_v61 = vpop.f32.mrf.mxu2  ;;  %v10396_v0 = vld [vmem:[%s20422_s1 + $0xd78] sm:$0xf0]  ;;  %v7197_v20 = vpop.f32.mrf.mxu0  ;;  %7607 = vmatpush.bf16.msra.mxu2 %v10543_v23  ;;  %v10271_v49 = vor.u32 %v12965_v28, %v10268_v29  ;;  %v13025_v31 = vld [vmem:[%s20422_s1 + $0xe4c] sm:$0xf] }
 0x326   :  { %v10652_v37 = vld [vmem:[%s20422_s1 + $0xf78] sm:$0xf0]  ;;  %v7234_v36 = vadd.f32 %v7233_v61, %v7215_v54  ;;  %v7198_v6 = vadd.f32 %v7197_v20, %v19025_v11  ;;  %7588 = vmatpush.bf16.msra.mxu1 %v10415_v26  ;;  %v10399_v38 = vor.u32 %v12997_v34, %v10396_v0  ;;  %v12961_v11 = vld [vmem:[%s20422_s1 + $0xc4c] sm:$0xf] }
 0x327   :  { %v10508_v63 = vld [vmem:[%s20422_s1 + $0xe58] sm:$0xf0]  ;;  %7626 = vmatpush.bf16.msra.mxu3 %v10671_v35  ;;  %v10655_v2 = vor.u32 %v13061_v1, %v10652_v37  ;;  %v12993_v30 = vld [vmem:[%s20422_s1 + $0xd4c] sm:$0xf] }
 0x328   :  { %v19180_v19 = vadd.f32 %v7252_v27, %v7234_v36  ;;  %v10252_v4 = vld [vmem:[%s20422_s1 + $0xc58] sm:$0xf0]  ;;  %v7217_v59 = vadd.f32 %v7216_v12, %v7198_v6  ;;  %v13057_v44 = vld [vmem:[%s20422_s1 + $0xf4c] sm:$0xf]  ;;  %7570 = vmatpush.bf16.msra.mxu0 %v10271_v49  ;;  %v10511_v16 = vor.u32 %v13025_v31, %v10508_v63 }
 0x329   :  { %v10380_v47 = vld [vmem:[%s20422_s1 + $0xd58] sm:$0xf0]  ;;  %7608 = vmatpush.bf16.msra.mxu2 %v10527_v41  ;;  %v10255_v60 = vor.u32 %v12961_v11, %v10252_v4  ;;  %v13021_v51 = vld [vmem:[%s20422_s1 + $0xe2c] sm:$0xf] }
 0x32a   :  { %v10636_v50 = vld [vmem:[%s20422_s1 + $0xf58] sm:$0xf0]  ;;  %7589 = vmatpush.bf16.msra.mxu1 %v10399_v38  ;;  %v10383_v9 = vor.u32 %v12993_v30, %v10380_v47  ;;  %v12957_v3 = vld [vmem:[%s20422_s1 + $0xc2c] sm:$0xf] }
 0x32b   :  { %v10492_v8 = vld [vmem:[%s20422_s1 + $0xe38] sm:$0xf0]  ;;  %7627 = vmatpush.bf16.msra.mxu3 %v10655_v2  ;;  %v10639_v56 = vor.u32 %v13057_v44, %v10636_v50  ;;  %v12989_v13 = vld [vmem:[%s20422_s1 + $0xd2c] sm:$0xf] }
 0x32c   :  { %v10236_v53 = vld [vmem:[%s20422_s1 + $0xc38] sm:$0xf0]  ;;  %v7254_v21 = vpop.f32.mrf.mxu3  ;;  %v13053_v48 = vld [vmem:[%s20422_s1 + $0xf2c] sm:$0xf]  ;;  %v7219_v42 = vpop.f32.mrf.mxu1  ;;  %7571 = vmatpush.bf16.msra.mxu0 %v10255_v60  ;;  %v10495_v24 = vor.u32 %v13021_v51, %v10492_v8 }
 0x32d   :  { %v7235_v32 = vpop.f32.mrf.mxu2  ;;  %v10364_v7 = vld [vmem:[%s20422_s1 + $0xd38] sm:$0xf0]  ;;  %v13017_v33 = vld [vmem:[%s20422_s1 + $0xe0c] sm:$0xf]  ;;  %7609 = vmatpush.bf16.msra.mxu2 %v10511_v16  ;;  %v10239_v10 = vor.u32 %v12957_v3, %v10236_v53 }
 0x32e   :  { %v10620_v43 = vld [vmem:[%s20422_s1 + $0xf38] sm:$0xf0]  ;;  %v7236_v54 = vadd.f32 %v7235_v32, %v7217_v59  ;;  %v12953_v26 = vld [vmem:[%s20422_s1 + $0xc0c] sm:$0xf]  ;;  %7590 = vmatpush.bf16.msra.mxu1 %v10383_v9 }
 0x32f   :  { %v7200_v57 = vpop.f32.mrf.mxu0  ;;  %v10476_v52 = vld [vmem:[%s20422_s1 + $0xe18] sm:$0xf0]  ;;  %7628 = vmatpush.bf16.msra.mxu3 %v10639_v56  ;;  %v10623_v29 = vor.u32 %v13053_v48, %v10620_v43  ;;  %v12985_v34 = vld [vmem:[%s20422_s1 + $0xd0c] sm:$0xf]  ;;  %7522 = vmatmul.bf16.gmra.mxu1 %v14490_v40 }
 0x330   :  { %v7201_v23 = vadd.f32 %v7200_v57, %v19092_v5  ;;  %v10220_v35 = vld [vmem:[%s20422_s1 + $0xc18] sm:$0xf0]  ;;  %v19237_v28 = vadd.f32 %v7254_v21, %v7236_v54  ;;  %v10367_v5 = vor.u32 %v12989_v13, %v10364_v7  ;;  %v13049_v27 = vld [vmem:[%s20422_s1 + $0xf0c] sm:$0xf]  ;;  %7572 = vmatpush.bf16.msra.mxu0 %v10239_v10  ;;  %v10479_v12 = vor.u32 %v13017_v33, %v10476_v52 }
 0x331   :  { %v10348_v61 = vld [vmem:[%s20422_s1 + $0xd18] sm:$0xf0]  ;;  %v13173_v37 = vld [vmem:[%s20422_s1 + $0x12ec] sm:$0xf]  ;;  %7560 = vmatmul.bf16.gmra.mxu3 %v14503_v46  ;;  %7610 = vmatpush.bf16.msra.mxu2 %v10495_v24  ;;  %v10223_v6 = vor.u32 %v12953_v26, %v10220_v35 }
 0x332   :  { %v7220_v0 = vadd.f32 %v7219_v42, %v7201_v23  ;;  %7503 = vmatmul.bf16.gmra.mxu0 %v14488_v39  ;;  %v10604_v1 = vld [vmem:[%s20422_s1 + $0xf18] sm:$0xf0]  ;;  %v13109_v39 = vld [vmem:[%s20422_s1 + $0x10ec] sm:$0xf]  ;;  %7591 = vmatpush.bf16.msra.mxu1 %v10367_v5  ;;  %v10351_v49 = vor.u32 %v12985_v34, %v10348_v61 }
 0x333   :  { %v11100_v36 = vld [vmem:[%s20422_s1 + $0x12f8] sm:$0xf0]  ;;  %v13141_v20 = vld [vmem:[%s20422_s1 + $0x11ec] sm:$0xf]  ;;  %7629 = vmatpush.bf16.msra.mxu3 %v10623_v29  ;;  %v10607_v31 = vor.u32 %v13049_v27, %v10604_v1 }
 0x334   :  { %7541 = vmatmul.bf16.gmra.mxu2 %v14501_v45  ;;  %v10844_v40 = vld [vmem:[%s20422_s1 + $0x10f8] sm:$0xf0]  ;;  %v13205_v46 = vld [vmem:[%s20422_s1 + $0x13ec] sm:$0xf]  ;;  %v7257_v38 = vpop.f32.mrf.mxu3  ;;  %v11103_v2 = vor.u32 %v13173_v37, %v11100_v36  ;;  %v7221_v44 = vpop.f32.mrf.mxu1  ;;  %7573 = vmatpush.bf16.msra.mxu0 %v10223_v6 }
 0x335   :  { %v10972_v45 = vld [vmem:[%s20422_s1 + $0x11f8] sm:$0xf0]  ;;  %v10847_v11 = vor.u32 %v13109_v39, %v10844_v40  ;;  %v13169_v4 = vld [vmem:[%s20422_s1 + $0x12cc] sm:$0xf]  ;;  %7611 = vmatpush.bf16.msra.mxu2 %v10479_v12 }
 0x336   :  { %v11228_v41 = vld [vmem:[%s20422_s1 + $0x13f8] sm:$0xf0]  ;;  %v7238_v63 = vpop.f32.mrf.mxu2  ;;  %v10975_v50 = vor.u32 %v13141_v20, %v10972_v45  ;;  %v13105_v60 = vld [vmem:[%s20422_s1 + $0x10cc] sm:$0xf]  ;;  %7592 = vmatpush.bf16.msra.mxu1 %v10351_v49 }
 0x337   :  { %v11084_v30 = vld [vmem:[%s20422_s1 + $0x12d8] sm:$0xf0]  ;;  %v7239_v59 = vadd.f32 %v7238_v63, %v7220_v0  ;;  %v7202_v47 = vpop.f32.mrf.mxu0  ;;  %v11231_v16 = vor.u32 %v13205_v46, %v11228_v41  ;;  %v13137_v8 = vld [vmem:[%s20422_s1 + $0x11cc] sm:$0xf]  ;;  %7630 = vmatpush.bf16.msra.mxu3 %v10607_v31 }
 0x338   :  { %v10828_v51 = vld [vmem:[%s20422_s1 + $0x10d8] sm:$0xf0]  ;;  %v7203_v9 = vadd.f32 %v7202_v47, %v19125_v14  ;;  %v13201_v3 = vld [vmem:[%s20422_s1 + $0x13cc] sm:$0xf]  ;;  %7642 = vmatpush.bf16.msrb.mxu0 %v10847_v11  ;;  %v11087_v14 = vor.u32 %v13169_v4, %v11084_v30 }
 0x339   :  { %v10956_v56 = vld [vmem:[%s20422_s1 + $0x11d8] sm:$0xf0]  ;;  %v19304_v13 = vadd.f32 %v7257_v38, %v7239_v59  ;;  %7680 = vmatpush.bf16.msrb.mxu2 %v11103_v2  ;;  %v10831_v21 = vor.u32 %v13105_v60, %v10828_v51  ;;  %v13165_v43 = vld [vmem:[%s20422_s1 + $0x12ac] sm:$0xf] }
 0x33a   :  { %v11212_v53 = vld [vmem:[%s20422_s1 + $0x13d8] sm:$0xf0]  ;;  %v7222_v32 = vadd.f32 %v7221_v44, %v7203_v9  ;;  %7661 = vmatpush.bf16.msrb.mxu1 %v10975_v50  ;;  %v10959_v7 = vor.u32 %v13137_v8, %v10956_v56  ;;  %v13101_v57 = vld [vmem:[%s20422_s1 + $0x10ac] sm:$0xf] }
 0x33b   :  { %7699 = vmatpush.bf16.msrb.mxu3 %v11231_v16  ;;  %v11215_v48 = vor.u32 %v13201_v3, %v11212_v53  ;;  %v11068_v54 = vld [vmem:[%s20422_s1 + $0x12b8] sm:$0xf0]  ;;  %v13133_v33 = vld [vmem:[%s20422_s1 + $0x11ac] sm:$0xf] }
 0x33c   :  { %v10812_v42 = vld [vmem:[%s20422_s1 + $0x10b8] sm:$0xf0]  ;;  %v7259_v24 = vpop.f32.mrf.mxu3  ;;  %7643 = vmatpush.bf16.msrb.mxu0 %v10831_v21  ;;  %v13197_v52 = vld [vmem:[%s20422_s1 + $0x13ac] sm:$0xf]  ;;  %v7290_v29 = vpop.f32.mrf.mxu1  ;;  %v11071_v61 = vor.u32 %v13165_v43, %v11068_v54 }
 0x33d   :  { %7681 = vmatpush.bf16.msrb.mxu2 %v11087_v14  ;;  %v10940_v10 = vld [vmem:[%s20422_s1 + $0x11b8] sm:$0xf0]  ;;  %v10815_v27 = vor.u32 %v13101_v57, %v10812_v42  ;;  %v13161_v0 = vld [vmem:[%s20422_s1 + $0x128c] sm:$0xf] }
 0x33e   :  { %v7240_v23 = vpop.f32.mrf.mxu2  ;;  %v11196_v26 = vld [vmem:[%s20422_s1 + $0x13b8] sm:$0xf0]  ;;  %7662 = vmatpush.bf16.msrb.mxu1 %v10959_v7  ;;  %v10943_v36 = vor.u32 %v13133_v33, %v10940_v10  ;;  %v13097_v40 = vld [vmem:[%s20422_s1 + $0x108c] sm:$0xf] }
 0x33f   :  { %v7241_v35 = vadd.f32 %v7240_v23, %v7222_v32  ;;  %v7271_v5 = vpop.f32.mrf.mxu0  ;;  %7700 = vmatpush.bf16.msrb.mxu3 %v11215_v48  ;;  %v11052_v1 = vld [vmem:[%s20422_s1 + $0x1298] sm:$0xf0]  ;;  %v11199_v39 = vor.u32 %v13197_v52, %v11196_v26  ;;  %v13129_v20 = vld [vmem:[%s20422_s1 + $0x118c] sm:$0xf]  ;;  %7593 = vmatmul.bf16.vlgmr.msra.gmra.mxu1 %v14634_v18 }
 0x340   :  { %v7272_v34 = vadd.f32 %v7271_v5, %v19180_v19  ;;  %v10796_v19 = vld [vmem:[%s20422_s1 + $0x1098] sm:$0xf0]  ;;  %v13193_v45 = vld [vmem:[%s20422_s1 + $0x138c] sm:$0xf]  ;;  %7644 = vmatpush.bf16.msrb.mxu0 %v10815_v27 }
 0x341   :  { %v19337_v37 = vadd.f32 %v7259_v24, %v7241_v35  ;;  %v10924_v6 = vld [vmem:[%s20422_s1 + $0x1198] sm:$0xf0]  ;;  %7631 = vmatmul.bf16.vlgmr.msra.gmra.mxu3 %v14647_v25  ;;  %7682 = vmatpush.bf16.msrb.mxu2 %v11071_v61  ;;  %v10799_v18 = vor.u32 %v13097_v40, %v10796_v19  ;;  %v13157_v41 = vld [vmem:[%s20422_s1 + $0x126c] sm:$0xf] }
 0x342   :  { %v7291_v12 = vadd.f32 %v7290_v29, %v7272_v34  ;;  %7574 = vmatmul.bf16.vlgmr.msra.gmra.mxu0 %v14632_v17  ;;  %v11180_v46 = vld [vmem:[%s20422_s1 + $0x1398] sm:$0xf0]  ;;  %v11055_v17 = vor.u32 %v13161_v0, %v11052_v1  ;;  %7663 = vmatpush.bf16.msrb.mxu1 %v10943_v36  ;;  %v10927_v31 = vor.u32 %v13129_v20, %v10924_v6  ;;  %v13125_v38 = vld [vmem:[%s20422_s1 + $0x116c] sm:$0xf] }
 0x343   :  { %v11036_v49 = vld [vmem:[%s20422_s1 + $0x1278] sm:$0xf0]  ;;  %7701 = vmatpush.bf16.msrb.mxu3 %v11199_v39  ;;  %v11183_v63 = vor.u32 %v13193_v45, %v11180_v46  ;;  %v13189_v30 = vld [vmem:[%s20422_s1 + $0x136c] sm:$0xf] }
 0x344   :  { %7612 = vmatmul.bf16.vlgmr.msra.gmra.mxu2 %v14645_v22  ;;  %v13093_v22 = vld [vmem:[%s20422_s1 + $0x106c] sm:$0xf]  ;;  %v10780_v25 = vld [vmem:[%s20422_s1 + $0x1078] sm:$0xf0]  ;;  %v7328_v11 = vpop.f32.mrf.mxu3  ;;  %v7292_v50 = vpop.f32.mrf.mxu1  ;;  %7645 = vmatpush.bf16.msrb.mxu0 %v10799_v18  ;;  %v11039_v60 = vor.u32 %v13157_v41, %v11036_v49 }
 0x345   :  { %v10908_v4 = vld [vmem:[%s20422_s1 + $0x1178] sm:$0xf0]  ;;  %7683 = vmatpush.bf16.msrb.mxu2 %v11055_v17  ;;  %v10783_v51 = vor.u32 %v13093_v22, %v10780_v25  ;;  %v13153_v8 = vld [vmem:[%s20422_s1 + $0x124c] sm:$0xf] }
 0x346   :  { %v7309_v2 = vpop.f32.mrf.mxu2  ;;  %v11164_v59 = vld [vmem:[%s20422_s1 + $0x1378] sm:$0xf0]  ;;  %7664 = vmatpush.bf16.msrb.mxu1 %v10927_v31  ;;  %v10911_v3 = vor.u32 %v13125_v38, %v10908_v4  ;;  %v13121_v14 = vld [vmem:[%s20422_s1 + $0x114c] sm:$0xf] }
 0x347   :  { %v7310_v47 = vadd.f32 %v7309_v2, %v7291_v12  ;;  %v7273_v44 = vpop.f32.mrf.mxu0  ;;  %v11020_v9 = vld [vmem:[%s20422_s1 + $0x1258] sm:$0xf0]  ;;  %7702 = vmatpush.bf16.msrb.mxu3 %v11183_v63  ;;  %v11167_v53 = vor.u32 %v13189_v30, %v11164_v59  ;;  %v13185_v48 = vld [vmem:[%s20422_s1 + $0x134c] sm:$0xf] }
 0x348   :  { %v7274_v16 = vadd.f32 %v7273_v44, %v19237_v28  ;;  %v13089_v28 = vld [vmem:[%s20422_s1 + $0x104c] sm:$0xf]  ;;  %v10764_v32 = vld [vmem:[%s20422_s1 + $0x1058] sm:$0xf0]  ;;  %7646 = vmatpush.bf16.msrb.mxu0 %v10783_v51  ;;  %v11023_v54 = vor.u32 %v13153_v8, %v11020_v9 }
 0x349   :  { %v19392_v56 = vadd.f32 %v7328_v11, %v7310_v47  ;;  %v10892_v7 = vld [vmem:[%s20422_s1 + $0x1158] sm:$0xf0]  ;;  %7684 = vmatpush.bf16.msrb.mxu2 %v11039_v60  ;;  %v10767_v57 = vor.u32 %v13089_v28, %v10764_v32  ;;  %v13149_v42 = vld [vmem:[%s20422_s1 + $0x122c] sm:$0xf] }
 0x34a   :  { %v7293_v21 = vadd.f32 %v7292_v50, %v7274_v16  ;;  %v11148_v43 = vld [vmem:[%s20422_s1 + $0x1358] sm:$0xf0]  ;;  %7665 = vmatpush.bf16.msrb.mxu1 %v10911_v3  ;;  %v10895_v23 = vor.u32 %v13121_v14, %v10892_v7  ;;  %v13085_v10 = vld [vmem:[%s20422_s1 + $0x102c] sm:$0xf] }
 0x34b   :  { %v11004_v33 = vld [vmem:[%s20422_s1 + $0x1238] sm:$0xf0]  ;;  %7703 = vmatpush.bf16.msrb.mxu3 %v11167_v53  ;;  %v11151_v24 = vor.u32 %v13185_v48, %v11148_v43  ;;  %v13117_v26 = vld [vmem:[%s20422_s1 + $0x112c] sm:$0xf]  ;;  %v7872_v38 = vmax.f32 %v19392_v56, 0.0 }
 0x34c   :  { %v10748_v52 = vld [vmem:[%s20422_s1 + $0x1038] sm:$0xf0]  ;;  %v7330_v5 = vpop.f32.mrf.mxu3  ;;  %v13181_v34 = vld [vmem:[%s20422_s1 + $0x132c] sm:$0xf]  ;;  %v7295_v1 = vpop.f32.mrf.mxu1  ;;  %7647 = vmatpush.bf16.msrb.mxu0 %v10767_v57  ;;  %v11007_v19 = vor.u32 %v13149_v42, %v11004_v33 }
 0x34d   :  { %v10876_v29 = vld [vmem:[%s20422_s1 + $0x1138] sm:$0xf0]  ;;  %v13145_v36 = vld [vmem:[%s20422_s1 + $0x120c] sm:$0xf]  ;;  %7685 = vmatpush.bf16.msrb.mxu2 %v11023_v54  ;;  %v10751_v20 = vor.u32 %v13085_v10, %v10748_v52 }
 0x34e   :  { %v7311_v35 = vpop.f32.mrf.mxu2  ;;  %v11132_v61 = vld [vmem:[%s20422_s1 + $0x1338] sm:$0xf0]  ;;  %v13081_v12 = vld [vmem:[%s20422_s1 + $0x100c] sm:$0xf]  ;;  %7666 = vmatpush.bf16.msrb.mxu1 %v10895_v23 }
 0x34f   :  { %v7312_v27 = vadd.f32 %v7311_v35, %v7293_v21  ;;  %v7276_v0 = vpop.f32.mrf.mxu0  ;;  %v10988_v39 = vld [vmem:[%s20422_s1 + $0x1218] sm:$0xf0]  ;;  %v13113_v45 = vld [vmem:[%s20422_s1 + $0x110c] sm:$0xf]  ;;  %7704 = vmatpush.bf16.msrb.mxu3 %v11151_v24  ;;  %v11135_v17 = vor.u32 %v13181_v34, %v11132_v61  ;;  %7598 = vmatmul.bf16.gmra.mxu1 %v14766_v58  ;;  %v13530_v35 = vld [vmem:[%s20424_s2] sm:$0xf] }
 0x350   :  { %v7277_v40 = vadd.f32 %v7276_v0, %v19304_v13  ;;  %v10732_v6 = vld [vmem:[%s20422_s1 + $0x1018] sm:$0xf0]  ;;  %v10879_v13 = vor.u32 %v13117_v26, %v10876_v29  ;;  %v13177_v41 = vld [vmem:[%s20422_s1 + $0x130c] sm:$0xf]  ;;  %7648 = vmatpush.bf16.msrb.mxu0 %v10751_v20  ;;  %v10991_v4 = vor.u32 %v13145_v36, %v10988_v39 }
 0x351   :  { %v7331_v46 = vadd.f32 %v7330_v5, %v7312_v27  ;;  %v10860_v18 = vld [vmem:[%s20422_s1 + $0x1118] sm:$0xf0]  ;;  %v13301_v63 = vld [vmem:[%s20422_s1 + $0x16ec] sm:$0xf]  ;;  %7686 = vmatpush.bf16.msrb.mxu2 %v11007_v19  ;;  %v10735_v30 = vor.u32 %v13081_v12, %v10732_v6  ;;  %v19522_v5 = vperm.slane %v13530_v35, 3 }
 0x352   :  { %v11116_v49 = vld [vmem:[%s20422_s1 + $0x1318] sm:$0xf0]  ;;  %v7296_v31 = vadd.f32 %v7295_v1, %v7277_v40  ;;  %7579 = vmatmul.bf16.gmra.mxu0 %v14764_v55  ;;  %v13237_v25 = vld [vmem:[%s20422_s1 + $0x14ec] sm:$0xf]  ;;  %v20559_v55 = vld [vmem:[#allocation2_spill] sm:$0xff]  ;;  %7667 = vmatpush.bf16.msrb.mxu1 %v10879_v13  ;;  %v10863_v50 = vor.u32 %v13113_v45, %v10860_v18 }
 0x353   :  { %v11612_v22 = vld [vmem:[%s20422_s1 + $0x16f8] sm:$0xf0]  ;;  %v7876_v2 = vmax.f32 %v7331_v46, 0.0  ;;  %7636 = vmatmul.bf16.gmra.mxu3 %v20559_v55  ;;  %v13269_v11 = vld [vmem:[%s20422_s1 + $0x15ec] sm:$0xf]  ;;  %v11119_v16 = vor.u32 %v13177_v41, %v11116_v49  ;;  %v20561_v55 = vld [vmem:[#allocation4_spill] sm:$0xff] }
 0x354   :  { %7617 = vmatmul.bf16.gmra.mxu2 %v14777_v62  ;;  %v11356_v58 = vld [vmem:[%s20422_s1 + $0x14f8] sm:$0xf0]  ;;  %v13333_v62 = vld [vmem:[%s20422_s1 + $0x17ec] sm:$0xf]  ;;  %7705 = vmatpush.bf16.msrb.mxu3 %v11135_v17  ;;  %v7333_v51 = vpop.f32.mrf.mxu3  ;;  %v11615_v8 = vor.u32 %v13301_v63, %v11612_v22  ;;  %v7297_v32 = vpop.f32.mrf.mxu1 }
 0x355   :  { %v11484_v59 = vld [vmem:[%s20422_s1 + $0x15f8] sm:$0xf0]  ;;  %v19490_v44 = vpack.c.bf16 %v7876_v2, %v7872_v38  ;;  %v11359_v9 = vor.u32 %v13237_v25, %v11356_v58  ;;  %v13297_v56 = vld [vmem:[%s20422_s1 + $0x16cc] sm:$0xf]  ;;  %7687 = vmatpush.bf16.msrb.mxu2 %v10991_v4  ;;  %7649 = vmatpush.bf16.msrb.mxu0 %v10735_v30 }
 0x356   :  { %v11740_v47 = vld [vmem:[%s20422_s1 + $0x17f8] sm:$0xf0]  ;;  %v11487_v14 = vor.u32 %v13269_v11, %v11484_v59  ;;  %v13233_v7 = vld [vmem:[%s20422_s1 + $0x14cc] sm:$0xf]  ;;  %7668 = vmatpush.bf16.msrb.mxu1 %v10863_v50 }
 0x357   :  { %v7314_v60 = vpop.f32.mrf.mxu2  ;;  %v11596_v3 = vld [vmem:[%s20422_s1 + $0x16d8] sm:$0xf0]  ;;  %v7278_v28 = vpop.f32.mrf.mxu0  ;;  %v11743_v21 = vor.u32 %v13333_v62, %v11740_v47  ;;  %v13265_v43 = vld [vmem:[%s20422_s1 + $0x15cc] sm:$0xf]  ;;  %v20563_v47 = vld [vmem:[#allocation6_spill] sm:$0xff] }
 0x358   :  { %v7315_v53 = vadd.f32 %v7314_v60, %v7296_v31  ;;  %v11340_v48 = vld [vmem:[%s20422_s1 + $0x14d8] sm:$0xf0]  ;;  %v7279_v54 = vadd.f32 %v7278_v28, %v19337_v37  ;;  %v13329_v42 = vld [vmem:[%s20422_s1 + $0x17cc] sm:$0xf]  ;;  %7706 = vmatpush.bf16.msrb.mxu3 %v11119_v16  ;;  %v11599_v37 = vor.u32 %v13297_v56, %v11596_v3 }
 0x359   :  { %v11468_v57 = vld [vmem:[%s20422_s1 + $0x15d8] sm:$0xf0]  ;;  %7756 = vmatpush.bf16.msra.mxu2 %v11615_v8  ;;  %7718 = vmatpush.bf16.msra.mxu0 %v11359_v9  ;;  %v11343_v10 = vor.u32 %v13233_v7, %v11340_v48  ;;  %v13293_v29 = vld [vmem:[%s20422_s1 + $0x16ac] sm:$0xf] }
 0x35a   :  { %v11724_v33 = vld [vmem:[%s20422_s1 + $0x17d8] sm:$0xf0]  ;;  %v19517_v23 = vadd.f32 %v7333_v51, %v7315_v53  ;;  %v7298_v24 = vadd.f32 %v7297_v32, %v7279_v54  ;;  %7737 = vmatpush.bf16.msra.mxu1 %v11487_v14  ;;  %v11471_v52 = vor.u32 %v13265_v43, %v11468_v57  ;;  %v13229_v61 = vld [vmem:[%s20422_s1 + $0x14ac] sm:$0xf] }
 0x35b   :  { %v11727_v26 = vor.u32 %v13329_v42, %v11724_v33  ;;  %v11580_v34 = vld [vmem:[%s20422_s1 + $0x16b8] sm:$0xf0]  ;;  %v13261_v0 = vld [vmem:[%s20422_s1 + $0x15ac] sm:$0xf] }
 0x35c   :  { %7775 = vmatpush.bf16.msra.mxu3 %v11743_v21  ;;  %v11324_v27 = vld [vmem:[%s20422_s1 + $0x14b8] sm:$0xf0]  ;;  %v7335_v36 = vpop.f32.mrf.mxu3  ;;  %v13325_v40 = vld [vmem:[%s20422_s1 + $0x17ac] sm:$0xf]  ;;  %v7366_v6 = vpop.f32.mrf.mxu1  ;;  %v11583_v46 = vor.u32 %v13293_v29, %v11580_v34  ;;  %v7880_v30 = vmax.f32 %v19517_v23, 0.0 }
 0x35d   :  { %7757 = vmatpush.bf16.msra.mxu2 %v11599_v37  ;;  %7719 = vmatpush.bf16.msra.mxu0 %v11343_v10  ;;  %v11452_v39 = vld [vmem:[%s20422_s1 + $0x15b8] sm:$0xf0]  ;;  %v11327_v13 = vor.u32 %v13229_v61, %v11324_v27  ;;  %v13289_v17 = vld [vmem:[%s20422_s1 + $0x168c] sm:$0xf] }
 0x35e   :  { %v11708_v19 = vld [vmem:[%s20422_s1 + $0x17b8] sm:$0xf0]  ;;  %7738 = vmatpush.bf16.msra.mxu1 %v11471_v52  ;;  %v11455_v49 = vor.u32 %v13261_v0, %v11452_v39  ;;  %v13225_v63 = vld [vmem:[%s20422_s1 + $0x148c] sm:$0xf] }
 0x35f   :  { %v7316_v1 = vpop.f32.mrf.mxu2  ;;  %v7347_v12 = vpop.f32.mrf.mxu0  ;;  %v11564_v18 = vld [vmem:[%s20422_s1 + $0x1698] sm:$0xf0]  ;;  %v11711_v31 = vor.u32 %v13325_v40, %v11708_v19  ;;  %v13257_v25 = vld [vmem:[%s20422_s1 + $0x158c] sm:$0xf]  ;;  %7669 = vmatmul.bf16.vlgmr.msrb.gmra.mxu1 %v20561_v55 }
 0x360   :  { %v7317_v20 = vadd.f32 %v7316_v1, %v7298_v24  ;;  %7776 = vmatpush.bf16.msra.mxu3 %v11727_v26  ;;  %v7348_v45 = vadd.f32 %v7347_v12, %v19522_v5  ;;  %v11308_v22 = vld [vmem:[%s20422_s1 + $0x1498] sm:$0xf0]  ;;  %v20560_v2 = vld [vmem:[#allocation3_spill] sm:$0xff]  ;;  %v11567_v50 = vor.u32 %v13289_v17, %v11564_v18 }
 0x361   :  { %v11436_v58 = vld [vmem:[%s20422_s1 + $0x1598] sm:$0xf0]  ;;  %v13321_v11 = vld [vmem:[%s20422_s1 + $0x178c] sm:$0xf]  ;;  %7758 = vmatpush.bf16.msra.mxu2 %v11583_v46  ;;  %7720 = vmatpush.bf16.msra.mxu0 %v11327_v13  ;;  %v11311_v16 = vor.u32 %v13225_v63, %v11308_v22 }
 0x362   :  { %v7336_v41 = vadd.f32 %v7335_v36, %v7317_v20  ;;  %v7367_v38 = vadd.f32 %v7366_v6, %v7348_v45  ;;  %7650 = vmatmul.bf16.vlgmr.msrb.gmra.mxu0 %v20560_v2  ;;  %v11692_v4 = vld [vmem:[%s20422_s1 + $0x1798] sm:$0xf0]  ;;  %v13285_v60 = vld [vmem:[%s20422_s1 + $0x166c] sm:$0xf]  ;;  %7739 = vmatpush.bf16.msra.mxu1 %v11455_v49  ;;  %v11439_v8 = vor.u32 %v13257_v25, %v11436_v58 }
 0x363   :  { %v20562_v62 = vld [vmem:[#allocation5_spill] sm:$0xff]  ;;  %7707 = vmatmul.bf16.vlgmr.msrb.gmra.mxu3 %v20563_v47  ;;  %v11695_v9 = vor.u32 %v13321_v11, %v11692_v4  ;;  %v13221_v56 = vld [vmem:[%s20422_s1 + $0x146c] sm:$0xf] }
 0x364   :  { %v7884_v59 = vmax.f32 %v7336_v41, 0.0  ;;  %7688 = vmatmul.bf16.vlgmr.msrb.gmra.mxu2 %v20562_v62  ;;  %v11548_v51 = vld [vmem:[%s20422_s1 + $0x1678] sm:$0xf0]  ;;  %7777 = vmatpush.bf16.msra.mxu3 %v11711_v31  ;;  %v13253_v53 = vld [vmem:[%s20422_s1 + $0x156c] sm:$0xf]  ;;  %v7404_v14 = vpop.f32.mrf.mxu3  ;;  %v7368_v57 = vpop.f32.mrf.mxu1 }
 0x365   :  { %v11292_v3 = vld [vmem:[%s20422_s1 + $0x1478] sm:$0xf0]  ;;  %v13317_v7 = vld [vmem:[%s20422_s1 + $0x176c] sm:$0xf]  ;;  %7759 = vmatpush.bf16.msra.mxu2 %v11567_v50  ;;  %7721 = vmatpush.bf16.msra.mxu0 %v11311_v16  ;;  %v11551_v33 = vor.u32 %v13285_v60, %v11548_v51 }
 0x366   :  { %v19593_v28 = vpack.c.bf16 %v7884_v59, %v7880_v30  ;;  %v11420_v21 = vld [vmem:[%s20422_s1 + $0x1578] sm:$0xf0]  ;;  %v11295_v23 = vor.u32 %v13221_v56, %v11292_v3  ;;  %v13281_v24 = vld [vmem:[%s20422_s1 + $0x164c] sm:$0xf]  ;;  %7740 = vmatpush.bf16.msra.mxu1 %v11439_v8  ;;  %v20565_v8 = vld [vmem:[#allocation8_spill] sm:$0xff] }
 0x367   :  { %v7385_v32 = vpop.f32.mrf.mxu2  ;;  %v11676_v48 = vld [vmem:[%s20422_s1 + $0x1778] sm:$0xf0]  ;;  %v7349_v54 = vpop.f32.mrf.mxu0  ;;  %v11423_v52 = vor.u32 %v13253_v53, %v11420_v21  ;;  %v13217_v35 = vld [vmem:[%s20422_s1 + $0x144c] sm:$0xf] }
 0x368   :  { %v7386_v43 = vadd.f32 %v7385_v32, %v7367_v38  ;;  %v7350_v42 = vadd.f32 %v7349_v54, %v19522_v5  ;;  %v11532_v37 = vld [vmem:[%s20422_s1 + $0x1658] sm:$0xf0]  ;;  %7778 = vmatpush.bf16.msra.mxu3 %v11695_v9  ;;  %v11679_v26 = vor.u32 %v13317_v7, %v11676_v48  ;;  %v13249_v34 = vld [vmem:[%s20422_s1 + $0x154c] sm:$0xf]  ;;  %v20567_v32 = vld [vmem:[#allocation10_spill] sm:$0xff] }
 0x369   :  { %v11276_v29 = vld [vmem:[%s20422_s1 + $0x1458] sm:$0xf0]  ;;  %v13313_v0 = vld [vmem:[%s20422_s1 + $0x174c] sm:$0xf]  ;;  %7760 = vmatpush.bf16.msra.mxu2 %v11551_v33  ;;  %7722 = vmatpush.bf16.msra.mxu0 %v11295_v23  ;;  %v11535_v36 = vor.u32 %v13281_v24, %v11532_v37 }
 0x36a   :  { %v19611_v10 = vadd.f32 %v7404_v14, %v7386_v43  ;;  %v7369_v61 = vadd.f32 %v7368_v57, %v7350_v42  ;;  %v11404_v27 = vld [vmem:[%s20422_s1 + $0x1558] sm:$0xf0]  ;;  %v11279_v39 = vor.u32 %v13217_v35, %v11276_v29  ;;  %v13277_v40 = vld [vmem:[%s20422_s1 + $0x162c] sm:$0xf]  ;;  %7741 = vmatpush.bf16.msra.mxu1 %v11423_v52 }
 0x36b   :  { %v11660_v1 = vld [vmem:[%s20422_s1 + $0x1758] sm:$0xf0]  ;;  %v11407_v20 = vor.u32 %v13249_v34, %v11404_v27  ;;  %v13213_v6 = vld [vmem:[%s20422_s1 + $0x142c] sm:$0xf] }
 0x36c   :  { %v11516_v19 = vld [vmem:[%s20422_s1 + $0x1638] sm:$0xf0]  ;;  %7779 = vmatpush.bf16.msra.mxu3 %v11679_v26  ;;  %v11663_v12 = vor.u32 %v13313_v0, %v11660_v1  ;;  %v13245_v46 = vld [vmem:[%s20422_s1 + $0x152c] sm:$0xf]  ;;  %v7406_v17 = vpop.f32.mrf.mxu3  ;;  %v7371_v22 = vpop.f32.mrf.mxu1 }
 0x36d   :  { %v11260_v45 = vld [vmem:[%s20422_s1 + $0x1438] sm:$0xf0]  ;;  %v13309_v41 = vld [vmem:[%s20422_s1 + $0x172c] sm:$0xf]  ;;  %7761 = vmatpush.bf16.msra.mxu2 %v11535_v36  ;;  %7723 = vmatpush.bf16.msra.mxu0 %v11279_v39  ;;  %v11519_v2 = vor.u32 %v13277_v40, %v11516_v19 }
 0x36e   :  { %v11388_v18 = vld [vmem:[%s20422_s1 + $0x1538] sm:$0xf0]  ;;  %v13273_v25 = vld [vmem:[%s20422_s1 + $0x160c] sm:$0xf]  ;;  %v11263_v55 = vor.u32 %v13213_v6, %v11260_v45  ;;  %7742 = vmatpush.bf16.msra.mxu1 %v11407_v20 }
 0x36f   :  { %v7387_v13 = vpop.f32.mrf.mxu2  ;;  %v11644_v49 = vld [vmem:[%s20422_s1 + $0x1738] sm:$0xf0]  ;;  %v7352_v63 = vpop.f32.mrf.mxu0  ;;  %v13209_v11 = vld [vmem:[%s20422_s1 + $0x140c] sm:$0xf]  ;;  %v11391_v59 = vor.u32 %v13245_v46, %v11388_v18  ;;  %7674 = vmatmul.bf16.gmra.mxu1 %v20565_v8 }
 0x370   :  { %v7388_v31 = vadd.f32 %v7387_v13, %v7369_v61  ;;  %v7353_v38 = vadd.f32 %v7352_v63, %v19522_v5  ;;  %v11500_v58 = vld [vmem:[%s20422_s1 + $0x1618] sm:$0xf0]  ;;  %7780 = vmatpush.bf16.msra.mxu3 %v11663_v12  ;;  %v11647_v62 = vor.u32 %v13309_v41, %v11644_v49  ;;  %v13241_v47 = vld [vmem:[%s20422_s1 + $0x150c] sm:$0xf] }
 0x371   :  { %v11244_v4 = vld [vmem:[%s20422_s1 + $0x1418] sm:$0xf0]  ;;  %v13305_v16 = vld [vmem:[%s20422_s1 + $0x170c] sm:$0xf]  ;;  %7762 = vmatpush.bf16.msra.mxu2 %v11519_v2  ;;  %7724 = vmatpush.bf16.msra.mxu0 %v11263_v55  ;;  %v11503_v48 = vor.u32 %v13273_v25, %v11500_v58 }
 0x372   :  { %v19668_v30 = vadd.f32 %v7406_v17, %v7388_v31  ;;  %v11372_v50 = vld [vmem:[%s20422_s1 + $0x1518] sm:$0xf0]  ;;  %v7372_v60 = vadd.f32 %v7371_v22, %v7353_v38  ;;  %v20564_v51 = vld [vmem:[#allocation7_spill] sm:$0xff]  ;;  %v11247_v43 = vor.u32 %v13209_v11, %v11244_v4  ;;  %7743 = vmatpush.bf16.msra.mxu1 %v11391_v59 }
 0x373   :  { %7655 = vmatmul.bf16.gmra.mxu0 %v20564_v51  ;;  %v11628_v9 = vld [vmem:[%s20422_s1 + $0x1718] sm:$0xf0]  ;;  %v13429_v56 = vld [vmem:[%s20422_s1 + $0x1aec] sm:$0xf]  ;;  %7712 = vmatmul.bf16.gmra.mxu3 %v20567_v32  ;;  %v11375_v33 = vor.u32 %v13241_v47, %v11372_v50 }
 0x374   :  { %v12124_v3 = vld [vmem:[%s20422_s1 + $0x1af8] sm:$0xf0]  ;;  %v13365_v14 = vld [vmem:[%s20422_s1 + $0x18ec] sm:$0xf]  ;;  %7781 = vmatpush.bf16.msra.mxu3 %v11647_v62  ;;  %v11631_v23 = vor.u32 %v13305_v16, %v11628_v9  ;;  %v7409_v37 = vpop.f32.mrf.mxu3  ;;  %v7373_v27 = vpop.f32.mrf.mxu1 }
 0x375   :  { %v20566_v53 = vld [vmem:[#allocation9_spill] sm:$0xff]  ;;  %v13397_v7 = vld [vmem:[%s20422_s1 + $0x19ec] sm:$0xf]  ;;  %v12127_v52 = vor.u32 %v13429_v56, %v12124_v3  ;;  %7763 = vmatpush.bf16.msra.mxu2 %v11503_v48  ;;  %7725 = vmatpush.bf16.msra.mxu0 %v11247_v43 }
 0x376   :  { %7693 = vmatmul.bf16.gmra.mxu2 %v20566_v53  ;;  %v11868_v21 = vld [vmem:[%s20422_s1 + $0x18f8] sm:$0xf0]  ;;  %v13461_v57 = vld [vmem:[%s20422_s1 + $0x1bec] sm:$0xf]  ;;  %7744 = vmatpush.bf16.msra.mxu1 %v11375_v33 }
 0x377   :  { %v11996_v54 = vld [vmem:[%s20422_s1 + $0x19f8] sm:$0xf0]  ;;  %v7390_v24 = vpop.f32.mrf.mxu2  ;;  %v11871_v26 = vor.u32 %v13365_v14, %v11868_v21  ;;  %v13425_v35 = vld [vmem:[%s20422_s1 + $0x1acc] sm:$0xf]  ;;  %v7354_v61 = vpop.f32.mrf.mxu0  ;;  %v20569_v14 = vld [vmem:[#allocation12_spill] sm:$0xff] }
 0x378   :  { %v12252_v42 = vld [vmem:[%s20422_s1 + $0x1bf8] sm:$0xf0]  ;;  %v7391_v34 = vadd.f32 %v7390_v24, %v7372_v60  ;;  %v11999_v0 = vor.u32 %v13397_v7, %v11996_v54  ;;  %v13361_v36 = vld [vmem:[%s20422_s1 + $0x18cc] sm:$0xf]  ;;  %v7355_v19 = vadd.f32 %v7354_v61, %v19522_v5  ;;  %7782 = vmatpush.bf16.msra.mxu3 %v11631_v23  ;;  %v20571_v54 = vld [vmem:[#allocation14_spill] sm:$0xff] }
 0x379   :  { %v12108_v29 = vld [vmem:[%s20422_s1 + $0x1ad8] sm:$0xf0]  ;;  %v12255_v1 = vor.u32 %v13461_v57, %v12252_v42  ;;  %v13393_v40 = vld [vmem:[%s20422_s1 + $0x19cc] sm:$0xf]  ;;  %7832 = vmatpush.bf16.msrb.mxu2 %v12127_v52  ;;  %7794 = vmatpush.bf16.msrb.mxu0 %v11871_v26 }
 0x37a   :  { %v11852_v39 = vld [vmem:[%s20422_s1 + $0x18d8] sm:$0xf0]  ;;  %v13457_v12 = vld [vmem:[%s20422_s1 + $0x1bcc] sm:$0xf]  ;;  %v19735_v45 = vadd.f32 %v7409_v37, %v7391_v34  ;;  %v7374_v46 = vadd.f32 %v7373_v27, %v7355_v19  ;;  %v12111_v5 = vor.u32 %v13425_v35, %v12108_v29  ;;  %7813 = vmatpush.bf16.msrb.mxu1 %v11999_v0 }
 0x37b   :  { %v11980_v20 = vld [vmem:[%s20422_s1 + $0x19d8] sm:$0xf0]  ;;  %v11855_v13 = vor.u32 %v13361_v36, %v11852_v39  ;;  %v13421_v41 = vld [vmem:[%s20422_s1 + $0x1aac] sm:$0xf] }
 0x37c   :  { %v12236_v6 = vld [vmem:[%s20422_s1 + $0x1bd8] sm:$0xf0]  ;;  %7851 = vmatpush.bf16.msrb.mxu3 %v12255_v1  ;;  %v11983_v17 = vor.u32 %v13393_v40, %v11980_v20  ;;  %v13357_v31 = vld [vmem:[%s20422_s1 + $0x18ac] sm:$0xf]  ;;  %v7411_v38 = vpop.f32.mrf.mxu3  ;;  %v7442_v59 = vpop.f32.mrf.mxu1 }
 0x37d   :  { %v12239_v18 = vor.u32 %v13457_v12, %v12236_v6  ;;  %v12092_v49 = vld [vmem:[%s20422_s1 + $0x1ab8] sm:$0xf0]  ;;  %v13389_v22 = vld [vmem:[%s20422_s1 + $0x19ac] sm:$0xf]  ;;  %7833 = vmatpush.bf16.msrb.mxu2 %v12111_v5  ;;  %7795 = vmatpush.bf16.msrb.mxu0 %v11855_v13 }
 0x37e   :  { %v11836_v63 = vld [vmem:[%s20422_s1 + $0x18b8] sm:$0xf0]  ;;  %v13453_v55 = vld [vmem:[%s20422_s1 + $0x1bac] sm:$0xf]  ;;  %7814 = vmatpush.bf16.msrb.mxu1 %v11983_v17  ;;  %v12095_v47 = vor.u32 %v13421_v41, %v12092_v49 }
 0x37f   :  { %v7392_v25 = vpop.f32.mrf.mxu2  ;;  %v11964_v2 = vld [vmem:[%s20422_s1 + $0x19b8] sm:$0xf0]  ;;  %v7423_v4 = vpop.f32.mrf.mxu0  ;;  %v11839_v50 = vor.u32 %v13357_v31, %v11836_v63  ;;  %v13417_v16 = vld [vmem:[%s20422_s1 + $0x1a8c] sm:$0xf]  ;;  %7745 = vmatmul.bf16.vlgmr.msra.gmra.mxu1 %v20569_v14 }
 0x380   :  { %v12220_v58 = vld [vmem:[%s20422_s1 + $0x1bb8] sm:$0xf0]  ;;  %v7393_v11 = vadd.f32 %v7392_v25, %v7374_v46  ;;  %7852 = vmatpush.bf16.msrb.mxu3 %v12239_v18  ;;  %v7424_v62 = vadd.f32 %v7423_v4, %v19611_v10  ;;  %v11967_v8 = vor.u32 %v13389_v22, %v11964_v2  ;;  %v13353_v56 = vld [vmem:[%s20422_s1 + $0x188c] sm:$0xf] }
 0x381   :  { %v12076_v60 = vld [vmem:[%s20422_s1 + $0x1a98] sm:$0xf0]  ;;  %v12223_v9 = vor.u32 %v13453_v55, %v12220_v58  ;;  %v13385_v3 = vld [vmem:[%s20422_s1 + $0x198c] sm:$0xf]  ;;  %7834 = vmatpush.bf16.msrb.mxu2 %v12095_v47  ;;  %7796 = vmatpush.bf16.msrb.mxu0 %v11839_v50 }
 0x382   :  { %v19768_v51 = vadd.f32 %v7411_v38, %v7393_v11  ;;  %v11820_v10 = vld [vmem:[%s20422_s1 + $0x1898] sm:$0xf0]  ;;  %v7443_v53 = vadd.f32 %v7442_v59, %v7424_v62  ;;  %v20568_v32 = vld [vmem:[#allocation11_spill] sm:$0xff]  ;;  %v12079_v57 = vor.u32 %v13417_v16, %v12076_v60  ;;  %7815 = vmatpush.bf16.msrb.mxu1 %v11967_v8 }
 0x383   :  { %7726 = vmatmul.bf16.vlgmr.msra.gmra.mxu0 %v20568_v32  ;;  %v11948_v21 = vld [vmem:[%s20422_s1 + $0x1998] sm:$0xf0]  ;;  %v13449_v7 = vld [vmem:[%s20422_s1 + $0x1b8c] sm:$0xf]  ;;  %7783 = vmatmul.bf16.vlgmr.msra.gmra.mxu3 %v20571_v54  ;;  %v11823_v42 = vor.u32 %v13353_v56, %v11820_v10 }
 0x384   :  { %v12204_v48 = vld [vmem:[%s20422_s1 + $0x1b98] sm:$0xf0]  ;;  %v13413_v33 = vld [vmem:[%s20422_s1 + $0x1a6c] sm:$0xf]  ;;  %7853 = vmatpush.bf16.msrb.mxu3 %v12223_v9  ;;  %v11951_v24 = vor.u32 %v13385_v3, %v11948_v21  ;;  %v7480_v34 = vpop.f32.mrf.mxu3  ;;  %v7444_v39 = vpop.f32.mrf.mxu1 }
 0x385   :  { %v20570_v43 = vld [vmem:[#allocation13_spill] sm:$0xff]  ;;  %v12207_v37 = vor.u32 %v13449_v7, %v12204_v48  ;;  %v13349_v52 = vld [vmem:[%s20422_s1 + $0x186c] sm:$0xf]  ;;  %7835 = vmatpush.bf16.msrb.mxu2 %v12079_v57  ;;  %7797 = vmatpush.bf16.msrb.mxu0 %v11823_v42 }
 0x386   :  { %7764 = vmatmul.bf16.vlgmr.msra.gmra.mxu2 %v20570_v43  ;;  %v12060_v23 = vld [vmem:[%s20422_s1 + $0x1a78] sm:$0xf0]  ;;  %v13381_v35 = vld [vmem:[%s20422_s1 + $0x196c] sm:$0xf]  ;;  %7816 = vmatpush.bf16.msrb.mxu1 %v11951_v24 }
 0x387   :  { %v11804_v26 = vld [vmem:[%s20422_s1 + $0x1878] sm:$0xf0]  ;;  %v7461_v29 = vpop.f32.mrf.mxu2  ;;  %v13445_v27 = vld [vmem:[%s20422_s1 + $0x1b6c] sm:$0xf]  ;;  %v7425_v36 = vpop.f32.mrf.mxu0  ;;  %v12063_v19 = vor.u32 %v13413_v33, %v12060_v23  ;;  %v20573_v33 = vld [vmem:[#allocation16_spill] sm:$0xff] }
 0x388   :  { %v11932_v61 = vld [vmem:[%s20422_s1 + $0x1978] sm:$0xf0]  ;;  %v7462_v1 = vadd.f32 %v7461_v29, %v7443_v53  ;;  %v7426_v40 = vadd.f32 %v7425_v36, %v19668_v30  ;;  %v11807_v20 = vor.u32 %v13349_v52, %v11804_v26  ;;  %v13409_v12 = vld [vmem:[%s20422_s1 + $0x1a4c] sm:$0xf]  ;;  %7854 = vmatpush.bf16.msrb.mxu3 %v12207_v37  ;;  %v12314_v37 = vld [vmem:[%s20425_s3 + $0x70] sm:$0xf] }
 0x389   :  { %v12188_v0 = vld [vmem:[%s20422_s1 + $0x1b78] sm:$0xf0]  ;;  %v11935_v5 = vor.u32 %v13381_v35, %v11932_v61  ;;  %v13345_v30 = vld [vmem:[%s20422_s1 + $0x184c] sm:$0xf]  ;;  %7836 = vmatpush.bf16.msrb.mxu2 %v12063_v19  ;;  %v20575_v26 = vld [vmem:[#allocation18_spill] sm:$0xff] }
 0x38a   :  { %v12044_v6 = vld [vmem:[%s20422_s1 + $0x1a58] sm:$0xf0]  ;;  %v19823_v46 = vadd.f32 %v7480_v34, %v7462_v1  ;;  %v12191_v13 = vor.u32 %v13445_v27, %v12188_v0  ;;  %v13377_v18 = vld [vmem:[%s20422_s1 + $0x194c] sm:$0xf]  ;;  %v7445_v41 = vadd.f32 %v7444_v39, %v7426_v40  ;;  %7798 = vmatpush.bf16.msrb.mxu0 %v11807_v20  ;;  %v13479_v35 = vld [vmem:[%s20425_s3 + $0x74] sm:$0xf0] }
 0x38b   :  { %v11788_v17 = vld [vmem:[%s20422_s1 + $0x1858] sm:$0xf0]  ;;  %v13441_v31 = vld [vmem:[%s20422_s1 + $0x1b4c] sm:$0xf]  ;;  %v12047_v22 = vor.u32 %v13409_v12, %v12044_v6  ;;  %7817 = vmatpush.bf16.msrb.mxu1 %v11935_v5  ;;  %v12378_v29 = vld [vmem:[%s20425_s3 + $0xf0] sm:$0xf]  ;;  %v12315_v20 = vor.u32 %v13479_v35, %v12314_v37 }
 0x38c   :  { %v11916_v49 = vld [vmem:[%s20422_s1 + $0x1958] sm:$0xf0]  ;;  %v11791_v25 = vor.u32 %v13345_v30, %v11788_v17  ;;  %v13405_v38 = vld [vmem:[%s20422_s1 + $0x1a2c] sm:$0xf]  ;;  %7855 = vmatpush.bf16.msrb.mxu3 %v12191_v13  ;;  %v19858_v47 = vpop.f32.mrf.mxu3  ;;  %v7447_v56 = vpop.f32.mrf.mxu1  ;;  %v13495_v34 = vld [vmem:[%s20425_s3 + $0xf4] sm:$0xf0] }
 0x38d   :  { %v12172_v63 = vld [vmem:[%s20422_s1 + $0x1b58] sm:$0xf0]  ;;  %v11919_v55 = vor.u32 %v13377_v18, %v11916_v49  ;;  %v13341_v11 = vld [vmem:[%s20422_s1 + $0x182c] sm:$0xf]  ;;  %7837 = vmatpush.bf16.msrb.mxu2 %v12047_v22  ;;  %v12442_v0 = vld [vmem:[%s20425_s3 + $0x170] sm:$0xf]  ;;  %v12379_v12 = vor.u32 %v13495_v34, %v12378_v29 }
 0x38e   :  { %v12028_v2 = vld [vmem:[%s20422_s1 + $0x1a38] sm:$0xf0]  ;;  %v12175_v58 = vor.u32 %v13441_v31, %v12172_v63  ;;  %v13373_v59 = vld [vmem:[%s20422_s1 + $0x192c] sm:$0xf]  ;;  %7799 = vmatpush.bf16.msrb.mxu0 %v11791_v25  ;;  %v13511_v1 = vld [vmem:[%s20425_s3 + $0x174] sm:$0xf0] }
 0x38f   :  { %v11772_v4 = vld [vmem:[%s20422_s1 + $0x1838] sm:$0xf0]  ;;  %v7463_v62 = vpop.f32.mrf.mxu2  ;;  %v13437_v16 = vld [vmem:[%s20422_s1 + $0x1b2c] sm:$0xf]  ;;  %v7428_v9 = vpop.f32.mrf.mxu0  ;;  %v12031_v3 = vor.u32 %v13405_v38, %v12028_v2  ;;  %7818 = vmatpush.bf16.msrb.mxu1 %v11919_v55  ;;  %v12306_v6 = vld [vmem:[%s20425_s3 + $0x60] sm:$0xf]  ;;  %v12443_v17 = vor.u32 %v13511_v1, %v12442_v0 }
 0x390   :  { %v11900_v50 = vld [vmem:[%s20422_s1 + $0x1938] sm:$0xf0]  ;;  %v19869_v8 = vadd.f32 %v7463_v62, %v7445_v41  ;;  %v7429_v10 = vadd.f32 %v7428_v9, %v19735_v45  ;;  %v11775_v53 = vor.u32 %v13341_v11, %v11772_v4  ;;  %v13401_v32 = vld [vmem:[%s20422_s1 + $0x1a0c] sm:$0xf]  ;;  %7856 = vmatpush.bf16.msrb.mxu3 %v12175_v58  ;;  %7750 = vmatmul.bf16.gmra.mxu1 %v20573_v33  ;;  %v13477_v18 = vld [vmem:[%s20425_s3 + $0x64] sm:$0xf0] }
 0x391   :  { %v12156_v60 = vld [vmem:[%s20422_s1 + $0x1b38] sm:$0xf0]  ;;  %v13337_v21 = vld [vmem:[%s20422_s1 + $0x180c] sm:$0xf]  ;;  %v11903_v7 = vor.u32 %v13373_v59, %v11900_v50  ;;  %7838 = vmatpush.bf16.msrb.mxu2 %v12031_v3  ;;  %v12370_v41 = vld [vmem:[%s20425_s3 + $0xe0] sm:$0xf]  ;;  %v12307_v2 = vor.u32 %v13477_v18, %v12306_v6 }
 0x392   :  { %v12012_v14 = vld [vmem:[%s20422_s1 + $0x1a18] sm:$0xf0]  ;;  %v12159_v45 = vor.u32 %v13437_v16, %v12156_v60  ;;  %v13369_v43 = vld [vmem:[%s20422_s1 + $0x190c] sm:$0xf]  ;;  %v7448_v57 = vadd.f32 %v7447_v56, %v7429_v10  ;;  %7800 = vmatpush.bf16.msrb.mxu0 %v11775_v53  ;;  %v13493_v49 = vld [vmem:[%s20425_s3 + $0xe4] sm:$0xf0]  ;;  %v7483_v29 = vadd.f32 %v19858_v47, %v19869_v8 }
 0x393   :  { %v11756_v48 = vld [vmem:[%s20422_s1 + $0x1818] sm:$0xf0]  ;;  %v20572_v42 = vld [vmem:[#allocation15_spill] sm:$0xff]  ;;  %7788 = vmatmul.bf16.gmra.mxu3 %v20575_v26  ;;  %v12015_v61 = vor.u32 %v13401_v32, %v12012_v14  ;;  %7819 = vmatpush.bf16.msrb.mxu1 %v11903_v7  ;;  %v12434_v63 = vld [vmem:[%s20425_s3 + $0x160] sm:$0xf]  ;;  %v12371_v55 = vor.u32 %v13493_v49, %v12370_v41 }
 0x394   :  { %v11884_v54 = vld [vmem:[%s20422_s1 + $0x1918] sm:$0xf0]  ;;  %7731 = vmatmul.bf16.gmra.mxu0 %v20572_v42  ;;  %v13433_v23 = vld [vmem:[%s20422_s1 + $0x1b0c] sm:$0xf]  ;;  %v11759_v27 = vor.u32 %v13337_v21, %v11756_v48  ;;  %7857 = vmatpush.bf16.msrb.mxu3 %v12159_v45  ;;  %v7485_v19 = vpop.f32.mrf.mxu3  ;;  %v7449_v30 = vpop.f32.mrf.mxu1  ;;  %v13509_v22 = vld [vmem:[%s20425_s3 + $0x164] sm:$0xf0] }
 0x395   :  { %v12140_v24 = vld [vmem:[%s20422_s1 + $0x1b18] sm:$0xf0]  ;;  %v11887_v36 = vor.u32 %v13369_v43, %v11884_v54  ;;  %7839 = vmatpush.bf16.msrb.mxu2 %v12015_v61  ;;  %v12298_v58 = vld [vmem:[%s20425_s3 + $0x50] sm:$0xf]  ;;  %v13475_v11 = vld [vmem:[%s20425_s3 + $0x54] sm:$0xf0] }
 0x396   :  { %v20574_v52 = vld [vmem:[#allocation17_spill] sm:$0xff]  ;;  %v12143_v39 = vor.u32 %v13433_v23, %v12140_v24  ;;  %7801 = vmatpush.bf16.msrb.mxu0 %v11759_v27  ;;  %v12362_v4 = vld [vmem:[%s20425_s3 + $0xd0] sm:$0xf]  ;;  %v12299_v53 = vor.u32 %v13475_v11, %v12298_v58  ;;  %v12290_v14 = vld [vmem:[%s20425_s3 + $0x40] sm:$0xf] }
 0x397   :  { %7769 = vmatmul.bf16.gmra.mxu2 %v20574_v52  ;;  %v7466_v40 = vpop.f32.mrf.mxu2  ;;  %v7430_v13 = vpop.f32.mrf.mxu0  ;;  %7820 = vmatpush.bf16.msrb.mxu1 %v11887_v36  ;;  %v13491_v59 = vld [vmem:[%s20425_s3 + $0xd4] sm:$0xf0]  ;;  %v12426_v16 = vld [vmem:[%s20425_s3 + $0x150] sm:$0xf]  ;;  %v13473_v7 = vld [vmem:[%s20425_s3 + $0x44] sm:$0xf0] }
 0x398   :  { %v7467_v5 = vadd.f32 %v7466_v40, %v7448_v57  ;;  %v7431_v31 = vadd.f32 %v7430_v13, %v19768_v51  ;;  %7858 = vmatpush.bf16.msrb.mxu3 %v12143_v39  ;;  %v12435_v51 = vor.u32 %v13509_v22, %v12434_v63  ;;  %v13507_v60 = vld [vmem:[%s20425_s3 + $0x154] sm:$0xf0]  ;;  %v12363_v32 = vor.u32 %v13491_v59, %v12362_v4  ;;  %v12354_v45 = vld [vmem:[%s20425_s3 + $0xc0] sm:$0xf]  ;;  %v13489_v48 = vld [vmem:[%s20425_s3 + $0xc4] sm:$0xf0] }
 0x399   :  { %8322 = vmatpush.bf16.msra.mxu2 %v12443_v17  ;;  %v12427_v21 = vor.u32 %v13507_v60, %v12426_v16  ;;  %v20576_v43 = vld [vmem:[#allocation20_spill] sm:$0xff]  ;;  %v12418_v54 = vld [vmem:[%s20425_s3 + $0x140] sm:$0xf]  ;;  %v13505_v57 = vld [vmem:[%s20425_s3 + $0x144] sm:$0xf0]  ;;  %v12291_v23 = vor.u32 %v13473_v7, %v12290_v14  ;;  %v12355_v24 = vor.u32 %v13489_v48, %v12354_v45 }
 0x39a   :  { %v19937_v25 = vadd.f32 %v7485_v19, %v7467_v5  ;;  %v7450_v38 = vadd.f32 %v7449_v30, %v7431_v31  ;;  %8284 = vmatpush.bf16.msra.mxu0 %v12315_v20  ;;  %v20577_v42 = vld [vmem:[#allocation21_spill] sm:$0xff]  ;;  %v20578_v33 = vld [vmem:[#allocation22_spill] sm:$0xff]  ;;  %v12419_v37 = vor.u32 %v13505_v57, %v12418_v54  ;;  %v12346_v26 = vld [vmem:[%s20425_s3 + $0xb0] sm:$0xf] }
 0x39b   :  { %8303 = vmatpush.bf16.msra.mxu1 %v12379_v12  ;;  %v13471_v52 = vld [vmem:[%s20425_s3 + $0x34] sm:$0xf0]  ;;  %v12410_v27 = vld [vmem:[%s20425_s3 + $0x130] sm:$0xf]  ;;  %v12274_v47 = vld [vmem:[%s20425_s3 + $0x20] sm:$0xf] }
 0x39c   :  { %v19951_v50 = vpop.f32.mrf.mxu3  ;;  %v7518_v10 = vpop.f32.mrf.mxu1  ;;  %v13487_v35 = vld [vmem:[%s20425_s3 + $0xb4] sm:$0xf0]  ;;  %v13469_v6 = vld [vmem:[%s20425_s3 + $0x24] sm:$0xf0]  ;;  %v12338_v5 = vld [vmem:[%s20425_s3 + $0xa0] sm:$0xf] }
 0x39d   :  { %8323 = vmatpush.bf16.msra.mxu2 %v12435_v51  ;;  %v13503_v0 = vld [vmem:[%s20425_s3 + $0x134] sm:$0xf0]  ;;  %v12347_v20 = vor.u32 %v13487_v35, %v12346_v26  ;;  %v13485_v13 = vld [vmem:[%s20425_s3 + $0xa4] sm:$0xf0]  ;;  %v12402_v17 = vld [vmem:[%s20425_s3 + $0x120] sm:$0xf]  ;;  %v12275_v41 = vor.u32 %v13469_v6, %v12274_v47 }
 0x39e   :  { %8285 = vmatpush.bf16.msra.mxu0 %v12307_v2  ;;  %v12411_v12 = vor.u32 %v13503_v0, %v12410_v27  ;;  %v13501_v18 = vld [vmem:[%s20425_s3 + $0x124] sm:$0xf0]  ;;  %v12339_v49 = vor.u32 %v13485_v13, %v12338_v5  ;;  %v12266_v31 = vld [vmem:[%s20425_s3 + $0x10] sm:$0xf]  ;;  %v13467_v22 = vld [vmem:[%s20425_s3 + $0x14] sm:$0xf0] }
 0x39f   :  { %v7468_v62 = vpop.f32.mrf.mxu2  ;;  %8304 = vmatpush.bf16.msra.mxu1 %v12371_v55  ;;  %v7499_v56 = vpop.f32.mrf.mxu0  ;;  %v12403_v63 = vor.u32 %v13501_v18, %v12402_v17  ;;  %v13483_v2 = vld [vmem:[%s20425_s3 + $0x94] sm:$0xf0]  ;;  %v12394_v58 = vld [vmem:[%s20425_s3 + $0x110] sm:$0xf]  ;;  %v12267_v60 = vor.u32 %v13467_v22, %v12266_v31  ;;  %v12386_v14 = vld [vmem:[%s20425_s3 + $0x100] sm:$0xf] }
 0x3a0   :  { %v19959_v9 = vadd.f32 %v7468_v62, %v7450_v38  ;;  %v7500_v3 = vadd.f32 %v7499_v56, %v19823_v46  ;;  %7821 = vmatmul.bf16.vlgmr.msrb.gmra.mxu1 %v20576_v43  ;;  %v12330_v38 = vld [vmem:[%s20425_s3 + $0x90] sm:$0xf]  ;;  %v13499_v11 = vld [vmem:[%s20425_s3 + $0x114] sm:$0xf0]  ;;  %v20579_v45 = vld [vmem:[#allocation23_spill] sm:$0xff] }
 0x3a1   :  { %8324 = vmatpush.bf16.msra.mxu2 %v12427_v21  ;;  %v12331_v56 = vor.u32 %v13483_v2, %v12330_v38  ;;  %v13497_v21 = vld [vmem:[%s20425_s3 + $0x104] sm:$0xf0]  ;;  %v20580_v48 = vld [vmem:[#allocation24_spill] sm:$0xff]  ;;  %v12316_v43 = vld [vmem:[%s20425_s3 + $0x78] sm:$0xf0] }
 0x3a2   :  { %v7519_v46 = vadd.f32 %v7518_v10, %v7500_v3  ;;  %8286 = vmatpush.bf16.msra.mxu0 %v12299_v53  ;;  %v12258_v10 = vld [vmem:[%s20425_s3] sm:$0xf]  ;;  %v13465_v3 = vld [vmem:[%s20425_s3 + $0x4] sm:$0xf0]  ;;  %v13494_v54 = vld [vmem:[%s20425_s3 + $0xf4] sm:$0xf]  ;;  %v7488_v35 = vadd.f32 %v19951_v50, %v19959_v9 }
 0x3a3   :  { %7859 = vmatmul.bf16.vlgmr.msrb.gmra.mxu3 %v20578_v33  ;;  %8305 = vmatpush.bf16.msra.mxu1 %v12363_v32  ;;  %v12322_v53 = vld [vmem:[%s20425_s3 + $0x80] sm:$0xf]  ;;  %v12395_v32 = vor.u32 %v13499_v11, %v12394_v58  ;;  %v20581_v57 = vld [vmem:[#allocation25_spill] sm:$0xff]  ;;  %v13476_v0 = vld [vmem:[%s20425_s3 + $0x64] sm:$0xf] }
 0x3a4   :  { %7802 = vmatmul.bf16.vlgmr.msrb.gmra.mxu0 %v20526_v15  ;;  %v12282_v15 = vld [vmem:[%s20425_s3 + $0x30] sm:$0xf]  ;;  %v7556_v61 = vpop.f32.mrf.mxu3  ;;  %v7520_v39 = vpop.f32.mrf.mxu1  ;;  %v12380_v33 = vld [vmem:[%s20425_s3 + $0xf8] sm:$0xf0]  ;;  %v12372_v50 = vld [vmem:[%s20425_s3 + $0xe8] sm:$0xf0] }
 0x3a5   :  { %v12283_v19 = vor.u32 %v13471_v52, %v12282_v15  ;;  %8325 = vmatpush.bf16.msra.mxu2 %v12419_v37  ;;  %v12259_v15 = vor.u32 %v13465_v3, %v12258_v10  ;;  %v12387_v52 = vor.u32 %v13497_v21, %v12386_v14  ;;  %v13508_v9 = vld [vmem:[%s20425_s3 + $0x164] sm:$0xf]  ;;  %v13474_v17 = vld [vmem:[%s20425_s3 + $0x54] sm:$0xf]  ;;  %v12300_v18 = vld [vmem:[%s20425_s3 + $0x58] sm:$0xf0] }
 0x3a6   :  { %8287 = vmatpush.bf16.msra.mxu0 %v12291_v23  ;;  %v13510_v23 = vld [vmem:[%s20425_s3 + $0x174] sm:$0xf]  ;;  %v12303_v31 = vor.u32 %v13474_v17, %v12300_v18  ;;  %v12428_v22 = vld [vmem:[%s20425_s3 + $0x158] sm:$0xf0]  ;;  %v12292_v58 = vld [vmem:[%s20425_s3 + $0x48] sm:$0xf0] }
 0x3a7   :  { %7840 = vmatmul.bf16.vlgmr.msrb.gmra.mxu2 %v20577_v42  ;;  %v7537_v34 = vpop.f32.mrf.mxu2  ;;  %v7501_v36 = vpop.f32.mrf.mxu0  ;;  %8306 = vmatpush.bf16.msra.mxu1 %v12355_v24  ;;  %v20582_v42 = vld [vmem:[#allocation26_spill] sm:$0xff]  ;;  %v12444_v24 = vld [vmem:[%s20425_s3 + $0x178] sm:$0xf0]  ;;  %v12356_v3 = vld [vmem:[%s20425_s3 + $0xc8] sm:$0xf0] }
 0x3a8   :  { %v7538_v1 = vadd.f32 %v7537_v34, %v7519_v46  ;;  %v7502_v40 = vadd.f32 %v7501_v36, %v7483_v29  ;;  %v13478_v46 = vld [vmem:[%s20425_s3 + $0x74] sm:$0xf]  ;;  %v12447_v27 = vor.u32 %v13510_v23, %v12444_v24  ;;  %v13492_v36 = vld [vmem:[%s20425_s3 + $0xe4] sm:$0xf]  ;;  %v20583_v14 = vld [vmem:[#allocation27_spill] sm:$0xff] }
 0x3a9   :  { %8326 = vmatpush.bf16.msra.mxu2 %v12411_v12  ;;  %v12319_v26 = vor.u32 %v13478_v46, %v12316_v43  ;;  %v12375_v13 = vor.u32 %v13492_v36, %v12372_v50  ;;  %v13488_v10 = vld [vmem:[%s20425_s3 + $0xc4] sm:$0xf]  ;;  %v20584_v21 = vld [vmem:[#allocation19_spill] sm:$0xff]  ;;  %v13486_v43 = vld [vmem:[%s20425_s3 + $0xb4] sm:$0xf] }
 0x3aa   :  { %v20007_v8 = vadd.f32 %v7556_v61, %v7538_v1  ;;  %v7521_v30 = vadd.f32 %v7520_v39, %v7502_v40  ;;  %8288 = vmatpush.bf16.msra.mxu0 %v12283_v19  ;;  %v12383_v61 = vor.u32 %v13494_v54, %v12380_v33  ;;  %v12308_v1 = vld [vmem:[%s20425_s3 + $0x68] sm:$0xf0]  ;;  %v12348_v54 = vld [vmem:[%s20425_s3 + $0xb8] sm:$0xf0]  ;;  %v13500_v36 = vld [vmem:[%s20425_s3 + $0x124] sm:$0xf] }
 0x3ab   :  { %8307 = vmatpush.bf16.msra.mxu1 %v12347_v20  ;;  %v12436_v20 = vld [vmem:[%s20425_s3 + $0x168] sm:$0xf0]  ;;  %v12311_v6 = vor.u32 %v13476_v0, %v12308_v1  ;;  %v12412_v33 = vld [vmem:[%s20425_s3 + $0x138] sm:$0xf0] }
 0x3ac   :  { %v20036_v51 = vpop.f32.mrf.mxu3  ;;  %v7523_v62 = vpop.f32.mrf.mxu1  ;;  %v12268_v50 = vld [vmem:[%s20425_s3 + $0x18] sm:$0xf0] }
 0x3ad   :  { %8327 = vmatpush.bf16.msra.mxu2 %v12403_v63  ;;  %v13506_v63 = vld [vmem:[%s20425_s3 + $0x154] sm:$0xf] }
 0x3ae   :  { %8289 = vmatpush.bf16.msra.mxu0 %v12275_v41  ;;  %v13490_v41 = vld [vmem:[%s20425_s3 + $0xd4] sm:$0xf] }
 0x3af   :  { %v7539_v55 = vpop.f32.mrf.mxu2  ;;  %v7504_v59 = vpop.f32.mrf.mxu0  ;;  %8308 = vmatpush.bf16.msra.mxu1 %v12339_v49  ;;  %v12364_v49 = vld [vmem:[%s20425_s3 + $0xd8] sm:$0xf0] }
 0x3b0   :  { %v20044_v4 = vadd.f32 %v7539_v55, %v7521_v30  ;;  %v7505_v16 = vadd.f32 %v7504_v59, %v19937_v25  ;;  %v13481_v25 = vld [vmem:[%s20425_s3 + $0x84] sm:$0xf0]  ;;  %7826 = vmatmul.bf16.gmra.mxu1 %v20580_v48  ;;  %v12439_v30 = vor.u32 %v13508_v9, %v12436_v20  ;;  %v13472_v55 = vld [vmem:[%s20425_s3 + $0x44] sm:$0xf]  ;;  %v12359_v48 = vor.u32 %v13488_v10, %v12356_v3  ;;  %v20585_v3 = vld [vmem:[#allocation28_spill] sm:$0xff] }
 0x3b1   :  { %v12323_v37 = vor.u32 %v13481_v25, %v12322_v53  ;;  %8328 = vmatpush.bf16.msra.mxu2 %v12395_v32  ;;  %v12295_v53 = vor.u32 %v13472_v55, %v12292_v58  ;;  %v13504_v32 = vld [vmem:[%s20425_s3 + $0x144] sm:$0xf]  ;;  %v12420_v25 = vld [vmem:[%s20425_s3 + $0x148] sm:$0xf0] }
 0x3b2   :  { %v7524_v7 = vadd.f32 %v7523_v62, %v7505_v16  ;;  %8290 = vmatpush.bf16.msra.mxu0 %v12267_v60  ;;  %v12367_v16 = vor.u32 %v13490_v41, %v12364_v49  ;;  %v12423_v46 = vor.u32 %v13504_v32, %v12420_v25  ;;  %v7559_v23 = vadd.f32 %v20036_v51, %v20044_v4  ;;  %v13484_v51 = vld [vmem:[%s20425_s3 + $0xa4] sm:$0xf]  ;;  %v12340_v4 = vld [vmem:[%s20425_s3 + $0xa8] sm:$0xf0] }
 0x3b3   :  { %7864 = vmatmul.bf16.gmra.mxu3 %v20582_v42  ;;  %8309 = vmatpush.bf16.msra.mxu1 %v12331_v56  ;;  %v12431_v56 = vor.u32 %v13506_v63, %v12428_v22  ;;  %v13502_v42 = vld [vmem:[%s20425_s3 + $0x134] sm:$0xf]  ;;  %v12343_v9 = vor.u32 %v13484_v51, %v12340_v4  ;;  %v13464_v41 = vld [vmem:[%s20425_s3 + $0x4] sm:$0xf]  ;;  %v12260_v49 = vld [vmem:[%s20425_s3 + $0x8] sm:$0xf0] }
 0x3b4   :  { %7807 = vmatmul.bf16.gmra.mxu0 %v20579_v45  ;;  %v7561_v34 = vpop.f32.mrf.mxu3  ;;  %v7525_v19 = vpop.f32.mrf.mxu1  ;;  %v12284_v45 = vld [vmem:[%s20425_s3 + $0x38] sm:$0xf0] }
 0x3b5   :  { %8329 = vmatpush.bf16.msra.mxu2 %v12387_v52  ;;  %v12276_v52 = vld [vmem:[%s20425_s3 + $0x28] sm:$0xf0] }
 0x3b6   :  { %8291 = vmatpush.bf16.msra.mxu0 %v12259_v15 }
 0x3b7   :  { %7845 = vmatmul.bf16.gmra.mxu2 %v20581_v57  ;;  %v7542_v29 = vpop.f32.mrf.mxu2  ;;  %v7506_v40 = vpop.f32.mrf.mxu0  ;;  %8310 = vmatpush.bf16.msra.mxu1 %v12323_v37  ;;  %v13468_v37 = vld [vmem:[%s20425_s3 + $0x24] sm:$0xf] }
 0x3b8   :  { %v7543_v39 = vadd.f32 %v7542_v29, %v7524_v7  ;;  %v7507_v47 = vadd.f32 %v7506_v40, %v7488_v35  ;;  %v13470_v7 = vld [vmem:[%s20425_s3 + $0x34] sm:$0xf]  ;;  %v12279_v1 = vor.u32 %v13468_v37, %v12276_v52 }
 0x3b9   :  { %8398 = vmatpush.bf16.msrb.mxu2 %v12447_v27  ;;  %v12287_v57 = vor.u32 %v13470_v7, %v12284_v45  ;;  %v12415_v27 = vor.u32 %v13502_v42, %v12412_v33 }
 0x3ba   :  { %v20107_v12 = vadd.f32 %v7561_v34, %v7543_v39  ;;  %8360 = vmatpush.bf16.msrb.mxu0 %v12319_v26  ;;  %v7526_v5 = vadd.f32 %v7525_v19, %v7507_v47  ;;  %v12351_v34 = vor.u32 %v13486_v43, %v12348_v54  ;;  %v12404_v39 = vld [vmem:[%s20425_s3 + $0x128] sm:$0xf0]  ;;  %v13466_v19 = vld [vmem:[%s20425_s3 + $0x14] sm:$0xf] }
 0x3bb   :  { %8379 = vmatpush.bf16.msrb.mxu1 %v12383_v61  ;;  %v12407_v20 = vor.u32 %v13500_v36, %v12404_v39  ;;  %v13482_v47 = vld [vmem:[%s20425_s3 + $0x94] sm:$0xf]  ;;  %v13525_v39 = vld [vmem:[%s20425_s3 + $0x1e4] sm:$0xf0] }
 0x3bc   :  { %v20127_v2 = vpop.f32.mrf.mxu3  ;;  %v7594_v62 = vpop.f32.mrf.mxu1 }
 0x3bd   :  { %8399 = vmatpush.bf16.msrb.mxu2 %v12439_v30  ;;  %v12396_v30 = vld [vmem:[%s20425_s3 + $0x118] sm:$0xf0] }
 0x3be   :  { %8361 = vmatpush.bf16.msrb.mxu0 %v12311_v6  ;;  %v12332_v6 = vld [vmem:[%s20425_s3 + $0x98] sm:$0xf0] }
 0x3bf   :  { %v7544_v38 = vpop.f32.mrf.mxu2  ;;  %8380 = vmatpush.bf16.msrb.mxu1 %v12375_v13  ;;  %v7575_v59 = vpop.f32.mrf.mxu0  ;;  %v13498_v13 = vld [vmem:[%s20425_s3 + $0x114] sm:$0xf] }
 0x3c0   :  { %v20135_v11 = vadd.f32 %v7544_v38, %v7526_v5  ;;  %v7576_v60 = vadd.f32 %v7575_v59, %v20007_v8  ;;  %8311 = vmatmul.bf16.vlgmr.msra.gmra.mxu1 %v20584_v21  ;;  %v12271_v5 = vor.u32 %v13466_v19, %v12268_v50  ;;  %v12335_v38 = vor.u32 %v13482_v47, %v12332_v6  ;;  %v13480_v59 = vld [vmem:[%s20425_s3 + $0x84] sm:$0xf]  ;;  %v12490_v19 = vld [vmem:[%s20425_s3 + $0x1d0] sm:$0xf]  ;;  %v13523_v50 = vld [vmem:[%s20425_s3 + $0x1d4] sm:$0xf0] }
 0x3c1   :  { %8400 = vmatpush.bf16.msrb.mxu2 %v12431_v56  ;;  %v12399_v58 = vor.u32 %v13498_v13, %v12396_v30  ;;  %v13496_v56 = vld [vmem:[%s20425_s3 + $0x104] sm:$0xf]  ;;  %v12491_v47 = vor.u32 %v13523_v50, %v12490_v19  ;;  %v12482_v13 = vld [vmem:[%s20425_s3 + $0x1c0] sm:$0xf]  ;;  %v13521_v30 = vld [vmem:[%s20425_s3 + $0x1c4] sm:$0xf0] }
 0x3c2   :  { %8362 = vmatpush.bf16.msrb.mxu0 %v12303_v31  ;;  %v7595_v8 = vadd.f32 %v7594_v62, %v7576_v60  ;;  %v12324_v62 = vld [vmem:[%s20425_s3 + $0x88] sm:$0xf0]  ;;  %v12263_v60 = vor.u32 %v13464_v41, %v12260_v49  ;;  %v13519_v41 = vld [vmem:[%s20425_s3 + $0x1b4] sm:$0xf0] }
 0x3c3   :  { %8381 = vmatpush.bf16.msrb.mxu1 %v12367_v16  ;;  %v12327_v32 = vor.u32 %v13480_v59, %v12324_v62 }
 0x3c4   :  { %8292 = vmatmul.bf16.vlgmr.msra.gmra.mxu0 %v20583_v14  ;;  %v7632_v15 = vpop.f32.mrf.mxu3  ;;  %v7596_v29 = vpop.f32.mrf.mxu1 }
 0x3c5   :  { %8401 = vmatpush.bf16.msrb.mxu2 %v12423_v46 }
 0x3c6   :  { %8363 = vmatpush.bf16.msrb.mxu0 %v12295_v53  ;;  %v20586_v53 = vld [vmem:[#allocation29_spill] sm:$0xff] }
 0x3c7   :  { %8330 = vmatmul.bf16.vlgmr.msra.gmra.mxu2 %v19490_v44  ;;  %v7613_v24 = vpop.f32.mrf.mxu2  ;;  %v7577_v35 = vpop.f32.mrf.mxu0  ;;  %8382 = vmatpush.bf16.msrb.mxu1 %v12359_v48 }
 0x3c8   :  { %v7614_v26 = vadd.f32 %v7613_v24, %v7595_v8  ;;  %v7578_v61 = vadd.f32 %v7577_v35, %v7559_v23  ;;  %v7564_v8 = vadd.f32 %v20127_v2, %v20135_v11 }
 0x3c9   :  { %8402 = vmatpush.bf16.msrb.mxu2 %v12415_v27 }
 0x3ca   :  { %v20185_v0 = vadd.f32 %v7632_v15, %v7614_v26  ;;  %8364 = vmatpush.bf16.msrb.mxu0 %v12287_v57  ;;  %v7597_v40 = vadd.f32 %v7596_v29, %v7578_v61 }
 0x3cb   :  { %8383 = vmatpush.bf16.msrb.mxu1 %v12351_v34 }
 0x3cc   :  { %v7634_v18 = vpop.f32.mrf.mxu3  ;;  %v7599_v22 = vpop.f32.mrf.mxu1 }
 0x3cd   :  { %8403 = vmatpush.bf16.msrb.mxu2 %v12407_v20 }
 0x3ce   :  { %8365 = vmatpush.bf16.msrb.mxu0 %v12279_v1 }
 0x3cf   :  { %v7615_v17 = vpop.f32.mrf.mxu2  ;;  %v7580_v63 = vpop.f32.mrf.mxu0  ;;  %8384 = vmatpush.bf16.msrb.mxu1 %v12343_v9 }
 0x3d0   :  { %v7616_v31 = vadd.f32 %v7615_v17, %v7597_v40  ;;  %v7581_v55 = vadd.f32 %v7580_v63, %v20107_v12  ;;  %v12388_v12 = vld [vmem:[%s20425_s3 + $0x108] sm:$0xf0]  ;;  %8316 = vmatmul.bf16.gmra.mxu1 %v20586_v53  ;;  %v12483_v17 = vor.u32 %v13521_v30, %v12482_v13  ;;  %v13520_v13 = vld [vmem:[%s20425_s3 + $0x1c4] sm:$0xf] }
 0x3d1   :  { %8404 = vmatpush.bf16.msrb.mxu2 %v12399_v58  ;;  %v12391_v25 = vor.u32 %v13496_v56, %v12388_v12  ;;  %v13517_v58 = vld [vmem:[%s20425_s3 + $0x1a4] sm:$0xf0]  ;;  %v13515_v56 = vld [vmem:[%s20425_s3 + $0x194] sm:$0xf0]  ;;  %v12484_v30 = vld [vmem:[%s20425_s3 + $0x1c8] sm:$0xf0] }
 0x3d2   :  { %v20224_v16 = vadd.f32 %v7634_v18, %v7616_v31  ;;  %8366 = vmatpush.bf16.msrb.mxu0 %v12271_v5  ;;  %v7600_v10 = vadd.f32 %v7599_v22, %v7581_v55  ;;  %v12474_v18 = vld [vmem:[%s20425_s3 + $0x1b0] sm:$0xf]  ;;  %v12466_v55 = vld [vmem:[%s20425_s3 + $0x1a0] sm:$0xf] }
 0x3d3   :  { %8385 = vmatpush.bf16.msrb.mxu1 %v12335_v38  ;;  %v12475_v63 = vor.u32 %v13519_v41, %v12474_v18  ;;  %v12467_v59 = vor.u32 %v13517_v58, %v12466_v55 }
 0x3d4   :  { %8297 = vmatmul.bf16.gmra.mxu0 %v20585_v3  ;;  %v7601_v43 = vpop.f32.mrf.mxu1 }
 0x3d5   :  { %8405 = vmatpush.bf16.msrb.mxu2 %v12391_v25 }
 0x3d6   :  { %8367 = vmatpush.bf16.msrb.mxu0 %v12263_v60  ;;  %v7637_v45 = vpop.f32.mrf.mxu3  ;;  %v12458_v60 = vld [vmem:[%s20425_s3 + $0x190] sm:$0xf] }
 0x3d7   :  { %8335 = vmatmul.bf16.gmra.mxu2 %v19593_v28  ;;  %v7618_v7 = vpop.f32.mrf.mxu2  ;;  %v7582_v46 = vpop.f32.mrf.mxu0  ;;  %8386 = vmatpush.bf16.msrb.mxu1 %v12327_v32 }
 0x3d8   :  { %v7619_v48 = vadd.f32 %v7618_v7, %v7600_v10  ;;  %v7583_v54 = vadd.f32 %v7582_v46, %v7564_v8  ;;  %v13513_v7 = vld [vmem:[%s20425_s3 + $0x184] sm:$0xf0] }
 0x3da   :  { %v20237_v57 = vadd.f32 %v7637_v45, %v7619_v48  ;;  %v7602_v42 = vadd.f32 %v7601_v43, %v7583_v54  ;;  %v13526_v43 = vld [vmem:[%s20425_s3 + $0x1f4] sm:$0xf] }
 0x3dc   :  { %v7670_v37 = vpop.f32.mrf.mxu1 }
 0x3de   :  { %v7639_v23 = vpop.f32.mrf.mxu3 }
 0x3df   :  { %v7620_v33 = vpop.f32.mrf.mxu2  ;;  %v7651_v15 = vpop.f32.mrf.mxu0 }
 0x3e0   :  { %v7621_v24 = vadd.f32 %v7620_v33, %v7602_v42  ;;  %8387 = vmatmul.bf16.vlgmr.msrb.gmra.mxu1 %v20584_v21  ;;  %v7652_v62 = vadd.f32 %v7651_v15, %v20185_v0  ;;  %v12450_v0 = vld [vmem:[%s20425_s3 + $0x180] sm:$0xf] }
 0x3e1   :  { %v12451_v45 = vor.u32 %v13513_v7, %v12450_v0  ;;  %v12460_v7 = vld [vmem:[%s20425_s3 + $0x198] sm:$0xf0] }
 0x3e2   :  { %v20239_v52 = vadd.f32 %v7639_v23, %v7621_v24  ;;  %v7671_v25 = vadd.f32 %v7670_v37, %v7652_v62 }
 0x3e4   :  { %8368 = vmatmul.bf16.vlgmr.msrb.gmra.mxu0 %v20583_v14  ;;  %v7672_v35 = vpop.f32.mrf.mxu1  ;;  %v13527_v14 = vld [vmem:[%s20425_s3 + $0x1f4] sm:$0xf0] }
 0x3e6   :  { %v20244_v11 = vpop.f32.mrf.mxu3 }
 0x3e7   :  { %8406 = vmatmul.bf16.vlgmr.msrb.gmra.mxu2 %v19490_v44  ;;  %v7689_v2 = vpop.f32.mrf.mxu2  ;;  %v7653_v26 = vpop.f32.mrf.mxu0  ;;  %v12506_v44 = vld [vmem:[%s20425_s3 + $0x1f0] sm:$0xf] }
 0x3e8   :  { %v12507_v4 = vor.u32 %v13527_v14, %v12506_v44  ;;  %v7654_v8 = vadd.f32 %v7653_v26, %v20224_v16  ;;  %v7690_v48 = vadd.f32 %v7689_v2, %v7671_v25  ;;  %v12508_v16 = vld [vmem:[%s20425_s3 + $0x1f8] sm:$0xf0]  ;;  %v13524_v26 = vld [vmem:[%s20425_s3 + $0x1e4] sm:$0xf] }
 0x3e9   :  { %v12511_v33 = vor.u32 %v13526_v43, %v12508_v16 }
 0x3ea   :  { %8341 = vmatpush.bf16.msra.mxu3 %v12507_v4  ;;  %v7673_v46 = vadd.f32 %v7672_v35, %v7654_v8  ;;  %v7709_v23 = vadd.f32 %v20244_v11, %v7690_v48  ;;  %v12500_v35 = vld [vmem:[%s20425_s3 + $0x1e8] sm:$0xf0] }
 0x3eb   :  { %v12503_v44 = vor.u32 %v13524_v26, %v12500_v35 }
 0x3ec   :  { %v20252_v27 = vpop.f32.mrf.mxu1 }
 0x3ee   :  { %v20248_v34 = vpop.f32.mrf.mxu3 }
 0x3ef   :  { %v20246_v29 = vpop.f32.mrf.mxu2 }
 0x3f0   :  { %v20250_v61 = vpop.f32.mrf.mxu0  ;;  %8392 = vmatmul.bf16.gmra.mxu1 %v20586_v53  ;;  %v7692_v24 = vadd.f32 %v20246_v29, %v7673_v46 }
 0x3f1   :  { %v7657_v11 = vadd.f32 %v20250_v61, %v20237_v57 }
 0x3f2   :  { %v7711_v14 = vadd.f32 %v20248_v34, %v7692_v24  ;;  %v13512_v24 = vld [vmem:[%s20425_s3 + $0x184] sm:$0xf] }
 0x3f3   :  { %v7676_v57 = vadd.f32 %v20252_v27, %v7657_v11 }
 0x3f4   :  { %8373 = vmatmul.bf16.gmra.mxu0 %v20585_v3  ;;  %v20269_v36 = vpop.f32.mrf.mxu1  ;;  %v12459_v3 = vor.u32 %v13515_v56, %v12458_v60 }
 0x3f6   :  { %v20265_v51 = vpop.f32.mrf.mxu3 }
 0x3f7   :  { %8411 = vmatmul.bf16.gmra.mxu2 %v19593_v28  ;;  %v12498_v28 = vld [vmem:[%s20425_s3 + $0x1e0] sm:$0xf] }
 0x3f8   :  { %v20267_v1 = vpop.f32.mrf.mxu0  ;;  %v12499_v40 = vor.u32 %v13525_v39, %v12498_v28  ;;  %v13522_v28 = vld [vmem:[%s20425_s3 + $0x1d4] sm:$0xf]  ;;  %v12492_v39 = vld [vmem:[%s20425_s3 + $0x1d8] sm:$0xf0] }
 0x3f9   :  { %v20263_v21 = vpop.f32.mrf.mxu2  ;;  %v12495_v50 = vor.u32 %v13522_v28, %v12492_v39  ;;  %v7659_v61 = vadd.f32 %v20267_v1, %v20239_v52  ;;  %v13518_v52 = vld [vmem:[%s20425_s3 + $0x1b4] sm:$0xf]  ;;  %v12476_v1 = vld [vmem:[%s20425_s3 + $0x1b8] sm:$0xf0] }
 0x3fa   :  { %8342 = vmatpush.bf16.msra.mxu3 %v12499_v40  ;;  %v7695_v18 = vadd.f32 %v20263_v21, %v7676_v57  ;;  %v12479_v55 = vor.u32 %v13518_v52, %v12476_v1 }
 0x3fb   :  { %v7678_v27 = vadd.f32 %v20269_v36, %v7659_v61 }
 0x3fc   :  { %v7746_v5 = vpop.f32.mrf.mxu1  ;;  %v7714_v58 = vadd.f32 %v20265_v51, %v7695_v18 }
 0x3fe   :  { %v20285_v20 = vpop.f32.mrf.mxu3  ;;  %8343 = vmatpush.bf16.msra.mxu3 %v12491_v47 }
 0x400   :  { %v7727_v6 = vpop.f32.mrf.mxu0 }
 0x401   :  { %v20283_v9 = vpop.f32.mrf.mxu2  ;;  %v7728_v2 = vadd.f32 %v7727_v6, %v7709_v23 }
 0x402   :  { %8344 = vmatpush.bf16.msra.mxu3 %v12483_v17  ;;  %v12487_v17 = vor.u32 %v13520_v13, %v12484_v30  ;;  %v7697_v21 = vadd.f32 %v20283_v9, %v7678_v27  ;;  %v7958_v27 = vld [vmem:[%s20426_s4] sm:$0x3] }
 0x403   :  { %v7747_v29 = vadd.f32 %v7746_v5, %v7728_v2  ;;  %v7960_v52 = vperm.slane %v7958_v27, 0 }
 0x404   :  { %v7748_v38 = vpop.f32.mrf.mxu1  ;;  %v7716_v51 = vadd.f32 %v20285_v20, %v7697_v21 }
 0x406   :  { %v7784_v31 = vpop.f32.mrf.mxu3  ;;  %8345 = vmatpush.bf16.msra.mxu3 %v12475_v63 }
 0x408   :  { %v7729_v22 = vpop.f32.mrf.mxu0 }
 0x409   :  { %v7765_v49 = vpop.f32.mrf.mxu2  ;;  %v7730_v4 = vadd.f32 %v7729_v22, %v7711_v14 }
 0x40a   :  { %8346 = vmatpush.bf16.msra.mxu3 %v12467_v59  ;;  %v7766_v47 = vadd.f32 %v7765_v49, %v7747_v29 }
 0x40b   :  { %v7749_v5 = vadd.f32 %v7748_v38, %v7730_v4 }
 0x40c   :  { %v7785_v41 = vadd.f32 %v7784_v31, %v7766_v47 }
 0x40d   :  { %v20312_v32 = vpop.f32.mrf.mxu1 }
 0x40e   :  { %v7786_v10 = vpop.f32.mrf.mxu3  ;;  %8347 = vmatpush.bf16.msra.mxu3 %v12459_v3  ;;  %v12468_v3 = vld [vmem:[%s20425_s3 + $0x1a8] sm:$0xf0] }
 0x411   :  { %v7767_v12 = vpop.f32.mrf.mxu2  ;;  %v7732_v53 = vpop.f32.mrf.mxu0 }
 0x412   :  { %8348 = vmatpush.bf16.msra.mxu3 %v12451_v45  ;;  %v7768_v49 = vadd.f32 %v7767_v12, %v7749_v5  ;;  %v7733_v36 = vadd.f32 %v7732_v53, %v7714_v58  ;;  %v13516_v12 = vld [vmem:[%s20425_s3 + $0x1a4] sm:$0xf]  ;;  %v13514_v53 = vld [vmem:[%s20425_s3 + $0x194] sm:$0xf] }
 0x413   :  { %v12471_v25 = vor.u32 %v13516_v12, %v12468_v3  ;;  %v12463_v46 = vor.u32 %v13514_v53, %v12460_v7 }
 0x414   :  { %v7787_v31 = vadd.f32 %v7786_v10, %v7768_v49  ;;  %v7752_v9 = vadd.f32 %v20312_v32, %v7733_v36 }
 0x415   :  { %v20333_v37 = vpop.f32.mrf.mxu1 }
 0x416   :  { %v20329_v42 = vpop.f32.mrf.mxu3  ;;  %8417 = vmatpush.bf16.msrb.mxu3 %v12511_v33 }
 0x419   :  { %v7734_v15 = vpop.f32.mrf.mxu0 }
 0x41a   :  { %v20327_v54 = vpop.f32.mrf.mxu2  ;;  %8418 = vmatpush.bf16.msrb.mxu3 %v12503_v44  ;;  %v7735_v10 = vadd.f32 %v7734_v15, %v7716_v51  ;;  %v12452_v15 = vld [vmem:[%s20425_s3 + $0x188] sm:$0xf0] }
 0x41b   :  { %v7771_v43 = vadd.f32 %v20327_v54, %v7752_v9  ;;  %v12455_v26 = vor.u32 %v13512_v24, %v12452_v15 }
 0x41c   :  { %v7754_v32 = vadd.f32 %v20333_v37, %v7735_v10 }
 0x41d   :  { %v7822_v6 = vpop.f32.mrf.mxu1  ;;  %v7790_v35 = vadd.f32 %v20329_v42, %v7771_v43 }
 0x41e   :  { %v20350_v19 = vpop.f32.mrf.mxu3  ;;  %8419 = vmatpush.bf16.msrb.mxu3 %v12495_v50 }
 0x421   :  { %v7803_v34 = vpop.f32.mrf.mxu0 }
 0x422   :  { %v7772_v40 = vpop.f32.mrf.mxu2  ;;  %8420 = vmatpush.bf16.msrb.mxu3 %v12487_v17  ;;  %v7804_v63 = vadd.f32 %v7803_v34, %v7785_v41 }
 0x423   :  { %v7773_v54 = vadd.f32 %v7772_v40, %v7754_v32 }
 0x424   :  { %v7823_v60 = vadd.f32 %v7822_v6, %v7804_v63 }
 0x425   :  { %v7824_v62 = vpop.f32.mrf.mxu1  ;;  %v7792_v28 = vadd.f32 %v20350_v19, %v7773_v54 }
 0x426   :  { %v7860_v38 = vpop.f32.mrf.mxu3  ;;  %8421 = vmatpush.bf16.msrb.mxu3 %v12479_v55 }
 0x429   :  { %v7805_v59 = vpop.f32.mrf.mxu0 }
 0x42a   :  { %v7841_v22 = vpop.f32.mrf.mxu2  ;;  %v7806_v56 = vadd.f32 %v7805_v59, %v7787_v31  ;;  %8422 = vmatpush.bf16.msrb.mxu3 %v12471_v25 }
 0x42b   :  { %v7842_v8 = vadd.f32 %v7841_v22, %v7823_v60 }
 0x42c   :  { %v7825_v0 = vadd.f32 %v7824_v62, %v7806_v56 }
 0x42d   :  { %v7861_v20 = vadd.f32 %v7860_v38, %v7842_v8  ;;  %v7827_v2 = vpop.f32.mrf.mxu1 }
 0x42e   :  { %v7862_v48 = vpop.f32.mrf.mxu3  ;;  %8423 = vmatpush.bf16.msrb.mxu3 %v12463_v46 }
 0x42f   :  { %v7873_v44 = vmax.f32 %v7861_v20, 0.0  ;;  %v7961_v20 = vperm.slane %v7958_v27, 1 }
 0x431   :  { %v7808_v33 = vpop.f32.mrf.mxu0 }
 0x432   :  { %v7843_v45 = vpop.f32.mrf.mxu2  ;;  %8424 = vmatpush.bf16.msrb.mxu3 %v12455_v26  ;;  %v7809_v29 = vadd.f32 %v7808_v33, %v7790_v35 }
 0x433   :  { %v7844_v16 = vadd.f32 %v7843_v45, %v7825_v0 }
 0x434   :  { %v7828_v50 = vadd.f32 %v7827_v2, %v7809_v29 }
 0x435   :  { %v7863_v23 = vadd.f32 %v7862_v48, %v7844_v16  ;;  %v7829_v6 = vpop.f32.mrf.mxu1 }
 0x436   :  { %v7865_v4 = vpop.f32.mrf.mxu3 }
 0x437   :  { %v7877_v14 = vmax.f32 %v7863_v23, 0.0 }
 0x439   :  { %v7889_v11 = vpack.c.bf16 %v7877_v14, %v7873_v44  ;;  %v7810_v39 = vpop.f32.mrf.mxu0 }
 0x43a   :  { %v7846_v37 = vpop.f32.mrf.mxu2  ;;  %v7811_v47 = vadd.f32 %v7810_v39, %v7792_v28 }
 0x43b   :  { %8349 = vmatmul.bf16.vlgmr.msra.gmra.mxu3 %v7889_v11  ;;  %v7847_v34 = vadd.f32 %v7846_v37, %v7828_v50 }
 0x43c   :  { %v7830_v57 = vadd.f32 %v7829_v6, %v7811_v47 }
 0x43d   :  { %v7866_v5 = vadd.f32 %v7865_v4, %v7847_v34  ;;  %v8312_v19 = vpop.f32.mrf.mxu1 }
 0x43e   :  { %v7867_v40 = vpop.f32.mrf.mxu3 }
 0x43f   :  { %v7881_v30 = vmax.f32 %v7866_v5, 0.0 }
 0x441   :  { %v8293_v41 = vpop.f32.mrf.mxu0 }
 0x442   :  { %v7848_v61 = vpop.f32.mrf.mxu2  ;;  %v8294_v38 = vadd.f32 %v8293_v41, %v7960_v52 }
 0x443   :  { %v7849_v42 = vadd.f32 %v7848_v61, %v7830_v57 }
 0x444   :  { %v8313_v58 = vadd.f32 %v8312_v19, %v8294_v38 }
 0x445   :  { %v7868_v13 = vadd.f32 %v7867_v40, %v7849_v42  ;;  %v8314_v1 = vpop.f32.mrf.mxu1 }
 0x447   :  { %v7885_v17 = vmax.f32 %v7868_v13, 0.0 }
 0x449   :  { %v7893_v18 = vpack.c.bf16 %v7885_v17, %v7881_v30  ;;  %v8295_v63 = vpop.f32.mrf.mxu0 }
 0x44a   :  { %v8331_v49 = vpop.f32.mrf.mxu2  ;;  %v8296_v59 = vadd.f32 %v8295_v63, %v7960_v52 }
 0x44b   :  { %8354 = vmatmul.bf16.gmra.mxu3 %v7893_v18  ;;  %v8332_v21 = vadd.f32 %v8331_v49, %v8313_v58 }
 0x44c   :  { %v8315_v56 = vadd.f32 %v8314_v1, %v8296_v59 }
 0x44d   :  { %v8317_v62 = vpop.f32.mrf.mxu1 }
 0x451   :  { %v8298_v55 = vpop.f32.mrf.mxu0 }
 0x452   :  { %v8333_v22 = vpop.f32.mrf.mxu2  ;;  %v8299_v51 = vadd.f32 %v8298_v55, %v7960_v52 }
 0x453   :  { %v8334_v3 = vadd.f32 %v8333_v22, %v8315_v56 }
 0x454   :  { %v8318_v0 = vadd.f32 %v8317_v62, %v8299_v51 }
 0x455   :  { %v8319_v9 = vpop.f32.mrf.mxu1 }
 0x459   :  { %v8300_v12 = vpop.f32.mrf.mxu0 }
 0x45a   :  { %v8336_v60 = vpop.f32.mrf.mxu2  ;;  %v8301_v48 = vadd.f32 %v8300_v12, %v7960_v52 }
 0x45b   :  { %8425 = vmatmul.bf16.vlgmr.msrb.gmra.mxu3 %v7889_v11  ;;  %v8337_v53 = vadd.f32 %v8336_v60, %v8318_v0 }
 0x45c   :  { %v8320_v43 = vadd.f32 %v8319_v9, %v8301_v48 }
 0x45d   :  { %v8388_v16 = vpop.f32.mrf.mxu1 }
 0x461   :  { %v8369_v7 = vpop.f32.mrf.mxu0 }
 0x462   :  { %v8338_v10 = vpop.f32.mrf.mxu2  ;;  %v8370_v24 = vadd.f32 %v8369_v7, %v7961_v20 }
 0x463   :  { %v8339_v32 = vadd.f32 %v8338_v10, %v8320_v43 }
 0x464   :  { %v8389_v26 = vadd.f32 %v8388_v16, %v8370_v24 }
 0x465   :  { %v8390_v54 = vpop.f32.mrf.mxu1 }
 0x469   :  { %v8371_v2 = vpop.f32.mrf.mxu0 }
 0x46a   :  { %v8407_v33 = vpop.f32.mrf.mxu2  ;;  %v8372_v11 = vadd.f32 %v8371_v2, %v7961_v20 }
 0x46b   :  { %8430 = vmatmul.bf16.gmra.mxu3 %v7893_v18  ;;  %v8408_v35 = vadd.f32 %v8407_v33, %v8389_v26 }
 0x46c   :  { %v8391_v4 = vadd.f32 %v8390_v54, %v8372_v11 }
 0x46d   :  { %v8393_v34 = vpop.f32.mrf.mxu1 }
 0x471   :  { %v8374_v37 = vpop.f32.mrf.mxu0 }
 0x472   :  { %v8409_v44 = vpop.f32.mrf.mxu2  ;;  %v8375_v50 = vadd.f32 %v8374_v37, %v7961_v20 }
 0x473   :  { %v8410_v28 = vadd.f32 %v8409_v44, %v8391_v4 }
 0x474   :  { %v8394_v57 = vadd.f32 %v8393_v34, %v8375_v50 }
 0x475   :  { %v8395_v30 = vpop.f32.mrf.mxu1 }
 0x479   :  { %v8376_v61 = vpop.f32.mrf.mxu0 }
 0x47a   :  { %v8412_v6 = vpop.f32.mrf.mxu2  ;;  %v8377_v40 = vadd.f32 %v8376_v61, %v7961_v20 }
 0x47b   :  { %v8413_v5 = vadd.f32 %v8412_v6, %v8394_v57 }
 0x47c   :  { %v8396_v18 = vadd.f32 %v8395_v30, %v8377_v40 }
 0x482   :  { %v8414_v17 = vpop.f32.mrf.mxu2 }
 0x483   :  { %v8415_v41 = vadd.f32 %v8414_v17, %v8396_v18 }
 0x4be   :  { %v8350_v31 = vpop.f32.mrf.mxu3 }
 0x4bf   :  { %v8351_v36 = vadd.f32 %v8350_v31, %v8332_v21 }
 0x4c1   :  { %8436 = vst [vmem:[%s20427_s5] sm:$0xff] %v8351_v36 }
 0x4c6   :  { %v8352_v25 = vpop.f32.mrf.mxu3 }
 0x4c7   :  { %v8353_v8 = vadd.f32 %v8352_v25, %v8334_v3 }
 0x4c9   :  { %8438 = vst [vmem:[%s20427_s5 + $0x10] sm:$0xff] %v8353_v8 }
 0x4ce   :  { %v8355_v45 = vpop.f32.mrf.mxu3 }
 0x4cf   :  { %v8356_v46 = vadd.f32 %v8355_v45, %v8337_v53 }
 0x4d1   :  { %8440 = vst [vmem:[%s20427_s5 + $0x20] sm:$0xff] %v8356_v46 }
 0x4d6   :  { %v8357_v23 = vpop.f32.mrf.mxu3 }
 0x4d7   :  { %v8358_v15 = vadd.f32 %v8357_v23, %v8339_v32 }
 0x4d9   :  { %8442 = vst [vmem:[%s20427_s5 + $0x30] sm:$0xff] %v8358_v15 }
 0x4de   :  { %v8426_v14 = vpop.f32.mrf.mxu3 }
 0x4df   :  { %v8427_v29 = vadd.f32 %v8426_v14, %v8408_v35 }
 0x4e1   :  { %8437 = vst [vmem:[%s20427_s5 + $0x8] sm:$0xff] %v8427_v29 }
 0x4e6   :  { %v8428_v39 = vpop.f32.mrf.mxu3 }
 0x4e7   :  { %v8429_v47 = vadd.f32 %v8428_v39, %v8410_v28 }
 0x4e9   :  { %8439 = vst [vmem:[%s20427_s5 + $0x18] sm:$0xff] %v8429_v47 }
 0x4ee   :  { %v8431_v42 = vpop.f32.mrf.mxu3 }
 0x4ef   :  { %v8432_v13 = vadd.f32 %v8431_v42, %v8413_v5 }
 0x4f1   :  { %8441 = vst [vmem:[%s20427_s5 + $0x28] sm:$0xff] %v8432_v13 }
 0x4f6   :  { %v8433_v19 = vpop.f32.mrf.mxu3 }
 0x4f7   :  { %v8434_v49 = vadd.f32 %v8433_v19, %v8415_v41 }
 0x4f9   :  { %8443 = vst [vmem:[%s20427_s5 + $0x38] sm:$0xff] %v8434_v49 }

</bundles_post_ra>
